<compile_context>
chip_gen: v6e
topology: v6e:2x2x1
jax: 0.10.0
libtpu: 0.0.40
codegen_flags: <defaults>
</compile_context>

<pallas_src>
import functools

import jax
import jax.numpy as jnp
from jax import lax
from jax.experimental import pallas as pl
from jax.experimental.pallas import tpu as pltpu

KH, KW = 5, 5
PAD = 2
CIN, COUT = 32, 32
TAPS = KH * KW                    # 25
KDIM = TAPS * CIN                 # 800
TAPS_PER_GROUP = 128 // CIN       # 4 taps -> one 128-lane scratch column group


def _conv5x5_kernel(x_ref, w_ref, b_ref, o_ref, patch_ref, *, TH, W):
    # x_ref:     (1, H+4, W+4, CIN)  padded NHWC image (bf16), resident across hi
    # w_ref:     (COUT, KDIM)        bf16 weights, columns ordered (kh, kw, c)
    # b_ref:     (COUT, 1)           f32 bias
    # o_ref:     (1, COUT, TH*W)     f32 output tile (NCHW-ordered, lane-dense)
    # patch_ref: (TH*W, KDIM)        bf16 im2col scratch (VMEM)
    hi = pl.program_id(1)
    h0 = pl.multiple_of(hi * TH, TH)

    # ---- im2col, interleaved build + store (low live-vreg count) ----
    # Each 4-tap group is loaded straight from the VMEM ref (offset loads, no
    # big row value kept live), lane-concatenated to 128 lanes and stored.
    for t0 in range(0, TAPS, TAPS_PER_GROUP):
        slabs = []
        for t in range(t0, min(t0 + TAPS_PER_GROUP, TAPS)):
            kh, kw = divmod(t, KW)
            tap = x_ref[0, pl.ds(h0 + kh, TH), kw:kw + W, :]      # (TH, W, CIN)
            slabs.append(tap.reshape(TH * W, CIN))
        blk = slabs[0] if len(slabs) == 1 else jnp.concatenate(slabs, axis=1)
        patch_ref[:, t0 * CIN: t0 * CIN + blk.shape[1]] = blk

    # ---- single MXU contraction, K = 800, bf16 x bf16 -> f32 accumulation ----
    # (COUT, K) . (TH*W, K)^T -> (COUT, TH*W): spatial sits on the lane axis, so
    # the output store is fully lane-dense and already NCHW-ordered.
    out_t = lax.dot_general(
        w_ref[...], patch_ref[...],
        dimension_numbers=(((1,), (1,)), ((), ())),
        preferred_element_type=jnp.float32)                       # (COUT, TH*W)
    o_ref[0] = (out_t + b_ref[...]).astype(o_ref.dtype)


def _pick_tile_rows(H, W, max_cols=1024):
    """Largest TH dividing H with TH*W % 128 == 0 and TH*W <= max_cols."""
    cands = [th for th in range(1, H + 1)
             if H % th == 0 and (th * W) % 128 == 0]
    if not cands:
        return H                  # full-dim output block: always a legal spec
    within = [th for th in cands if th * W <= max_cols]
    return max(within) if within else min(cands)


@jax.jit
def oracle_forward(x_nchw, weight, bias):
    """x_nchw: (N, 32, H, W) f32; weight: (COUT, CIN, 5, 5); bias: (COUT,)."""
    N, C, H, W = x_nchw.shape
    assert C == CIN
    TH = _pick_tile_rows(H, W)

    # Glue (cheap XLA ops): NCHW -> NHWC, pad=2, cast to bf16 (the MXU path is
    # bf16 anyway).  Weight columns ordered (kh, kw, c) to match the patch.
    x = jnp.transpose(x_nchw, (0, 2, 3, 1))
    x_pad = jnp.pad(x, ((0, 0), (PAD, PAD), (PAD, PAD), (0, 0)))
    x_pad = x_pad.astype(jnp.bfloat16)
    w_cm = jnp.transpose(weight, (0, 2, 3, 1)).reshape(
        COUT, KDIM).astype(jnp.bfloat16)
    b = bias.reshape(COUT, 1).astype(jnp.float32)

    flops = 2 * N * H * W * COUT * KH * KW * CIN
    bytes_accessed = (x_pad.size * 2 + w_cm.size * 2 + b.size * 4
                      + N * COUT * H * W * 4)

    kernel = functools.partial(_conv5x5_kernel, TH=TH, W=W)
    out = pl.pallas_call(
        kernel,
        out_shape=jax.ShapeDtypeStruct((N, COUT, H * W), jnp.float32),
        grid_spec=pltpu.PrefetchScalarGridSpec(
            num_scalar_prefetch=0,
            grid=(N, H // TH),
            in_specs=[
                # Full padded image per batch element (bf16); index map ignores
                # hi so the block stays VMEM-resident across the H-tile loop.
                # TODO(synk): for very large H*W (v7x 64 MiB VMEM), switch to
                # H-tiled input blocks with a 4-row halo instead of the full
                # per-n image block.
                pl.BlockSpec((1, H + 2 * PAD, W + 2 * PAD, CIN),
                             lambda n, hi: (n, 0, 0, 0)),
                pl.BlockSpec((COUT, KDIM), lambda n, hi: (0, 0)),
                pl.BlockSpec((COUT, 1), lambda n, hi: (0, 0)),
            ],
            out_specs=pl.BlockSpec((1, COUT, TH * W), lambda n, hi: (n, 0, hi)),
            scratch_shapes=[pltpu.VMEM((TH * W, KDIM), jnp.bfloat16)],
        ),
        compiler_params=pltpu.CompilerParams(
            dimension_semantics=("parallel", "parallel")),
        cost_estimate=pl.CostEstimate(
            flops=flops, transcendentals=0, bytes_accessed=bytes_accessed),
    )(x_pad, w_cm, b)

    # (N, COUT, H*W) -> (N, COUT, H, W): free reshape, already NCHW-ordered.
    return out.reshape(N, COUT, H, W)


def reference_forward(x_nchw, weight, bias):
    out = lax.conv_general_dilated(
        x_nchw, weight,
        window_strides=(1, 1),
        padding=((PAD, PAD), (PAD, PAD)),
        dimension_numbers=("NCHW", "OIHW", "NCHW"),
        precision=lax.Precision.HIGHEST)
    return out + bias.reshape(1, COUT, 1, 1)


if __name__ == "__main__":
    key = jax.random.PRNGKey(0)
    kx, kw_, kb = jax.random.split(key, 3)

    N, H, W = 2, 16, 16
    x = jax.random.normal(kx, (N, CIN, H, W), dtype=jnp.float32)
    # Deterministic synthetic parameters (Conv2d(32, 32, 5) shapes).
    weight = jax.random.normal(kw_, (COUT, CIN, KH, KW), dtype=jnp.float32) * 0.05
    bias = jax.random.normal(kb, (COUT,), dtype=jnp.float32) * 0.1

    out = jax.block_until_ready(oracle_forward(x, weight, bias))
    ref = jax.block_until_ready(reference_forward(x, weight, bias))

    assert out.shape == (N, COUT, H, W), out.shape
    # bf16 MXU inputs with f32 accumulation (XLA's default TPU conv precision):
    # expected max abs error ~1e-2 for K=800; structural bugs are O(0.1+).
    max_err = float(jnp.max(jnp.abs(out - ref)))
    assert jnp.allclose(out, ref, atol=3e-2, rtol=3e-2), max_err
    print("KERNEL_OK")
</pallas_src>

<mosaic_0001>
module attributes {stable_mosaic.version = 11 : i64} {
  func.func @_conv5x5_kernel(%arg0: i32, %arg1: i32, %arg2: memref<1x20x20x32xbf16, #tpu.memory_space<vmem>>, %arg3: memref<32x800xbf16, #tpu.memory_space<vmem>>, %arg4: memref<32x1xf32, #tpu.memory_space<vmem>>, %arg5: memref<1x32x256xf32, #tpu.memory_space<vmem>>, %arg6: memref<256x800xbf16, #tpu.memory_space<vmem>>) attributes {dimension_semantics = [#tpu.dimension_semantics<parallel>, #tpu.dimension_semantics<parallel>], iteration_bounds = array<i64: 2, 1>, scalar_prefetch = 0 : i64, scratch_operands = 1 : i64, tpu.core_type = #tpu.core_type<tc>, window_params = [{transform_indices = @transform_0, window_bounds = array<i64: 1, 20, 20, 32>}, {pipeline_mode = #tpu.pipeline_mode<synchronous>, transform_indices = @transform_1, window_bounds = array<i64: 32, 800>}, {pipeline_mode = #tpu.pipeline_mode<synchronous>, transform_indices = @transform_2, window_bounds = array<i64: 32, 1>}, {transform_indices = @transform_3, window_bounds = array<i64: 1, 32, 256>}]} {
    %c16_i32 = arith.constant 16 : i32
    %0 = arith.muli %arg1, %c16_i32 : i32
    %1 = tpu.assume_multiple %0, 16 : i32
    %c0_i32 = arith.constant 0 : i32
    %2 = arith.addi %1, %c0_i32 : i32
    %c0 = arith.constant 0 : index
    %3 = arith.index_cast %2 : i32 to index
    %c0_0 = arith.constant 0 : index
    %c0_1 = arith.constant 0 : index
    %4 = vector.load %arg2[%c0, %3, %c0_0, %c0_1] : memref<1x20x20x32xbf16, #tpu.memory_space<vmem>>, vector<1x16x16x32xbf16>
    %5 = vector.shape_cast %4 : vector<1x16x16x32xbf16> to vector<16x16x32xbf16>
    %6 = vector.shape_cast %5 : vector<16x16x32xbf16> to vector<256x32xbf16>
    %c0_i32_2 = arith.constant 0 : i32
    %7 = arith.addi %1, %c0_i32_2 : i32
    %c0_3 = arith.constant 0 : index
    %8 = arith.index_cast %7 : i32 to index
    %c1 = arith.constant 1 : index
    %c0_4 = arith.constant 0 : index
    %9 = vector.load %arg2[%c0_3, %8, %c1, %c0_4] : memref<1x20x20x32xbf16, #tpu.memory_space<vmem>>, vector<1x16x16x32xbf16>
    %10 = vector.shape_cast %9 : vector<1x16x16x32xbf16> to vector<16x16x32xbf16>
    %11 = vector.shape_cast %10 : vector<16x16x32xbf16> to vector<256x32xbf16>
    %c0_i32_5 = arith.constant 0 : i32
    %12 = arith.addi %1, %c0_i32_5 : i32
    %c0_6 = arith.constant 0 : index
    %13 = arith.index_cast %12 : i32 to index
    %c2 = arith.constant 2 : index
    %c0_7 = arith.constant 0 : index
    %14 = vector.load %arg2[%c0_6, %13, %c2, %c0_7] : memref<1x20x20x32xbf16, #tpu.memory_space<vmem>>, vector<1x16x16x32xbf16>
    %15 = vector.shape_cast %14 : vector<1x16x16x32xbf16> to vector<16x16x32xbf16>
    %16 = vector.shape_cast %15 : vector<16x16x32xbf16> to vector<256x32xbf16>
    %c0_i32_8 = arith.constant 0 : i32
    %17 = arith.addi %1, %c0_i32_8 : i32
    %c0_9 = arith.constant 0 : index
    %18 = arith.index_cast %17 : i32 to index
    %c3 = arith.constant 3 : index
    %c0_10 = arith.constant 0 : index
    %19 = vector.load %arg2[%c0_9, %18, %c3, %c0_10] : memref<1x20x20x32xbf16, #tpu.memory_space<vmem>>, vector<1x16x16x32xbf16>
    %20 = vector.shape_cast %19 : vector<1x16x16x32xbf16> to vector<16x16x32xbf16>
    %21 = vector.shape_cast %20 : vector<16x16x32xbf16> to vector<256x32xbf16>
    %22 = tpu.concatenate %6, %11, %16, %21 in 1 : vector<256x32xbf16>, vector<256x32xbf16>, vector<256x32xbf16>, vector<256x32xbf16> -> vector<256x128xbf16>
    %c0_11 = arith.constant 0 : index
    %c0_12 = arith.constant 0 : index
    %23 = vector.load %arg6[%c0_11, %c0_12] : memref<256x800xbf16, #tpu.memory_space<vmem>>, vector<256x128xbf16>
    tpu.vector_store %arg6[%c0_11, %c0_12], %22 {strides = array<i32>} : memref<256x800xbf16, #tpu.memory_space<vmem>>, vector<256x128xbf16>,
    %c0_i32_13 = arith.constant 0 : i32
    %24 = arith.addi %1, %c0_i32_13 : i32
    %c0_14 = arith.constant 0 : index
    %25 = arith.index_cast %24 : i32 to index
    %c4 = arith.constant 4 : index
    %c0_15 = arith.constant 0 : index
    %26 = vector.load %arg2[%c0_14, %25, %c4, %c0_15] : memref<1x20x20x32xbf16, #tpu.memory_space<vmem>>, vector<1x16x16x32xbf16>
    %27 = vector.shape_cast %26 : vector<1x16x16x32xbf16> to vector<16x16x32xbf16>
    %28 = vector.shape_cast %27 : vector<16x16x32xbf16> to vector<256x32xbf16>
    %c1_i32 = arith.constant 1 : i32
    %29 = arith.addi %1, %c1_i32 : i32
    %c0_16 = arith.constant 0 : index
    %30 = arith.index_cast %29 : i32 to index
    %c0_17 = arith.constant 0 : index
    %c0_18 = arith.constant 0 : index
    %31 = vector.load %arg2[%c0_16, %30, %c0_17, %c0_18] : memref<1x20x20x32xbf16, #tpu.memory_space<vmem>>, vector<1x16x16x32xbf16>
    %32 = vector.shape_cast %31 : vector<1x16x16x32xbf16> to vector<16x16x32xbf16>
    %33 = vector.shape_cast %32 : vector<16x16x32xbf16> to vector<256x32xbf16>
    %c1_i32_19 = arith.constant 1 : i32
    %34 = arith.addi %1, %c1_i32_19 : i32
    %c0_20 = arith.constant 0 : index
    %35 = arith.index_cast %34 : i32 to index
    %c1_21 = arith.constant 1 : index
    %c0_22 = arith.constant 0 : index
    %36 = vector.load %arg2[%c0_20, %35, %c1_21, %c0_22] : memref<1x20x20x32xbf16, #tpu.memory_space<vmem>>, vector<1x16x16x32xbf16>
    %37 = vector.shape_cast %36 : vector<1x16x16x32xbf16> to vector<16x16x32xbf16>
    %38 = vector.shape_cast %37 : vector<16x16x32xbf16> to vector<256x32xbf16>
    %c1_i32_23 = arith.constant 1 : i32
    %39 = arith.addi %1, %c1_i32_23 : i32
    %c0_24 = arith.constant 0 : index
    %40 = arith.index_cast %39 : i32 to index
    %c2_25 = arith.constant 2 : index
    %c0_26 = arith.constant 0 : index
    %41 = vector.load %arg2[%c0_24, %40, %c2_25, %c0_26] : memref<1x20x20x32xbf16, #tpu.memory_space<vmem>>, vector<1x16x16x32xbf16>
    %42 = vector.shape_cast %41 : vector<1x16x16x32xbf16> to vector<16x16x32xbf16>
    %43 = vector.shape_cast %42 : vector<16x16x32xbf16> to vector<256x32xbf16>
    %44 = tpu.concatenate %28, %33, %38, %43 in 1 : vector<256x32xbf16>, vector<256x32xbf16>, vector<256x32xbf16>, vector<256x32xbf16> -> vector<256x128xbf16>
    %c0_27 = arith.constant 0 : index
    %c128 = arith.constant 128 : index
    %45 = vector.load %arg6[%c0_27, %c128] : memref<256x800xbf16, #tpu.memory_space<vmem>>, vector<256x128xbf16>
    tpu.vector_store %arg6[%c0_27, %c128], %44 {strides = array<i32>} : memref<256x800xbf16, #tpu.memory_space<vmem>>, vector<256x128xbf16>,
    %c1_i32_28 = arith.constant 1 : i32
    %46 = arith.addi %1, %c1_i32_28 : i32
    %c0_29 = arith.constant 0 : index
    %47 = arith.index_cast %46 : i32 to index
    %c3_30 = arith.constant 3 : index
    %c0_31 = arith.constant 0 : index
    %48 = vector.load %arg2[%c0_29, %47, %c3_30, %c0_31] : memref<1x20x20x32xbf16, #tpu.memory_space<vmem>>, vector<1x16x16x32xbf16>
    %49 = vector.shape_cast %48 : vector<1x16x16x32xbf16> to vector<16x16x32xbf16>
    %50 = vector.shape_cast %49 : vector<16x16x32xbf16> to vector<256x32xbf16>
    %c1_i32_32 = arith.constant 1 : i32
    %51 = arith.addi %1, %c1_i32_32 : i32
    %c0_33 = arith.constant 0 : index
    %52 = arith.index_cast %51 : i32 to index
    %c4_34 = arith.constant 4 : index
    %c0_35 = arith.constant 0 : index
    %53 = vector.load %arg2[%c0_33, %52, %c4_34, %c0_35] : memref<1x20x20x32xbf16, #tpu.memory_space<vmem>>, vector<1x16x16x32xbf16>
    %54 = vector.shape_cast %53 : vector<1x16x16x32xbf16> to vector<16x16x32xbf16>
    %55 = vector.shape_cast %54 : vector<16x16x32xbf16> to vector<256x32xbf16>
    %c2_i32 = arith.constant 2 : i32
    %56 = arith.addi %1, %c2_i32 : i32
    %c0_36 = arith.constant 0 : index
    %57 = arith.index_cast %56 : i32 to index
    %c0_37 = arith.constant 0 : index
    %c0_38 = arith.constant 0 : index
    %58 = vector.load %arg2[%c0_36, %57, %c0_37, %c0_38] : memref<1x20x20x32xbf16, #tpu.memory_space<vmem>>, vector<1x16x16x32xbf16>
    %59 = vector.shape_cast %58 : vector<1x16x16x32xbf16> to vector<16x16x32xbf16>
    %60 = vector.shape_cast %59 : vector<16x16x32xbf16> to vector<256x32xbf16>
    %c2_i32_39 = arith.constant 2 : i32
    %61 = arith.addi %1, %c2_i32_39 : i32
    %c0_40 = arith.constant 0 : index
    %62 = arith.index_cast %61 : i32 to index
    %c1_41 = arith.constant 1 : index
    %c0_42 = arith.constant 0 : index
    %63 = vector.load %arg2[%c0_40, %62, %c1_41, %c0_42] : memref<1x20x20x32xbf16, #tpu.memory_space<vmem>>, vector<1x16x16x32xbf16>
    %64 = vector.shape_cast %63 : vector<1x16x16x32xbf16> to vector<16x16x32xbf16>
    %65 = vector.shape_cast %64 : vector<16x16x32xbf16> to vector<256x32xbf16>
    %66 = tpu.concatenate %50, %55, %60, %65 in 1 : vector<256x32xbf16>, vector<256x32xbf16>, vector<256x32xbf16>, vector<256x32xbf16> -> vector<256x128xbf16>
    %c0_43 = arith.constant 0 : index
    %c256 = arith.constant 256 : index
    %67 = vector.load %arg6[%c0_43, %c256] : memref<256x800xbf16, #tpu.memory_space<vmem>>, vector<256x128xbf16>
    tpu.vector_store %arg6[%c0_43, %c256], %66 {strides = array<i32>} : memref<256x800xbf16, #tpu.memory_space<vmem>>, vector<256x128xbf16>,
    %c2_i32_44 = arith.constant 2 : i32
    %68 = arith.addi %1, %c2_i32_44 : i32
    %c0_45 = arith.constant 0 : index
    %69 = arith.index_cast %68 : i32 to index
    %c2_46 = arith.constant 2 : index
    %c0_47 = arith.constant 0 : index
    %70 = vector.load %arg2[%c0_45, %69, %c2_46, %c0_47] : memref<1x20x20x32xbf16, #tpu.memory_space<vmem>>, vector<1x16x16x32xbf16>
    %71 = vector.shape_cast %70 : vector<1x16x16x32xbf16> to vector<16x16x32xbf16>
    %72 = vector.shape_cast %71 : vector<16x16x32xbf16> to vector<256x32xbf16>
    %c2_i32_48 = arith.constant 2 : i32
    %73 = arith.addi %1, %c2_i32_48 : i32
    %c0_49 = arith.constant 0 : index
    %74 = arith.index_cast %73 : i32 to index
    %c3_50 = arith.constant 3 : index
    %c0_51 = arith.constant 0 : index
    %75 = vector.load %arg2[%c0_49, %74, %c3_50, %c0_51] : memref<1x20x20x32xbf16, #tpu.memory_space<vmem>>, vector<1x16x16x32xbf16>
    %76 = vector.shape_cast %75 : vector<1x16x16x32xbf16> to vector<16x16x32xbf16>
    %77 = vector.shape_cast %76 : vector<16x16x32xbf16> to vector<256x32xbf16>
    %c2_i32_52 = arith.constant 2 : i32
    %78 = arith.addi %1, %c2_i32_52 : i32
    %c0_53 = arith.constant 0 : index
    %79 = arith.index_cast %78 : i32 to index
    %c4_54 = arith.constant 4 : index
    %c0_55 = arith.constant 0 : index
    %80 = vector.load %arg2[%c0_53, %79, %c4_54, %c0_55] : memref<1x20x20x32xbf16, #tpu.memory_space<vmem>>, vector<1x16x16x32xbf16>
    %81 = vector.shape_cast %80 : vector<1x16x16x32xbf16> to vector<16x16x32xbf16>
    %82 = vector.shape_cast %81 : vector<16x16x32xbf16> to vector<256x32xbf16>
    %c3_i32 = arith.constant 3 : i32
    %83 = arith.addi %1, %c3_i32 : i32
    %c0_56 = arith.constant 0 : index
    %84 = arith.index_cast %83 : i32 to index
    %c0_57 = arith.constant 0 : index
    %c0_58 = arith.constant 0 : index
    %85 = vector.load %arg2[%c0_56, %84, %c0_57, %c0_58] : memref<1x20x20x32xbf16, #tpu.memory_space<vmem>>, vector<1x16x16x32xbf16>
    %86 = vector.shape_cast %85 : vector<1x16x16x32xbf16> to vector<16x16x32xbf16>
    %87 = vector.shape_cast %86 : vector<16x16x32xbf16> to vector<256x32xbf16>
    %88 = tpu.concatenate %72, %77, %82, %87 in 1 : vector<256x32xbf16>, vector<256x32xbf16>, vector<256x32xbf16>, vector<256x32xbf16> -> vector<256x128xbf16>
    %c0_59 = arith.constant 0 : index
    %c384 = arith.constant 384 : index
    %89 = vector.load %arg6[%c0_59, %c384] : memref<256x800xbf16, #tpu.memory_space<vmem>>, vector<256x128xbf16>
    tpu.vector_store %arg6[%c0_59, %c384], %88 {strides = array<i32>} : memref<256x800xbf16, #tpu.memory_space<vmem>>, vector<256x128xbf16>,
    %c3_i32_60 = arith.constant 3 : i32
    %90 = arith.addi %1, %c3_i32_60 : i32
    %c0_61 = arith.constant 0 : index
    %91 = arith.index_cast %90 : i32 to index
    %c1_62 = arith.constant 1 : index
    %c0_63 = arith.constant 0 : index
    %92 = vector.load %arg2[%c0_61, %91, %c1_62, %c0_63] : memref<1x20x20x32xbf16, #tpu.memory_space<vmem>>, vector<1x16x16x32xbf16>
    %93 = vector.shape_cast %92 : vector<1x16x16x32xbf16> to vector<16x16x32xbf16>
    %94 = vector.shape_cast %93 : vector<16x16x32xbf16> to vector<256x32xbf16>
    %c3_i32_64 = arith.constant 3 : i32
    %95 = arith.addi %1, %c3_i32_64 : i32
    %c0_65 = arith.constant 0 : index
    %96 = arith.index_cast %95 : i32 to index
    %c2_66 = arith.constant 2 : index
    %c0_67 = arith.constant 0 : index
    %97 = vector.load %arg2[%c0_65, %96, %c2_66, %c0_67] : memref<1x20x20x32xbf16, #tpu.memory_space<vmem>>, vector<1x16x16x32xbf16>
    %98 = vector.shape_cast %97 : vector<1x16x16x32xbf16> to vector<16x16x32xbf16>
    %99 = vector.shape_cast %98 : vector<16x16x32xbf16> to vector<256x32xbf16>
    %c3_i32_68 = arith.constant 3 : i32
    %100 = arith.addi %1, %c3_i32_68 : i32
    %c0_69 = arith.constant 0 : index
    %101 = arith.index_cast %100 : i32 to index
    %c3_70 = arith.constant 3 : index
    %c0_71 = arith.constant 0 : index
    %102 = vector.load %arg2[%c0_69, %101, %c3_70, %c0_71] : memref<1x20x20x32xbf16, #tpu.memory_space<vmem>>, vector<1x16x16x32xbf16>
    %103 = vector.shape_cast %102 : vector<1x16x16x32xbf16> to vector<16x16x32xbf16>
    %104 = vector.shape_cast %103 : vector<16x16x32xbf16> to vector<256x32xbf16>
    %c3_i32_72 = arith.constant 3 : i32
    %105 = arith.addi %1, %c3_i32_72 : i32
    %c0_73 = arith.constant 0 : index
    %106 = arith.index_cast %105 : i32 to index
    %c4_74 = arith.constant 4 : index
    %c0_75 = arith.constant 0 : index
    %107 = vector.load %arg2[%c0_73, %106, %c4_74, %c0_75] : memref<1x20x20x32xbf16, #tpu.memory_space<vmem>>, vector<1x16x16x32xbf16>
    %108 = vector.shape_cast %107 : vector<1x16x16x32xbf16> to vector<16x16x32xbf16>
    %109 = vector.shape_cast %108 : vector<16x16x32xbf16> to vector<256x32xbf16>
    %110 = tpu.concatenate %94, %99, %104, %109 in 1 : vector<256x32xbf16>, vector<256x32xbf16>, vector<256x32xbf16>, vector<256x32xbf16> -> vector<256x128xbf16>
    %c0_76 = arith.constant 0 : index
    %c512 = arith.constant 512 : index
    %111 = vector.load %arg6[%c0_76, %c512] : memref<256x800xbf16, #tpu.memory_space<vmem>>, vector<256x128xbf16>
    tpu.vector_store %arg6[%c0_76, %c512], %110 {strides = array<i32>} : memref<256x800xbf16, #tpu.memory_space<vmem>>, vector<256x128xbf16>,
    %c4_i32 = arith.constant 4 : i32
    %112 = arith.addi %1, %c4_i32 : i32
    %c0_77 = arith.constant 0 : index
    %113 = arith.index_cast %112 : i32 to index
    %c0_78 = arith.constant 0 : index
    %c0_79 = arith.constant 0 : index
    %114 = vector.load %arg2[%c0_77, %113, %c0_78, %c0_79] : memref<1x20x20x32xbf16, #tpu.memory_space<vmem>>, vector<1x16x16x32xbf16>
    %115 = vector.shape_cast %114 : vector<1x16x16x32xbf16> to vector<16x16x32xbf16>
    %116 = vector.shape_cast %115 : vector<16x16x32xbf16> to vector<256x32xbf16>
    %c4_i32_80 = arith.constant 4 : i32
    %117 = arith.addi %1, %c4_i32_80 : i32
    %c0_81 = arith.constant 0 : index
    %118 = arith.index_cast %117 : i32 to index
    %c1_82 = arith.constant 1 : index
    %c0_83 = arith.constant 0 : index
    %119 = vector.load %arg2[%c0_81, %118, %c1_82, %c0_83] : memref<1x20x20x32xbf16, #tpu.memory_space<vmem>>, vector<1x16x16x32xbf16>
    %120 = vector.shape_cast %119 : vector<1x16x16x32xbf16> to vector<16x16x32xbf16>
    %121 = vector.shape_cast %120 : vector<16x16x32xbf16> to vector<256x32xbf16>
    %c4_i32_84 = arith.constant 4 : i32
    %122 = arith.addi %1, %c4_i32_84 : i32
    %c0_85 = arith.constant 0 : index
    %123 = arith.index_cast %122 : i32 to index
    %c2_86 = arith.constant 2 : index
    %c0_87 = arith.constant 0 : index
    %124 = vector.load %arg2[%c0_85, %123, %c2_86, %c0_87] : memref<1x20x20x32xbf16, #tpu.memory_space<vmem>>, vector<1x16x16x32xbf16>
    %125 = vector.shape_cast %124 : vector<1x16x16x32xbf16> to vector<16x16x32xbf16>
    %126 = vector.shape_cast %125 : vector<16x16x32xbf16> to vector<256x32xbf16>
    %c4_i32_88 = arith.constant 4 : i32
    %127 = arith.addi %1, %c4_i32_88 : i32
    %c0_89 = arith.constant 0 : index
    %128 = arith.index_cast %127 : i32 to index
    %c3_90 = arith.constant 3 : index
    %c0_91 = arith.constant 0 : index
    %129 = vector.load %arg2[%c0_89, %128, %c3_90, %c0_91] : memref<1x20x20x32xbf16, #tpu.memory_space<vmem>>, vector<1x16x16x32xbf16>
    %130 = vector.shape_cast %129 : vector<1x16x16x32xbf16> to vector<16x16x32xbf16>
    %131 = vector.shape_cast %130 : vector<16x16x32xbf16> to vector<256x32xbf16>
    %132 = tpu.concatenate %116, %121, %126, %131 in 1 : vector<256x32xbf16>, vector<256x32xbf16>, vector<256x32xbf16>, vector<256x32xbf16> -> vector<256x128xbf16>
    %c0_92 = arith.constant 0 : index
    %c640 = arith.constant 640 : index
    %133 = vector.load %arg6[%c0_92, %c640] : memref<256x800xbf16, #tpu.memory_space<vmem>>, vector<256x128xbf16>
    tpu.vector_store %arg6[%c0_92, %c640], %132 {strides = array<i32>} : memref<256x800xbf16, #tpu.memory_space<vmem>>, vector<256x128xbf16>,
    %c4_i32_93 = arith.constant 4 : i32
    %134 = arith.addi %1, %c4_i32_93 : i32
    %c0_94 = arith.constant 0 : index
    %135 = arith.index_cast %134 : i32 to index
    %c4_95 = arith.constant 4 : index
    %c0_96 = arith.constant 0 : index
    %136 = vector.load %arg2[%c0_94, %135, %c4_95, %c0_96] : memref<1x20x20x32xbf16, #tpu.memory_space<vmem>>, vector<1x16x16x32xbf16>
    %137 = vector.shape_cast %136 : vector<1x16x16x32xbf16> to vector<16x16x32xbf16>
    %138 = vector.shape_cast %137 : vector<16x16x32xbf16> to vector<256x32xbf16>
    %c0_97 = arith.constant 0 : index
    %c768 = arith.constant 768 : index
    %139 = vector.load %arg6[%c0_97, %c768] : memref<256x800xbf16, #tpu.memory_space<vmem>>, vector<256x32xbf16>
    tpu.vector_store %arg6[%c0_97, %c768], %138 {strides = array<i32>} : memref<256x800xbf16, #tpu.memory_space<vmem>>, vector<256x32xbf16>,
    %c0_98 = arith.constant 0 : index
    %c0_99 = arith.constant 0 : index
    %140 = vector.load %arg3[%c0_98, %c0_99] : memref<32x800xbf16, #tpu.memory_space<vmem>>, vector<32x800xbf16>
    %c0_100 = arith.constant 0 : index
    %c0_101 = arith.constant 0 : index
    %141 = vector.load %arg6[%c0_100, %c0_101] : memref<256x800xbf16, #tpu.memory_space<vmem>>, vector<256x800xbf16>
    %cst = arith.constant dense<0.000000e+00> : vector<32x256xf32>
    %142 = tpu.matmul %140, %141, %cst {dimension_numbers = #tpu.dot_dimension_numbers<[1], [1], [0], [0], [0, 0, 1, 0], [], []>} : vector<32x800xbf16>, vector<256x800xbf16>, vector<32x256xf32> -> vector<32x256xf32>
    %c0_102 = arith.constant 0 : index
    %c0_103 = arith.constant 0 : index
    %143 = vector.load %arg4[%c0_102, %c0_103] : memref<32x1xf32, #tpu.memory_space<vmem>>, vector<32x1xf32>
    %144 = vector.broadcast %143 : vector<32x1xf32> to vector<32x256xf32>
    %145 = arith.addf %142, %144 : vector<32x256xf32>
    %c0_104 = arith.constant 0 : index
    %c0_105 = arith.constant 0 : index
    %c0_106 = arith.constant 0 : index
    %146 = vector.load %arg5[%c0_104, %c0_105, %c0_106] : memref<1x32x256xf32, #tpu.memory_space<vmem>>, vector<1x32x256xf32>
    %147 = vector.shape_cast %146 : vector<1x32x256xf32> to vector<32x256xf32>
    %148 = vector.shape_cast %145 : vector<32x256xf32> to vector<1x32x256xf32>
    tpu.vector_store %arg5[%c0_104, %c0_105, %c0_106], %148 {strides = array<i32>} : memref<1x32x256xf32, #tpu.memory_space<vmem>>, vector<1x32x256xf32>,
    return
  }
  func.func @transform_0(%arg0: i32, %arg1: i32) -> (i32, i32, i32, i32) {
    %c0_i32 = arith.constant 0 : i32
    %c0_i32_0 = arith.constant 0 : i32
    %c0_i32_1 = arith.constant 0 : i32
    %c0_i32_2 = arith.constant 0 : i32
    return %arg0, %c0_i32, %c0_i32_0, %c0_i32_1 : i32, i32, i32, i32
  }
  func.func @transform_1(%arg0: i32, %arg1: i32) -> (i32, i32) {
    %c0_i32 = arith.constant 0 : i32
    %c0_i32_0 = arith.constant 0 : i32
    %c0_i32_1 = arith.constant 0 : i32
    return %c0_i32, %c0_i32_0 : i32, i32
  }
  func.func @transform_2(%arg0: i32, %arg1: i32) -> (i32, i32) {
    %c0_i32 = arith.constant 0 : i32
    %c0_i32_0 = arith.constant 0 : i32
    %c0_i32_1 = arith.constant 0 : i32
    return %c0_i32, %c0_i32_0 : i32, i32
  }
  func.func @transform_3(%arg0: i32, %arg1: i32) -> (i32, i32, i32) {
    %c0_i32 = arith.constant 0 : i32
    %c0_i32_0 = arith.constant 0 : i32
    return %arg0, %c0_i32, %arg1 : i32, i32, i32
  }
}

</mosaic_0001>

<bundles_post_ra>
// kernel: oracle_forward.1
= control target key start
LH: loop header
LB: loop body
LE: loop exit
PB: predicated region body
PF: predicated region fallthrough
CT: control target
= control target key end

     0   :  { %s12863_s12 = smov 0   ;;  %s12865_s13 = smov 0   ;;  %s17548_s0 = inlined_call_operand.vmem [shape: bf16[2,20,20,32], index: 0, kind: input, shape index: {}]   ;;  %s17549_s1 = inlined_call_operand.vmem [shape: bf16[32,800], index: 1, kind: input, shape index: {}]   ;;  %s17550_s2 = inlined_call_operand.vmem [shape: f32[32,1], index: 2, kind: input, shape index: {}]   ;;  %s17551_s3 = inlined_call_operand.vmem [shape: f32[2,32,256], index: 3, kind: output, shape index: {}]  }
   0x1   :  { %s12867_s14 = smov 0  }
   0x2 LB: > { %s25_s15 = sadd.s32 1, %s12833_s13  ;;  %p10974_p0 = scmp.ge.s32.totalorder %s12837_s14, 1  ;;  %s12837_s14 = sphi %s12867_s14, %s13_s14   ;;  %s12833_s13 = sphi %s12865_s13, %s17686_s13   ;;  %s12829_s12 = sphi %s12863_s12, %s17685_s12  }
   0x3   : > { %p27_p1 = scmp.ge.s32.totalorder %s25_s15, 2  ;;  %p151_p2 = scmp.lt.s32.totalorder %s12837_s14, 3 }
   0x5   : > { %s17688_s15 = smov (%p27_p1, %s25_s15), 0  ;;  %p152_p3 = pnand %p10974_p0, %p151_p2 }
   0x7   : > { %155 = sbr.rel (%p152_p3) target bundleno = 1425 (0x591), region = 32 }
   0xc   : > { %p179_p4 = scmp.lt.s32.totalorder %s12829_s12, 1  ;;  %vm247_vm0 = vsmask.f32 3328  ;;  %vm248_vm1 = vsmask.f32 7440  ;;  %s12839_s20 = smov 32  }
   0xd   : > { %vm12915_vm2 = vmor %vm247_vm0, %vm248_vm1  ;;  %vm698_vm3 = vcmask 1042432   ;;  %vm699_vm4 = vcmask 1046532   ;;  %s12840_s21 = smov 64   ;;  %vm829_vm6 = vsmask.f32 2304  ;;  %s12841_s22 = smov 96  }
   0xe   : > { %s17690_s12 = smov (!%p179_p4, %s12829_s12), 1  ;;  %vm13186_vm5 = vmor %vm698_vm3, %vm699_vm4  ;;  %vm830_vm7 = vsmask.f32 6416  ;;  %vm1504_vm9 = vcmask 261120   ;;  %vm1859_vm10 = vcmask 1041408   ;;  %vm1860_vm11 = vcmask 1045508  }
   0xf   : > { %s12385_s16 = smul.u32 240, %s17690_s12  ;;  %vm13345_vm8 = vmor %vm829_vm6, %vm830_vm7  ;;  %vm1553_vm13 = vcmask 523264   ;;  %vm1586_vm14 = vcmask 785408   ;;  %vm9766_vm15 = vcmask 257024   ;;  %s12356_s9 = sshll.u32 %s17690_s12, 6 }
  0x10   : > { %vm13666_vm12 = vmor %vm1859_vm10, %vm1860_vm11 }
  0x11   : > { %s12887_s19 = scalar_lea.vmem %s17548_s0, %s12385_s16  ;;  %s17529_s16 = scalar_lea.vmem %s17551_s3, %s12356_s9 }
  0x12   : > { %v203_v0 = vld [vmem:[%s12887_s19 + $0x18] sm:$0xf]  ;;  %v12891_v1 = vld [vmem:[%s12887_s19 + $0x1c] sm:$0xf]  ;;  %v12894_v2 = vld [vmem:[%s12887_s19 + $0x20] sm:$0x1] }
  0x13   : > { %v299_v3 = vshrl.u32 %v203_v0, 16  ;;  %v302_v4 = vshll.u32 %v203_v0, 16  ;;  %v308_v5 = vshll.u32 %v12891_v1, 16  ;;  %v17558_v6 = vshrl.u32 %v12891_v1, 16  ;;  %v199_v7 = vld [vmem:[%s12887_s19] sm:$0xf] }
  0x14   : > { %v318_v8 = vshll.u32 %v12894_v2, 16  ;;  %v12901_v9 = vld [vmem:[%s12887_s19 + $0x4] sm:$0xf]  ;;  %v12904_v10 = vld [vmem:[%s12887_s19 + $0x8] sm:$0x1]  ;;  %v251_v11 = vshrl.u32 %v199_v7, 16 }
  0x15   : > { %v301_v12 = vrot.slane %v299_v3, 4  ;;  %v304_v13 = vrot.slane %v302_v4, 5  ;;  %v310_v14 = vrot.slane %v308_v5, 5  ;;  %v314_v15 = vrot.slane %v17558_v6, 4  ;;  %v205_v16 = vld [vmem:[%s12887_s19 + $0x24] sm:$0xf] }
  0x16   : > { %v320_v17 = vrot.slane %v318_v8, 5  ;;  %v12909_v18 = vrot.slane %v308_v5, 6  ;;  %v253_v19 = vrot.slane %v251_v11, 4  ;;  %v254_v20 = vshll.u32 %v199_v7, 16  ;;  %v12921_v28 = vld [vmem:[%s12887_s19 + $0x28] sm:$0xf] }
  0x17   : > { %v305_v21 = vor.u32 %v304_v13, %v301_v12  ;;  %v315_v22 = vor.u32 %v314_v15, %v310_v14  ;;  %v260_v23 = vshll.u32 %v12901_v9, 16  ;;  %v17555_v24 = vshrl.u32 %v12901_v9, 16  ;;  %v12926_v35 = vld [vmem:[%s12887_s19 + $0x2c] sm:$0x1]  ;;  %v12938_v49 = vld [vmem:[%s12887_s19 + $0x10] sm:$0xf] }
  0x18   : > { %v256_v26 = vrot.slane %v254_v20, 5  ;;  %v270_v27 = vshll.u32 %v12904_v10, 16  ;;  %v323_v29 = vshrl.u32 %v205_v16, 16  ;;  %v326_v30 = vshll.u32 %v205_v16, 16  ;;  %v201_v40 = vld [vmem:[%s12887_s19 + $0xc] sm:$0xf] }
  0x19   : > { %v306_v31 = vrot.slane %v305_v21, 4  ;;  %v316_v32 = vrot.slane %v315_v22, 4  ;;  %v262_v33 = vrot.slane %v260_v23, 5  ;;  %v266_v34 = vrot.slane %v17555_v24, 4  ;;  %v12942_v53 = vld [vmem:[%s12887_s19 + $0x14] sm:$0x1] }
  0x1a   : > { %v257_v36 = vor.u32 %v256_v26, %v253_v19  ;;  %v272_v37 = vrot.slane %v270_v27, 5  ;;  %v12928_v38 = vrot.slane %v260_v23, 6  ;;  %v325_v39 = vrot.slane %v323_v29, 4  ;;  %v209_v59 = vld [vmem:[%s12887_s19 + $0x3c] sm:$0xf] }
  0x1b   : > { %v311_v41 = vsel %vm12915_vm2, %v306_v31, %v310_v14  ;;  %v321_v42 = vsel %vm12915_vm2, %v316_v32, %v320_v17  ;;  %v267_v43 = vor.u32 %v266_v34, %v262_v33  ;;  %v328_v44 = vrot.slane %v326_v30, 5  ;;  %v12956_v7 = vld [vmem:[%s12887_s19 + $0x40] sm:$0xf]  ;;  %v12966_v17 = vld [vmem:[%s12887_s19 + $0x44] sm:$0x1] }
  0x1c   : > { %v11012_v45 = vcombine.low %v311_v41, %v321_v42  ;;  %v258_v46 = vrot.slane %v257_v36, 4  ;;  %v17560_v47 = vshll.u32 %v12921_v28, 16  ;;  %v17561_v48 = vshrl.u32 %v12921_v28, 16  ;;  %v207_v26 = vld [vmem:[%s12887_s19 + $0x30] sm:$0xf] }
  0x1d   : > { %v268_v50 = vrot.slane %v267_v43, 4  ;;  %v329_v51 = vor.u32 %v328_v44, %v325_v39  ;;  %v342_v52 = vshll.u32 %v12926_v35, 16  ;;  %v275_v54 = vshrl.u32 %v201_v40, 16  ;;  %v12976_v32 = vld [vmem:[%s12887_s19 + $0x34] sm:$0xf] }
  0x1e   : > { %1316 = vrot.lane.b32.xlu1 %v11012_v45, %s12839_s20  ;;  %v263_v55 = vsel %vm12915_vm2, %v258_v46, %v262_v33  ;;  %v334_v56 = vrot.slane %v17560_v47, 5  ;;  %v338_v57 = vrot.slane %v17561_v48, 4  ;;  %v278_v58 = vshll.u32 %v201_v40, 16  ;;  %v12986_v42 = vld [vmem:[%s12887_s19 + $0x38] sm:$0x1] }
  0x1f   : > { %v273_v60 = vsel %vm12915_vm2, %v268_v50, %v272_v37  ;;  %v330_v61 = vrot.slane %v329_v51, 4  ;;  %v344_v62 = vrot.slane %v342_v52, 5  ;;  %v277_v63 = vrot.slane %v275_v54, 4  ;;  %v13128_v48 = vld [vmem:[%s12887_s19 + $0x94] sm:$0xf] }
  0x20   : > { %v11010_v0 = vcombine.low %v263_v55, %v273_v60  ;;  %v339_v3 = vor.u32 %v338_v57, %v334_v56  ;;  %v280_v4 = vrot.slane %v278_v58, 5  ;;  %v17556_v5 = vshll.u32 %v12938_v49, 16 }
  0x21   : > { %v335_v8 = vsel %vm12915_vm2, %v330_v61, %v334_v56  ;;  %v17557_v11 = vshrl.u32 %v12938_v49, 16  ;;  %v294_v12 = vshll.u32 %v12942_v53, 16  ;;  %v371_v13 = vshrl.u32 %v209_v59, 16  ;;  %v213_v56 = vld [vmem:[%s12887_s19 + $0x54] sm:$0xf] }
  0x22   : > { %1312 = vrot.lane.b32.xlu0 %v11010_v0, %s12839_s20  ;;  %v340_v14 = vrot.slane %v339_v3, 4  ;;  %v281_v15 = vor.u32 %v280_v4, %v277_v63  ;;  %v286_v16 = vrot.slane %v17556_v5, 5  ;;  %v374_v19 = vshll.u32 %v209_v59, 16  ;;  %v12998_v61 = vld [vmem:[%s12887_s19 + $0x58] sm:$0xf] }
  0x23   : > { %v290_v20 = vrot.slane %v17557_v11, 4  ;;  %v296_v21 = vrot.slane %v294_v12, 5  ;;  %v373_v22 = vrot.slane %v371_v13, 4  ;;  %v17568_v23 = vshll.u32 %v12956_v7, 16  ;;  %v13005_v12 = vld [vmem:[%s12887_s19 + $0x5c] sm:$0x1] }
  0x24   : > { %v345_v27 = vsel %vm12915_vm2, %v340_v14, %v344_v62  ;;  %v282_v29 = vrot.slane %v281_v15, 4  ;;  %v376_v30 = vrot.slane %v374_v19, 5  ;;  %v17573_v31 = vshrl.u32 %v12956_v7, 16  ;;  %v225_v5 = vld [vmem:[%s12887_s19 + $0x9c] sm:$0xf] }
  0x25   : > { %v11013_v33 = vcombine.low %v335_v8, %v345_v27  ;;  %v291_v34 = vor.u32 %v290_v20, %v286_v16  ;;  %v382_v36 = vrot.slane %v17568_v23, 5  ;;  %v390_v37 = vshll.u32 %v12966_v17, 16  ;;  %v245_v23 = vld [vmem:[%s12887_s19 + $0xb0] sm:$0x1] }
  0x26   : > { %v287_v39 = vsel %vm12915_vm2, %v282_v29, %v286_v16  ;;  %v377_v40 = vor.u32 %v376_v30, %v373_v22  ;;  %v386_v41 = vrot.slane %v17573_v31, 4  ;;  %v347_v43 = vshrl.u32 %v207_v26, 16  ;;  %v13014_v30 = vld [vmem:[%s12887_s19 + $0x4c] sm:$0xf] }
  0x27   : > { %1318 = vrot.lane.b32.xlu1 %v11013_v33, %s12839_s20  ;;  %v292_v44 = vrot.slane %v291_v34, 4  ;;  %v392_v45 = vrot.slane %v390_v37, 5  ;;  %v350_v46 = vshll.u32 %v207_v26, 16  ;;  %v17563_v50 = vshll.u32 %v12976_v32, 16 }
  0x28   : > { %v378_v51 = vrot.slane %v377_v40, 4  ;;  %v387_v52 = vor.u32 %v386_v41, %v382_v36  ;;  %v349_v54 = vrot.slane %v347_v43, 4  ;;  %v17567_v55 = vshrl.u32 %v12976_v32, 16  ;;  %v13025_v41 = vld [vmem:[%s12887_s19 + $0x50] sm:$0x1] }
  0x29   : > { %v297_v57 = vsel %vm12915_vm2, %v292_v44, %v296_v21  ;;  %v352_v58 = vrot.slane %v350_v46, 5  ;;  %v358_v59 = vrot.slane %v17563_v50, 5  ;;  %v366_v60 = vshll.u32 %v12986_v42, 16  ;;  %v211_v21 = vld [vmem:[%s12887_s19 + $0x48] sm:$0xf] }
  0x2a   : > { %v11011_v62 = vcombine.low %v287_v39, %v297_v57  ;;  %v383_v63 = vsel %vm12915_vm2, %v378_v51, %v382_v36  ;;  %v388_v0 = vrot.slane %v387_v52, 4  ;;  %v362_v3 = vrot.slane %v17567_v55, 4 }
  0x2b   : > { %v353_v4 = vor.u32 %v352_v58, %v349_v54  ;;  %v368_v8 = vrot.slane %v366_v60, 5  ;;  %v419_v13 = vshrl.u32 %v213_v56, 16  ;;  %v422_v14 = vshll.u32 %v213_v56, 16  ;;  %v217_v54 = vld [vmem:[%s12887_s19 + $0x6c] sm:$0xf] }
  0x2c   : > { %1314 = vrot.lane.b32.xlu0 %v11011_v62, %s12839_s20  ;;  %v393_v15 = vsel %vm12915_vm2, %v388_v0, %v392_v45  ;;  %v363_v16 = vor.u32 %v362_v3, %v358_v59  ;;  %v428_v19 = vshll.u32 %v12998_v61, 16  ;;  %v432_v20 = vshrl.u32 %v12998_v61, 16 }
  0x2d   : > { %v11015_v22 = vcombine.low %v383_v63, %v393_v15  ;;  %v354_v26 = vrot.slane %v353_v4, 4  ;;  %v421_v27 = vrot.slane %v419_v13, 4  ;;  %v424_v29 = vrot.slane %v422_v14, 5  ;;  %v13042_v13 = vld [vmem:[%s12887_s19 + $0x74] sm:$0x1] }
  0x2e   : > { %v364_v33 = vrot.slane %v363_v16, 4  ;;  %v430_v34 = vrot.slane %v428_v19, 5  ;;  %v434_v36 = vrot.slane %v432_v20, 4  ;;  %v438_v37 = vshll.u32 %v13005_v12, 16 }
  0x2f   : > { %1322 = vrot.lane.b32.xlu1 %v11015_v22, %s12839_s20  ;;  %v359_v39 = vsel %vm12915_vm2, %v354_v26, %v358_v59  ;;  %v425_v40 = vor.u32 %v424_v29, %v421_v27  ;;  %v395_v43 = vshrl.u32 %v211_v21, 16  ;;  %v398_v44 = vshll.u32 %v211_v21, 16  ;;  %v13032_v59 = vld [vmem:[%s12887_s19 + $0x70] sm:$0xf]  ;;  %v215_v27 = vld [vmem:[%s12887_s19 + $0x60] sm:$0xf] }
  0x30   : > { %v369_v45 = vsel %vm12915_vm2, %v364_v33, %v368_v8  ;;  %v435_v46 = vor.u32 %v434_v36, %v430_v34  ;;  %v440_v51 = vrot.slane %v438_v37, 5  ;;  %v17574_v52 = vshll.u32 %v13014_v30, 16 }
  0x31   : > { %v11014_v56 = vcombine.low %v359_v39, %v369_v45  ;;  %v426_v57 = vrot.slane %v425_v40, 4  ;;  %v397_v58 = vrot.slane %v395_v43, 4  ;;  %v400_v60 = vrot.slane %v398_v44, 5  ;;  %v13053_v44 = vld [vmem:[%s12887_s19 + $0x64] sm:$0xf] }
  0x32   : > { %v436_v62 = vrot.slane %v435_v46, 4  ;;  %v406_v63 = vrot.slane %v17574_v52, 5  ;;  %v17575_v0 = vshrl.u32 %v13014_v30, 16  ;;  %v414_v3 = vshll.u32 %v13025_v41, 16  ;;  %17601 = vst [vmem:[#allocation3_spill] sm:$0xff] %v13053_v44 }
  0x33   : > { %1320 = vrot.lane.b32.xlu0 %v11014_v56, %s12839_s20  ;;  %v431_v4 = vsel %vm12915_vm2, %v426_v57, %v430_v34  ;;  %v401_v8 = vor.u32 %v400_v60, %v397_v58  ;;  %v467_v14 = vshrl.u32 %v217_v54, 16  ;;  %v470_v15 = vshll.u32 %v217_v54, 16  ;;  %v13061_v54 = vld [vmem:[%s12887_s19 + $0x68] sm:$0x1] }
  0x34   : > { %v441_v16 = vsel %vm12915_vm2, %v436_v62, %v440_v51  ;;  %v410_v21 = vrot.slane %v17575_v0, 4  ;;  %v416_v22 = vrot.slane %v414_v3, 5  ;;  %v476_v26 = vshll.u32 %v13032_v59, 16 }
  0x35   : > { %v11017_v29 = vcombine.low %v431_v4, %v441_v16  ;;  %v402_v33 = vrot.slane %v401_v8, 4  ;;  %v469_v34 = vrot.slane %v467_v14, 4  ;;  %v472_v36 = vrot.slane %v470_v15, 5 }
  0x36   : > { %v411_v37 = vor.u32 %v410_v21, %v406_v63  ;;  %v478_v39 = vrot.slane %v476_v26, 5  ;;  %v17553_v40 = vshrl.u32 %v13032_v59, 16  ;;  %v486_v43 = vshll.u32 %v13042_v13, 16 }
  0x37   : > { %1326 = vrot.lane.b32.xlu1 %v11017_v29, %s12839_s20  ;;  %v407_v45 = vsel %vm12915_vm2, %v402_v33, %v406_v63  ;;  %v473_v46 = vor.u32 %v472_v36, %v469_v34  ;;  %v13058_v51 = vrot.slane %v476_v26, 6  ;;  %v443_v56 = vshrl.u32 %v215_v27, 16  ;;  %v221_v26 = vld [vmem:[%s12887_s19 + $0x84] sm:$0xf]  ;;  %v13072_v29 = vld [vmem:[%s12887_s19 + $0x88] sm:$0xf] }
  0x38   : > { %v412_v57 = vrot.slane %v411_v37, 4  ;;  %v482_v58 = vrot.slane %v17553_v40, 4  ;;  %v488_v60 = vrot.slane %v486_v43, 5  ;;  %v446_v62 = vshll.u32 %v215_v27, 16  ;;  %v13079_v37 = vld [vmem:[%s12887_s19 + $0x8c] sm:$0x1] }
  0x39   : > { %v474_v3 = vrot.slane %v473_v46, 4  ;;  %v445_v4 = vrot.slane %v443_v56, 4  ;;  %v452_v8 = vshll.u32 %v13053_v44, 16  ;;  %v17552_v63 = vshrl.u32 %v13053_v44, 16 }
  0x3a   : > { %v417_v14 = vsel %vm12915_vm2, %v412_v57, %v416_v22  ;;  %v483_v15 = vor.u32 %v482_v58, %v478_v39  ;;  %v448_v16 = vrot.slane %v446_v62, 5  ;;  %v462_v21 = vshll.u32 %v13061_v54, 16 }
  0x3b   : > { %v11016_v33 = vcombine.low %v407_v45, %v417_v14  ;;  %v479_v27 = vsel %vm12915_vm2, %v474_v3, %v478_v39  ;;  %v454_v34 = vrot.slane %v452_v8, 5  ;;  %v458_v36 = vrot.slane %v17552_v63, 4 }
  0x3c   : > { %v484_v43 = vrot.slane %v483_v15, 4  ;;  %v449_v22 = vor.u32 %v448_v16, %v445_v4  ;;  %v464_v46 = vrot.slane %v462_v21, 5  ;;  %v13081_v56 = vrot.slane %v452_v8, 6  ;;  %v219_v15 = vld [vmem:[%s12887_s19 + $0x78] sm:$0xf] }
  0x3d   : > { %1324 = vrot.lane.b32.xlu0 %v11016_v33, %s12839_s20  ;;  %v459_v57 = vor.u32 %v458_v36, %v454_v34  ;;  %v515_v45 = vshrl.u32 %v221_v26, 16  ;;  %v518_v58 = vshll.u32 %v221_v26, 16  ;;  %v524_v39 = vshll.u32 %v13072_v29, 16  ;;  %v13091_v33 = vld [vmem:[%s12887_s19 + $0x7c] sm:$0xf] }
  0x3e   : > { %17602 = vst [vmem:[#allocation4_spill] sm:$0xff] %v13081_v56  ;;  %v489_v62 = vsel %vm12915_vm2, %v484_v43, %v488_v60  ;;  %v450_v3 = vrot.slane %v449_v22, 4  ;;  %v17554_v14 = vshrl.u32 %v13072_v29, 16  ;;  %v534_v4 = vshll.u32 %v13079_v37, 16  ;;  %v13098_v43 = vld [vmem:[%s12887_s19 + $0x80] sm:$0x1] }
  0x3f   : > { %v11019_v16 = vcombine.low %v479_v27, %v489_v62  ;;  %v460_v8 = vrot.slane %v459_v57, 4  ;;  %v517_v21 = vrot.slane %v515_v45, 4  ;;  %v520_v63 = vrot.slane %v518_v58, 5 }
  0x40   : > { %v455_v26 = vsel %vm12915_vm2, %v450_v3, %v454_v34  ;;  %v526_v36 = vrot.slane %v524_v39, 5  ;;  %v530_v40 = vrot.slane %v17554_v14, 4  ;;  %v536_v60 = vrot.slane %v534_v4, 5 }
  0x41   : > { %1330 = vrot.lane.b32.xlu1 %v11019_v16, %s12839_s20  ;;  %v465_v27 = vsel %vm12915_vm2, %v460_v8, %v464_v46  ;;  %v521_v22 = vor.u32 %v520_v63, %v517_v21  ;;  %v13104_v45 = vrot.slane %v524_v39, 6  ;;  %v491_v62 = vshrl.u32 %v219_v15, 16  ;;  %v223_v8 = vld [vmem:[%s12887_s19 + $0x90] sm:$0xf] }
  0x42   : > { %v11018_v34 = vcombine.low %v455_v26, %v465_v27  ;;  %v531_v58 = vor.u32 %v530_v40, %v526_v36  ;;  %v494_v3 = vshll.u32 %v219_v15, 16  ;;  %v500_v4 = vshll.u32 %v13091_v33, 16  ;;  %v13113_v40 = vld [vmem:[%s12887_s19 + $0xa0] sm:$0xf] }
  0x43   : > { %v522_v14 = vrot.slane %v521_v22, 4  ;;  %v17559_v24 = vshrl.u32 %v13091_v33, 16  ;;  %v510_v16 = vshll.u32 %v13098_v43, 16  ;;  %v493_v46 = vrot.slane %v491_v62, 4  ;;  %v244_v22 = vld [vmem:[%s12887_s19 + $0xa4] sm:$0x1] }
  0x44   : > { %1328 = vrot.lane.b32.xlu0 %v11018_v34, %s12839_s20  ;;  %v532_v63 = vrot.slane %v531_v58, 4  ;;  %v496_v39 = vrot.slane %v494_v3, 5  ;;  %v502_v21 = vrot.slane %v500_v4, 5  ;;  %v13122_v62 = vrot.slane %v500_v4, 6 }
  0x45   : > { %v527_v15 = vsel %vm12915_vm2, %v522_v14, %v526_v36  ;;  %v506_v26 = vrot.slane %v17559_v24, 4  ;;  %v512_v27 = vrot.slane %v510_v16, 5  ;;  %v563_v3 = vshrl.u32 %v225_v5, 16 }
  0x46   : > { %v537_v34 = vsel %vm12915_vm2, %v532_v63, %v536_v60  ;;  %v497_v58 = vor.u32 %v496_v39, %v493_v46  ;;  %v566_v6 = vshll.u32 %v225_v5, 16  ;;  %v17562_v14 = vshll.u32 %v13113_v40, 16  ;;  %v243_v46 = vld [vmem:[%s12887_s19 + $0x98] sm:$0x1] }
  0x47   : > { %v11021_v57 = vcombine.low %v527_v15, %v537_v34  ;;  %v507_v11 = vor.u32 %v506_v26, %v502_v21  ;;  %v565_v24 = vrot.slane %v563_v3, 4  ;;  %v17565_v16 = vshrl.u32 %v13113_v40, 16  ;;  %v229_v34 = vld [vmem:[%s12887_s19 + $0xb4] sm:$0xf] }
  0x48   : > { %v498_v36 = vrot.slane %v497_v58, 4  ;;  %v582_v47 = vshll.u32 %v244_v22, 16  ;;  %v568_v4 = vrot.slane %v566_v6, 5  ;;  %v574_v63 = vrot.slane %v17562_v14, 5 }
  0x49   : > { %1334 = vrot.lane.b32.xlu1 %v11021_v57, %s12839_s20  ;;  %v508_v60 = vrot.slane %v507_v11, 4  ;;  %v539_v39 = vshrl.u32 %v223_v8, 16  ;;  %v578_v15 = vrot.slane %v17565_v16, 4  ;;  %v542_v22 = vshll.u32 %v223_v8, 16 }
  0x4a   : > { %v503_v5 = vsel %vm12915_vm2, %v498_v36, %v502_v21  ;;  %v584_v26 = vrot.slane %v582_v47, 5  ;;  %v569_v11 = vor.u32 %v568_v4, %v565_v24  ;;  %v17564_v58 = vshll.u32 %v13128_v48, 16  ;;  %v13144_v36 = vld [vmem:[%s12887_s19 + $0xb8] sm:$0xf] }
  0x4b   : > { %v513_v57 = vsel %vm12915_vm2, %v508_v60, %v512_v27  ;;  %v541_v6 = vrot.slane %v539_v39, 4  ;;  %v579_v14 = vor.u32 %v578_v15, %v574_v63  ;;  %v544_v50 = vrot.slane %v542_v22, 5 }
  0x4c   : > { %v11020_v3 = vcombine.low %v503_v5, %v513_v57  ;;  %v17566_v21 = vshrl.u32 %v13128_v48, 16  ;;  %v570_v47 = vrot.slane %v569_v11, 4  ;;  %v550_v8 = vrot.slane %v17564_v58, 5  ;;  %v246_v5 = vld [vmem:[%s12887_s19 + $0xbc] sm:$0x1] }
  0x4d   : > { %v558_v27 = vshll.u32 %v243_v46, 16  ;;  %v611_v24 = vshrl.u32 %v229_v34, 16  ;;  %v580_v60 = vrot.slane %v579_v14, 4  ;;  %v545_v4 = vor.u32 %v544_v50, %v541_v6  ;;  %v227_v46 = vld [vmem:[%s12887_s19 + $0xa8] sm:$0xf] }
  0x4e   : > { %1332 = vrot.lane.b32.xlu0 %v11020_v3, %s12839_s20  ;;  %v554_v39 = vrot.slane %v17566_v21, 4  ;;  %v614_v15 = vshll.u32 %v229_v34, 16  ;;  %v575_v22 = vsel %vm12915_vm2, %v570_v47, %v574_v63  ;;  %v17569_v58 = vshll.u32 %v13144_v36, 16  ;;  %v13159_v6 = vld [vmem:[%s12887_s19 + $0xac] sm:$0xf] }
  0x4f   : > { %v560_v57 = vrot.slane %v558_v27, 5  ;;  %v613_v11 = vrot.slane %v611_v24, 4  ;;  %v585_v16 = vsel %vm12915_vm2, %v580_v60, %v584_v26  ;;  %v546_v3 = vrot.slane %v545_v4, 4 }
  0x50   : > { %v555_v14 = vor.u32 %v554_v39, %v550_v8  ;;  %v616_v50 = vrot.slane %v614_v15, 5  ;;  %v11023_v21 = vcombine.low %v575_v22, %v585_v16  ;;  %v622_v34 = vrot.slane %v17569_v58, 5  ;;  %v13172_v15 = vld [vmem:[%s12887_s19 + $0xc] sm:$0xe] }
  0x51   : > { %v17570_v63 = vshrl.u32 %v13144_v36, 16  ;;  %v630_v47 = vshll.u32 %v246_v5, 16  ;;  %v551_v27 = vsel %vm12915_vm2, %v546_v3, %v550_v8  ;;  %v587_v26 = vshrl.u32 %v227_v46, 16 }
  0x52   : > { %v556_v24 = vrot.slane %v555_v14, 4  ;;  %v617_v55 = vor.u32 %v616_v50, %v613_v11  ;;  %1338 = vrot.lane.b32.xlu1 %v11023_v21, %s12839_s20  ;;  %v590_v4 = vshll.u32 %v227_v46, 16  ;;  %v17571_v39 = vshll.u32 %v13159_v6, 16 }
  0x53   : > { %v626_v60 = vrot.slane %v17570_v63, 4  ;;  %v632_v16 = vrot.slane %v630_v47, 5  ;;  %v589_v22 = vrot.slane %v587_v26, 4  ;;  %v17572_v11 = vshrl.u32 %v13159_v6, 16  ;;  %v634_v47 = vld [vmem:[%s12887_s19] sm:$0xe] }
  0x54   : > { %v561_v5 = vsel %vm12915_vm2, %v556_v24, %v560_v57  ;;  %v618_v8 = vrot.slane %v617_v55, 4  ;;  %v592_v50 = vrot.slane %v590_v4, 5  ;;  %v598_v21 = vrot.slane %v17571_v39, 5 }
  0x55   : > { %v11022_v3 = vcombine.low %v551_v27, %v561_v5  ;;  %v627_v14 = vor.u32 %v626_v60, %v622_v34  ;;  %v602_v58 = vrot.slane %v17572_v11, 4  ;;  %v606_v63 = vshll.u32 %v245_v23, 16 }
  0x56   : > { %v623_v46 = vsel %vm12915_vm2, %v618_v8, %v622_v34  ;;  %v10979_v57 = vrot.slane %v13172_v15, 9  ;;  %v593_v24 = vor.u32 %v592_v50, %v589_v22  ;;  %v710_v26 = vrot.slane %v12938_v49, 5  ;;  %v13196_v8 = vld [vmem:[%s12887_s19 + $0x24] sm:$0xe] }
  0x57   : > { %1336 = vrot.lane.b32.xlu0 %v11022_v3, %s12839_s20  ;;  %v628_v27 = vrot.slane %v627_v14, 4  ;;  %v713_v34 = vrot.slane %v12942_v53, 5  ;;  %v603_v60 = vor.u32 %v602_v58, %v598_v21  ;;  %v608_v4 = vrot.slane %v606_v63, 5  ;;  %v13205_v63 = vld [vmem:[%s12887_s19 + $0x18] sm:$0xe] }
  0x58   : > { %v10978_v23 = vrot.slane %v634_v47, 9  ;;  %v703_v5 = vrot.slane %v12901_v9, 5  ;;  %v594_v11 = vrot.slane %v593_v24, 4  ;;  %v711_v3 = vsel %vm13186_vm5, %v10979_v57, %v710_v26 }
  0x59   : > { %v633_v39 = vsel %vm12915_vm2, %v628_v27, %v632_v16  ;;  %v712_v22 = vrot.slane %v710_v26, 4  ;;  %v604_v50 = vrot.slane %v603_v60, 4  ;;  %v706_v27 = vrot.slane %v12904_v10, 5  ;;  %v13219_v60 = vld [vmem:[%s12887_s19 + $0x3c] sm:$0xe] }
  0x5a   : > { %v11025_v14 = vcombine.low %v623_v46, %v633_v39  ;;  %v704_v53 = vsel %vm13186_vm5, %v10978_v23, %v703_v5  ;;  %v705_v58 = vrot.slane %v703_v5, 4  ;;  %v599_v47 = vsel %vm12915_vm2, %v594_v11, %v598_v21  ;;  %v13226_v23 = vld [vmem:[%s12887_s19 + $0x30] sm:$0xe] }
  0x5b   : > { %v714_v16 = vsel %vm13186_vm5, %v712_v22, %v713_v34  ;;  %v10981_v57 = vrot.slane %v13196_v8, 9  ;;  %v609_v39 = vsel %vm12915_vm2, %v604_v50, %v608_v4  ;;  %v724_v24 = vrot.slane %v12921_v28, 5 }
  0x5c   : > { %1342 = vrot.lane.b32.xlu1 %v11025_v14, %s12839_s20  ;;  %v11027_v46 = vcombine.low %v711_v3, %v714_v16  ;;  %v727_v26 = vrot.slane %v12926_v35, 5  ;;  %v11024_v11 = vcombine.low %v599_v47, %v609_v39  ;;  %v707_v21 = vsel %vm13186_vm5, %v705_v58, %v706_v27  ;;  %v13243_v27 = vld [vmem:[%s12887_s19 + $0x54] sm:$0xe] }
  0x5d   : > { %v10980_v10 = vrot.slane %v13205_v63, 9  ;;  %v717_v34 = vrot.slane %v12891_v1, 5  ;;  %v11026_v5 = vcombine.low %v704_v53, %v707_v21  ;;  %v725_v4 = vsel %vm13186_vm5, %v10981_v57, %v724_v24 }
  0x5e   : > { %v726_v3 = vrot.slane %v724_v24, 4  ;;  %v720_v35 = vrot.slane %v12894_v2, 5  ;;  %1340 = vrot.lane.b32.xlu0 %v11024_v11, %s12839_s20  ;;  %v10983_v50 = vrot.slane %v13219_v60, 9  ;;  %v738_v58 = vrot.slane %v12956_v7, 5 }
  0x5f   : > { %v718_v22 = vsel %vm13186_vm5, %v10980_v10, %v717_v34  ;;  %v719_v14 = vrot.slane %v717_v34, 4  ;;  %v741_v2 = vrot.slane %v12966_v17, 5  ;;  %v10982_v47 = vrot.slane %v13226_v23, 9  ;;  %v643_v34 = vld [vmem:[%s12887_s19 + $0x6c] sm:$0xe] }
  0x60   : > { %1394 = vrot.lane.b32.xlu1 %v11027_v46, %s12840_s21  ;;  %v728_v53 = vsel %vm13186_vm5, %v726_v3, %v727_v26  ;;  %v731_v16 = vrot.slane %v12976_v32, 5  ;;  %v739_v24 = vsel %vm13186_vm5, %v10983_v50, %v738_v58  ;;  %v740_v11 = vrot.slane %v738_v58, 4  ;;  %v13250_v46 = vld [vmem:[%s12887_s19 + $0x48] sm:$0xe] }
  0x61   : > { %v11029_v57 = vcombine.low %v725_v4, %v728_v53  ;;  %v721_v39 = vsel %vm13186_vm5, %v719_v14, %v720_v35  ;;  %v734_v10 = vrot.slane %v12986_v42, 5  ;;  %v10985_v3 = vrot.slane %v13243_v27, 9 }
  0x62   : > { %v11028_v26 = vcombine.low %v718_v22, %v721_v39  ;;  %v732_v17 = vsel %vm13186_vm5, %v10982_v47, %v731_v16  ;;  %v733_v21 = vrot.slane %v731_v16, 4  ;;  %1392 = vrot.lane.b32.xlu0 %v11026_v5, %s12840_s21  ;;  %v742_v4 = vsel %vm13186_vm5, %v740_v11, %v741_v2  ;;  %v642_v5 = vld [vmem:[%s12887_s19 + $0x60] sm:$0xe] }
  0x63   : > { %v752_v35 = vrot.slane %v12998_v61, 5  ;;  %v755_v14 = vrot.slane %v13005_v12, 5  ;;  %v11031_v22 = vcombine.low %v739_v24, %v742_v4  ;;  %v10984_v42 = vrot.slane %v13250_v46, 9 }
  0x64   : > { %1398 = vrot.lane.b32.xlu1 %v11029_v57, %s12840_s21  ;;  %v735_v50 = vsel %vm13186_vm5, %v733_v21, %v734_v10  ;;  %v745_v58 = vrot.slane %v13014_v30, 5  ;;  %v748_v16 = vrot.slane %v13025_v41, 5  ;;  %v10987_v39 = vrot.slane %v643_v34, 9 }
  0x65   : > { %v11030_v53 = vcombine.low %v732_v17, %v735_v50  ;;  %v753_v2 = vsel %vm13186_vm5, %v10985_v3, %v752_v35  ;;  %v754_v47 = vrot.slane %v752_v35, 4  ;;  %v766_v24 = vrot.slane %v13032_v59, 5  ;;  %v13287_v50 = vld [vmem:[%s12887_s19 + $0x64] sm:$0xf] }
  0x66   : > { %v746_v12 = vsel %vm13186_vm5, %v10984_v42, %v745_v58  ;;  %v747_v57 = vrot.slane %v745_v58, 4  ;;  %1396 = vrot.lane.b32.xlu0 %v11028_v26, %s12840_s21  ;;  %v769_v17 = vrot.slane %v13042_v13, 5  ;;  %v1040_v21 = vshrl.u32 %v643_v34, 16  ;;  %v13284_v26 = vld [vmem:[%s12887_s19 + $0x60] sm:$0xf] }
  0x67   : > { %v756_v11 = vsel %vm13186_vm5, %v754_v47, %v755_v14  ;;  %v1043_v10 = vshll.u32 %v643_v34, 16  ;;  %v767_v3 = vsel %vm13186_vm5, %v10987_v39, %v766_v24  ;;  %v768_v35 = vrot.slane %v766_v24, 4 }
  0x68   : > { %1402 = vrot.lane.b32.xlu1 %v11031_v22, %s12840_s21  ;;  %v11033_v41 = vcombine.low %v753_v2, %v756_v11  ;;  %v749_v4 = vsel %vm13186_vm5, %v747_v57, %v748_v16  ;;  %v13289_v42 = vrot.slane %v1040_v21, 5  ;;  %v10986_v34 = vrot.slane %v642_v5, 9  ;;  %v11145_v22 = vld [vmem:[%s12887_s19 + $0x68] sm:$0x1]  ;;  %v11161_v57 = vld [vmem:[%s12887_s19 + $0x60] sm:$0xe] }
  0x69   : > { %v11032_v14 = vcombine.low %v746_v12, %v749_v4  ;;  %v13291_v13 = vrot.slane %v1043_v10, 6  ;;  %v770_v58 = vsel %vm13186_vm5, %v768_v35, %v769_v17  ;;  %v759_v2 = vrot.slane %v13053_v44, 5 }
  0x6a   : > { %v762_v47 = vrot.slane %v13061_v54, 5  ;;  %v1017_v16 = vshrl.u32 %v642_v5, 16  ;;  %1400 = vrot.lane.b32.xlu0 %v11030_v53, %s12840_s21  ;;  %v11035_v39 = vcombine.low %v767_v3, %v770_v58  ;;  %v1020_v24 = vshll.u32 %v642_v5, 16 }
  0x6b   : > { %v2195_v12 = vshrl.u32 %v13284_v26, 16  ;;  %v2198_v11 = vshll.u32 %v13284_v26, 16  ;;  %v760_v17 = vsel %vm13186_vm5, %v10986_v34, %v759_v2  ;;  %v761_v21 = vrot.slane %v759_v2, 4 }
  0x6c   : > { %1406 = vrot.lane.b32.xlu1 %v11033_v41, %s12840_s21  ;;  %v13305_v10 = vrot.slane %v1017_v16, 5  ;;  %v2204_v54 = vshll.u32 %v13287_v50, 16  ;;  %v13308_v4 = vrot.slane %v1020_v24, 6  ;;  %v2208_v3 = vshrl.u32 %v13287_v50, 16 }
  0x6d   : > { %v2197_v53 = vrot.slane %v2195_v12, 4  ;;  %v2200_v5 = vrot.slane %v2198_v11, 5  ;;  %v763_v35 = vsel %vm13186_vm5, %v761_v21, %v762_v47  ;;  %v2214_v41 = vshll.u32 %v11145_v22, 16  ;;  %v820_v47 = vld [vmem:[%s12887_s19 + $0x5c] sm:$0x3] }
  0x6e   : > { %17605 = vst [vmem:[#allocation5_spill] sm:$0xff] %v13308_v4  ;;  %v2206_v58 = vrot.slane %v2204_v54, 5  ;;  %v11209_v34 = vcombine.low %v13284_v26, %v13287_v50  ;;  %1404 = vrot.lane.b32.xlu0 %v11032_v14, %s12840_s21  ;;  %v11034_v2 = vcombine.low %v760_v17, %v763_v35  ;;  %v2210_v24 = vrot.slane %v2208_v3, 4  ;;  %v13324_v17 = vld [vmem:[%s12887_s19 + $0x54] sm:$0xf] }
  0x6f   : > { %v2201_v16 = vor.u32 %v2200_v5, %v2197_v53  ;;  %v11177_v31 = vrot.slane %v11161_v57, 9  ;;  %v2216_v12 = vrot.slane %v2214_v41, 5  ;;  %v2525_v11 = vrot.slane %v13287_v50, 5  ;;  %v11144_v35 = vld [vmem:[%s12887_s19 + $0x5c] sm:$0x1] }
  0x70   : > { %1410 = vrot.lane.b32.xlu1 %v11035_v39, %s12840_s21  ;;  %v2528_v52 = vrot.slane %v11145_v22, 5  ;;  %v994_v21 = vshrl.u32 %v13243_v27, 16  ;;  %v2211_v26 = vor.u32 %v2210_v24, %v2206_v58  ;;  %v997_v0 = vshll.u32 %v13243_v27, 16  ;;  %v13331_v22 = vld [vmem:[%s12887_s19 + $0x58] sm:$0xf] }
  0x71   : > { %v2202_v54 = vrot.slane %v2201_v16, 4  ;;  %v1002_v14 = vrot.slane %v432_v20, 5  ;;  %v2526_v57 = vsel %vm13186_vm5, %v11177_v31, %v2525_v11  ;;  %v2527_v39 = vrot.slane %v2525_v11, 4  ;;  %v14030_v4 = vld [vmem:[%s12887_s19 + $0x9c] sm:$0xf] }
  0x72   : > { %v996_v53 = vrot.slane %v994_v21, 5  ;;  %v1003_v50 = vrot.slane %v428_v19, 6  ;;  %1408 = vrot.lane.b32.xlu0 %v11034_v2, %s12840_s21  ;;  %v2212_v5 = vrot.slane %v2211_v26, 4  ;;  %v999_v20 = vrot.slane %v997_v0, 6  ;;  %v11160_v21 = vld [vmem:[%s12887_s19 + $0x54] sm:$0xe] }
  0x73   : > { %v2207_v27 = vsel %vm12915_vm2, %v2202_v54, %v2206_v58  ;;  %v1008_v3 = vshrl.u32 %v820_v47, 16  ;;  %v2529_v31 = vsel %vm13186_vm5, %v2527_v39, %v2528_v52  ;;  %v1011_v16 = vshll.u32 %v820_v47, 16 }
  0x74   : > { %v1004_v41 = vor.u32 %v1003_v50, %v1002_v14  ;;  %v2171_v61 = vshrl.u32 %v13324_v17, 16  ;;  %v2217_v19 = vsel %vm12915_vm2, %v2212_v5, %v2216_v12  ;;  %v11241_v24 = vcombine.low %v2526_v57, %v2529_v31 }
  0x75   : > { %v1000_v11 = vor.u32 %v999_v20, %v996_v53  ;;  %v1010_v2 = vrot.slane %v1008_v3, 5  ;;  %v11225_v56 = vcombine.low %v2207_v27, %v2217_v19  ;;  %v1013_v52 = vrot.slane %v1011_v16, 6 }
  0x76   : > { %v1006_v58 = vrot.slane %v1004_v41, 4  ;;  %v2173_v54 = vrot.slane %v2171_v61, 4  ;;  %2712 = vrot.lane.b32.xlu0 %v11209_v34, %s12839_s20  ;;  %v2174_v26 = vshll.u32 %v13324_v17, 16  ;;  %v2180_v12 = vshll.u32 %v13331_v22, 16 }
  0x77   : > { %v1001_v47 = vrot.slane %v1000_v11, 4  ;;  %v2184_v14 = vshrl.u32 %v13331_v22, 16  ;;  %2792 = vrot.lane.b32.xlu1 %v11225_v56, %s12840_s21  ;;  %v1014_v57 = vor.u32 %v1013_v52, %v1010_v2  ;;  %v2190_v39 = vshll.u32 %v11144_v35, 16 }
  0x78   : > { %v11208_v53 = vcombine.low %v13324_v17, %v13331_v22  ;;  %v11176_v50 = vrot.slane %v11160_v21, 9  ;;  %v2176_v34 = vrot.slane %v2174_v26, 5  ;;  %v2182_v5 = vrot.slane %v2180_v12, 5  ;;  %v819_v17 = vld [vmem:[%s12887_s19 + $0x50] sm:$0x3] }
  0x79   : > { %v1005_v27 = vsel %vm13345_vm8, %v1001_v47, %v1004_v41  ;;  %v2186_v20 = vrot.slane %v2184_v14, 4  ;;  %v1015_v3 = vsel %vm13345_vm8, %v1006_v58, %v1014_v57  ;;  %v2192_v31 = vrot.slane %v2190_v39, 5  ;;  %v11143_v57 = vld [vmem:[%s12887_s19 + $0x50] sm:$0x1] }
  0x7a   : > { %v2518_v56 = vrot.slane %v13331_v22, 5  ;;  %v2521_v16 = vrot.slane %v11144_v35, 5  ;;  %v11049_v61 = vcombine.low %v1005_v27, %v1015_v3  ;;  %v2177_v19 = vor.u32 %v2176_v34, %v2173_v54  ;;  %v13370_v35 = vld [vmem:[%s12887_s19 + $0x48] sm:$0xf]  ;;  %v13373_v54 = vld [vmem:[%s12887_s19 + $0x4c] sm:$0xf] }
  0x7b   : > { %v2187_v11 = vor.u32 %v2186_v20, %v2182_v5  ;;  %v971_v2 = vshrl.u32 %v13250_v46, 16  ;;  %2872 = vrot.lane.b32.xlu1 %v11241_v24, %s12841_s22  ;;  %v974_v58 = vshll.u32 %v13250_v46, 16  ;;  %v17608_v52 = vshrl.u32 %v13014_v30, 16 }
  0x7c   : > { %v2519_v41 = vsel %vm13186_vm5, %v11176_v50, %v2518_v56  ;;  %v2520_v21 = vrot.slane %v2518_v56, 4  ;;  %1486 = vrot.lane.b32.xlu0 %v11049_v61, %s12841_s22  ;;  %v2178_v47 = vrot.slane %v2177_v19, 4  ;;  %v17609_v24 = vshll.u32 %v13014_v30, 16 }
  0x7d   : > { %v979_v22 = vrot.slane %v17608_v52, 5  ;;  %v2188_v26 = vrot.slane %v2187_v11, 4  ;;  %v973_v12 = vrot.slane %v971_v2, 5  ;;  %v976_v39 = vrot.slane %v974_v58, 6  ;;  %v11159_v2 = vld [vmem:[%s12887_s19 + $0x48] sm:$0xe] }
  0x7e   : > { %v980_v14 = vrot.slane %v17609_v24, 6  ;;  %v2522_v46 = vsel %vm13186_vm5, %v2520_v21, %v2521_v16  ;;  %v985_v50 = vshrl.u32 %v819_v17, 16  ;;  %v988_v27 = vshll.u32 %v819_v17, 16 }
  0x7f   : > { %v2183_v34 = vsel %vm12915_vm2, %v2178_v47, %v2182_v5  ;;  %v2193_v20 = vsel %vm12915_vm2, %v2188_v26, %v2192_v31  ;;  %v11240_v3 = vcombine.low %v2519_v41, %v2522_v46  ;;  %v977_v19 = vor.u32 %v976_v39, %v973_v12 }
  0x80   : > { %v981_v56 = vor.u32 %v980_v14, %v979_v22  ;;  %v11224_v61 = vcombine.low %v2183_v34, %v2193_v20  ;;  %v987_v11 = vrot.slane %v985_v50, 5  ;;  %v990_v30 = vrot.slane %v988_v27, 6  ;;  %2710 = vrot.lane.b32.xlu0 %v11208_v53, %s12839_s20  ;;  %v818_v20 = vld [vmem:[%s12887_s19 + $0x44] sm:$0x3] }
  0x81   : > { %v2147_v16 = vshrl.u32 %v13370_v35, 16  ;;  %v2150_v17 = vshll.u32 %v13370_v35, 16  ;;  %v2156_v21 = vshll.u32 %v13373_v54, 16  ;;  %v978_v5 = vrot.slane %v977_v19, 4 }
  0x82   : > { %v983_v52 = vrot.slane %v981_v56, 4  ;;  %2790 = vrot.lane.b32.xlu1 %v11224_v61, %s12840_s21  ;;  %v991_v31 = vor.u32 %v990_v30, %v987_v11  ;;  %v2160_v41 = vshrl.u32 %v13373_v54, 16  ;;  %v2166_v58 = vshll.u32 %v11143_v57, 16  ;;  %v13404_v11 = vld [vmem:[%s12887_s19 + $0x3c] sm:$0xf] }
  0x83   : > { %v2149_v22 = vrot.slane %v2147_v16, 4  ;;  %v2152_v47 = vrot.slane %v2150_v17, 5  ;;  %v2158_v26 = vrot.slane %v2156_v21, 5  ;;  %v11207_v53 = vcombine.low %v13370_v35, %v13373_v54 }
  0x84   : > { %v982_v12 = vsel %vm13345_vm8, %v978_v5, %v981_v56  ;;  %v992_v24 = vsel %vm13345_vm8, %v983_v52, %v991_v31  ;;  %v2162_v14 = vrot.slane %v2160_v41, 4  ;;  %v2168_v46 = vrot.slane %v2166_v58, 5 }
  0x85   : > { %v11048_v39 = vcombine.low %v982_v12, %v992_v24  ;;  %v2153_v50 = vor.u32 %v2152_v47, %v2149_v22  ;;  %v11175_v27 = vrot.slane %v11159_v2, 9  ;;  %v2511_v34 = vrot.slane %v13373_v54, 5  ;;  %v11115_v22 = vld [vmem:[%s12887_s19 + $0x40] sm:$0xf] }
  0x86   : > { %2870 = vrot.lane.b32.xlu1 %v11240_v3, %s12841_s22  ;;  %v2163_v61 = vor.u32 %v2162_v14, %v2158_v26  ;;  %v2514_v19 = vrot.slane %v11143_v57, 5  ;;  %v948_v35 = vshrl.u32 %v13219_v60, 16  ;;  %v951_v56 = vshll.u32 %v13219_v60, 16 }
  0x87   : > { %1484 = vrot.lane.b32.xlu0 %v11048_v39, %s12841_s22  ;;  %v2154_v30 = vrot.slane %v2153_v50, 4  ;;  %v2512_v2 = vsel %vm13186_vm5, %v11175_v27, %v2511_v34  ;;  %v2513_v54 = vrot.slane %v2511_v34, 4  ;;  %v17610_v52 = vshrl.u32 %v12956_v7, 16  ;;  %v11142_v39 = vld [vmem:[%s12887_s19 + $0x44] sm:$0x1] }
  0x88   : > { %v2164_v16 = vrot.slane %v2163_v61, 4  ;;  %v950_v57 = vrot.slane %v948_v35, 5  ;;  %v953_v17 = vrot.slane %v951_v56, 6  ;;  %v17611_v21 = vshll.u32 %v12956_v7, 16  ;;  %v11158_v35 = vld [vmem:[%s12887_s19 + $0x3c] sm:$0xe] }
  0x89   : > { %v956_v3 = vrot.slane %v17610_v52, 5  ;;  %v2159_v60 = vsel %vm12915_vm2, %v2154_v30, %v2158_v26  ;;  %v2515_v31 = vsel %vm13186_vm5, %v2513_v54, %v2514_v19  ;;  %v962_v41 = vshrl.u32 %v818_v20, 16 }
  0x8a   : > { %v957_v5 = vrot.slane %v17611_v21, 6  ;;  %v965_v58 = vshll.u32 %v818_v20, 16  ;;  %v2169_v47 = vsel %vm12915_vm2, %v2164_v16, %v2168_v46  ;;  %v11239_v12 = vcombine.low %v2512_v2, %v2515_v31 }
  0x8b   : > { %v954_v24 = vor.u32 %v953_v17, %v950_v57  ;;  %v11223_v50 = vcombine.low %v2159_v60, %v2169_v47  ;;  %2708 = vrot.lane.b32.xlu0 %v11207_v53, %s12839_s20  ;;  %v964_v7 = vrot.slane %v962_v41, 5  ;;  %v2123_v26 = vshrl.u32 %v13404_v11, 16 }
  0x8c   : > { %v958_v14 = vor.u32 %v957_v5, %v956_v3  ;;  %v967_v27 = vrot.slane %v965_v58, 6  ;;  %v2126_v20 = vshll.u32 %v13404_v11, 16  ;;  %v2132_v19 = vshll.u32 %v11115_v22, 16  ;;  %v817_v58 = vld [vmem:[%s12887_s19 + $0x38] sm:$0x3] }
  0x8d   : > { %v955_v34 = vrot.slane %v954_v24, 4  ;;  %2788 = vrot.lane.b32.xlu1 %v11223_v50, %s12840_s21  ;;  %v2125_v56 = vrot.slane %v2123_v26, 4  ;;  %v2136_v30 = vshrl.u32 %v11115_v22, 16  ;;  %v2142_v2 = vshll.u32 %v11142_v39, 16 }
  0x8e   : > { %v960_v61 = vrot.slane %v958_v14, 4  ;;  %v968_v46 = vor.u32 %v967_v27, %v964_v7  ;;  %v2128_v54 = vrot.slane %v2126_v20, 5  ;;  %v2134_v52 = vrot.slane %v2132_v19, 5 }
  0x8f   : > { %v959_v53 = vsel %vm13345_vm8, %v955_v34, %v958_v14  ;;  %v11206_v3 = vcombine.low %v13404_v11, %v11115_v22  ;;  %v2138_v57 = vrot.slane %v2136_v30, 4  ;;  %v2144_v17 = vrot.slane %v2142_v2, 5  ;;  %v11113_v30 = vld [vmem:[%s12887_s19 + $0x34] sm:$0xf] }
  0x90   : > { %v969_v16 = vsel %vm13345_vm8, %v960_v61, %v968_v46  ;;  %v11174_v21 = vrot.slane %v11158_v35, 9  ;;  %v2129_v60 = vor.u32 %v2128_v54, %v2125_v56  ;;  %v2504_v31 = vrot.slane %v11115_v22, 5 }
  0x91   : > { %v11047_v5 = vcombine.low %v959_v53, %v969_v16  ;;  %v2507_v41 = vrot.slane %v11142_v39, 5  ;;  %2868 = vrot.lane.b32.xlu1 %v11239_v12, %s12841_s22  ;;  %v2139_v47 = vor.u32 %v2138_v57, %v2134_v52  ;;  %v925_v24 = vshrl.u32 %v13226_v23, 16  ;;  %v11141_v16 = vld [vmem:[%s12887_s19 + $0x38] sm:$0x1] }
  0x92   : > { %v928_v14 = vshll.u32 %v13226_v23, 16  ;;  %v17612_v11 = vshrl.u32 %v12976_v32, 16  ;;  %v2130_v7 = vrot.slane %v2129_v60, 4  ;;  %v2505_v22 = vsel %vm13186_vm5, %v11174_v21, %v2504_v31  ;;  %v13443_v23 = vld [vmem:[%s12887_s19 + $0x30] sm:$0xf] }
  0x93   : > { %1482 = vrot.lane.b32.xlu0 %v11047_v5, %s12841_s22  ;;  %v2506_v39 = vrot.slane %v2504_v31, 4  ;;  %v17613_v27 = vshll.u32 %v12976_v32, 16  ;;  %v2140_v26 = vrot.slane %v2139_v47, 4  ;;  %v927_v34 = vrot.slane %v925_v24, 5  ;;  %v11157_v47 = vld [vmem:[%s12887_s19 + $0x30] sm:$0xe] }
  0x94   : > { %v933_v50 = vrot.slane %v17612_v11, 5  ;;  %v930_v61 = vrot.slane %v928_v14, 6  ;;  %v939_v20 = vshrl.u32 %v817_v58, 16  ;;  %v2135_v19 = vsel %vm12915_vm2, %v2130_v7, %v2134_v52 }
  0x95   : > { %v934_v12 = vrot.slane %v17613_v27, 6  ;;  %v2508_v35 = vsel %vm13186_vm5, %v2506_v39, %v2507_v41  ;;  %v942_v56 = vshll.u32 %v817_v58, 16  ;;  %v2145_v32 = vsel %vm12915_vm2, %v2140_v26, %v2144_v17 }
  0x96   : > { %v11238_v2 = vcombine.low %v2505_v22, %v2508_v35  ;;  %v931_v53 = vor.u32 %v930_v61, %v927_v34  ;;  %v941_v54 = vrot.slane %v939_v20, 5  ;;  %v11222_v57 = vcombine.low %v2135_v19, %v2145_v32  ;;  %v816_v35 = vld [vmem:[%s12887_s19 + $0x2c] sm:$0x3] }
  0x97   : > { %v935_v46 = vor.u32 %v934_v12, %v933_v50  ;;  %2706 = vrot.lane.b32.xlu0 %v11206_v3, %s12839_s20  ;;  %v944_v5 = vrot.slane %v942_v56, 6  ;;  %v2099_v52 = vshrl.u32 %v13443_v23, 16  ;;  %v2102_v31 = vshll.u32 %v13443_v23, 16 }
  0x98   : > { %v932_v60 = vrot.slane %v931_v53, 4  ;;  %v2108_v41 = vshll.u32 %v11113_v30, 16  ;;  %v2112_v58 = vshrl.u32 %v11113_v30, 16  ;;  %2786 = vrot.lane.b32.xlu1 %v11222_v57, %s12840_s21  ;;  %v2118_v14 = vshll.u32 %v11141_v16, 16 }
  0x99   : > { %v937_v21 = vrot.slane %v935_v46, 4  ;;  %v945_v17 = vor.u32 %v944_v5, %v941_v54  ;;  %v2101_v24 = vrot.slane %v2099_v52, 4  ;;  %v11205_v11 = vcombine.low %v13443_v23, %v11113_v30 }
  0x9a   : > { %v936_v3 = vsel %vm13345_vm8, %v932_v60, %v935_v46  ;;  %v2104_v50 = vrot.slane %v2102_v31, 5  ;;  %v2110_v7 = vrot.slane %v2108_v41, 5  ;;  %v2114_v22 = vrot.slane %v2112_v58, 4 }
  0x9b   : > { %v946_v39 = vsel %vm13345_vm8, %v937_v21, %v945_v17  ;;  %v2120_v27 = vrot.slane %v2118_v14, 5  ;;  %v11173_v12 = vrot.slane %v11157_v47, 9  ;;  %v2497_v26 = vrot.slane %v11113_v30, 5 }
  0x9c   : > { %v11046_v34 = vcombine.low %v936_v3, %v946_v39  ;;  %v2105_v61 = vor.u32 %v2104_v50, %v2101_v24  ;;  %v2115_v20 = vor.u32 %v2114_v22, %v2110_v7  ;;  %v2500_v19 = vrot.slane %v11141_v16, 5  ;;  %2866 = vrot.lane.b32.xlu1 %v11238_v2, %s12841_s22  ;;  %v13475_v2 = vld [vmem:[%s12887_s19 + $0x24] sm:$0xf] }
  0x9d   : > { %v2498_v23 = vsel %vm13186_vm5, %v11173_v12, %v2497_v26  ;;  %v2499_v46 = vrot.slane %v2497_v26, 4  ;;  %v902_v56 = vshrl.u32 %v13196_v8, 16  ;;  %v905_v32 = vshll.u32 %v13196_v8, 16  ;;  %v13480_v8 = vld [vmem:[%s12887_s19 + $0x28] sm:$0xf] }
  0x9e   : > { %1480 = vrot.lane.b32.xlu0 %v11046_v34, %s12841_s22  ;;  %v2106_v30 = vrot.slane %v2105_v61, 4  ;;  %v2116_v53 = vrot.slane %v2115_v20, 4  ;;  %v17614_v54 = vshrl.u32 %v12921_v28, 16  ;;  %v17615_v57 = vshll.u32 %v12921_v28, 16  ;;  %v11140_v28 = vld [vmem:[%s12887_s19 + $0x2c] sm:$0x1] }
  0x9f   : > { %v2501_v5 = vsel %vm13186_vm5, %v2499_v46, %v2500_v19  ;;  %v904_v52 = vrot.slane %v902_v56, 5  ;;  %v907_v60 = vrot.slane %v905_v32, 6  ;;  %v916_v31 = vshrl.u32 %v816_v35, 16  ;;  %v11156_v20 = vld [vmem:[%s12887_s19 + $0x24] sm:$0xe] }
  0xa0   : > { %v910_v16 = vrot.slane %v17614_v54, 5  ;;  %v911_v21 = vrot.slane %v17615_v57, 6  ;;  %v2111_v41 = vsel %vm12915_vm2, %v2106_v30, %v2110_v7  ;;  %v2121_v58 = vsel %vm12915_vm2, %v2116_v53, %v2120_v27 }
  0xa1   : > { %v11237_v47 = vcombine.low %v2498_v23, %v2501_v5  ;;  %v11221_v24 = vcombine.low %v2111_v41, %v2121_v58  ;;  %v908_v14 = vor.u32 %v907_v60, %v904_v52  ;;  %v918_v3 = vrot.slane %v916_v31, 5  ;;  %v815_v52 = vld [vmem:[%s12887_s19 + $0x20] sm:$0x3] }
  0xa2   : > { %v912_v17 = vor.u32 %v911_v21, %v910_v16  ;;  %v919_v50 = vshll.u32 %v816_v35, 16  ;;  %2704 = vrot.lane.b32.xlu0 %v11205_v11, %s12839_s20  ;;  %v2075_v39 = vshrl.u32 %v13475_v2, 16  ;;  %v2078_v12 = vshll.u32 %v13475_v2, 16 }
  0xa3   : > { %v2084_v7 = vshll.u32 %v13480_v8, 16  ;;  %2784 = vrot.lane.b32.xlu1 %v11221_v24, %s12840_s21  ;;  %v909_v27 = vrot.slane %v908_v14, 4  ;;  %v2088_v34 = vshrl.u32 %v13480_v8, 16  ;;  %v2094_v61 = vshll.u32 %v11140_v28, 16 }
  0xa4   : > { %v914_v22 = vrot.slane %v912_v17, 4  ;;  %v921_v26 = vrot.slane %v919_v50, 6  ;;  %v2077_v19 = vrot.slane %v2075_v39, 4  ;;  %v2080_v35 = vrot.slane %v2078_v12, 5  ;;  %v11109_v12 = vld [vmem:[%s12887_s19 + $0x1c] sm:$0xf] }
  0xa5   : > { %v2086_v23 = vrot.slane %v2084_v7, 5  ;;  %v11204_v11 = vcombine.low %v13475_v2, %v13480_v8  ;;  %v913_v46 = vsel %vm13345_vm8, %v909_v27, %v912_v17  ;;  %v2090_v32 = vrot.slane %v2088_v34, 4  ;;  %v11139_v34 = vld [vmem:[%s12887_s19 + $0x20] sm:$0x1] }
  0xa6   : > { %v922_v56 = vor.u32 %v921_v26, %v918_v3  ;;  %v2096_v30 = vrot.slane %v2094_v61, 5  ;;  %v2081_v53 = vor.u32 %v2080_v35, %v2077_v19  ;;  %v11172_v54 = vrot.slane %v11156_v20, 9  ;;  %v13510_v3 = vld [vmem:[%s12887_s19 + $0x18] sm:$0xf] }
  0xa7   : > { %v2490_v16 = vrot.slane %v13480_v8, 5  ;;  %v2493_v57 = vrot.slane %v11140_v28, 5  ;;  %2864 = vrot.lane.b32.xlu1 %v11237_v47, %s12841_s22  ;;  %v2091_v5 = vor.u32 %v2090_v32, %v2086_v23  ;;  %v879_v2 = vshrl.u32 %v13205_v63, 16 }
  0xa8   : > { %v923_v21 = vsel %vm13345_vm8, %v914_v22, %v922_v56  ;;  %v882_v60 = vshll.u32 %v13205_v63, 16  ;;  %v2082_v41 = vrot.slane %v2081_v53, 4  ;;  %v17616_v24 = vshrl.u32 %v12891_v1, 16  ;;  %v11155_v53 = vld [vmem:[%s12887_s19 + $0x18] sm:$0xe] }
  0xa9   : > { %v11045_v31 = vcombine.low %v913_v46, %v923_v21  ;;  %v2491_v58 = vsel %vm13186_vm5, %v11172_v54, %v2490_v16  ;;  %v2492_v8 = vrot.slane %v2490_v16, 4  ;;  %v2092_v17 = vrot.slane %v2091_v5, 4 }
  0xaa   : > { %v881_v28 = vrot.slane %v879_v2, 5  ;;  %v884_v47 = vrot.slane %v882_v60, 6  ;;  %v887_v14 = vrot.slane %v17616_v24, 5  ;;  %v2087_v63 = vsel %vm12915_vm2, %v2082_v41, %v2086_v23 }
  0xab   : > { %1478 = vrot.lane.b32.xlu0 %v11045_v31, %s12841_s22  ;;  %v2494_v50 = vsel %vm13186_vm5, %v2492_v8, %v2493_v57  ;;  %v893_v22 = vshrl.u32 %v815_v52, 16  ;;  %v896_v39 = vshll.u32 %v815_v52, 16  ;;  %v2097_v7 = vsel %vm12915_vm2, %v2092_v17, %v2096_v30 }
  0xac   : > { %v11236_v27 = vcombine.low %v2491_v58, %v2494_v50  ;;  %v885_v1 = vor.u32 %v884_v47, %v881_v28  ;;  %v889_v26 = vor.u32 %v12909_v18, %v887_v14  ;;  %v11220_v61 = vcombine.low %v2087_v63, %v2097_v7  ;;  %v814_v28 = vld [vmem:[%s12887_s19 + $0x14] sm:$0x3] }
  0xad   : > { %v895_v20 = vrot.slane %v893_v22, 5  ;;  %v898_v19 = vrot.slane %v896_v39, 6  ;;  %v2051_v35 = vshrl.u32 %v13510_v3, 16  ;;  %v2054_v56 = vshll.u32 %v13510_v3, 16 }
  0xae   : > { %v886_v23 = vrot.slane %v885_v1, 4  ;;  %v891_v46 = vrot.slane %v889_v26, 4  ;;  %v2060_v32 = vshll.u32 %v11109_v12, 16  ;;  %2782 = vrot.lane.b32.xlu1 %v11220_v61, %s12840_s21  ;;  %v2064_v18 = vshrl.u32 %v11109_v12, 16 }
  0xaf   : > { %2702 = vrot.lane.b32.xlu0 %v11204_v11, %s12839_s20  ;;  %v899_v30 = vor.u32 %v898_v19, %v895_v20  ;;  %v2053_v54 = vrot.slane %v2051_v35, 4  ;;  %v2070_v16 = vshll.u32 %v11139_v34, 16  ;;  %v2056_v21 = vrot.slane %v2054_v56, 5 }
  0xb0   : > { %v890_v57 = vsel %vm13345_vm8, %v886_v23, %v889_v26  ;;  %v2062_v5 = vrot.slane %v2060_v32, 5  ;;  %v11203_v52 = vcombine.low %v13510_v3, %v11109_v12  ;;  %v2066_v60 = vrot.slane %v2064_v18, 4  ;;  %v11107_v23 = vld [vmem:[%s12887_s19 + $0x10] sm:$0xf] }
  0xb1   : > { %v900_v2 = vsel %vm13345_vm8, %v891_v46, %v899_v30  ;;  %v2072_v31 = vrot.slane %v2070_v16, 5  ;;  %v11171_v41 = vrot.slane %v11155_v53, 9  ;;  %v2057_v11 = vor.u32 %v2056_v21, %v2053_v54  ;;  %v11138_v53 = vld [vmem:[%s12887_s19 + $0x14] sm:$0x1] }
  0xb2   : > { %v11044_v58 = vcombine.low %v890_v57, %v900_v2  ;;  %v2483_v8 = vrot.slane %v11109_v12, 5  ;;  %v2486_v17 = vrot.slane %v11139_v34, 5  ;;  %2862 = vrot.lane.b32.xlu1 %v11236_v27, %s12841_s22  ;;  %v2067_v47 = vor.u32 %v2066_v60, %v2062_v5  ;;  %v11154_v60 = vld [vmem:[%s12887_s19 + $0xc] sm:$0xe] }
  0xb3   : > { %v856_v24 = vshrl.u32 %v13172_v15, 16  ;;  %v859_v14 = vshll.u32 %v13172_v15, 16  ;;  %v17617_v3 = vshrl.u32 %v12938_v49, 16  ;;  %v2058_v50 = vrot.slane %v2057_v11, 4  ;;  %v13544_v15 = vld [vmem:[%s12887_s19 + $0xc] sm:$0xf] }
  0xb4   : > { %1476 = vrot.lane.b32.xlu0 %v11044_v58, %s12841_s22  ;;  %v2484_v22 = vsel %vm13186_vm5, %v11171_v41, %v2483_v8  ;;  %v2485_v39 = vrot.slane %v2483_v8, 4  ;;  %v17618_v12 = vshll.u32 %v12938_v49, 16  ;;  %v2068_v27 = vrot.slane %v2067_v47, 4  ;;  %v1317_v47 = vpop.permute.xlu1 %1316 }
  0xb5   : > { %v864_v63 = vrot.slane %v17617_v3, 5  ;;  %v858_v1 = vrot.slane %v856_v24, 5  ;;  %v861_v26 = vrot.slane %v859_v14, 6  ;;  %v870_v34 = vshrl.u32 %v814_v28, 16 }
  0xb6   : > { %v865_v7 = vrot.slane %v17618_v12, 6  ;;  %v2063_v61 = vsel %vm12915_vm2, %v2058_v50, %v2062_v5  ;;  %v2487_v20 = vsel %vm13186_vm5, %v2485_v39, %v2486_v17  ;;  %v873_v35 = vshll.u32 %v814_v28, 16  ;;  %v813_v50 = vld [vmem:[%s12887_s19 + $0x8] sm:$0x3] }
  0xb7   : > { %v2073_v49 = vsel %vm12915_vm2, %v2068_v27, %v2072_v31  ;;  %v11235_v46 = vcombine.low %v2484_v22, %v2487_v20  ;;  %v862_v56 = vor.u32 %v861_v26, %v858_v1  ;;  %v872_v32 = vrot.slane %v870_v34, 5  ;;  %v1313_v22 = vpop.permute.xlu0 %1312  ;;  %v12672_v34 = vld [vmem:[%s12887_s19] sm:$0xe] }
  0xb8   : > { %v866_v19 = vor.u32 %v865_v7, %v864_v63  ;;  %v11219_v30 = vcombine.low %v2063_v61, %v2073_v49  ;;  %2700 = vrot.lane.b32.xlu0 %v11203_v52, %s12839_s20  ;;  %v875_v18 = vrot.slane %v873_v35, 6  ;;  %v2027_v16 = vshrl.u32 %v13544_v15, 16 }
  0xb9   : > { %v863_v57 = vrot.slane %v862_v56, 4  ;;  %v2030_v21 = vshll.u32 %v13544_v15, 16  ;;  %v2036_v5 = vshll.u32 %v11107_v23, 16  ;;  %v2040_v2 = vshrl.u32 %v11107_v23, 16 }
  0xba   : > { %v868_v54 = vrot.slane %v866_v19, 4  ;;  %2780 = vrot.lane.b32.xlu1 %v11219_v30, %s12840_s21  ;;  %v876_v31 = vor.u32 %v875_v18, %v872_v32  ;;  %v2029_v41 = vrot.slane %v2027_v16, 4  ;;  %v2046_v58 = vshll.u32 %v11138_v53, 16  ;;  %v1319_v16 = vpop.permute.xlu1 %1318 }
  0xbb   : > { %v11202_v11 = vcombine.low %v13544_v15, %v11107_v23  ;;  %v867_v52 = vsel %vm13345_vm8, %v863_v57, %v866_v19  ;;  %v2032_v8 = vrot.slane %v2030_v21, 5  ;;  %v2038_v17 = vrot.slane %v2036_v5, 5 }
  0xbc   : > { %v2042_v28 = vrot.slane %v2040_v2, 4  ;;  %v877_v24 = vsel %vm13345_vm8, %v868_v54, %v876_v31  ;;  %v2048_v14 = vrot.slane %v2046_v58, 5  ;;  %v11170_v3 = vrot.slane %v11154_v60, 9  ;;  %v13580_v60 = vld [vmem:[%s12887_s19 + $0xc0] sm:$0xf]  ;;  %v1315_v31 = vpop.permute.xlu0 %1314 }
  0xbd   : > { %v2476_v63 = vrot.slane %v11107_v23, 5  ;;  %v11043_v39 = vcombine.low %v867_v52, %v877_v24  ;;  %v2033_v12 = vor.u32 %v2032_v8, %v2029_v41  ;;  %v2479_v27 = vrot.slane %v11138_v53, 5  ;;  %v12673_v58 = vld [vmem:[%s12887_s19 + $0x18] sm:$0xf]  ;;  %v12674_v52 = vld [vmem:[%s12887_s19 + $0x1c] sm:$0xf] }
  0xbe   : > { %v2043_v7 = vor.u32 %v2042_v28, %v2038_v17  ;;  %2860 = vrot.lane.b32.xlu1 %v11235_v46, %s12841_s22  ;;  %v833_v15 = vshrl.u32 %v12672_v34, 16  ;;  %v836_v61 = vshll.u32 %v12672_v34, 16  ;;  %v17619_v35 = vshrl.u32 %v12901_v9, 16  ;;  %v649_v24 = vld [vmem:[%s12887_s19 + $0xb4] sm:$0xe] }
  0xbf   : > { %v2477_v1 = vsel %vm13186_vm5, %v11170_v3, %v2476_v63  ;;  %v2478_v26 = vrot.slane %v2476_v63, 4  ;;  %1474 = vrot.lane.b32.xlu0 %v11043_v39, %s12841_s22  ;;  %v2034_v20 = vrot.slane %v2033_v12, 4  ;;  %v847_v49 = vshrl.u32 %v813_v50, 16  ;;  %v13594_v39 = vld [vmem:[%s12887_s19 + $0xc4] sm:$0xf] }
  0xc0   : > { %v2044_v19 = vrot.slane %v2043_v7, 4  ;;  %v841_v23 = vrot.slane %v17619_v35, 5  ;;  %v835_v46 = vrot.slane %v833_v15, 5  ;;  %v838_v32 = vrot.slane %v836_v61, 6 }
  0xc1   : > { %v2480_v56 = vsel %vm13186_vm5, %v2478_v26, %v2479_v27  ;;  %v850_v53 = vshll.u32 %v813_v50, 16  ;;  %v2039_v30 = vsel %vm12915_vm2, %v2034_v20, %v2038_v17  ;;  %v849_v5 = vrot.slane %v847_v49, 5  ;;  %v12676_v17 = vld [vmem:[%s12887_s19 + $0x4] sm:$0xf]  ;;  %v13590_v50 = vld [vmem:[%s12887_s19 + $0xb8] sm:$0xf] }
  0xc2   : > { %v2049_v54 = vsel %vm12915_vm2, %v2044_v19, %v2048_v14  ;;  %v11234_v18 = vcombine.low %v2477_v1, %v2480_v56  ;;  %v843_v9 = vor.u32 %v12928_v38, %v841_v23  ;;  %v839_v21 = vor.u32 %v838_v32, %v835_v46  ;;  %v12675_v38 = vld [vmem:[%s12887_s19] sm:$0xf]  ;;  %v12678_v27 = vld [vmem:[%s12887_s19 + $0xbc] sm:$0x1]  ;;  %v1323_v23 = vpop.permute.xlu1 %1322  ;;  %v12679_v46 = vld [vmem:[%s12887_s19 + $0x24] sm:$0xf] }
  0xc3   : > { %v11218_v57 = vcombine.low %v2039_v30, %v2049_v54  ;;  %v852_v2 = vrot.slane %v850_v53, 6  ;;  %2698 = vrot.lane.b32.xlu0 %v11202_v11, %s12839_s20  ;;  %v10996_v8 = vcombine.low %v12673_v58, %v12674_v52  ;;  %v10994_v28 = vcombine.low %v12675_v38, %v12676_v17  ;;  %v12680_v32 = vld [vmem:[%s12887_s19 + $0x28] sm:$0xf]  ;;  %v12681_v30 = vld [vmem:[%s12887_s19 + $0xc] sm:$0xf] }
  0xc4   : > { %v845_v41 = vrot.slane %v843_v9, 4  ;;  %v840_v14 = vrot.slane %v839_v21, 4  ;;  %v10993_v63 = vrot.slane %v649_v24, 9  ;;  %v808_v11 = vrot.slane %v13590_v50, 5  ;;  %v12682_v54 = vld [vmem:[%s12887_s19 + $0x10] sm:$0xf]  ;;  %v1321_v21 = vpop.permute.xlu0 %1320 }
  0xc5   : > { %2778 = vrot.lane.b32.xlu1 %v11218_v57, %s12840_s21  ;;  %v853_v3 = vor.u32 %v852_v2, %v849_v5  ;;  %v13597_v12 = vsel %vm1504_vm9, %v10996_v8, %v1317_v47  ;;  %v13600_v7 = vsel %vm1504_vm9, %v10994_v28, %v1313_v22  ;;  %v811_v1 = vrot.slane %v12678_v27, 5  ;;  %v828_v57 = vld [vmem:[%s12887_s19 + $0xbc] sm:$0x3]  ;;  %v13634_v28 = vld [vmem:[%s12887_s19 + $0xc8] sm:$0x1] }
  0xc6   : > { %v2387_v26 = vshrl.u32 %v13580_v60, 16  ;;  %v844_v34 = vsel %vm13345_vm8, %v840_v14, %v843_v9  ;;  %v809_v47 = vsel %vm13186_vm5, %v10993_v63, %v808_v11  ;;  %v810_v22 = vrot.slane %v808_v11, 4 }
  0xc7   : > { %v854_v15 = vsel %vm13345_vm8, %v845_v41, %v853_v3  ;;  %v2390_v19 = vshll.u32 %v13580_v60, 16  ;;  %v2400_v35 = vshrl.u32 %v13594_v39, 16  ;;  %v11217_v56 = vcombine.low %v13580_v60, %v13594_v39 }
  0xc8   : > { %v11042_v61 = vcombine.low %v844_v34, %v854_v15  ;;  %v2389_v20 = vrot.slane %v2387_v26, 4  ;;  %v812_v49 = vsel %vm13186_vm5, %v810_v22, %v811_v1  ;;  %v10997_v53 = vcombine.low %v12679_v46, %v12680_v32  ;;  %v13640_v15 = vpop.permute.xlu1 %1326 }
  0xc9   : > { %2858 = vrot.lane.b32.xlu1 %v11234_v18, %s12841_s22  ;;  %v10995_v9 = vcombine.low %v12681_v30, %v12682_v54  ;;  %v11041_v5 = vcombine.low %v809_v47, %v812_v49  ;;  %v2392_v2 = vrot.slane %v2390_v19, 5  ;;  %v1178_v18 = vshrl.u32 %v649_v24, 16  ;;  %v12684_v19 = vld [vmem:[%s12887_s19 + $0x40] sm:$0xf]  ;;  %v12686_v30 = vld [vmem:[%s12887_s19 + $0x34] sm:$0xf] }
  0xca   : > { %1472 = vrot.lane.b32.xlu0 %v11042_v61, %s12841_s22  ;;  %v1181_v41 = vshll.u32 %v649_v24, 16  ;;  %v13624_v58 = vsel %vm1504_vm9, %v10997_v53, %v1319_v16  ;;  %v17620_v52 = vshrl.u32 %v13144_v36, 16  ;;  %v17621_v38 = vshll.u32 %v13144_v36, 16  ;;  %v12685_v53 = vld [vmem:[%s12887_s19 + $0x30] sm:$0xf] }
  0xcb   : > { %v13627_v60 = vsel %vm1504_vm9, %v10995_v9, %v1315_v31  ;;  %v1180_v14 = vrot.slane %v1178_v18, 5  ;;  %v1192_v63 = vshrl.u32 %v828_v57, 16  ;;  %v1195_v11 = vshll.u32 %v828_v57, 16  ;;  %v11337_v18 = vld [vmem:[%s12887_s19 + $0x60] sm:$0xc] }
  0xcc   : > { %v1186_v8 = vrot.slane %v17620_v52, 5  ;;  %v1187_v17 = vrot.slane %v17621_v38, 6  ;;  %v1183_v3 = vrot.slane %v1181_v41, 6  ;;  %v2393_v24 = vor.u32 %v2392_v2, %v2389_v20  ;;  %v12683_v20 = vld [vmem:[%s12887_s19 + $0x3c] sm:$0xf] }
  0xcd   : > { %1422 = vrot.lane.b32.xlu1 %v11041_v5, %s12840_s21  ;;  %v2396_v31 = vshll.u32 %v13594_v39, 16  ;;  %v2402_v27 = vrot.slane %v2400_v35, 4  ;;  %v1194_v1 = vrot.slane %v1192_v63, 5  ;;  %v1197_v26 = vrot.slane %v1195_v11, 6  ;;  %v1325_v35 = vpop.permute.xlu0 %1324  ;;  %v13652_v2 = vld [vmem:[%s12887_s19 + $0x64] sm:$0xf] }
  0xce   : > { %v1188_v16 = vor.u32 %v1187_v17, %v1186_v8  ;;  %2728 = vrot.lane.b32.xlu0 %v11217_v56, %s12839_s20  ;;  %v1184_v36 = vor.u32 %v1183_v3, %v1180_v14  ;;  %v2406_v34 = vshll.u32 %v13634_v28, 16  ;;  %v2394_v22 = vrot.slane %v2393_v24, 4  ;;  %v13663_v38 = vld [vmem:[%s12887_s19 + $0x68] sm:$0x3]  ;;  %v11169_v17 = vld [vmem:[%s12887_s19 + $0xc0] sm:$0xe] }
  0xcf   : > { %v2398_v61 = vrot.slane %v2396_v31, 5  ;;  %v10999_v49 = vcombine.low %v12683_v20, %v12684_v19  ;;  %v1198_v56 = vor.u32 %v1197_v26, %v1194_v1  ;;  %v10998_v54 = vcombine.low %v12685_v53, %v12686_v30  ;;  %v12687_v53 = vld [vmem:[%s12887_s19 + $0x54] sm:$0xf]  ;;  %v12688_v30 = vld [vmem:[%s12887_s19 + $0x58] sm:$0xf] }
  0xd0   : > { %v1190_v47 = vrot.slane %v1188_v16, 4  ;;  %v1185_v46 = vrot.slane %v1184_v36, 4  ;;  %v2408_v32 = vrot.slane %v2406_v34, 5  ;;  %v11353_v24 = vrot.slane %v11337_v18, 10  ;;  %v13676_v36 = vpop.permute.xlu1 %1330  ;;  %v12694_v11 = vld [vmem:[%s12887_s19 + $0x64] sm:$0xf] }
  0xd1   : > { %v2399_v9 = vsel %vm12915_vm2, %v2394_v22, %v2398_v61  ;;  %v2403_v57 = vor.u32 %v2402_v27, %v2398_v61  ;;  %v13649_v5 = vsel %vm1504_vm9, %v10999_v49, %v1323_v23  ;;  %v13660_v8 = vsel %vm1504_vm9, %v10998_v54, %v1321_v21  ;;  %v11376_v27 = vld [vmem:[%s12887_s19 + $0x6c] sm:$0xf]  ;;  %v11377_v22 = vld [vmem:[%s12887_s19 + $0x70] sm:$0xf]  ;;  %v13684_v61 = vpop.permute.xlu0 %1328  ;;  %v12689_v54 = vld [vmem:[%s12887_s19 + $0x48] sm:$0xf] }
  0xd2   : > { %v1189_v41 = vsel %vm13345_vm8, %v1185_v46, %v1188_v16  ;;  %v1199_v52 = vsel %vm13345_vm8, %v1190_v47, %v1198_v56  ;;  %v3757_v31 = vrot.slane %v13652_v2, 6  ;;  %v3760_v26 = vrot.slane %v13663_v38, 6 }
  0xd3   : > { %v11057_v23 = vcombine.low %v1189_v41, %v1199_v52  ;;  %v2404_v14 = vrot.slane %v2403_v57, 4  ;;  %v11185_v34 = vrot.slane %v11169_v17, 9  ;;  %v2581_v47 = vrot.slane %v13594_v39, 5  ;;  %v12690_v57 = vld [vmem:[%s12887_s19 + $0x4c] sm:$0xf] }
  0xd4   : > { %v3758_v19 = vsel %vm13666_vm12, %v11353_v24, %v3757_v31  ;;  %v3759_v49 = vrot.slane %v3757_v31, 4  ;;  %v2584_v46 = vrot.slane %v13634_v28, 5  ;;  %v11001_v39 = vcombine.low %v12687_v53, %v12688_v30  ;;  %v11527_v17 = vld [vmem:[%s12887_s19 + $0x6c] sm:$0xe] }
  0xd5   : > { %1502 = vrot.lane.b32.xlu1 %v11057_v23, %s12841_s22  ;;  %v2409_v1 = vsel %vm12915_vm2, %v2404_v14, %v2408_v32  ;;  %v2582_v56 = vsel %vm13186_vm5, %v11185_v34, %v2581_v47  ;;  %v2583_v32 = vrot.slane %v2581_v47, 4  ;;  %v11000_v18 = vcombine.low %v12689_v54, %v12690_v57  ;;  %v13712_v34 = vld [vmem:[%s12887_s19 + $0x74] sm:$0x3] }
  0xd6   : > { %v11233_v20 = vcombine.low %v2399_v9, %v2409_v1  ;;  %v3761_v9 = vsel %vm13666_vm12, %v3759_v49, %v3760_v26  ;;  %v4039_v41 = vshrl.u32 %v11376_v27, 16  ;;  %v4042_v52 = vshll.u32 %v11376_v27, 16  ;;  %v13709_v1 = vld [vmem:[%s12887_s19 + $0x70] sm:$0xf] }
  0xd7   : > { %v4048_v28 = vshll.u32 %v11377_v22, 16  ;;  %v11433_v23 = vcombine.low %v3758_v19, %v3761_v9  ;;  %v2585_v14 = vsel %vm13186_vm5, %v2583_v32, %v2584_v46  ;;  %v13703_v24 = vsel %vm1504_vm9, %v11001_v39, %v13640_v15  ;;  %v1335_v19 = vpop.permute.xlu1 %1334  ;;  %v12692_v9 = vld [vmem:[%s12887_s19 + $0x70] sm:$0xf] }
  0xd8   : > { %2808 = vrot.lane.b32.xlu0 %v11233_v20, %s12840_s21  ;;  %v13706_v31 = vsel %vm1504_vm9, %v11000_v18, %v1325_v35  ;;  %v11249_v26 = vcombine.low %v2582_v56, %v2585_v14  ;;  %v4041_v47 = vrot.slane %v4039_v41, 4  ;;  %v4044_v20 = vrot.slane %v4042_v52, 5  ;;  %v13715_v35 = vpop.permute.xlu0 %1332  ;;  %v11401_v52 = vld [vmem:[%s12887_s19 + $0x74] sm:$0x1] }
  0xd9   : > { %v4050_v49 = vrot.slane %v4048_v28, 5  ;;  %4364 = vrot.lane.b32.xlu1 %v11433_v23, %s12839_s20  ;;  %v4052_v46 = vshrl.u32 %v11377_v22, 16  ;;  %v11449_v15 = vcombine.low %v11376_v27, %v11377_v22  ;;  %v5251_v32 = vshrl.u32 %v11527_v17, 16  ;;  %v12691_v22 = vld [vmem:[%s12887_s19 + $0x6c] sm:$0xf] }
  0xda   : > { %v5254_v53 = vshll.u32 %v11527_v17, 16  ;;  %v5260_v56 = vshrl.u32 %v13709_v1, 16  ;;  %v5263_v30 = vshll.u32 %v13709_v1, 16  ;;  %v5270_v39 = vshrl.u32 %v13712_v34, 16 }
  0xdb   : > { %v5273_v54 = vshll.u32 %v13712_v34, 16  ;;  %v4054_v57 = vrot.slane %v4052_v46, 4  ;;  %v5253_v18 = vrot.slane %v5251_v32, 5  ;;  %v11003_v41 = vcombine.low %v12691_v22, %v12692_v9  ;;  %v12693_v46 = vld [vmem:[%s12887_s19 + $0x60] sm:$0xf] }
  0xdc   : > { %2888 = vrot.lane.b32.xlu0 %v11249_v26, %s12841_s22  ;;  %v5256_v27 = vrot.slane %v5254_v53, 6  ;;  %v5262_v28 = vrot.slane %v5260_v56, 5  ;;  %v5265_v17 = vrot.slane %v5263_v30, 6  ;;  %v5272_v23 = vrot.slane %v5270_v39, 5  ;;  %v11593_v26 = vld [vmem:[%s12887_s19 + $0x6c] sm:$0xc]  ;;  %v1339_v30 = vpop.permute.xlu1 %1338 }
  0xdd   : > { %v5275_v14 = vrot.slane %v5273_v54, 6  ;;  %4476 = vrot.lane.b32.xlu1 %v11449_v15, %s12840_s21  ;;  %v13729_v16 = vsel %vm1504_vm9, %v11003_v41, %v13676_v36  ;;  %v11002_v32 = vcombine.low %v12693_v46, %v12694_v11  ;;  %v4045_v53 = vor.u32 %v4044_v20, %v4041_v47  ;;  %v12696_v41 = vld [vmem:[%s12887_s19 + $0x88] sm:$0xf]  ;;  %v12697_v46 = vld [vmem:[%s12887_s19 + $0x78] sm:$0xf] }
  0xde   : > { %v5257_v21 = vor.u32 %v5256_v27, %v5253_v18  ;;  %v5266_v63 = vor.u32 %v5265_v17, %v5262_v28  ;;  %v4055_v22 = vor.u32 %v4054_v57, %v4050_v49  ;;  %v4058_v56 = vshll.u32 %v11401_v52, 16  ;;  %v1337_v18 = vpop.permute.xlu0 %1336  ;;  %v11134_v28 = vld [vmem:[%s12887_s19 + $0xb4] sm:$0xf]  ;;  %v13747_v17 = vld [vmem:[%s12887_s19 + $0xb8] sm:$0xf] }
  0xdf   : > { %v5276_v44 = vor.u32 %v5275_v14, %v5272_v23  ;;  %v13735_v15 = vsel %vm1504_vm9, %v11002_v32, %v13684_v61  ;;  %v4046_v36 = vrot.slane %v4045_v53, 4  ;;  %v11609_v54 = vrot.slane %v11593_v26, 10  ;;  %v12695_v61 = vld [vmem:[%s12887_s19 + $0x84] sm:$0xf]  ;;  %v12698_v32 = vld [vmem:[%s12887_s19 + $0x7c] sm:$0xf] }
  0xe0   : > { %v5258_v39 = vrot.slane %v5257_v21, 4  ;;  %v5268_v27 = vrot.slane %v5266_v63, 4  ;;  %v4056_v11 = vrot.slane %v4055_v22, 4  ;;  %v4060_v47 = vrot.slane %v4058_v56, 5 }
  0xe1   : > { %v5601_v20 = vrot.slane %v13709_v1, 6  ;;  %v4051_v21 = vsel %vm12915_vm2, %v4046_v36, %v4050_v49  ;;  %v5604_v9 = vrot.slane %v13712_v34, 6  ;;  %v11005_v52 = vcombine.low %v12695_v61, %v12696_v41  ;;  %v13764_v36 = vld [vmem:[%s12887_s19 + $0xbc] sm:$0x1]  ;;  %v13776_v61 = vld [vmem:[%s12887_s19 + $0xa0] sm:$0xf] }
  0xe2   : > { %v5267_v57 = vsel %vm13345_vm8, %v5258_v39, %v5266_v63  ;;  %v5277_v1 = vsel %vm13345_vm8, %v5268_v27, %v5276_v44  ;;  %v4061_v23 = vsel %vm12915_vm2, %v4056_v11, %v4060_v47  ;;  %v11004_v53 = vcombine.low %v12697_v46, %v12698_v32 }
  0xe3   : > { %v5602_v63 = vsel %vm13666_vm12, %v11609_v54, %v5601_v20  ;;  %v5603_v14 = vrot.slane %v5601_v20, 4  ;;  %v11673_v49 = vcombine.low %v5267_v57, %v5277_v1  ;;  %v11465_v26 = vcombine.low %v4051_v21, %v4061_v23  ;;  %v1343_v54 = vpop.permute.xlu1 %1342  ;;  %v1341_v20 = vpop.permute.xlu0 %1340  ;;  %v13781_v1 = vld [vmem:[%s12887_s19 + $0x94] sm:$0xf]  ;;  %v648_v23 = vld [vmem:[%s12887_s19 + $0xa8] sm:$0xe] }
  0xe4   : > { %v13756_v34 = vsel %vm1504_vm9, %v11005_v52, %v1335_v19  ;;  %v2363_v44 = vshrl.u32 %v11134_v28, 16  ;;  %v2366_v56 = vshll.u32 %v11134_v28, 16  ;;  %v2376_v39 = vshrl.u32 %v13747_v17, 16  ;;  %v12701_v52 = vld [vmem:[%s12887_s19 + $0x90] sm:$0xf] }
  0xe5   : > { %17624 = vst [vmem:[#allocation6_spill] sm:$0xff] %v13756_v34  ;;  %v5605_v22 = vsel %vm13666_vm12, %v5603_v14, %v5604_v9  ;;  %5808 = vrot.lane.b32.xlu0 %v11673_v49, %s12839_s20  ;;  %4556 = vrot.lane.b32.xlu1 %v11465_v26, %s12841_s22  ;;  %v13770_v27 = vsel %vm1504_vm9, %v11004_v53, %v13715_v35  ;;  %v2372_v47 = vshll.u32 %v13747_v17, 16  ;;  %v12699_v9 = vld [vmem:[%s12887_s19 + $0x9c] sm:$0xf]  ;;  %v2382_v14 = vshll.u32 %v13764_v36, 16 }
  0xe6   : > { %v11689_v19 = vcombine.low %v5602_v63, %v5605_v22  ;;  %17625 = vst [vmem:[#allocation7_spill] sm:$0xff] %v13770_v27  ;;  %v11216_v11 = vcombine.low %v11134_v28, %v13747_v17  ;;  %v2365_v57 = vrot.slane %v2363_v44, 4  ;;  %v2368_v21 = vrot.slane %v2366_v56, 5  ;;  %v12703_v53 = vld [vmem:[%s12887_s19 + $0xac] sm:$0xf]  ;;  %v12439_v56 = vld [vmem:[%s12887_s19 + $0x78] sm:$0xff]  }
  0xe7   : > { %v11007_v41 = vcombine.low %v12699_v9, %v13776_v61  ;;  %v11006_v35 = vcombine.low %v12701_v52, %v13781_v1  ;;  %v2374_v28 = vrot.slane %v2372_v47, 5  ;;  %v2378_v63 = vrot.slane %v2376_v39, 4  ;;  %v11168_v44 = vld [vmem:[%s12887_s19 + $0xb4] sm:$0xe]  ;;  %v12704_v9 = vld [vmem:[%s12887_s19 + $0xb0] sm:$0x1]  ;;  %v1395_v34 = vpop.permute.xlu1 %1394 }
  0xe8   : > { %v10992_v49 = vrot.slane %v648_v23, 9  ;;  %v2369_v32 = vor.u32 %v2368_v21, %v2365_v57  ;;  %v801_v22 = vrot.slane %v12703_v53, 5  ;;  %v2384_v47 = vrot.slane %v2382_v14, 5  ;;  %v12705_v27 = vld [vmem:[%s12887_s19 + $0xb4] sm:$0xf] }
  0xe9   : > { %v13787_v26 = vsel %vm1504_vm9, %v11007_v41, %v1339_v30  ;;  %v13790_v46 = vsel %vm1504_vm9, %v11006_v35, %v1337_v18  ;;  %5888 = vrot.lane.b32.xlu0 %v11689_v19, %s12840_s21  ;;  %2726 = vrot.lane.b32.xlu1 %v11216_v11, %s12839_s20  ;;  %v2379_v39 = vor.u32 %v2378_v63, %v2374_v28  ;;  %v804_v52 = vrot.slane %v12704_v9, 5  ;;  %v12706_v41 = vld [vmem:[%s12887_s19 + $0xa8] sm:$0xf]  ;;  %v1393_v9 = vpop.permute.xlu0 %1392 }
  0xea   : > { %17626 = vst [vmem:[#allocation8_spill] sm:$0xff] %v13787_v26  ;;  %17627 = vst [vmem:[#allocation9_spill] sm:$0xff] %v13790_v46  ;;  %v11009_v30 = vcombine.low %v12705_v27, %v13590_v50  ;;  %v2370_v18 = vrot.slane %v2369_v32, 4  ;;  %v802_v57 = vsel %vm13186_vm5, %v10992_v49, %v801_v22  ;;  %v803_v21 = vrot.slane %v801_v22, 4 }
  0xeb   : > { %v11008_v35 = vcombine.low %v12706_v41, %v12703_v53  ;;  %v2380_v19 = vrot.slane %v2379_v39, 4  ;;  %v11184_v63 = vrot.slane %v11168_v44, 9  ;;  %v2574_v14 = vrot.slane %v13747_v17, 5  ;;  %v827_v53 = vld [vmem:[%s12887_s19 + $0xb0] sm:$0x3] }
  0xec   : > { %v13804_v11 = vsel %vm1504_vm9, %v11009_v30, %v1343_v54  ;;  %v2375_v50 = vsel %vm12915_vm2, %v2370_v18, %v2374_v28  ;;  %v805_v27 = vsel %vm13186_vm5, %v803_v21, %v804_v52  ;;  %v2577_v32 = vrot.slane %v13764_v36, 5  ;;  %v11524_v21 = vld [vmem:[%s12887_s19 + $0x60] sm:$0xe] }
  0xed   : > { %v13812_v49 = vsel %vm1504_vm9, %v11008_v35, %v1341_v20  ;;  %6000 = vrot.lane.b32.xlu0 %v12439_v56, %s12841_s22  ;;  %v2385_v54 = vsel %vm12915_vm2, %v2380_v19, %v2384_v47  ;;  %v11040_v17 = vcombine.low %v802_v57, %v805_v27  ;;  %v2575_v22 = vsel %vm13186_vm5, %v11184_v63, %v2574_v14  ;;  %v1399_v63 = vpop.permute.xlu1 %1398 }
  0xee   : > { %v2576_v28 = vrot.slane %v2574_v14, 4  ;;  %v11232_v44 = vcombine.low %v2375_v50, %v2385_v54  ;;  %v1155_v39 = vshrl.u32 %v648_v23, 16  ;;  %v1158_v52 = vshll.u32 %v648_v23, 16  ;;  %v13830_v23 = vld [vmem:[%s12887_s19 + $0x64] sm:$0xf] }
  0xef   : > { %v17628_v20 = vshrl.u32 %v13159_v6, 16  ;;  %v17629_v56 = vshll.u32 %v13159_v6, 16  ;;  %v1169_v47 = vshrl.u32 %v827_v53, 16  ;;  %v1172_v57 = vshll.u32 %v827_v53, 16  ;;  %v1397_v53 = vpop.permute.xlu0 %1396 }
  0xf0   : > { %v2578_v36 = vsel %vm13186_vm5, %v2576_v28, %v2577_v32  ;;  %2806 = vrot.lane.b32.xlu1 %v11232_v44, %s12840_s21  ;;  %v1157_v35 = vrot.slane %v1155_v39, 5  ;;  %v1160_v19 = vrot.slane %v1158_v52, 6  ;;  %v13835_v6 = vsel %vm1553_vm13, %v13627_v60, %v1395_v34  ;;  %v13838_v32 = vld [vmem:[%s12887_s19 + $0x68] sm:$0x3] }
  0xf1   : > { %v1163_v30 = vrot.slane %v17628_v20, 5  ;;  %v1164_v18 = vrot.slane %v17629_v56, 6  ;;  %v11248_v41 = vcombine.low %v2575_v22, %v2578_v36  ;;  %1420 = vrot.lane.b32.xlu0 %v11040_v17, %s12840_s21  ;;  %v1171_v50 = vrot.slane %v1169_v47, 5  ;;  %v13849_v56 = vld [vmem:[%s12887_s19 + $0x58] sm:$0xf] }
  0xf2   : > { %v1174_v27 = vrot.slane %v1172_v57, 6  ;;  %v1161_v54 = vor.u32 %v1160_v19, %v1157_v35  ;;  %v13842_v22 = vsel %vm1553_vm13, %v13600_v7, %v1393_v9  ;;  %v5223_v28 = vshrl.u32 %v11524_v21, 16  ;;  %v11336_v57 = vld [vmem:[%s12887_s19 + $0x54] sm:$0xc]  ;;  %v13858_v19 = vld [vmem:[%s12887_s19 + $0x5c] sm:$0x3] }
  0xf3   : > { %v1165_v14 = vor.u32 %v1164_v18, %v1163_v30  ;;  %v5226_v44 = vshll.u32 %v11524_v21, 16  ;;  %v5232_v52 = vshrl.u32 %v13830_v23, 16  ;;  %v5235_v60 = vshll.u32 %v13830_v23, 16 }
  0xf4   : > { %v1175_v39 = vor.u32 %v1174_v27, %v1171_v50  ;;  %2886 = vrot.lane.b32.xlu1 %v11248_v41, %s12841_s22  ;;  %v1162_v34 = vrot.slane %v1161_v54, 4  ;;  %v5225_v20 = vrot.slane %v5223_v28, 5  ;;  %v5242_v36 = vshrl.u32 %v13838_v32, 16  ;;  %v1403_v27 = vpop.permute.xlu1 %1402 }
  0xf5   : > { %v1167_v17 = vrot.slane %v1165_v14, 4  ;;  %v5228_v30 = vrot.slane %v5226_v44, 6  ;;  %v5234_v9 = vrot.slane %v5232_v52, 5  ;;  %v5237_v18 = vrot.slane %v5235_v60, 6  ;;  %v1401_v52 = vpop.permute.xlu0 %1400 }
  0xf6   : > { %v5245_v47 = vshll.u32 %v13838_v32, 16  ;;  %v1166_v21 = vsel %vm13345_vm8, %v1162_v34, %v1165_v14  ;;  %v5244_v35 = vrot.slane %v5242_v36, 5  ;;  %v11352_v34 = vrot.slane %v11336_v57, 10 }
  0xf7   : > { %v1176_v7 = vsel %vm13345_vm8, %v1167_v17, %v1175_v39  ;;  %v5229_v41 = vor.u32 %v5228_v30, %v5225_v20  ;;  %v5238_v28 = vor.u32 %v5237_v18, %v5234_v9  ;;  %v11592_v39 = vld [vmem:[%s12887_s19 + $0x60] sm:$0xc]  ;;  %v3750_v36 = vrot.slane %v13849_v56, 6 }
  0xf8   : > { %v11056_v54 = vcombine.low %v1166_v21, %v1176_v7  ;;  %v5247_v44 = vrot.slane %v5245_v47, 6  ;;  %v3753_v7 = vrot.slane %v13858_v19, 6  ;;  %v11374_v9 = vld [vmem:[%s12887_s19 + $0x60] sm:$0xf]  ;;  %v13873_v47 = vsel %vm1553_vm13, %v13624_v58, %v1399_v63  ;;  %v1407_v46 = vpop.permute.xlu1 %1406 }
  0xf9   : > { %v5230_v60 = vrot.slane %v5229_v41, 4  ;;  %v5240_v20 = vrot.slane %v5238_v28, 4  ;;  %v13877_v21 = vsel %vm1553_vm13, %v13597_v12, %v1397_v53  ;;  %v11608_v57 = vrot.slane %v11592_v39, 10  ;;  %v11375_v41 = vld [vmem:[%s12887_s19 + $0x64] sm:$0xf] }
  0xfa   : > { %1500 = vrot.lane.b32.xlu0 %v11056_v54, %s12841_s22  ;;  %v5248_v30 = vor.u32 %v5247_v44, %v5244_v35  ;;  %v3751_v54 = vsel %vm13666_vm12, %v11352_v34, %v3750_v36  ;;  %v3752_v44 = vrot.slane %v3750_v36, 4  ;;  %v5594_v14 = vrot.slane %v13830_v23, 6  ;;  %v1405_v34 = vpop.permute.xlu0 %1404 }
  0xfb   : > { %v5239_v18 = vsel %vm13345_vm8, %v5230_v60, %v5238_v28  ;;  %v5597_v58 = vrot.slane %v13838_v32, 6  ;;  %v4015_v63 = vshrl.u32 %v11374_v9, 16  ;;  %v4018_v60 = vshll.u32 %v11374_v9, 16 }
  0xfc   : > { %v5249_v35 = vsel %vm13345_vm8, %v5240_v20, %v5248_v30  ;;  %v3754_v12 = vsel %vm13666_vm12, %v3752_v44, %v3753_v7  ;;  %v5595_v53 = vsel %vm13666_vm12, %v11608_v57, %v5594_v14  ;;  %v5596_v39 = vrot.slane %v5594_v14, 4  ;;  %v647_v57 = vld [vmem:[%s12887_s19 + $0x9c] sm:$0xe] }
  0xfd   : > { %v11672_v28 = vcombine.low %v5239_v18, %v5249_v35  ;;  %v4024_v20 = vshll.u32 %v11375_v41, 16  ;;  %v11432_v23 = vcombine.low %v3751_v54, %v3754_v12  ;;  %v4017_v30 = vrot.slane %v4015_v63, 4  ;;  %v11400_v18 = vld [vmem:[%s12887_s19 + $0x68] sm:$0x1]  ;;  %v12445_v12 = vld [vmem:[%s12887_s19 + $0x6c] sm:$0xff]  }
  0xfe   : > { %v4020_v32 = vrot.slane %v4018_v60, 5  ;;  %v4028_v36 = vshrl.u32 %v11375_v41, 16  ;;  %v5598_v35 = vsel %vm13666_vm12, %v5596_v39, %v5597_v58  ;;  %v11448_v7 = vcombine.low %v11374_v9, %v11375_v41  ;;  %v13905_v60 = vld [vmem:[%s12887_s19 + $0xa8] sm:$0xf]  ;;  %v13908_v58 = vld [vmem:[%s12887_s19 + $0xac] sm:$0xf] }
  0xff   : > { %5806 = vrot.lane.b32.xlu1 %v11672_v28, %s12839_s20  ;;  %v4026_v17 = vrot.slane %v4024_v20, 5  ;;  %v13896_v14 = vsel %vm1553_vm13, %v13649_v5, %v1403_v27  ;;  %4362 = vrot.lane.b32.xlu0 %v11432_v23, %s12839_s20  ;;  %v11688_v54 = vcombine.low %v5595_v53, %v5598_v35  ;;  %v13902_v28 = vsel %vm1553_vm13, %v13660_v8, %v1401_v52  ;;  %v12707_v39 = vld [vmem:[%s12887_s19 + $0xa4] sm:$0x1]  ;;  %v1411_v23 = vpop.permute.xlu1 %1410 }
 0x100   : > { %v4030_v44 = vrot.slane %v4028_v36, 4  ;;  %v4021_v63 = vor.u32 %v4020_v32, %v4017_v30  ;;  %v4034_v9 = vshll.u32 %v11400_v18, 16  ;;  %v13912_v5 = vsel %vm1553_vm13, %v13703_v24, %v1407_v46 }
 0x101   : > { %v13916_v27 = vsel %vm1553_vm13, %v13706_v31, %v1405_v34  ;;  %v10991_v41 = vrot.slane %v647_v57, 9  ;;  %v794_v53 = vrot.slane %v13776_v61, 5  ;;  %v797_v20 = vrot.slane %v12707_v39, 5  ;;  %v1409_v34 = vpop.permute.xlu0 %1408 }
 0x102   : > { %v4022_v8 = vrot.slane %v4021_v63, 4  ;;  %v4031_v52 = vor.u32 %v4030_v44, %v4026_v17  ;;  %v4036_v30 = vrot.slane %v4034_v9, 5  ;;  %v2339_v24 = vshrl.u32 %v13905_v60, 16 }
 0x103   : > { %5886 = vrot.lane.b32.xlu1 %v11688_v54, %s12840_s21  ;;  %v2342_v46 = vshll.u32 %v13905_v60, 16  ;;  %v2352_v31 = vshrl.u32 %v13908_v58, 16  ;;  %4474 = vrot.lane.b32.xlu0 %v11448_v7, %s12840_s21  ;;  %v795_v61 = vsel %vm13186_vm5, %v10991_v41, %v794_v53  ;;  %v796_v18 = vrot.slane %v794_v53, 4  ;;  %v826_v7 = vld [vmem:[%s12887_s19 + $0xa4] sm:$0x3]  ;;  %v2793_v50 = vpop.permute.xlu1 %2792 }
 0x104   : > { %v4027_v32 = vsel %vm12915_vm2, %v4022_v8, %v4026_v17  ;;  %v4032_v36 = vrot.slane %v4031_v52, 4  ;;  %v2341_v35 = vrot.slane %v2339_v24, 4  ;;  %v11215_v44 = vcombine.low %v13905_v60, %v13908_v58 }
 0x105   : > { %v2344_v54 = vrot.slane %v2342_v46, 5  ;;  %v13934_v63 = vsel %vm1553_vm13, %v13729_v16, %v1411_v23  ;;  %v798_v9 = vsel %vm13186_vm5, %v796_v18, %v797_v20  ;;  %v13944_v41 = vsel %vm1553_vm13, %v13735_v15, %v1409_v34  ;;  %v13949_v23 = vld [vmem:[%s12887_s19 + $0xb0] sm:$0x1] }
 0x106   : > { %17630 = vst [vmem:[#allocation10_spill] sm:$0xff] %v13934_v63  ;;  %v4037_v17 = vsel %vm12915_vm2, %v4032_v36, %v4036_v30  ;;  %17631 = vst [vmem:[#allocation11_spill] sm:$0xff] %v13944_v41  ;;  %v1132_v8 = vshrl.u32 %v647_v57, 16  ;;  %v11039_v52 = vcombine.low %v795_v61, %v798_v9  ;;  %v1135_v16 = vshll.u32 %v647_v57, 16  ;;  %v1784_v36 = vld [vmem:[%s12887_s19 + $0x54] sm:$0xc] }
 0x107   : > { %5998 = vrot.lane.b32.xlu1 %v12445_v12, %s12841_s22  ;;  %v11464_v60 = vcombine.low %v4027_v32, %v4037_v17  ;;  %v17632_v53 = vshrl.u32 %v13113_v40, 16  ;;  %v17633_v30 = vshll.u32 %v13113_v40, 16  ;;  %v1146_v20 = vshrl.u32 %v826_v7, 16  ;;  %v1785_v61 = vld [vmem:[%s12887_s19 + $0x58] sm:$0xf] }
 0x108   : > { %v1134_v12 = vrot.slane %v1132_v8, 5  ;;  %v1149_v46 = vshll.u32 %v826_v7, 16  ;;  %v1137_v15 = vrot.slane %v1135_v16, 6  ;;  %v2345_v34 = vor.u32 %v2344_v54, %v2341_v35  ;;  %v1786_v8 = vld [vmem:[%s12887_s19 + $0x5c] sm:$0x3]  ;;  %v2713_v16 = vpop.permute.xlu0 %2712 }
 0x109   : > { %v1140_v39 = vrot.slane %v17632_v53, 5  ;;  %v1141_v24 = vrot.slane %v17633_v30, 6  ;;  %4554 = vrot.lane.b32.xlu0 %v11464_v60, %s12841_s22  ;;  %v2348_v32 = vshll.u32 %v13908_v58, 16  ;;  %v2354_v57 = vrot.slane %v2352_v31, 4  ;;  %v11591_v63 = vld [vmem:[%s12887_s19 + $0x54] sm:$0xc] }
 0x10a   : > { %v1148_v17 = vrot.slane %v1146_v20, 5  ;;  %v1151_v9 = vrot.slane %v1149_v46, 6  ;;  %v2358_v40 = vshll.u32 %v13949_v23, 16  ;;  %v1138_v53 = vor.u32 %v1137_v15, %v1134_v12  ;;  %v13964_v20 = vld [vmem:[%s12887_s19 + $0x4c] sm:$0xf] }
 0x10b   : > { %1418 = vrot.lane.b32.xlu1 %v11039_v52, %s12840_s21  ;;  %v1142_v18 = vor.u32 %v1141_v24, %v1140_v39  ;;  %v2346_v7 = vrot.slane %v2345_v34, 4  ;;  %v2350_v30 = vrot.slane %v2348_v32, 5  ;;  %v11097_v60 = vrot.slane %v1784_v36, 10  ;;  %17634 = vst [vmem:[#allocation12_spill] sm:$0xff] %v13964_v20  ;;  %v11335_v46 = vld [vmem:[%s12887_s19 + $0x48] sm:$0xc] }
 0x10c   : > { %v1152_v54 = vor.u32 %v1151_v9, %v1148_v17  ;;  %v2360_v31 = vrot.slane %v2358_v40, 5  ;;  %v1913_v41 = vrot.slane %v1785_v61, 6  ;;  %v1139_v52 = vrot.slane %v1138_v53, 4  ;;  %v13972_v32 = vld [vmem:[%s12887_s19 + $0x50] sm:$0x3] }
 0x10d   : > { %v1144_v35 = vrot.slane %v1142_v18, 4  ;;  %2724 = vrot.lane.b32.xlu0 %v11215_v44, %s12839_s20  ;;  %v2351_v39 = vsel %vm12915_vm2, %v2346_v7, %v2350_v30  ;;  %v2355_v24 = vor.u32 %v2354_v57, %v2350_v30  ;;  %v1916_v12 = vrot.slane %v1786_v8, 6  ;;  %17635 = vst [vmem:[#allocation13_spill] sm:$0xff] %v13972_v32  ;;  %v11167_v40 = vld [vmem:[%s12887_s19 + $0xa8] sm:$0xe] }
 0x10e   : > { %v1914_v15 = vsel %vm13666_vm12, %v11097_v60, %v1913_v41  ;;  %v1915_v34 = vrot.slane %v1913_v41, 4  ;;  %v1143_v61 = vsel %vm13345_vm8, %v1139_v52, %v1142_v18  ;;  %v11351_v41 = vrot.slane %v11335_v46, 10  ;;  %v2873_v46 = vpop.permute.xlu1 %2872 }
 0x10f   : > { %v1153_v36 = vsel %vm13345_vm8, %v1144_v35, %v1152_v54  ;;  %v2356_v17 = vrot.slane %v2355_v24, 4  ;;  %v3743_v35 = vrot.slane %v13964_v20, 6  ;;  %v3746_v18 = vrot.slane %v13972_v32, 6  ;;  %v1487_v54 = vpop.permute.xlu0 %1486 }
 0x110   : > { %v11055_v8 = vcombine.low %v1143_v61, %v1153_v36  ;;  %v1917_v53 = vsel %vm13666_vm12, %v1915_v34, %v1916_v12  ;;  %v11183_v24 = vrot.slane %v11167_v40, 9  ;;  %v2567_v12 = vrot.slane %v13908_v58, 5 }
 0x111   : > { %v2361_v30 = vsel %vm12915_vm2, %v2356_v17, %v2360_v31  ;;  %v11193_v60 = vcombine.low %v1914_v15, %v1917_v53  ;;  %v2570_v36 = vrot.slane %v13949_v23, 5  ;;  %v3744_v15 = vsel %vm13666_vm12, %v11351_v41, %v3743_v35  ;;  %v11372_v17 = vld [vmem:[%s12887_s19 + $0x54] sm:$0xf] }
 0x112   : > { %1498 = vrot.lane.b32.xlu1 %v11055_v8, %s12841_s22  ;;  %v11231_v52 = vcombine.low %v2351_v39, %v2361_v30  ;;  %v3745_v34 = vrot.slane %v3743_v35, 4  ;;  %v2568_v39 = vsel %vm13186_vm5, %v11183_v24, %v2567_v12  ;;  %v2569_v61 = vrot.slane %v2567_v12, 4  ;;  %v11521_v30 = vld [vmem:[%s12887_s19 + $0x54] sm:$0xe]  ;;  %v14008_v24 = vld [vmem:[%s12887_s19 + $0x58] sm:$0xf] }
 0x113   : > { %v2913_v31 = vsel %vm1504_vm9, %v11193_v60, %v2713_v16  ;;  %v1602_v23 = vsel %vm1586_vm14, %v13912_v5, %v1487_v54  ;;  %v11373_v16 = vld [vmem:[%s12887_s19 + $0x58] sm:$0xf]  ;;  %v14011_v5 = vld [vmem:[%s12887_s19 + $0x5c] sm:$0x3]  ;;  %v3994_v12 = vshll.u32 %v11372_v17, 16 }
 0x114   : > { %2804 = vrot.lane.b32.xlu0 %v11231_v52, %s12840_s21  ;;  %v2953_v58 = vsel %vm1553_vm13, %v2913_v31, %v2793_v50  ;;  %v3747_v40 = vsel %vm13666_vm12, %v3745_v34, %v3746_v18  ;;  %v11072_v53 = vcombine.low %v1602_v23, %v1602_v23  ;;  %v11073_v41 = vcombine.high %v1602_v23, %v1602_v23  ;;  %v1782_v31 = vld [vmem:[%s12887_s19 + $0x4c] sm:$0xf]  ;;  %v14014_v34 = vpop.permute.xlu0 %2710  ;;  %v1781_v23 = vld [vmem:[%s12887_s19 + $0x48] sm:$0xc] }
 0x115   : > { %v2985_v8 = vsel %vm1586_vm14, %v2953_v58, %v2873_v46  ;;  %v11431_v60 = vcombine.low %v3744_v15, %v3747_v40  ;;  %v2571_v35 = vsel %vm13186_vm5, %v2569_v61, %v2570_v36  ;;  %v3991_v18 = vshrl.u32 %v11372_v17, 16 }
 0x116   : > { %v11264_v52 = vcombine.low %v2985_v8, %v2985_v8  ;;  %v11265_v50 = vcombine.high %v2985_v8, %v2985_v8  ;;  %v11247_v54 = vcombine.low %v2568_v39, %v2571_v35  ;;  %1745 = vst [vmem:[#allocation2 + $0x188] sm:$0xf] %v11072_v53  ;;  %1746 = vst [vmem:[#allocation2 + $0x1a4] sm:$0xf] %v11073_v41  ;;  %v4000_v46 = vshll.u32 %v11373_v16, 16 }
 0x117   : > { %4360 = vrot.lane.b32.xlu1 %v11431_v60, %s12839_s20  ;;  %v4004_v36 = vshrl.u32 %v11373_v16, 16  ;;  %v11447_v15 = vcombine.low %v11372_v17, %v11373_v16  ;;  %v5195_v61 = vshrl.u32 %v11521_v30, 16  ;;  %v5198_v58 = vshll.u32 %v11521_v30, 16  ;;  %v1783_v41 = vld [vmem:[%s12887_s19 + $0x50] sm:$0x3]  ;;  %v2791_v30 = vpop.permute.xlu1 %2790 }
 0x118   : > { %3128 = vst [vmem:[#allocation2 + $0x18c] sm:$0xf] %v11264_v52  ;;  %3129 = vst [vmem:[#allocation2 + $0x1a8] sm:$0xf] %v11265_v50  ;;  %2884 = vrot.lane.b32.xlu0 %v11247_v54, %s12841_s22  ;;  %v3993_v39 = vrot.slane %v3991_v18, 4  ;;  %v3996_v40 = vrot.slane %v3994_v12, 5 }
 0x119   : > { %v4002_v8 = vrot.slane %v4000_v46, 5  ;;  %v5204_v53 = vshrl.u32 %v14008_v24, 16  ;;  %v4006_v35 = vrot.slane %v4004_v36, 4  ;;  %v5197_v7 = vrot.slane %v5195_v61, 5  ;;  %v11399_v36 = vld [vmem:[%s12887_s19 + $0x5c] sm:$0x1] }
 0x11a   : > { %v5200_v9 = vrot.slane %v5198_v58, 6  ;;  %v5207_v60 = vshll.u32 %v14008_v24, 16  ;;  %v5214_v17 = vshrl.u32 %v14011_v5, 16  ;;  %v5217_v16 = vshll.u32 %v14011_v5, 16 }
 0x11b   : > { %v5206_v52 = vrot.slane %v5204_v53, 5  ;;  %v11096_v50 = vrot.slane %v1781_v23, 10  ;;  %4472 = vrot.lane.b32.xlu1 %v11447_v15, %s12840_s21  ;;  %v1906_v12 = vrot.slane %v1782_v31, 6  ;;  %v1909_v46 = vrot.slane %v1783_v41, 6  ;;  %v1485_v53 = vpop.permute.xlu0 %1484 }
 0x11c   : > { %v5201_v54 = vor.u32 %v5200_v9, %v5197_v7  ;;  %v5209_v18 = vrot.slane %v5207_v60, 6  ;;  %v5216_v61 = vrot.slane %v5214_v17, 5  ;;  %v5219_v58 = vrot.slane %v5217_v16, 6 }
 0x11d   : > { %v3997_v57 = vor.u32 %v3996_v40, %v3993_v39  ;;  %v4007_v44 = vor.u32 %v4006_v35, %v4002_v8  ;;  %v1907_v26 = vsel %vm13666_vm12, %v11096_v50, %v1906_v12  ;;  %v1908_v23 = vrot.slane %v1906_v12, 4  ;;  %v14052_v12 = vld [vmem:[%s12887_s19 + $0xa0] sm:$0xf] }
 0x11e   : > { %v5202_v32 = vrot.slane %v5201_v54, 4  ;;  %v5210_v20 = vor.u32 %v5209_v18, %v5206_v52  ;;  %v5220_v15 = vor.u32 %v5219_v58, %v5216_v61  ;;  %v4010_v31 = vshll.u32 %v11399_v36, 16  ;;  %v12452_v52 = vld [vmem:[#allocation2 + $0x188] ss:$28 sps:$4 sm:$0xff]  }
 0x11f   : > { %v3998_v9 = vrot.slane %v3997_v57, 4  ;;  %v4008_v7 = vrot.slane %v4007_v44, 4  ;;  %v1910_v39 = vsel %vm13666_vm12, %v1908_v23, %v1909_v46  ;;  %v11607_v40 = vrot.slane %v11591_v63, 10  ;;  %v12450_v35 = vld [vmem:[#allocation2 + $0x18c] ss:$28 sps:$4 sm:$0xff]   ;;  %v2871_v44 = vpop.permute.xlu1 %2870 }
 0x120   : > { %v5211_v41 = vsel %vm13345_vm8, %v5202_v32, %v5210_v20  ;;  %v5212_v60 = vrot.slane %v5210_v20, 4  ;;  %v11192_v17 = vcombine.low %v1907_v26, %v1910_v39  ;;  %v4012_v50 = vrot.slane %v4010_v31, 5  ;;  %10651 = vmatprep.subr.bf16.mxu0 %v12450_v35  ;;  %v14068_v39 = vld [vmem:[%s12887_s19 + $0xa4] sm:$0x1] }
 0x121   : > { %v4003_v16 = vsel %vm12915_vm2, %v3998_v9, %v4002_v8  ;;  %v5587_v57 = vrot.slane %v14008_v24, 6  ;;  %v5590_v20 = vrot.slane %v14011_v5, 6  ;;  %v1600_v63 = vsel %vm1586_vm14, %v13916_v27, %v1485_v53  ;;  %v14054_v5 = vpop.permute.xlu0 %2708  ;;  %10652 = vmatpush1.bf16.xpose.msra.mxu0 %v12452_v52  ;;  %v1779_v9 = vld [vmem:[%s12887_s19 + $0x40] sm:$0xf] }
 0x122   : > { %v5221_v54 = vsel %vm13345_vm8, %v5212_v60, %v5220_v15  ;;  %v2315_v32 = vshrl.u32 %v14030_v4, 16  ;;  %v2910_v8 = vsel %vm1504_vm9, %v11192_v17, %v14014_v34  ;;  %v4013_v24 = vsel %vm12915_vm2, %v4008_v7, %v4012_v50  ;;  %v1778_v34 = vld [vmem:[%s12887_s19 + $0x3c] sm:$0xc]  ;;  %v1780_v7 = vld [vmem:[%s12887_s19 + $0x44] sm:$0x3] }
 0x123   : > { %v11671_v26 = vcombine.low %v5211_v41, %v5221_v54  ;;  %v5588_v18 = vsel %vm13666_vm12, %v11607_v40, %v5587_v57  ;;  %v11463_v27 = vcombine.low %v4003_v16, %v4013_v24  ;;  %v5589_v46 = vrot.slane %v5587_v57, 4  ;;  %v2789_v17 = vpop.permute.xlu1 %2788 }
 0x124   : > { %v2951_v36 = vsel %vm1553_vm13, %v2910_v8, %v2791_v30  ;;  %v11070_v61 = vcombine.low %v1600_v63, %v1600_v63  ;;  %v11071_v53 = vcombine.high %v1600_v63, %v1600_v63  ;;  %v2317_v23 = vrot.slane %v2315_v32, 4  ;;  %v12449_v63 = vld [vmem:[%s12887_s19 + $0x60] sm:$0xff]  }
 0x125   : > { %5804 = vrot.lane.b32.xlu0 %v11671_v26, %s12839_s20  ;;  %v2983_v58 = vsel %vm1586_vm14, %v2951_v36, %v2871_v44  ;;  %v2318_v15 = vshll.u32 %v14030_v4, 16  ;;  %4552 = vrot.lane.b32.xlu1 %v11463_v27, %s12841_s22  ;;  %v5591_v31 = vsel %vm13666_vm12, %v5589_v46, %v5590_v20  ;;  %v2328_v60 = vshrl.u32 %v14052_v12, 16  ;;  %v646_v20 = vld [vmem:[%s12887_s19 + $0x90] sm:$0xe]  ;;  %v1483_v24 = vpop.permute.xlu0 %1482 }
 0x126   : > { %v11262_v41 = vcombine.low %v2983_v58, %v2983_v58  ;;  %v11263_v30 = vcombine.high %v2983_v58, %v2983_v58  ;;  %1743 = vst [vmem:[#allocation2 + $0x150] sm:$0xf] %v11070_v61  ;;  %v11687_v40 = vcombine.low %v5588_v18, %v5591_v31  ;;  %1744 = vst [vmem:[#allocation2 + $0x16c] sm:$0xf] %v11071_v53  ;;  %v11095_v16 = vrot.slane %v1778_v34, 10 }
 0x127   : > { %v2320_v35 = vrot.slane %v2318_v15, 5  ;;  %v11214_v52 = vcombine.low %v14030_v4, %v14052_v12  ;;  %v1899_v50 = vrot.slane %v1779_v9, 6  ;;  %v1902_v57 = vrot.slane %v1780_v7, 6  ;;  %v11166_v18 = vld [vmem:[%s12887_s19 + $0x9c] sm:$0xe] }
 0x128   : > { %3126 = vst [vmem:[#allocation2 + $0x154] sm:$0xf] %v11262_v41  ;;  %3127 = vst [vmem:[#allocation2 + $0x170] sm:$0xf] %v11263_v30  ;;  %v2324_v44 = vshll.u32 %v14052_v12, 16  ;;  %v2330_v54 = vrot.slane %v2328_v60, 4  ;;  %v1598_v7 = vsel %vm1586_vm14, %v13896_v14, %v1483_v24 }
 0x129   : > { %5884 = vrot.lane.b32.xlu0 %v11687_v40, %s12840_s21  ;;  %v2321_v32 = vor.u32 %v2320_v35, %v2317_v23  ;;  %v2334_v26 = vshll.u32 %v14068_v39, 16  ;;  %v10990_v8 = vrot.slane %v646_v20, 9  ;;  %v787_v4 = vrot.slane %v13781_v1, 5  ;;  %2722 = vrot.lane.b32.xlu1 %v11214_v52, %s12839_s20  ;;  %v12708_v61 = vld [vmem:[%s12887_s19 + $0x98] sm:$0x1]  ;;  %v2869_v40 = vpop.permute.xlu1 %2868 }
 0x12a   : > { %v1900_v27 = vsel %vm13666_vm12, %v11095_v16, %v1899_v50  ;;  %v1901_v46 = vrot.slane %v1899_v50, 4  ;;  %v2326_v36 = vrot.slane %v2324_v44, 5  ;;  %v790_v34 = vrot.slane %v12708_v61, 5  ;;  %v825_v44 = vld [vmem:[%s12887_s19 + $0x98] sm:$0x3] }
 0x12b   : > { %v2322_v58 = vrot.slane %v2321_v32, 4  ;;  %v2336_v53 = vrot.slane %v2334_v26, 5  ;;  %v788_v23 = vsel %vm13186_vm5, %v10990_v8, %v787_v4  ;;  %v789_v15 = vrot.slane %v787_v4, 4  ;;  %v1776_v26 = vld [vmem:[%s12887_s19 + $0x34] sm:$0xf] }
 0x12c   : > { %v1903_v1 = vsel %vm13666_vm12, %v1901_v46, %v1902_v57  ;;  %v2331_v9 = vor.u32 %v2330_v54, %v2326_v36  ;;  %v11182_v31 = vrot.slane %v11166_v18, 9  ;;  %v11068_v35 = vcombine.low %v1598_v7, %v1598_v7  ;;  %v1777_v61 = vld [vmem:[%s12887_s19 + $0x38] sm:$0x3] }
 0x12d   : > { %5996 = vrot.lane.b32.xlu0 %v12449_v63, %s12841_s22  ;;  %v11191_v41 = vcombine.low %v1900_v27, %v1903_v1  ;;  %v2327_v30 = vsel %vm12915_vm2, %v2322_v58, %v2326_v36  ;;  %v791_v60 = vsel %vm13186_vm5, %v789_v15, %v790_v34  ;;  %v11069_v50 = vcombine.high %v1598_v7, %v1598_v7  ;;  %v12455_v18 = vld [vmem:[#allocation2 + $0x150] ss:$28 sps:$4 sm:$0xff]   ;;  %v2707_v34 = vpop.permute.xlu0 %2706  ;;  %v11518_v1 = vld [vmem:[%s12887_s19 + $0x48] sm:$0xe] }
 0x12e   : > { %v2332_v52 = vrot.slane %v2331_v9, 4  ;;  %v11038_v16 = vcombine.low %v788_v23, %v791_v60  ;;  %v2560_v57 = vrot.slane %v14052_v12, 5  ;;  %1741 = vst [vmem:[#allocation2 + $0x118] sm:$0xf] %v11068_v35  ;;  %v2563_v54 = vrot.slane %v14068_v39, 5  ;;  %v2787_v60 = vpop.permute.xlu1 %2786 }
 0x12f   : > { %v2907_v14 = vsel %vm1504_vm9, %v11191_v41, %v14054_v5  ;;  %v1109_v63 = vshrl.u32 %v646_v20, 16  ;;  %v1112_v32 = vshll.u32 %v646_v20, 16  ;;  %1742 = vst [vmem:[#allocation2 + $0x134] sm:$0xf] %v11069_v50  ;;  %v12453_v5 = vld [vmem:[#allocation2 + $0x154] ss:$28 sps:$4 sm:$0xff]  }
 0x130   : > { %v2337_v8 = vsel %vm12915_vm2, %v2332_v52, %v2336_v53  ;;  %v2949_v4 = vsel %vm1553_vm13, %v2907_v14, %v2789_v17  ;;  %v2561_v12 = vsel %vm13186_vm5, %v11182_v31, %v2560_v57  ;;  %v2562_v24 = vrot.slane %v2560_v57, 4  ;;  %v1775_v36 = vld [vmem:[%s12887_s19 + $0x30] sm:$0xc]  ;;  %10653 = vmatprep.subr.bf16.mxu0 %v12453_v5  ;;  %v14118_v50 = vld [vmem:[%s12887_s19 + $0x4c] sm:$0xf] }
 0x131   : > { %v11230_v27 = vcombine.low %v2327_v30, %v2337_v8  ;;  %1416 = vrot.lane.b32.xlu0 %v11038_v16, %s12840_s21  ;;  %v2981_v39 = vsel %vm1586_vm14, %v2949_v4, %v2869_v40  ;;  %v1111_v20 = vrot.slane %v1109_v63, 5  ;;  %v1114_v46 = vrot.slane %v1112_v32, 6  ;;  %10654 = vmatpush1.bf16.xpose.msra.mxu0 %v12455_v18  ;;  %v14123_v4 = vld [vmem:[%s12887_s19 + $0x50] sm:$0x3]  ;;  %v1481_v18 = vpop.permute.xlu0 %1480 }
 0x132   : > { %v11260_v58 = vcombine.low %v2981_v39, %v2981_v39  ;;  %v11261_v17 = vcombine.high %v2981_v39, %v2981_v39  ;;  %v2564_v53 = vsel %vm13186_vm5, %v2562_v24, %v2563_v54  ;;  %v17636_v23 = vshrl.u32 %v13128_v48, 16 }
 0x133   : > { %2802 = vrot.lane.b32.xlu1 %v11230_v27, %s12840_s21  ;;  %v11246_v9 = vcombine.low %v2561_v12, %v2564_v53  ;;  %v1115_v7 = vor.u32 %v1114_v46, %v1111_v20  ;;  %v17637_v31 = vshll.u32 %v13128_v48, 16  ;;  %v1123_v30 = vshrl.u32 %v825_v44, 16  ;;  %v14135_v53 = vld [vmem:[%s12887_s19 + $0x40] sm:$0xf] }
 0x134   : > { %v1117_v15 = vrot.slane %v17636_v23, 5  ;;  %3124 = vst [vmem:[#allocation2 + $0x11c] sm:$0xf] %v11260_v58  ;;  %3125 = vst [vmem:[#allocation2 + $0x138] sm:$0xf] %v11261_v17  ;;  %v1126_v40 = vshll.u32 %v825_v44, 16  ;;  %v2867_v23 = vpop.permute.xlu1 %2866 }
 0x135   : > { %v1118_v41 = vrot.slane %v17637_v31, 6  ;;  %v11094_v35 = vrot.slane %v1775_v36, 10  ;;  %v1892_v52 = vrot.slane %v1776_v26, 6  ;;  %v1895_v16 = vrot.slane %v1777_v61, 6 }
 0x136   : > { %v1116_v57 = vrot.slane %v1115_v7, 4  ;;  %v1125_v54 = vrot.slane %v1123_v30, 5  ;;  %v5167_v63 = vshrl.u32 %v11518_v1, 16  ;;  %v1128_v32 = vrot.slane %v1126_v40, 6  ;;  %v14140_v7 = vld [vmem:[%s12887_s19 + $0x44] sm:$0x3] }
 0x137   : > { %v1119_v14 = vor.u32 %v1118_v41, %v1117_v15  ;;  %v1893_v48 = vsel %vm13666_vm12, %v11094_v35, %v1892_v52  ;;  %v1894_v8 = vrot.slane %v1892_v52, 4  ;;  %v5170_v12 = vshll.u32 %v11518_v1, 16  ;;  %2882 = vrot.lane.b32.xlu1 %v11246_v9, %s12841_s22  ;;  %v11334_v41 = vld [vmem:[%s12887_s19 + $0x3c] sm:$0xc] }
 0x138   : > { %v5169_v24 = vrot.slane %v5167_v63, 5  ;;  %v5176_v5 = vshrl.u32 %v14118_v50, 16  ;;  %v1129_v27 = vor.u32 %v1128_v32, %v1125_v54  ;;  %v5179_v46 = vshll.u32 %v14118_v50, 16  ;;  %v12460_v32 = vld [vmem:[#allocation2 + $0x118] ss:$28 sps:$4 sm:$0xff]  }
 0x139   : > { %v1120_v44 = vsel %vm13345_vm8, %v1116_v57, %v1119_v14  ;;  %v1121_v26 = vrot.slane %v1119_v14, 4  ;;  %v1896_v39 = vsel %vm13666_vm12, %v1894_v8, %v1895_v16  ;;  %v5172_v20 = vrot.slane %v5170_v12, 6 }
 0x13a   : > { %v11190_v36 = vcombine.low %v1893_v48, %v1896_v39  ;;  %v5178_v61 = vrot.slane %v5176_v5, 5  ;;  %v5186_v58 = vshrl.u32 %v14123_v4, 16  ;;  %v5189_v17 = vshll.u32 %v14123_v4, 16  ;;  %v11590_v39 = vld [vmem:[%s12887_s19 + $0x48] sm:$0xc] }
 0x13b   : > { %v1130_v15 = vsel %vm13345_vm8, %v1121_v26, %v1129_v27  ;;  %v5173_v1 = vor.u32 %v5172_v20, %v5169_v24  ;;  %v5181_v9 = vrot.slane %v5179_v46, 6  ;;  %v3316_v31 = vshrl.u32 %v14135_v53, 16  ;;  %v12458_v16 = vld [vmem:[#allocation2 + $0x11c] ss:$28 sps:$4 sm:$0xff]  }
 0x13c   : > { %v11054_v30 = vcombine.low %v1120_v44, %v1130_v15  ;;  %v2904_v40 = vsel %vm1504_vm9, %v11190_v36, %v2707_v34  ;;  %v5188_v35 = vrot.slane %v5186_v58, 5  ;;  %v5191_v52 = vrot.slane %v5189_v17, 6  ;;  %v14150_v44 = vpop.permute.xlu0 %2704  ;;  %10655 = vmatprep.subr.bf16.mxu0 %v12458_v16  ;;  %v11370_v58 = vld [vmem:[%s12887_s19 + $0x48] sm:$0xf]  ;;  %v14163_v17 = vpop.permute.xlu1 %2784 }
 0x13d   : > { %v5174_v57 = vrot.slane %v5173_v1, 4  ;;  %v5182_v14 = vor.u32 %v5181_v9, %v5178_v61  ;;  %v3319_v54 = vshll.u32 %v14135_v53, 16  ;;  %v3326_v63 = vshrl.u32 %v14140_v7, 16  ;;  %10656 = vmatpush1.bf16.xpose.msra.mxu0 %v12460_v32  ;;  %v11398_v32 = vld [vmem:[%s12887_s19 + $0x50] sm:$0x1] }
 0x13e   : > { %1496 = vrot.lane.b32.xlu0 %v11054_v30, %s12841_s22  ;;  %v5192_v48 = vor.u32 %v5191_v52, %v5188_v35  ;;  %v3329_v8 = vshll.u32 %v14140_v7, 16  ;;  %v11350_v12 = vrot.slane %v11334_v41, 10  ;;  %v3736_v34 = vrot.slane %v14135_v53, 6  ;;  %v11371_v41 = vld [vmem:[%s12887_s19 + $0x4c] sm:$0xf] }
 0x13f   : > { %v5183_v26 = vsel %vm13345_vm8, %v5174_v57, %v5182_v14  ;;  %v5184_v24 = vrot.slane %v5182_v14, 4  ;;  %v3739_v5 = vrot.slane %v14140_v7, 6  ;;  %v2947_v27 = vsel %vm1553_vm13, %v2904_v40, %v2787_v60  ;;  %v1772_v52 = vld [vmem:[%s12887_s19 + $0x24] sm:$0xc] }
 0x140   : > { %v3737_v20 = vsel %vm13666_vm12, %v11350_v12, %v3736_v34  ;;  %v3738_v46 = vrot.slane %v3736_v34, 4  ;;  %v2979_v36 = vsel %vm1586_vm14, %v2947_v27, %v2867_v23  ;;  %v1596_v61 = vsel %vm1586_vm14, %v13902_v28, %v1481_v18  ;;  %v1773_v28 = vld [vmem:[%s12887_s19 + $0x28] sm:$0xf] }
 0x141   : > { %v5193_v15 = vsel %vm13345_vm8, %v5184_v24, %v5192_v48  ;;  %v11258_v60 = vcombine.low %v2979_v36, %v2979_v36  ;;  %v11259_v1 = vcombine.high %v2979_v36, %v2979_v36  ;;  %v11066_v9 = vcombine.low %v1596_v61, %v1596_v61  ;;  %v1774_v24 = vld [vmem:[%s12887_s19 + $0x2c] sm:$0x3] }
 0x142   : > { %v11670_v30 = vcombine.low %v5183_v26, %v5193_v15  ;;  %v3740_v40 = vsel %vm13666_vm12, %v3738_v46, %v3739_v5  ;;  %v11067_v35 = vcombine.high %v1596_v61, %v1596_v61  ;;  %v11606_v23 = vrot.slane %v11590_v39, 10  ;;  %v1479_v5 = vpop.permute.xlu0 %1478  ;;  %v2865_v15 = vpop.permute.xlu1 %2864 }
 0x143   : > { %v11430_v18 = vcombine.low %v3737_v20, %v3740_v40  ;;  %3122 = vst [vmem:[#allocation2 + $0xe4] sm:$0xf] %v11258_v60  ;;  %3123 = vst [vmem:[#allocation2 + $0x100] sm:$0xf] %v11259_v1  ;;  %v5580_v16 = vrot.slane %v14118_v50, 6  ;;  %v5583_v57 = vrot.slane %v14123_v4, 6  ;;  %v11446_v26 = vcombine.low %v11370_v58, %v11371_v41 }
 0x144   : > { %1739 = vst [vmem:[#allocation2 + $0xe0] sm:$0xf] %v11066_v9  ;;  %v3967_v14 = vshrl.u32 %v11370_v58, 16  ;;  %5802 = vrot.lane.b32.xlu1 %v11670_v30, %s12839_s20  ;;  %1740 = vst [vmem:[#allocation2 + $0xfc] sm:$0xf] %v11067_v35  ;;  %v3970_v48 = vshll.u32 %v11370_v58, 16  ;;  %v1594_v9 = vsel %vm1586_vm14, %v13873_v47, %v1479_v5 }
 0x145   : > { %v3976_v12 = vshll.u32 %v11371_v41, 16  ;;  %v3980_v34 = vshrl.u32 %v11371_v41, 16  ;;  %4358 = vrot.lane.b32.xlu0 %v11430_v18, %s12839_s20  ;;  %v5581_v27 = vsel %vm13666_vm12, %v11606_v23, %v5580_v16  ;;  %v5582_v39 = vrot.slane %v5580_v16, 4  ;;  %v14187_v23 = vld [vmem:[%s12887_s19 + $0x90] sm:$0xf] }
 0x146   : > { %v3969_v50 = vrot.slane %v3967_v14, 4  ;;  %v11093_v4 = vrot.slane %v1772_v52, 10  ;;  %v3972_v20 = vrot.slane %v3970_v48, 5  ;;  %v1885_v61 = vrot.slane %v1773_v28, 6  ;;  %v12457_v52 = vld [vmem:[%s12887_s19 + $0x54] sm:$0xff]  }
 0x147   : > { %v3978_v46 = vrot.slane %v3976_v12, 5  ;;  %v3982_v36 = vrot.slane %v3980_v34, 4  ;;  %v5584_v58 = vsel %vm13666_vm12, %v5582_v39, %v5583_v57  ;;  %v1888_v60 = vrot.slane %v1774_v24, 6  ;;  %v645_v14 = vld [vmem:[%s12887_s19 + $0x84] sm:$0xe] }
 0x148   : > { %v3986_v1 = vshll.u32 %v11398_v32, 16  ;;  %v11686_v41 = vcombine.low %v5581_v27, %v5584_v58  ;;  %v1886_v30 = vsel %vm13666_vm12, %v11093_v4, %v1885_v61  ;;  %v1887_v40 = vrot.slane %v1885_v61, 4  ;;  %v14193_v32 = vld [vmem:[%s12887_s19 + $0x94] sm:$0xf]  ;;  %v12709_v34 = vld [vmem:[%s12887_s19 + $0x88] sm:$0xf] }
 0x149   : > { %v3973_v35 = vor.u32 %v3972_v20, %v3969_v50  ;;  %4470 = vrot.lane.b32.xlu0 %v11446_v26, %s12840_s21  ;;  %v3983_v28 = vor.u32 %v3982_v36, %v3978_v46  ;;  %v11064_v16 = vcombine.low %v1594_v9, %v1594_v9  ;;  %v11065_v57 = vcombine.high %v1594_v9, %v1594_v9  ;;  %v1770_v5 = vld [vmem:[%s12887_s19 + $0x1c] sm:$0xf] }
 0x14a   : > { %v3988_v18 = vrot.slane %v3986_v1, 5  ;;  %5882 = vrot.lane.b32.xlu1 %v11686_v41, %s12840_s21  ;;  %v1889_v47 = vsel %vm13666_vm12, %v1887_v40, %v1888_v60  ;;  %v10989_v12 = vrot.slane %v645_v14, 9  ;;  %v780_v24 = vrot.slane %v12709_v34, 5  ;;  %v12462_v4 = vld [vmem:[#allocation2 + $0xe4] ss:$28 sps:$4 sm:$0xff]   ;;  %v2783_v60 = vpop.permute.xlu1 %2782 }
 0x14b   : > { %v3974_v48 = vrot.slane %v3973_v35, 4  ;;  %v11189_v26 = vcombine.low %v1886_v30, %v1889_v47  ;;  %v3984_v27 = vrot.slane %v3983_v28, 4  ;;  %1737 = vst [vmem:[#allocation2 + $0xa8] sm:$0xf] %v11064_v16  ;;  %1738 = vst [vmem:[#allocation2 + $0xc4] sm:$0xf] %v11065_v57  ;;  %10657 = vmatprep.subr.bf16.mxu0 %v12462_v4 }
 0x14c   : > { %v2291_v39 = vshrl.u32 %v14187_v23, 16  ;;  %v2294_v50 = vshll.u32 %v14187_v23, 16  ;;  %v781_v36 = vsel %vm13186_vm5, %v10989_v12, %v780_v24  ;;  %v782_v61 = vrot.slane %v780_v24, 4  ;;  %v1769_v1 = vld [vmem:[%s12887_s19 + $0x18] sm:$0xc] }
 0x14d   : > { %v3979_v20 = vsel %vm12915_vm2, %v3974_v48, %v3978_v46  ;;  %v2304_v58 = vshrl.u32 %v14193_v32, 16  ;;  %v12464_v9 = vld [vmem:[#allocation2 + $0xe0] ss:$28 sps:$4 sm:$0xff]   ;;  %v2901_v41 = vsel %vm1504_vm9, %v11189_v26, %v14150_v44  ;;  %v3989_v30 = vsel %vm12915_vm2, %v3984_v27, %v3988_v18  ;;  %v2703_v46 = vpop.permute.xlu0 %2702  ;;  %v824_v26 = vld [vmem:[%s12887_s19 + $0x8c] sm:$0x3] }
 0x14e   : > { %v2293_v40 = vrot.slane %v2291_v39, 4  ;;  %v2296_v35 = vrot.slane %v2294_v50, 5  ;;  %v1771_v28 = vld [vmem:[%s12887_s19 + $0x20] sm:$0x3]  ;;  %5994 = vrot.lane.b32.xlu1 %v12457_v52, %s12841_s22  ;;  %v11462_v16 = vcombine.low %v3979_v20, %v3989_v30  ;;  %v2945_v57 = vsel %vm1553_vm13, %v2901_v41, %v14163_v17  ;;  %10658 = vmatpush1.bf16.xpose.msra.mxu0 %v12464_v9 }
 0x14f   : > { %v17638_v47 = vrot.slane %v13079_v37, 5  ;;  %v11213_v48 = vcombine.low %v14187_v23, %v14193_v32  ;;  %v2977_v18 = vsel %vm1586_vm14, %v2945_v57, %v2865_v15  ;;  %v11092_v34 = vrot.slane %v1769_v1, 10  ;;  %v2863_v1 = vpop.permute.xlu1 %2862 }
 0x150   : > { %v1878_v24 = vrot.slane %v1770_v5, 6  ;;  %4550 = vrot.lane.b32.xlu0 %v11462_v16, %s12841_s22  ;;  %v11256_v52 = vcombine.low %v2977_v18, %v2977_v18  ;;  %v11257_v27 = vcombine.high %v2977_v18, %v2977_v18  ;;  %v1881_v17 = vrot.slane %v1771_v28, 6  ;;  %v14234_v28 = vld [vmem:[%s12887_s19 + $0x98] sm:$0x1] }
 0x151   : > { %v784_v44 = vsel %vm13186_vm5, %v782_v61, %v17638_v47  ;;  %v1086_v39 = vshrl.u32 %v645_v14, 16  ;;  %v1089_v4 = vshll.u32 %v645_v14, 16  ;;  %v17639_v23 = vshrl.u32 %v13072_v29, 16  ;;  %v1477_v14 = vpop.permute.xlu0 %1476 }
 0x152   : > { %v11037_v12 = vcombine.low %v781_v36, %v784_v44  ;;  %v1879_v37 = vsel %vm13666_vm12, %v11092_v34, %v1878_v24  ;;  %v1880_v50 = vrot.slane %v1878_v24, 4  ;;  %3120 = vst [vmem:[#allocation2 + $0xac] sm:$0xf] %v11256_v52  ;;  %3121 = vst [vmem:[#allocation2 + $0xc8] sm:$0xf] %v11257_v27  ;;  %v1100_v20 = vshrl.u32 %v824_v26, 16 }
 0x153   : > { %v1094_v15 = vrot.slane %v17639_v23, 5  ;;  %v1088_v5 = vrot.slane %v1086_v39, 5  ;;  %v1103_v36 = vshll.u32 %v824_v26, 16  ;;  %v2297_v61 = vor.u32 %v2296_v35, %v2293_v40  ;;  %v11292_v26 = vld [vmem:[%s12887_s19 + $0x34] sm:$0xf] }
 0x154   : > { %1414 = vrot.lane.b32.xlu1 %v11037_v12, %s12840_s21  ;;  %v1882_v9 = vsel %vm13666_vm12, %v1880_v50, %v1881_v17  ;;  %v1091_v41 = vrot.slane %v1089_v4, 6  ;;  %v2300_v29 = vshll.u32 %v14193_v32, 16  ;;  %2720 = vrot.lane.b32.xlu0 %v11213_v48, %s12839_s20  ;;  %v1102_v57 = vrot.slane %v1100_v20, 5 }
 0x155   : > { %v1096_v30 = vor.u32 %v13104_v45, %v1094_v15  ;;  %v11188_v16 = vcombine.low %v1879_v37, %v1882_v9  ;;  %v1105_v47 = vrot.slane %v1103_v36, 6  ;;  %v2298_v40 = vrot.slane %v2297_v61, 4  ;;  %v11333_v37 = vld [vmem:[%s12887_s19 + $0x30] sm:$0xc]  ;;  %v14252_v15 = vpop.permute.xlu1 %2780  ;;  %v14258_v9 = vld [vmem:[%s12887_s19 + $0x3c] sm:$0xf] }
 0x156   : > { %v1092_v35 = vor.u32 %v1091_v41, %v1088_v5  ;;  %v2302_v18 = vrot.slane %v2300_v29, 5  ;;  %v2306_v12 = vrot.slane %v2304_v58, 4  ;;  %v2310_v24 = vshll.u32 %v14234_v28, 16  ;;  %v11293_v58 = vld [vmem:[%s12887_s19 + $0x38] sm:$0x3] }
 0x157   : > { %v1098_v44 = vrot.slane %v1096_v30, 4  ;;  %v2898_v45 = vsel %vm1504_vm9, %v11188_v16, %v2703_v46  ;;  %v1106_v34 = vor.u32 %v1105_v47, %v1102_v57  ;;  %v1592_v48 = vsel %vm1586_vm14, %v13877_v21, %v1477_v14  ;;  %v11165_v21 = vld [vmem:[%s12887_s19 + $0x90] sm:$0xe]  ;;  %v1766_v57 = vld [vmem:[%s12887_s19 + $0xc] sm:$0xc] }
 0x158   : > { %v1093_v52 = vrot.slane %v1092_v35, 4  ;;  %v2303_v27 = vsel %vm12915_vm2, %v2298_v40, %v2302_v18  ;;  %v2307_v17 = vor.u32 %v2306_v12, %v2302_v18  ;;  %v2943_v39 = vsel %vm1553_vm13, %v2898_v45, %v2783_v60  ;;  %v1767_v5 = vld [vmem:[%s12887_s19 + $0x10] sm:$0xf]  ;;  %v12468_v47 = vld [vmem:[#allocation2 + $0xa8] ss:$28 sps:$4 sm:$0xff]   ;;  %v2701_v12 = vpop.permute.xlu0 %2700 }
 0x159   : > { %v1107_v46 = vsel %vm13345_vm8, %v1098_v44, %v1106_v34  ;;  %v2312_v50 = vrot.slane %v2310_v24, 5  ;;  %v2975_v4 = vsel %vm1586_vm14, %v2943_v39, %v2863_v1  ;;  %v11062_v23 = vcombine.low %v1592_v48, %v1592_v48  ;;  %v12466_v41 = vld [vmem:[#allocation2 + $0xac] ss:$28 sps:$4 sm:$0xff]   ;;  %v1768_v18 = vld [vmem:[%s12887_s19 + $0x14] sm:$0x3] }
 0x15a   : > { %v1097_v20 = vsel %vm13345_vm8, %v1093_v52, %v1096_v30  ;;  %v2308_v36 = vrot.slane %v2307_v17, 4  ;;  %v11254_v61 = vcombine.low %v2975_v4, %v2975_v4  ;;  %v11255_v60 = vcombine.high %v2975_v4, %v2975_v4  ;;  %10659 = vmatprep.subr.bf16.mxu0 %v12466_v41  ;;  %v11369_v39 = vld [vmem:[%s12887_s19 + $0x40] sm:$0xf] }
 0x15b   : > { %v11053_v29 = vcombine.low %v1097_v20, %v1107_v46  ;;  %v11063_v14 = vcombine.high %v1592_v48, %v1592_v48  ;;  %1735 = vst [vmem:[#allocation2 + $0x70] sm:$0xf] %v11062_v23  ;;  %v11349_v1 = vrot.slane %v11333_v37, 10  ;;  %v3729_v16 = vrot.slane %v11292_v26, 6  ;;  %10660 = vmatpush1.bf16.xpose.msra.mxu0 %v12468_v47  ;;  %v11515_v46 = vld [vmem:[%s12887_s19 + $0x3c] sm:$0xe] }
 0x15c   : > { %v2313_v40 = vsel %vm12915_vm2, %v2308_v36, %v2312_v50  ;;  %3118 = vst [vmem:[#allocation2 + $0x74] sm:$0xf] %v11254_v61  ;;  %3119 = vst [vmem:[#allocation2 + $0x90] sm:$0xf] %v11255_v60  ;;  %v3732_v30 = vrot.slane %v11293_v58, 6  ;;  %v11181_v35 = vrot.slane %v11165_v21, 9  ;;  %v2861_v50 = vpop.permute.xlu1 %2860  ;;  %v1475_v47 = vpop.permute.xlu0 %1474 }
 0x15d   : > { %v2553_v44 = vrot.slane %v14193_v32, 5  ;;  %1494 = vrot.lane.b32.xlu1 %v11053_v29, %s12841_s22  ;;  %v11229_v45 = vcombine.low %v2303_v27, %v2313_v40  ;;  %1736 = vst [vmem:[#allocation2 + $0x8c] sm:$0xf] %v11063_v14  ;;  %v3730_v34 = vsel %vm13666_vm12, %v11349_v1, %v3729_v16  ;;  %v3731_v24 = vrot.slane %v3729_v16, 4  ;;  %v14283_v20 = vld [vmem:[%s12887_s19 + $0x40] sm:$0xf] }
 0x15e   : > { %v2556_v48 = vrot.slane %v14234_v28, 5  ;;  %v11091_v52 = vrot.slane %v1766_v57, 10  ;;  %v1871_v17 = vrot.slane %v1767_v5, 6  ;;  %v1874_v58 = vrot.slane %v1768_v18, 6  ;;  %v14286_v29 = vld [vmem:[%s12887_s19 + $0x44] sm:$0x3] }
 0x15f   : > { %v2554_v26 = vsel %vm13186_vm5, %v11181_v35, %v2553_v44  ;;  %v2555_v32 = vrot.slane %v2553_v44, 4  ;;  %2800 = vrot.lane.b32.xlu0 %v11229_v45, %s12840_s21  ;;  %v3733_v27 = vsel %vm13666_vm12, %v3731_v24, %v3732_v30  ;;  %v3943_v37 = vshrl.u32 %v14258_v9, 16 }
 0x160   : > { %v3946_v28 = vshll.u32 %v14258_v9, 16  ;;  %v11429_v4 = vcombine.low %v3730_v34, %v3733_v27  ;;  %v1872_v21 = vsel %vm13666_vm12, %v11091_v52, %v1871_v17  ;;  %v1873_v5 = vrot.slane %v1871_v17, 4  ;;  %v14300_v52 = vpop.permute.xlu1 %2778 }
 0x161   : > { %v2557_v23 = vsel %vm13186_vm5, %v2555_v32, %v2556_v48  ;;  %v3945_v61 = vrot.slane %v3943_v37, 4  ;;  %v3952_v41 = vshll.u32 %v11369_v39, 16  ;;  %v3956_v1 = vshrl.u32 %v11369_v39, 16 }
 0x162   : > { %v11245_v36 = vcombine.low %v2554_v26, %v2557_v23  ;;  %v3948_v60 = vrot.slane %v3946_v28, 5  ;;  %4356 = vrot.lane.b32.xlu1 %v11429_v4, %s12839_s20  ;;  %v1875_v14 = vsel %vm13666_vm12, %v1873_v5, %v1874_v58  ;;  %v11445_v16 = vcombine.low %v14258_v9, %v11369_v39  ;;  %v11589_v5 = vld [vmem:[%s12887_s19 + $0x3c] sm:$0xc] }
 0x163   : > { %v5139_v57 = vshrl.u32 %v11515_v46, 16  ;;  %v11187_v40 = vcombine.low %v1872_v21, %v1875_v14  ;;  %v14293_v30 = vrot.slane %v3952_v41, 5  ;;  %v5142_v35 = vshll.u32 %v11515_v46, 16  ;;  %v12471_v17 = vld [vmem:[#allocation2 + $0x74] ss:$28 sps:$4 sm:$0xff]  }
 0x164   : > { %2880 = vrot.lane.b32.xlu0 %v11245_v36, %s12841_s22  ;;  %v5148_v44 = vshrl.u32 %v14283_v20, 16  ;;  %v3958_v18 = vrot.slane %v3956_v1, 4  ;;  %v5151_v34 = vshll.u32 %v14283_v20, 16  ;;  %v5158_v24 = vshrl.u32 %v14286_v29, 16  ;;  %v11397_v21 = vld [vmem:[%s12887_s19 + $0x44] sm:$0x1]  ;;  %10661 = vmatprep.subr.bf16.mxu0 %v12471_v17 }
 0x165   : > { %v5141_v45 = vrot.slane %v5139_v57, 5  ;;  %v2895_v48 = vsel %vm1504_vm9, %v11187_v40, %v2701_v12  ;;  %v5144_v9 = vrot.slane %v5142_v35, 6  ;;  %v5161_v32 = vshll.u32 %v14286_v29, 16  ;;  %v12473_v12 = vld [vmem:[#allocation2 + $0x70] ss:$28 sps:$4 sm:$0xff]  }
 0x166   : > { %v5150_v26 = vrot.slane %v5148_v44, 5  ;;  %4468 = vrot.lane.b32.xlu1 %v11445_v16, %s12840_s21  ;;  %v5153_v39 = vrot.slane %v5151_v34, 6  ;;  %v5160_v27 = vrot.slane %v5158_v24, 5  ;;  %v2941_v58 = vsel %vm1553_vm13, %v2895_v48, %v14252_v15  ;;  %v14310_v16 = vpop.permute.xlu0 %2698  ;;  %10662 = vmatpush1.bf16.xpose.msra.mxu0 %v12473_v12  ;;  %v14315_v40 = vld [vmem:[%s12887_s19 + $0x84] sm:$0xf] }
 0x167   : > { %v1590_v37 = vsel %vm1586_vm14, %v13835_v6, %v1475_v47  ;;  %v5145_v28 = vor.u32 %v5144_v9, %v5141_v45  ;;  %v5163_v46 = vrot.slane %v5161_v32, 6  ;;  %v2973_v4 = vsel %vm1586_vm14, %v2941_v58, %v2861_v50  ;;  %v1764_v47 = vld [vmem:[%s12887_s19 + $0x4] sm:$0xf]  ;;  %v1763_v24 = vld [vmem:[%s12887_s19] sm:$0xc] }
 0x168   : > { %v11060_v23 = vcombine.low %v1590_v37, %v1590_v37  ;;  %v5154_v36 = vor.u32 %v5153_v39, %v5150_v26  ;;  %v11252_v41 = vcombine.low %v2973_v4, %v2973_v4  ;;  %v11253_v14 = vcombine.high %v2973_v4, %v2973_v4  ;;  %v1765_v9 = vld [vmem:[%s12887_s19 + $0x8] sm:$0x3]  ;;  %v2859_v26 = vpop.permute.xlu1 %2858 }
 0x169   : > { %v11061_v1 = vcombine.high %v1590_v37, %v1590_v37  ;;  %v5146_v6 = vrot.slane %v5145_v28, 4  ;;  %v5164_v15 = vor.u32 %v5163_v46, %v5160_v27  ;;  %v3949_v57 = vor.u32 %v3948_v60, %v3945_v61  ;;  %v14331_v28 = vld [vmem:[%s12887_s19 + $0x88] sm:$0xf] }
 0x16a   : > { %1733 = vst [vmem:[#allocation2 + $0x38] sm:$0xf] %v11060_v23  ;;  %v3959_v50 = vor.u32 %v3958_v18, %v14293_v30  ;;  %v5156_v35 = vrot.slane %v5154_v36, 4  ;;  %3116 = vst [vmem:[#allocation2 + $0x3c] sm:$0xf] %v11252_v41  ;;  %v3962_v44 = vshll.u32 %v11397_v21, 16  ;;  %v1473_v21 = vpop.permute.xlu0 %1472 }
 0x16b   : > { %3117 = vst [vmem:[#allocation2 + $0x58] sm:$0xf] %v11253_v14  ;;  %1734 = vst [vmem:[#allocation2 + $0x54] sm:$0xf] %v11061_v1  ;;  %v11605_v45 = vrot.slane %v11589_v5, 10  ;;  %v5573_v34 = vrot.slane %v14283_v20, 6  ;;  %v5155_v48 = vsel %vm13345_vm8, %v5146_v6, %v5154_v36 }
 0x16c   : > { %v3950_v61 = vrot.slane %v3949_v57, 4  ;;  %v3960_v60 = vrot.slane %v3959_v50, 4  ;;  %v5576_v18 = vrot.slane %v14286_v29, 6  ;;  %v5165_v32 = vsel %vm13345_vm8, %v5156_v35, %v5164_v15  ;;  %v14339_v5 = vld [vmem:[%s12887_s19 + $0x8c] sm:$0x1] }
 0x16d   : > { %v3964_v17 = vrot.slane %v3962_v44, 5  ;;  %v5574_v39 = vsel %vm13666_vm12, %v11605_v45, %v5573_v34  ;;  %v5575_v20 = vrot.slane %v5573_v34, 4  ;;  %v11669_v27 = vcombine.low %v5155_v48, %v5165_v32  ;;  %v14349_v50 = vld [vmem:[%s12887_s19 + $0x78] sm:$0xe] }
 0x16e   : > { %v3955_v58 = vsel %vm12915_vm2, %v3950_v61, %v14293_v30  ;;  %v11090_v37 = vrot.slane %v1763_v24, 10  ;;  %v1864_v12 = vrot.slane %v1764_v47, 6  ;;  %v1867_v4 = vrot.slane %v1765_v9, 6  ;;  %v1809_v47 = vld [vmem:[%s12887_s19 + $0xb8] sm:$0xf]  ;;  %v1423_v24 = vpop.permute.xlu1 %1422 }
 0x16f   : > { %v3965_v29 = vsel %vm12915_vm2, %v3960_v60, %v3964_v17  ;;  %v5577_v46 = vsel %vm13666_vm12, %v5575_v20, %v5576_v18  ;;  %v2267_v23 = vshrl.u32 %v14315_v40, 16  ;;  %5800 = vrot.lane.b32.xlu0 %v11669_v27, %s12839_s20  ;;  %v2270_v6 = vshll.u32 %v14315_v40, 16  ;;  %v1808_v9 = vld [vmem:[%s12887_s19 + $0xb4] sm:$0xc]  ;;  %v12470_v17 = vld [vmem:[%s12887_s19 + $0x48] sm:$0xff]  }
 0x170   : > { %v11461_v30 = vcombine.low %v3955_v58, %v3965_v29  ;;  %v11685_v36 = vcombine.low %v5574_v39, %v5577_v46  ;;  %v1865_v41 = vsel %vm13666_vm12, %v11090_v37, %v1864_v12  ;;  %v1866_v14 = vrot.slane %v1864_v12, 4  ;;  %v12710_v12 = vld [vmem:[%s12887_s19 + $0x7c] sm:$0xf] }
 0x171   : > { %v2269_v1 = vrot.slane %v2267_v23, 4  ;;  %v2280_v15 = vshrl.u32 %v14331_v28, 16  ;;  %v11212_v57 = vcombine.low %v14315_v40, %v14331_v28  ;;  %v1588_v44 = vsel %vm1586_vm14, %v13842_v22, %v1473_v21  ;;  %v1810_v21 = vld [vmem:[%s12887_s19 + $0xbc] sm:$0x3] }
 0x172   : > { %4548 = vrot.lane.b32.xlu1 %v11461_v30, %s12841_s22  ;;  %v1868_v35 = vsel %vm13666_vm12, %v1866_v14, %v1867_v4  ;;  %v2276_v45 = vshll.u32 %v14331_v28, 16  ;;  %v2286_v34 = vshll.u32 %v14339_v5, 16  ;;  %v12474_v48 = vld [vmem:[#allocation2 + $0x3c] ss:$28 sps:$4 sm:$0xff]   ;;  %v2272_v40 = vrot.slane %v2270_v6, 5  ;;  %v2729_v6 = vpop.permute.xlu0 %2728 }
 0x173   : > { %v11186_v61 = vcombine.low %v1865_v41, %v1868_v35  ;;  %v11058_v60 = vcombine.low %v1588_v44, %v1588_v44  ;;  %v11059_v18 = vcombine.high %v1588_v44, %v1588_v44  ;;  %v12476_v32 = vld [vmem:[#allocation2 + $0x38] ss:$28 sps:$4 sm:$0xff]   ;;  %5880 = vrot.lane.b32.xlu0 %v11685_v36, %s12840_s21  ;;  %v2282_v20 = vrot.slane %v2280_v15, 4  ;;  %10663 = vmatprep.subr.bf16.mxu0 %v12474_v48  ;;  %v11164_v15 = vld [vmem:[%s12887_s19 + $0x84] sm:$0xe] }
 0x174   : > { %v2278_v39 = vrot.slane %v2276_v45, 5  ;;  %v2288_v22 = vrot.slane %v2286_v34, 5  ;;  %v10988_v27 = vrot.slane %v14349_v50, 9  ;;  %v2273_v37 = vor.u32 %v2272_v40, %v2269_v1  ;;  %10664 = vmatpush1.bf16.xpose.msra.mxu0 %v12476_v32 }
 0x175   : > { %v2892_v58 = vsel %vm1504_vm9, %v11186_v61, %v14310_v16  ;;  %1731 = vst [vmem:[#allocation2] sm:$0xf] %v11058_v60  ;;  %1732 = vst [vmem:[#allocation2 + $0x1c] sm:$0xf] %v11059_v18  ;;  %v773_v29 = vrot.slane %v12710_v12, 5  ;;  %v1585_v46 = vsel %vm1553_vm13, %v13804_v11, %v1423_v24  ;;  %v11105_v30 = vrot.slane %v1808_v9, 10 }
 0x176   : > { %2718 = vrot.lane.b32.xlu1 %v11212_v57, %s12839_s20  ;;  %v2939_v4 = vsel %vm1553_vm13, %v2892_v58, %v14300_v52  ;;  %v2283_v23 = vor.u32 %v2282_v20, %v2278_v39  ;;  %v1969_v36 = vrot.slane %v1809_v47, 6  ;;  %v2274_v41 = vrot.slane %v2273_v37, 4  ;;  %v823_v60 = vld [vmem:[%s12887_s19 + $0x80] sm:$0x3] }
 0x177   : > { %v2971_v16 = vsel %vm1586_vm14, %v2939_v4, %v2859_v26  ;;  %v774_v14 = vsel %vm13186_vm5, %v10988_v27, %v773_v29  ;;  %v775_v1 = vrot.slane %v773_v29, 4  ;;  %5992 = vrot.lane.b32.xlu0 %v12470_v17, %s12841_s22  ;;  %v17640_v26 = vrot.slane %v13098_v43, 5  ;;  %v1503_v17 = vpop.permute.xlu1 %1502  ;;  %v2809_v29 = vpop.permute.xlu0 %2808 }
 0x178   : > { %v11250_v11 = vcombine.low %v2971_v16, %v2971_v16  ;;  %v11251_v57 = vcombine.high %v2971_v16, %v2971_v16  ;;  %v2284_v35 = vrot.slane %v2283_v23, 4  ;;  %v1970_v52 = vsel %vm13666_vm12, %v11105_v30, %v1969_v36  ;;  %v11512_v30 = vld [vmem:[%s12887_s19 + $0x30] sm:$0xe] }
 0x179   : > { %v2279_v47 = vsel %vm12915_vm2, %v2274_v41, %v2278_v39  ;;  %v777_v44 = vsel %vm13186_vm5, %v775_v1, %v17640_v26  ;;  %v1971_v45 = vrot.slane %v1969_v36, 4  ;;  %v1972_v34 = vrot.slane %v1810_v21, 6  ;;  %v14410_v1 = vld [vmem:[%s12887_s19 + $0x38] sm:$0x3]  ;;  %v11289_v26 = vld [vmem:[%s12887_s19 + $0x28] sm:$0xf] }
 0x17a   : > { %3114 = vst [vmem:[#allocation2 + $0x4] sm:$0xf] %v11250_v11  ;;  %3115 = vst [vmem:[#allocation2 + $0x20] sm:$0xf] %v11251_v57  ;;  %v2289_v24 = vsel %vm12915_vm2, %v2284_v35, %v2288_v22  ;;  %v11036_v48 = vcombine.low %v774_v14, %v777_v44  ;;  %v11180_v61 = vrot.slane %v11164_v15, 9  ;;  %v2546_v40 = vrot.slane %v14331_v28, 5 }
 0x17b   : > { %v11228_v18 = vcombine.low %v2279_v47, %v2289_v24  ;;  %v1973_v9 = vsel %vm13666_vm12, %v1971_v45, %v1972_v34  ;;  %v2549_v43 = vrot.slane %v14339_v5, 5  ;;  %v1063_v32 = vshrl.u32 %v14349_v50, 16  ;;  %v14407_v14 = vld [vmem:[%s12887_s19 + $0x34] sm:$0xf]  ;;  %v11332_v35 = vld [vmem:[%s12887_s19 + $0x24] sm:$0xc] }
 0x17c   : > { %1412 = vrot.lane.b32.xlu0 %v11036_v48, %s12840_s21  ;;  %v11201_v39 = vcombine.low %v1970_v52, %v1973_v9  ;;  %v2547_v20 = vsel %vm13186_vm5, %v11180_v61, %v2546_v40  ;;  %v2548_v22 = vrot.slane %v2546_v40, 4  ;;  %v1066_v28 = vshll.u32 %v14349_v50, 16  ;;  %v11290_v44 = vld [vmem:[%s12887_s19 + $0x2c] sm:$0x3]  ;;  %v11303_v45 = vld [vmem:[%s12887_s19 + $0x60] sm:$0xe] }
 0x17d   : > { %2798 = vrot.lane.b32.xlu1 %v11228_v18, %s12840_s21  ;;  %v1065_v27 = vrot.slane %v1063_v32, 5  ;;  %v17641_v5 = vshrl.u32 %v13091_v33, 16  ;;  %v1077_v37 = vshrl.u32 %v823_v60, 16  ;;  %v1080_v12 = vshll.u32 %v823_v60, 16  ;;  %v12480_v32 = vld [vmem:[#allocation2] ss:$28 sps:$4 sm:$0xff]  }
 0x17e   : > { %v2937_v4 = vsel %vm1504_vm9, %v11201_v39, %v2729_v6  ;;  %v2550_v23 = vsel %vm13186_vm5, %v2548_v22, %v2549_v43  ;;  %v1068_v21 = vrot.slane %v1066_v28, 6  ;;  %v1618_v50 = vsel %vm1586_vm14, %v1585_v46, %v1503_v17 }
 0x17f   : > { %v1071_v58 = vrot.slane %v17641_v5, 5  ;;  %v11244_v36 = vcombine.low %v2547_v20, %v2550_v23  ;;  %v1079_v33 = vrot.slane %v1077_v37, 5  ;;  %v1082_v41 = vrot.slane %v1080_v12, 6  ;;  %v14426_v37 = vpop.permute.xlu1 %4364 }
 0x180   : > { %v1069_v6 = vor.u32 %v1068_v21, %v1065_v27  ;;  %v11088_v15 = vcombine.low %v1618_v50, %v1618_v50  ;;  %v11089_v11 = vcombine.high %v1618_v50, %v1618_v50  ;;  %v2969_v57 = vsel %vm1553_vm13, %v2937_v4, %v2809_v29  ;;  %v2889_v21 = vpop.permute.xlu0 %2888 }
 0x181   : > { %v1073_v16 = vor.u32 %v13122_v62, %v1071_v58  ;;  %2878 = vrot.lane.b32.xlu1 %v11244_v36, %s12841_s22  ;;  %v1083_v52 = vor.u32 %v1082_v41, %v1079_v33  ;;  %v5111_v47 = vshrl.u32 %v11512_v30, 16  ;;  %v5114_v62 = vshll.u32 %v11512_v30, 16  ;;  %v12478_v40 = vld [vmem:[#allocation2 + $0x4] ss:$28 sps:$4 sm:$0xff]  }
 0x182   : > { %v1070_v34 = vrot.slane %v1069_v6, 4  ;;  %1761 = vst [vmem:[#allocation2 + $0x348] sm:$0xf] %v11088_v15  ;;  %1762 = vst [vmem:[#allocation2 + $0x364] sm:$0xf] %v11089_v11  ;;  %v5120_v24 = vshrl.u32 %v14407_v14, 16  ;;  %10665 = vmatprep.subr.bf16.mxu0 %v12478_v40 }
 0x183   : > { %v1075_v46 = vrot.slane %v1073_v16, 4  ;;  %v5123_v48 = vshll.u32 %v14407_v14, 16  ;;  %v5130_v61 = vshrl.u32 %v14410_v1, 16  ;;  %v5113_v18 = vrot.slane %v5111_v47, 5  ;;  %10666 = vmatpush1.bf16.xpose.msra.mxu0 %v12480_v32  ;;  %v4477_v32 = vpop.permute.xlu1 %4476 }
 0x184   : > { %v5116_v9 = vrot.slane %v5114_v62, 6  ;;  %v5133_v43 = vshll.u32 %v14410_v1, 16  ;;  %v1074_v17 = vsel %vm13345_vm8, %v1070_v34, %v1073_v16  ;;  %v5122_v39 = vrot.slane %v5120_v24, 5 }
 0x185   : > { %v1084_v60 = vsel %vm13345_vm8, %v1075_v46, %v1083_v52  ;;  %v5125_v20 = vrot.slane %v5123_v48, 6  ;;  %v5132_v22 = vrot.slane %v5130_v61, 5  ;;  %v11348_v58 = vrot.slane %v11332_v35, 10 }
 0x186   : > { %v11052_v28 = vcombine.low %v1074_v17, %v1084_v60  ;;  %v5117_v27 = vor.u32 %v5116_v9, %v5113_v18  ;;  %v5135_v5 = vrot.slane %v5133_v43, 6  ;;  %v3722_v29 = vrot.slane %v11289_v26, 6  ;;  %v11366_v9 = vld [vmem:[%s12887_s19 + $0x30] sm:$0xf]  ;;  %v11367_v43 = vld [vmem:[%s12887_s19 + $0x34] sm:$0xf] }
 0x187   : > { %v5126_v12 = vor.u32 %v5125_v20, %v5122_v39  ;;  %v3725_v4 = vrot.slane %v11290_v44, 6  ;;  %v3391_v23 = vshrl.u32 %v11303_v45, 16  ;;  %v3394_v36 = vshll.u32 %v11303_v45, 16  ;;  %v11588_v44 = vld [vmem:[%s12887_s19 + $0x30] sm:$0xc] }
 0x188   : > { %1492 = vrot.lane.b32.xlu0 %v11052_v28, %s12841_s22  ;;  %v5118_v50 = vrot.slane %v5117_v27, 4  ;;  %v5136_v30 = vor.u32 %v5135_v5, %v5132_v22  ;;  %v17642_v16 = vshrl.u32 %v13652_v2, 16  ;;  %v3723_v6 = vsel %vm13666_vm12, %v11348_v58, %v3722_v29  ;;  %v14449_v28 = vpop.permute.xlu0 %5808 }
 0x189   : > { %v5128_v41 = vrot.slane %v5126_v12, 4  ;;  %v3724_v15 = vrot.slane %v3722_v29, 4  ;;  %v3393_v11 = vrot.slane %v3391_v23, 5  ;;  %v3396_v46 = vrot.slane %v3394_v36, 6 }
 0x18a   : > { %v3402_v33 = vrot.slane %v17642_v16, 5  ;;  %v5127_v35 = vsel %vm13345_vm8, %v5118_v50, %v5126_v12  ;;  %v17643_v52 = vshll.u32 %v13652_v2, 16  ;;  %v17644_v62 = vshrl.u32 %v13663_v38, 16 }
 0x18b   : > { %v5137_v45 = vsel %vm13345_vm8, %v5128_v41, %v5136_v30  ;;  %v3726_v34 = vsel %vm13666_vm12, %v3724_v15, %v3725_v4  ;;  %v17645_v24 = vshll.u32 %v13663_v38, 16  ;;  %v3001_v61 = vsel %vm1586_vm14, %v2969_v57, %v2889_v21  ;;  %v11396_v41 = vld [vmem:[%s12887_s19 + $0x38] sm:$0x1] }
 0x18c   : > { %v3405_v47 = vrot.slane %v17643_v52, 6  ;;  %v3412_v26 = vrot.slane %v17644_v62, 5  ;;  %v11668_v40 = vcombine.low %v5127_v35, %v5137_v45  ;;  %v11428_v60 = vcombine.low %v3723_v6, %v3726_v34  ;;  %v12711_v35 = vld [vmem:[%s12887_s19 + $0x6c] sm:$0xe]  ;;  %v4557_v52 = vpop.permute.xlu1 %4556 }
 0x18d   : > { %v3415_v48 = vrot.slane %v17645_v24, 6  ;;  %v3397_v18 = vor.u32 %v3396_v46, %v3393_v11  ;;  %v11280_v39 = vcombine.low %v3001_v61, %v3001_v61  ;;  %v11281_v20 = vcombine.high %v3001_v61, %v3001_v61  ;;  %v5889_v24 = vpop.permute.xlu0 %5888 }
 0x18e   : > { %v3406_v2 = vor.u32 %v3405_v47, %v3402_v33  ;;  %v11604_v22 = vrot.slane %v11588_v44, 10  ;;  %5798 = vrot.lane.b32.xlu1 %v11668_v40, %s12839_s20  ;;  %4354 = vrot.lane.b32.xlu0 %v11428_v60, %s12839_s20  ;;  %v5566_v27 = vrot.slane %v14407_v14, 6  ;;  %v5569_v5 = vrot.slane %v14410_v1, 6  ;;  %v11529_v1 = vld [vmem:[%s12887_s19 + $0x74] sm:$0x1] }
 0x18f   : > { %v3416_v17 = vor.u32 %v3415_v48, %v3412_v26  ;;  %v3398_v38 = vrot.slane %v3397_v18, 4  ;;  %3144 = vst [vmem:[#allocation2 + $0x34c] sm:$0xf] %v11280_v39  ;;  %3145 = vst [vmem:[#allocation2 + $0x368] sm:$0xf] %v11281_v20  ;;  %v3919_v58 = vshrl.u32 %v11366_v9, 16  ;;  %v11444_v11 = vcombine.low %v11366_v9, %v11367_v43 }
 0x190   : > { %v3408_v57 = vrot.slane %v3406_v2, 4  ;;  %v3922_v12 = vshll.u32 %v11366_v9, 16  ;;  %v3928_v29 = vshll.u32 %v11367_v43, 16  ;;  %v3932_v4 = vshrl.u32 %v11367_v43, 16  ;;  %v14467_v47 = vld [vmem:[%s12887_s19 + $0x78] sm:$0xf] }
 0x191   : > { %v3407_v23 = vsel %vm13345_vm8, %v3398_v38, %v3406_v2  ;;  %v5567_v14 = vsel %vm13666_vm12, %v11604_v22, %v5566_v27  ;;  %v5568_v50 = vrot.slane %v5566_v27, 4  ;;  %v3921_v36 = vrot.slane %v3919_v58, 4  ;;  %v12712_v44 = vld [vmem:[%s12887_s19 + $0x70] sm:$0xf]  ;;  %v14475_v18 = vld [vmem:[%s12887_s19 + $0x7c] sm:$0xf] }
 0x192   : > { %v3417_v21 = vsel %vm13345_vm8, %v3408_v57, %v3416_v17  ;;  %v3924_v16 = vrot.slane %v3922_v12, 5  ;;  %v3930_v33 = vrot.slane %v3928_v29, 5  ;;  %v3934_v15 = vrot.slane %v3932_v4, 4  ;;  %4466 = vrot.lane.b32.xlu0 %v11444_v11, %s12840_s21  ;;  %v14478_v2 = vld [vmem:[%s12887_s19 + $0x80] sm:$0x1] }
 0x193   : > { %v11417_v30 = vcombine.low %v3407_v23, %v3417_v21  ;;  %v5570_v6 = vsel %vm13666_vm12, %v5568_v50, %v5569_v5  ;;  %v11561_v46 = vrot.slane %v12711_v35, 9  ;;  %v4977_v45 = vrot.slane %v12712_v44, 5  ;;  %v12481_v43 = vld [vmem:[%s12887_s19 + $0x3c] sm:$0xff]   ;;  %v1805_v20 = vld [vmem:[%s12887_s19 + $0xa8] sm:$0xc] }
 0x194   : > { %v11684_v26 = vcombine.low %v5567_v14, %v5570_v6  ;;  %v4980_v34 = vrot.slane %v11529_v1, 5  ;;  %v3925_v61 = vor.u32 %v3924_v16, %v3921_v36  ;;  %v3935_v40 = vor.u32 %v3934_v15, %v3930_v33  ;;  %v12485_v4 = vld [vmem:[#allocation2 + $0x348] ss:$28 sps:$4 sm:$0xff]   ;;  %v1806_v1 = vld [vmem:[%s12887_s19 + $0xac] sm:$0xf]  ;;  %v6001_v15 = vpop.permute.xlu0 %6000 }
 0x195   : > { %v4597_v62 = vsel %vm1504_vm9, %v11417_v30, %v14426_v37  ;;  %v3938_v60 = vshll.u32 %v11396_v41, 16  ;;  %v4978_v37 = vsel %vm13186_vm5, %v11561_v46, %v4977_v45  ;;  %v4979_v9 = vrot.slane %v4977_v45, 4  ;;  %v1807_v30 = vld [vmem:[%s12887_s19 + $0xb0] sm:$0x3]  ;;  %v11163_v11 = vld [vmem:[%s12887_s19 + $0x78] sm:$0xe] }
 0x196   : > { %v4637_v48 = vsel %vm1553_vm13, %v4597_v62, %v4477_v32  ;;  %5878 = vrot.lane.b32.xlu1 %v11684_v26, %s12840_s21  ;;  %v2243_v39 = vshrl.u32 %v14467_v47, 16  ;;  %v3926_v32 = vrot.slane %v3925_v61, 4  ;;  %v3936_v22 = vrot.slane %v3935_v40, 4  ;;  %v12483_v29 = vld [vmem:[#allocation2 + $0x34c] ss:$28 sps:$4 sm:$0xff]   ;;  %v2727_v62 = vpop.permute.xlu1 %2726 }
 0x197   : > { %v4669_v17 = vsel %vm1586_vm14, %v4637_v48, %v4557_v52  ;;  %v3940_v38 = vrot.slane %v3938_v60, 5  ;;  %v4981_v27 = vsel %vm13186_vm5, %v4979_v9, %v4980_v34  ;;  %v2246_v12 = vshll.u32 %v14467_v47, 16  ;;  %10667 = vmatprep.subr.bf16.mxu0 %v12483_v29 }
 0x198   : > { %v11488_v57 = vcombine.low %v4669_v17, %v4669_v17  ;;  %v11489_v5 = vcombine.high %v4669_v17, %v4669_v17  ;;  %v2245_v58 = vrot.slane %v2243_v39, 4  ;;  %v11657_v23 = vcombine.low %v4978_v37, %v4981_v27  ;;  %10668 = vmatpush2.bf16.xpose.msra.mxu0 %v12485_v4 }
 0x199   : > { %v3931_v21 = vsel %vm12915_vm2, %v3926_v32, %v3930_v33  ;;  %v3941_v14 = vsel %vm12915_vm2, %v3936_v22, %v3940_v38  ;;  %v2252_v50 = vshll.u32 %v14475_v18, 16  ;;  %v2248_v16 = vrot.slane %v2246_v12, 5 }
 0x19a   : > { %4812 = vst [vmem:[#allocation2 + $0x190] sm:$0xf] %v11488_v57  ;;  %5990 = vrot.lane.b32.xlu1 %v12481_v43, %s12841_s22  ;;  %v11460_v36 = vcombine.low %v3931_v21, %v3941_v14  ;;  %4813 = vst [vmem:[#allocation2 + $0x1ac] sm:$0xf] %v11489_v5  ;;  %v2256_v41 = vshrl.u32 %v14475_v18, 16  ;;  %v2262_v6 = vshll.u32 %v14478_v2, 16  ;;  %v6041_v33 = vsel %vm1504_vm9, %v11657_v23, %v14449_v28  ;;  %v2807_v12 = vpop.permute.xlu1 %2806 }
 0x19b   : > { %v2254_v35 = vrot.slane %v2252_v50, 5  ;;  %v11211_v46 = vcombine.low %v14467_v47, %v14475_v18  ;;  %v11104_v52 = vrot.slane %v1805_v20, 10  ;;  %v6081_v26 = vsel %vm1553_vm13, %v6041_v33, %v5889_v24  ;;  %v822_v43 = vld [vmem:[%s12887_s19 + $0x74] sm:$0x3]  ;;  %v11509_v23 = vld [vmem:[%s12887_s19 + $0x24] sm:$0xe] }
 0x19c   : > { %4546 = vrot.lane.b32.xlu0 %v11460_v36, %s12841_s22  ;;  %v2249_v44 = vor.u32 %v2248_v16, %v2245_v58  ;;  %v2258_v45 = vrot.slane %v2256_v41, 4  ;;  %v2264_v34 = vrot.slane %v2262_v6, 5  ;;  %v1962_v48 = vrot.slane %v1806_v1, 6  ;;  %v14534_v36 = vld [vmem:[%s12887_s19 + $0x2c] sm:$0x3] }
 0x19d   : > { %v1965_v61 = vrot.slane %v1807_v30, 6  ;;  %v6113_v40 = vsel %vm1586_vm14, %v6081_v26, %v6001_v15  ;;  %v11179_v28 = vrot.slane %v11163_v11, 9  ;;  %v2539_v20 = vrot.slane %v14475_v18, 5  ;;  %v14531_v30 = vld [vmem:[%s12887_s19 + $0x28] sm:$0xf] }
 0x19e   : > { %v2250_v60 = vrot.slane %v2249_v44, 4  ;;  %v2259_v37 = vor.u32 %v2258_v45, %v2254_v35  ;;  %v11728_v9 = vcombine.low %v6113_v40, %v6113_v40  ;;  %v11729_v47 = vcombine.high %v6113_v40, %v6113_v40  ;;  %v11331_v15 = vld [vmem:[%s12887_s19 + $0x18] sm:$0xc] }
 0x19f   : > { %v1963_v17 = vsel %vm13666_vm12, %v11104_v52, %v1962_v48  ;;  %v1964_v39 = vrot.slane %v1962_v48, 4  ;;  %v2542_v24 = vrot.slane %v14478_v2, 5  ;;  %v1046_v38 = vor.u32 %v13291_v13, %v13289_v42  ;;  %v1421_v13 = vpop.permute.xlu0 %1420  ;;  %v11286_v52 = vld [vmem:[%s12887_s19 + $0x1c] sm:$0xf] }
 0x1a0   : > { %v2255_v32 = vsel %vm12915_vm2, %v2250_v60, %v2254_v35  ;;  %v2260_v22 = vrot.slane %v2259_v37, 4  ;;  %2716 = vrot.lane.b32.xlu0 %v11211_v46, %s12839_s20  ;;  %6256 = vst [vmem:[#allocation2 + $0x194] sm:$0xf] %v11728_v9  ;;  %6257 = vst [vmem:[#allocation2 + $0x1b0] sm:$0xf] %v11729_v47  ;;  %v17646_v57 = vshrl.u32 %v13032_v59, 16  ;;  %v2540_v2 = vsel %vm13186_vm5, %v11179_v28, %v2539_v20  ;;  %v2887_v60 = vpop.permute.xlu1 %2886 }
 0x1a1   : > { %v1966_v18 = vsel %vm13666_vm12, %v1964_v39, %v1965_v61  ;;  %v2541_v5 = vrot.slane %v2539_v20, 4  ;;  %v1054_v58 = vshrl.u32 %v822_v43, 16  ;;  %v1047_v42 = vrot.slane %v1046_v38, 4 }
 0x1a2   : > { %v1048_v27 = vrot.slane %v17646_v57, 5  ;;  %v2265_v29 = vsel %vm12915_vm2, %v2260_v22, %v2264_v34  ;;  %v11200_v4 = vcombine.low %v1963_v17, %v1966_v18  ;;  %v1057_v1 = vshll.u32 %v822_v43, 16  ;;  %v11287_v34 = vld [vmem:[%s12887_s19 + $0x20] sm:$0x3]  ;;  %v12490_v22 = vld [vmem:[#allocation2 + $0x190] ss:$28 sps:$4 sm:$0xff]  }
 0x1a3   : > { %v11227_v21 = vcombine.low %v2255_v32, %v2265_v29  ;;  %v2543_v14 = vsel %vm13186_vm5, %v2541_v5, %v2542_v24  ;;  %v1056_v50 = vrot.slane %v1054_v58, 5  ;;  %v1583_v35 = vsel %vm1553_vm13, %v13812_v49, %v1421_v13  ;;  %v1501_v32 = vpop.permute.xlu0 %1500 }
 0x1a4   : > { %v1050_v59 = vor.u32 %v13058_v51, %v1048_v27  ;;  %v2934_v16 = vsel %vm1504_vm9, %v11200_v4, %v2727_v62  ;;  %v11243_v41 = vcombine.low %v2540_v2, %v2543_v14  ;;  %v1059_v11 = vrot.slane %v1057_v1, 6  ;;  %v11587_v2 = vld [vmem:[%s12887_s19 + $0x24] sm:$0xc] }
 0x1a5   : > { %2796 = vrot.lane.b32.xlu1 %v11227_v21, %s12840_s21  ;;  %v2967_v33 = vsel %vm1553_vm13, %v2934_v16, %v2807_v12  ;;  %v5083_v46 = vshrl.u32 %v11509_v23, 16  ;;  %v5086_v26 = vshll.u32 %v11509_v23, 16  ;;  %v5092_v44 = vshrl.u32 %v14531_v30, 16  ;;  %v11364_v23 = vld [vmem:[%s12887_s19 + $0x24] sm:$0xf] }
 0x1a6   : > { %v1051_v51 = vsel %vm13345_vm8, %v1047_v42, %v1050_v59  ;;  %v1052_v6 = vrot.slane %v1050_v59, 4  ;;  %v5095_v62 = vshll.u32 %v14531_v30, 16  ;;  %v5102_v45 = vshrl.u32 %v14534_v36, 16  ;;  %v11365_v16 = vld [vmem:[%s12887_s19 + $0x28] sm:$0xf] }
 0x1a7   : > { %v1060_v48 = vor.u32 %v1059_v11, %v1056_v50  ;;  %v5085_v61 = vrot.slane %v5083_v46, 5  ;;  %v5105_v40 = vshll.u32 %v14534_v36, 16  ;;  %v11347_v28 = vrot.slane %v11331_v15, 10  ;;  %v12488_v43 = vld [vmem:[#allocation2 + $0x194] ss:$28 sps:$4 sm:$0xff]   ;;  %v5807_v11 = vpop.permute.xlu1 %5806 }
 0x1a8   : > { %v5088_v37 = vrot.slane %v5086_v26, 6  ;;  %v5094_v9 = vrot.slane %v5092_v44, 5  ;;  %v5097_v49 = vrot.slane %v5095_v62, 6  ;;  %v5104_v47 = vrot.slane %v5102_v45, 5  ;;  %10704 = vmatprep.subr.bf16.mxu1 %v12488_v43  ;;  %v11300_v26 = vld [vmem:[%s12887_s19 + $0x54] sm:$0xe] }
 0x1a9   : > { %2876 = vrot.lane.b32.xlu1 %v11243_v41, %s12841_s22  ;;  %v1061_v17 = vsel %vm13345_vm8, %v1052_v6, %v1060_v48  ;;  %v5107_v39 = vrot.slane %v5105_v40, 6  ;;  %v3715_v20 = vrot.slane %v11286_v52, 6  ;;  %v3718_v24 = vrot.slane %v11287_v34, 6  ;;  %10705 = vmatpush1.bf16.xpose.msra.mxu1 %v12490_v22 }
 0x1aa   : > { %v11051_v38 = vcombine.low %v1051_v51, %v1061_v17  ;;  %v5089_v57 = vor.u32 %v5088_v37, %v5085_v61  ;;  %v5098_v27 = vor.u32 %v5097_v49, %v5094_v9  ;;  %v2999_v18 = vsel %vm1586_vm14, %v2967_v33, %v2887_v60  ;;  %v14576_v60 = vpop.permute.xlu0 %4362 }
 0x1ab   : > { %v5108_v5 = vor.u32 %v5107_v39, %v5104_v47  ;;  %v3716_v58 = vsel %vm13666_vm12, %v11347_v28, %v3715_v20  ;;  %v3717_v12 = vrot.slane %v3715_v20, 4  ;;  %v11278_v29 = vcombine.low %v2999_v18, %v2999_v18  ;;  %v12714_v47 = vld [vmem:[%s12887_s19 + $0x64] sm:$0xf] }
 0x1ac   : > { %1490 = vrot.lane.b32.xlu0 %v11051_v38, %s12841_s22  ;;  %v5090_v4 = vrot.slane %v5089_v57, 4  ;;  %v5100_v42 = vrot.slane %v5098_v27, 4  ;;  %v11279_v59 = vcombine.high %v2999_v18, %v2999_v18  ;;  %v1616_v13 = vsel %vm1586_vm14, %v1583_v35, %v1501_v32  ;;  %v11395_v32 = vld [vmem:[%s12887_s19 + $0x2c] sm:$0x1] }
 0x1ad   : > { %v3719_v21 = vsel %vm13666_vm12, %v3717_v12, %v3718_v24  ;;  %3142 = vst [vmem:[#allocation2 + $0x314] sm:$0xf] %v11278_v29  ;;  %v11086_v14 = vcombine.low %v1616_v13, %v1616_v13  ;;  %v11087_v50 = vcombine.high %v1616_v13, %v1616_v13  ;;  %v11603_v1 = vrot.slane %v11587_v2, 10 }
 0x1ae   : > { %v5099_v41 = vsel %vm13345_vm8, %v5090_v4, %v5098_v27  ;;  %v5109_v51 = vsel %vm13345_vm8, %v5100_v42, %v5108_v5  ;;  %v11427_v6 = vcombine.low %v3716_v58, %v3719_v21  ;;  %3143 = vst [vmem:[#allocation2 + $0x330] sm:$0xf] %v11279_v59  ;;  %v5559_v15 = vrot.slane %v14531_v30, 6  ;;  %v11526_v30 = vld [vmem:[%s12887_s19 + $0x68] sm:$0x1]  ;;  %v5887_v5 = vpop.permute.xlu1 %5886 }
 0x1af   : > { %v11667_v33 = vcombine.low %v5099_v41, %v5109_v51  ;;  %1759 = vst [vmem:[#allocation2 + $0x310] sm:$0xf] %v11086_v14  ;;  %1760 = vst [vmem:[#allocation2 + $0x32c] sm:$0xf] %v11087_v50  ;;  %v5562_v35 = vrot.slane %v14534_v36, 6  ;;  %v3895_v46 = vshrl.u32 %v11364_v23, 16  ;;  %v11443_v40 = vcombine.low %v11364_v23, %v11365_v16 }
 0x1b0   : > { %v3898_v52 = vshll.u32 %v11364_v23, 16  ;;  %4352 = vrot.lane.b32.xlu0 %v11427_v6, %s12839_s20  ;;  %v5560_v44 = vsel %vm13666_vm12, %v11603_v1, %v5559_v15  ;;  %v5561_v62 = vrot.slane %v5559_v15, 4  ;;  %v3904_v45 = vshll.u32 %v11365_v16, 16  ;;  %v12713_v36 = vld [vmem:[%s12887_s19 + $0x60] sm:$0xe]  ;;  %v12487_v23 = vld [vmem:[%s12887_s19 + $0x30] sm:$0xff]   ;;  %v4475_v15 = vpop.permute.xlu0 %4474 }
 0x1b1   : > { %v3908_v34 = vshrl.u32 %v11365_v16, 16  ;;  %5796 = vrot.lane.b32.xlu1 %v11667_v33, %s12839_s20  ;;  %v3897_v48 = vrot.slane %v3895_v46, 4  ;;  %v11560_v28 = vrot.slane %v12713_v36, 9  ;;  %v4970_v43 = vrot.slane %v12714_v47, 5  ;;  %v14590_v58 = vld [vmem:[%s12887_s19 + $0x6c] sm:$0xf] }
 0x1b2   : > { %v3900_v61 = vrot.slane %v3898_v52, 5  ;;  %v5563_v37 = vsel %vm13666_vm12, %v5561_v62, %v5562_v35  ;;  %v3906_v9 = vrot.slane %v3904_v45, 5  ;;  %v4973_v39 = vrot.slane %v11526_v30, 5  ;;  %v11123_v52 = vld [vmem:[%s12887_s19 + $0x70] sm:$0xf] }
 0x1b3   : > { %v3910_v49 = vrot.slane %v3908_v34, 4  ;;  %v11683_v17 = vcombine.low %v5560_v44, %v5563_v37  ;;  %v3363_v20 = vshrl.u32 %v11300_v26, 16  ;;  %v3366_v24 = vshll.u32 %v11300_v26, 16  ;;  %v11146_v34 = vld [vmem:[%s12887_s19 + $0x74] sm:$0x1] }
 0x1b4   : > { %4464 = vrot.lane.b32.xlu0 %v11443_v40, %s12840_s21  ;;  %v4971_v22 = vsel %vm13186_vm5, %v11560_v28, %v4970_v43  ;;  %v4972_v38 = vrot.slane %v4970_v43, 4  ;;  %v17647_v57 = vshrl.u32 %v13849_v56, 16  ;;  %v17648_v18 = vshll.u32 %v13849_v56, 16  ;;  %v5999_v28 = vpop.permute.xlu1 %5998 }
 0x1b5   : > { %5876 = vrot.lane.b32.xlu1 %v11683_v17, %s12840_s21  ;;  %v3365_v12 = vrot.slane %v3363_v20, 5  ;;  %v3368_v29 = vrot.slane %v3366_v24, 6  ;;  %v17649_v4 = vshrl.u32 %v13858_v19, 16  ;;  %v17650_v59 = vshll.u32 %v13858_v19, 16  ;;  %v12492_v1 = vld [vmem:[#allocation2 + $0x314] ss:$28 sps:$4 sm:$0xff]  }
 0x1b6   : > { %v3374_v27 = vrot.slane %v17647_v57, 5  ;;  %v3377_v2 = vrot.slane %v17648_v18, 6  ;;  %v4974_v21 = vsel %vm13186_vm5, %v4972_v38, %v4973_v39  ;;  %v3901_v14 = vor.u32 %v3900_v61, %v3897_v48  ;;  %v12494_v33 = vld [vmem:[#allocation2 + $0x310] ss:$28 sps:$4 sm:$0xff]   ;;  %10669 = vmatprep.subr.bf16.mxu0 %v12492_v1  ;;  %v4555_v57 = vpop.permute.xlu0 %4554 }
 0x1b7   : > { %v3384_v42 = vrot.slane %v17649_v4, 5  ;;  %v3387_v13 = vrot.slane %v17650_v59, 6  ;;  %v3911_v50 = vor.u32 %v3910_v49, %v3906_v9  ;;  %v11656_v16 = vcombine.low %v4971_v22, %v4974_v21  ;;  %10670 = vmatpush2.bf16.xpose.msra.mxu0 %v12494_v33  ;;  %v11162_v24 = vld [vmem:[%s12887_s19 + $0x6c] sm:$0xe]  ;;  %v821_v21 = vld [vmem:[%s12887_s19 + $0x68] sm:$0x3] }
 0x1b8   : > { %v3378_v56 = vor.u32 %v3377_v2, %v3374_v27  ;;  %v3369_v41 = vor.u32 %v3368_v29, %v3365_v12  ;;  %v3914_v6 = vshll.u32 %v11395_v32, 16  ;;  %v3902_v46 = vrot.slane %v3901_v14, 4  ;;  %v17651_v1 = vld [vmem:[#allocation5_spill] sm:$0xff]  ;;  %v17652_v33 = vld [vmem:[#allocation3_spill] sm:$0xff] }
 0x1b9   : > { %v3388_v51 = vor.u32 %v3387_v13, %v3384_v42  ;;  %v3912_v19 = vrot.slane %v3911_v50, 4  ;;  %v2219_v26 = vshrl.u32 %v14590_v58, 16  ;;  %v6038_v44 = vsel %vm1504_vm9, %v11656_v16, %v5807_v11  ;;  %5988 = vrot.lane.b32.xlu1 %v12487_v23, %s12841_s22 }
 0x1ba   : > { %v3380_v35 = vrot.slane %v3378_v56, 4  ;;  %v3370_v62 = vrot.slane %v3369_v41, 4  ;;  %v3916_v45 = vrot.slane %v3914_v6, 5  ;;  %v2222_v30 = vshll.u32 %v14590_v58, 16  ;;  %v1802_v41 = vld [vmem:[%s12887_s19 + $0x9c] sm:$0xc] }
 0x1bb   : > { %v3907_v61 = vsel %vm12915_vm2, %v3902_v46, %v3906_v9  ;;  %v6079_v40 = vsel %vm1553_vm13, %v6038_v44, %v5887_v5  ;;  %v2221_v36 = vrot.slane %v2219_v26, 4  ;;  %v2228_v47 = vshll.u32 %v11123_v52, 16  ;;  %v17654_v44 = vld [vmem:[#allocation8_spill] sm:$0xff] }
 0x1bc   : > { %v3389_v48 = vsel %vm13345_vm8, %v3380_v35, %v3388_v51  ;;  %v3379_v11 = vsel %vm13345_vm8, %v3370_v62, %v3378_v56  ;;  %v3917_v37 = vsel %vm12915_vm2, %v3912_v19, %v3916_v45  ;;  %v2224_v49 = vrot.slane %v2222_v30, 5  ;;  %v1803_v19 = vld [vmem:[%s12887_s19 + $0xa0] sm:$0xf]  ;;  %v1804_v45 = vld [vmem:[%s12887_s19 + $0xa4] sm:$0x3] }
 0x1bd   : > { %v11416_v43 = vcombine.low %v3379_v11, %v3389_v48  ;;  %v11459_v17 = vcombine.low %v3907_v61, %v3917_v37  ;;  %v2232_v39 = vshrl.u32 %v11123_v52, 16  ;;  %v2238_v20 = vshll.u32 %v11146_v34, 16  ;;  %v17655_v48 = vld [vmem:[#allocation4_spill] sm:$0xff] }
 0x1be   : > { %v2225_v32 = vor.u32 %v2224_v49, %v2221_v36  ;;  %v2230_v22 = vrot.slane %v2228_v47, 5  ;;  %v11210_v9 = vcombine.low %v14590_v58, %v11123_v52  ;;  %v6111_v38 = vsel %vm1586_vm14, %v6079_v40, %v5999_v28  ;;  %v11506_v36 = vld [vmem:[%s12887_s19 + $0x18] sm:$0xe]  ;;  %v14645_v28 = vld [vmem:[%s12887_s19 + $0x1c] sm:$0xf] }
 0x1bf   : > { %v4594_v27 = vsel %vm1504_vm9, %v11416_v43, %v14576_v60  ;;  %4544 = vrot.lane.b32.xlu0 %v11459_v17, %s12841_s22  ;;  %v2234_v18 = vrot.slane %v2232_v39, 4  ;;  %v2240_v2 = vrot.slane %v2238_v20, 5  ;;  %v11726_v5 = vcombine.low %v6111_v38, %v6111_v38  ;;  %v1419_v60 = vpop.permute.xlu1 %1418  ;;  %v14648_v43 = vld [vmem:[%s12887_s19 + $0x20] sm:$0x3] }
 0x1c0   : > { %v4635_v12 = vsel %vm1553_vm13, %v4594_v27, %v4475_v15  ;;  %v2226_v29 = vrot.slane %v2225_v32, 4  ;;  %v11727_v4 = vcombine.high %v6111_v38, %v6111_v38  ;;  %v11178_v42 = vrot.slane %v11162_v24, 9  ;;  %v2725_v32 = vpop.permute.xlu0 %2724  ;;  %v11283_v27 = vld [vmem:[%s12887_s19 + $0x10] sm:$0xf] }
 0x1c1   : > { %v2235_v59 = vor.u32 %v2234_v18, %v2230_v22  ;;  %6254 = vst [vmem:[#allocation2 + $0x15c] sm:$0xf] %v11726_v5  ;;  %v4667_v58 = vsel %vm1586_vm14, %v4635_v12, %v4555_v57  ;;  %v2532_v13 = vrot.slane %v11123_v52, 5  ;;  %v2535_v23 = vrot.slane %v11146_v34, 5 }
 0x1c2   : > { %v2231_v56 = vsel %vm12915_vm2, %v2226_v29, %v2230_v22  ;;  %6255 = vst [vmem:[#allocation2 + $0x178] sm:$0xf] %v11727_v4  ;;  %v11486_v14 = vcombine.low %v4667_v58, %v4667_v58  ;;  %v11487_v50 = vcombine.high %v4667_v58, %v4667_v58  ;;  %v1023_v16 = vor.u32 %v17651_v1, %v13305_v10  ;;  %v11330_v29 = vld [vmem:[%s12887_s19 + $0xc] sm:$0xc] }
 0x1c3   : > { %v2236_v51 = vrot.slane %v2235_v59, 4  ;;  %2714 = vrot.lane.b32.xlu0 %v11210_v9, %s12839_s20  ;;  %v2533_v6 = vsel %vm13186_vm5, %v11178_v42, %v2532_v13  ;;  %v2534_v15 = vrot.slane %v2532_v13, 4  ;;  %v17653_v35 = vshrl.u32 %v17652_v33, 16  ;;  %v11284_v13 = vld [vmem:[%s12887_s19 + $0x14] sm:$0x3] }
 0x1c4   : > { %4810 = vst [vmem:[#allocation2 + $0x158] sm:$0xf] %v11486_v14  ;;  %4811 = vst [vmem:[#allocation2 + $0x174] sm:$0xf] %v11487_v50  ;;  %v1024_v52 = vrot.slane %v1023_v16, 4  ;;  %v1031_v26 = vshrl.u32 %v821_v21, 16  ;;  %v1581_v62 = vsel %vm1553_vm13, %v17654_v44, %v1419_v60 }
 0x1c5   : > { %v1025_v46 = vrot.slane %v17653_v35, 5  ;;  %v1034_v10 = vshll.u32 %v821_v21, 16  ;;  %v2241_v34 = vsel %vm12915_vm2, %v2236_v51, %v2240_v2  ;;  %v2536_v30 = vsel %vm13186_vm5, %v2534_v15, %v2535_v23  ;;  %v1499_v23 = vpop.permute.xlu1 %1498 }
 0x1c6   : > { %v11103_v40 = vrot.slane %v1802_v41, 10  ;;  %v11226_v11 = vcombine.low %v2231_v56, %v2241_v34  ;;  %v11242_v37 = vcombine.low %v2533_v6, %v2536_v30  ;;  %v1033_v49 = vrot.slane %v1031_v26, 5  ;;  %v11362_v34 = vld [vmem:[%s12887_s19 + $0x18] sm:$0xf] }
 0x1c7   : > { %v1027_v61 = vor.u32 %v17655_v48, %v1025_v46  ;;  %v1036_v47 = vrot.slane %v1034_v10, 6  ;;  %v1955_v20 = vrot.slane %v1803_v19, 6  ;;  %v1958_v24 = vrot.slane %v1804_v45, 6  ;;  %v2805_v19 = vpop.permute.xlu0 %2804 }
 0x1c8   : > { %2794 = vrot.lane.b32.xlu1 %v11226_v11, %s12840_s21  ;;  %v5055_v9 = vshrl.u32 %v11506_v36, 16  ;;  %v5058_v38 = vshll.u32 %v11506_v36, 16  ;;  %v5064_v57 = vshrl.u32 %v14645_v28, 16  ;;  %v5067_v5 = vshll.u32 %v14645_v28, 16  ;;  %v11363_v36 = vld [vmem:[%s12887_s19 + $0x1c] sm:$0xf] }
 0x1c9   : > { %v1028_v17 = vsel %vm13345_vm8, %v1024_v52, %v1027_v61  ;;  %v1029_v39 = vrot.slane %v1027_v61, 4  ;;  %v1037_v22 = vor.u32 %v1036_v47, %v1033_v49  ;;  %v1956_v18 = vsel %vm13666_vm12, %v11103_v40, %v1955_v20  ;;  %v12497_v50 = vld [vmem:[#allocation2 + $0x15c] ss:$28 sps:$4 sm:$0xff]  }
 0x1ca   : > { %v1957_v2 = vrot.slane %v1955_v20, 4  ;;  %v5074_v12 = vshrl.u32 %v14648_v43, 16  ;;  %v5057_v42 = vrot.slane %v5055_v9, 5  ;;  %v5060_v59 = vrot.slane %v5058_v38, 6  ;;  %v11586_v52 = vld [vmem:[%s12887_s19 + $0x18] sm:$0xc]  ;;  %10706 = vmatprep.subr.bf16.mxu1 %v12497_v50 }
 0x1cb   : > { %v1038_v4 = vsel %vm13345_vm8, %v1029_v39, %v1037_v22  ;;  %v5066_v58 = vrot.slane %v5064_v57, 5  ;;  %v5069_v56 = vrot.slane %v5067_v5, 6  ;;  %v5077_v41 = vshll.u32 %v14648_v43, 16  ;;  %v12499_v6 = vld [vmem:[#allocation2 + $0x158] ss:$28 sps:$4 sm:$0xff]   ;;  %v14687_v5 = vpop.permute.xlu1 %4360 }
 0x1cc   : > { %v11050_v21 = vcombine.low %v1028_v17, %v1038_v4  ;;  %v1959_v60 = vsel %vm13666_vm12, %v1957_v2, %v1958_v24  ;;  %v5076_v14 = vrot.slane %v5074_v12, 5  ;;  %2874 = vrot.lane.b32.xlu1 %v11242_v37, %s12841_s22  ;;  %v5061_v16 = vor.u32 %v5060_v59, %v5057_v42  ;;  %10707 = vmatpush1.bf16.xpose.msra.mxu1 %v12499_v6  ;;  %v11297_v38 = vld [vmem:[%s12887_s19 + $0x48] sm:$0xe]  ;;  %v2885_v4 = vpop.permute.xlu0 %2884 }
 0x1cd   : > { %v11199_v1 = vcombine.low %v1956_v18, %v1959_v60  ;;  %v11346_v51 = vrot.slane %v11330_v29, 10  ;;  %v5070_v15 = vor.u32 %v5069_v56, %v5066_v58  ;;  %v3708_v33 = vrot.slane %v11283_v27, 6 }
 0x1ce   : > { %1488 = vrot.lane.b32.xlu0 %v11050_v21, %s12841_s22  ;;  %v3711_v35 = vrot.slane %v11284_v13, 6  ;;  %v1614_v46 = vsel %vm1586_vm14, %v1581_v62, %v1499_v23  ;;  %v5062_v10 = vrot.slane %v5061_v16, 4  ;;  %v5079_v44 = vrot.slane %v5077_v41, 6  ;;  %v17656_v13 = vld [vmem:[#allocation12_spill] sm:$0xff] }
 0x1cf   : > { %v2931_v26 = vsel %vm1504_vm9, %v11199_v1, %v2725_v32  ;;  %v11084_v45 = vcombine.low %v1614_v46, %v1614_v46  ;;  %v5072_v30 = vrot.slane %v5070_v15, 4  ;;  %v3709_v48 = vsel %vm13666_vm12, %v11346_v51, %v3708_v33  ;;  %v17659_v1 = vld [vmem:[#allocation13_spill] sm:$0xff]  ;;  %v11394_v51 = vld [vmem:[%s12887_s19 + $0x20] sm:$0x1] }
 0x1d0   : > { %v3710_v61 = vrot.slane %v3708_v33, 4  ;;  %v11085_v40 = vcombine.high %v1614_v46, %v1614_v46  ;;  %v5071_v62 = vsel %vm13345_vm8, %v5062_v10, %v5070_v15  ;;  %v5080_v11 = vor.u32 %v5079_v44, %v5076_v14  ;;  %v11523_v44 = vld [vmem:[%s12887_s19 + $0x5c] sm:$0x1] }
 0x1d1   : > { %1757 = vst [vmem:[#allocation2 + $0x2d8] sm:$0xf] %v11084_v45  ;;  %v2965_v37 = vsel %vm1553_vm13, %v2931_v26, %v2805_v19  ;;  %v11602_v49 = vrot.slane %v11586_v52, 10  ;;  %v5552_v17 = vrot.slane %v14645_v28, 6  ;;  %v5555_v39 = vrot.slane %v14648_v43, 6 }
 0x1d2   : > { %v3712_v47 = vsel %vm13666_vm12, %v3710_v61, %v3711_v35  ;;  %1758 = vst [vmem:[#allocation2 + $0x2f4] sm:$0xf] %v11085_v40  ;;  %v3871_v20 = vshrl.u32 %v11362_v34, 16  ;;  %v5081_v24 = vsel %vm13345_vm8, %v5072_v30, %v5080_v11  ;;  %v3874_v22 = vshll.u32 %v11362_v34, 16  ;;  %v12496_v30 = vld [vmem:[%s12887_s19 + $0x24] sm:$0xff]   ;;  %v4473_v40 = vpop.permute.xlu1 %4472 }
 0x1d3   : > { %v11426_v32 = vcombine.low %v3709_v48, %v3712_v47  ;;  %v3880_v9 = vshll.u32 %v11363_v36, 16  ;;  %v11666_v57 = vcombine.low %v5071_v62, %v5081_v24  ;;  %v5553_v27 = vsel %vm13666_vm12, %v11602_v49, %v5552_v17  ;;  %v12715_v11 = vld [vmem:[%s12887_s19 + $0x54] sm:$0xe]  ;;  %v12716_v49 = vld [vmem:[%s12887_s19 + $0x58] sm:$0xf] }
 0x1d4   : > { %v5554_v18 = vrot.slane %v5552_v17, 4  ;;  %v3873_v2 = vrot.slane %v3871_v20, 4  ;;  %v3876_v28 = vrot.slane %v3874_v22, 5  ;;  %v3884_v12 = vshrl.u32 %v11363_v36, 16  ;;  %v11984_v17 = vld [vmem:[%s12887_s19 + $0x84] sm:$0xf]  ;;  %v5805_v22 = vpop.permute.xlu0 %5804 }
 0x1d5   : > { %4350 = vrot.lane.b32.xlu0 %v11426_v32, %s12839_s20  ;;  %v3882_v43 = vrot.slane %v3880_v9, 5  ;;  %v11442_v29 = vcombine.low %v11362_v34, %v11363_v36  ;;  %5794 = vrot.lane.b32.xlu1 %v11666_v57, %s12839_s20  ;;  %v3335_v59 = vshrl.u32 %v11297_v38, 16  ;;  %v3338_v58 = vshll.u32 %v11297_v38, 16  ;;  %v14711_v9 = vld [vmem:[%s12887_s19 + $0x88] sm:$0xf] }
 0x1d6   : > { %v5556_v42 = vsel %vm13666_vm12, %v5554_v18, %v5555_v39  ;;  %v17657_v23 = vshrl.u32 %v17656_v13, 16  ;;  %v3886_v56 = vrot.slane %v3884_v12, 4  ;;  %v17658_v14 = vshll.u32 %v17656_v13, 16  ;;  %v14725_v12 = vld [vmem:[%s12887_s19 + $0x8c] sm:$0x1] }
 0x1d7   : > { %v11682_v60 = vcombine.low %v5553_v27, %v5556_v42  ;;  %v17660_v16 = vshrl.u32 %v17659_v1, 16  ;;  %v3337_v6 = vrot.slane %v3335_v59, 5  ;;  %v3340_v15 = vrot.slane %v3338_v58, 6  ;;  %v14731_v13 = vld [vmem:[%s12887_s19 + $0x7c] sm:$0xf] }
 0x1d8   : > { %v3346_v21 = vrot.slane %v17657_v23, 5  ;;  %v3349_v50 = vrot.slane %v17658_v14, 6  ;;  %v17661_v33 = vshll.u32 %v17659_v1, 16  ;;  %v2997_v46 = vsel %vm1586_vm14, %v2965_v37, %v2885_v4  ;;  %v14734_v23 = vld [vmem:[%s12887_s19 + $0x78] sm:$0xe]  ;;  %v4553_v1 = vpop.permute.xlu1 %4552 }
 0x1d9   : > { %v3356_v41 = vrot.slane %v17660_v16, 5  ;;  %4462 = vrot.lane.b32.xlu0 %v11442_v29, %s12840_s21  ;;  %v11276_v52 = vcombine.low %v2997_v46, %v2997_v46  ;;  %v11277_v26 = vcombine.high %v2997_v46, %v2997_v46  ;;  %v3877_v10 = vor.u32 %v3876_v28, %v3873_v2  ;;  %5874 = vrot.lane.b32.xlu1 %v11682_v60, %s12840_s21 }
 0x1da   : > { %v3359_v35 = vrot.slane %v17661_v33, 6  ;;  %v3350_v19 = vor.u32 %v3349_v50, %v3346_v21  ;;  %v3341_v45 = vor.u32 %v3340_v15, %v3337_v6  ;;  %v3887_v48 = vor.u32 %v3886_v56, %v3882_v43  ;;  %v11769_v50 = vld [vmem:[%s12887_s19 + $0x80] sm:$0x1]  ;;  %v14746_v15 = vld [vmem:[%s12887_s19 + $0x84] sm:$0xe] }
 0x1db   : > { %v3890_v61 = vshll.u32 %v11394_v51, 16  ;;  %3140 = vst [vmem:[#allocation2 + $0x2dc] sm:$0xf] %v11276_v52  ;;  %3141 = vst [vmem:[#allocation2 + $0x2f8] sm:$0xf] %v11277_v26  ;;  %v3878_v62 = vrot.slane %v3877_v10, 4 }
 0x1dc   : > { %v3360_v34 = vor.u32 %v3359_v35, %v3356_v41  ;;  %v3352_v36 = vrot.slane %v3350_v19, 4  ;;  %v11559_v37 = vrot.slane %v12715_v11, 9  ;;  %v4963_v47 = vrot.slane %v12716_v49, 5 }
 0x1dd   : > { %v3342_v39 = vrot.slane %v3341_v45, 4  ;;  %v3888_v20 = vrot.slane %v3887_v48, 4  ;;  %v3892_v24 = vrot.slane %v3890_v61, 5  ;;  %v4966_v32 = vrot.slane %v11523_v44, 5  ;;  %5986 = vrot.lane.b32.xlu1 %v12496_v30, %s12841_s22 }
 0x1de   : > { %v3361_v38 = vsel %vm13345_vm8, %v3352_v36, %v3360_v34  ;;  %v3883_v57 = vsel %vm12915_vm2, %v3878_v62, %v3882_v43  ;;  %v4964_v27 = vsel %vm13186_vm5, %v11559_v37, %v4963_v47  ;;  %v4965_v18 = vrot.slane %v4963_v47, 4  ;;  %v12502_v34 = vld [vmem:[#allocation2 + $0x2d8] ss:$28 sps:$4 sm:$0xff]  }
 0x1df   : > { %v3351_v2 = vsel %vm13345_vm8, %v3342_v39, %v3350_v19  ;;  %v3893_v28 = vsel %vm12915_vm2, %v3888_v20, %v3892_v24  ;;  %v8191_v29 = vshrl.u32 %v11984_v17, 16  ;;  %v8194_v4 = vshll.u32 %v11984_v17, 16 }
 0x1e0   : > { %v11415_v42 = vcombine.low %v3351_v2, %v3361_v38  ;;  %v11458_v59 = vcombine.low %v3883_v57, %v3893_v28  ;;  %v4967_v43 = vsel %vm13186_vm5, %v4965_v18, %v4966_v32  ;;  %v8200_v58 = vshll.u32 %v14711_v9, 16  ;;  %v1799_v28 = vld [vmem:[%s12887_s19 + $0x90] sm:$0xc] }
 0x1e1   : > { %v11655_v21 = vcombine.low %v4964_v27, %v4967_v43  ;;  %v8193_v60 = vrot.slane %v8191_v29, 4  ;;  %v8196_v56 = vrot.slane %v8194_v4, 5  ;;  %v8204_v14 = vshrl.u32 %v14711_v9, 16  ;;  %v1801_v43 = vld [vmem:[%s12887_s19 + $0x98] sm:$0x3] }
 0x1e2   : > { %v4591_v16 = vsel %vm1504_vm9, %v11415_v42, %v14687_v5  ;;  %4542 = vrot.lane.b32.xlu0 %v11458_v59, %s12841_s22  ;;  %v8202_v41 = vrot.slane %v8200_v58, 5  ;;  %v8210_v51 = vshll.u32 %v14725_v12, 16  ;;  %v11817_v6 = vrot.slane %v14734_v23, 9  ;;  %v5885_v5 = vpop.permute.xlu0 %5884  ;;  %v12500_v52 = vld [vmem:[#allocation2 + $0x2dc] ss:$28 sps:$4 sm:$0xff]  }
 0x1e3   : > { %v4633_v33 = vsel %vm1553_vm13, %v4591_v16, %v4473_v40  ;;  %v6035_v35 = vsel %vm1504_vm9, %v11655_v21, %v5805_v22  ;;  %v8197_v46 = vor.u32 %v8196_v56, %v8193_v60  ;;  %v8206_v19 = vrot.slane %v8204_v14, 4  ;;  %10671 = vmatprep.subr.bf16.mxu0 %v12500_v52  ;;  %v14767_v22 = vld [vmem:[%s12887_s19 + $0x80] sm:$0x3] }
 0x1e4   : > { %v8212_v26 = vrot.slane %v8210_v51, 5  ;;  %v6821_v10 = vrot.slane %v14731_v13, 5  ;;  %v6824_v44 = vrot.slane %v11769_v50, 5  ;;  %v4665_v45 = vsel %vm1586_vm14, %v4633_v33, %v4553_v1  ;;  %10672 = vmatpush2.bf16.xpose.msra.mxu0 %v12502_v34 }
 0x1e5   : > { %v8198_v30 = vrot.slane %v8197_v46, 4  ;;  %v8207_v48 = vor.u32 %v8206_v19, %v8202_v41  ;;  %v11484_v61 = vcombine.low %v4665_v45, %v4665_v45  ;;  %v11485_v36 = vcombine.high %v4665_v45, %v4665_v45  ;;  %v14793_v45 = vld [vmem:[%s12887_s19 + $0xd0] sm:$0xf] }
 0x1e6   : > { %v6822_v40 = vsel %vm13186_vm5, %v11817_v6, %v6821_v10  ;;  %v6823_v62 = vrot.slane %v6821_v10, 4  ;;  %v6077_v11 = vsel %vm1553_vm13, %v6035_v35, %v5885_v5  ;;  %v12041_v37 = vrot.slane %v14746_v15, 9  ;;  %v5997_v1 = vpop.permute.xlu0 %5996  ;;  %v2723_v6 = vpop.permute.xlu1 %2722  ;;  %v11551_v5 = vld [vmem:[%s12887_s19 + $0xcc] sm:$0xe] }
 0x1e7   : > { %v8203_v49 = vsel %vm12915_vm2, %v8198_v30, %v8202_v41  ;;  %v8208_v47 = vrot.slane %v8207_v48, 4  ;;  %4808 = vst [vmem:[#allocation2 + $0x120] sm:$0xf] %v11484_v61  ;;  %4809 = vst [vmem:[#allocation2 + $0x13c] sm:$0xf] %v11485_v36  ;;  %v8521_v17 = vrot.slane %v14711_v9, 5 }
 0x1e8   : > { %v8524_v39 = vrot.slane %v14725_v12, 5  ;;  %v6825_v20 = vsel %vm13186_vm5, %v6823_v62, %v6824_v44  ;;  %v6500_v24 = vshll.u32 %v14731_v13, 16  ;;  %v6504_v32 = vshrl.u32 %v14731_v13, 16  ;;  %v1800_v12 = vld [vmem:[%s12887_s19 + $0x94] sm:$0xf] }
 0x1e9   : > { %v7060_v38 = vshrl.u32 %v14734_v23, 16  ;;  %v8213_v57 = vsel %vm12915_vm2, %v8208_v47, %v8212_v26  ;;  %v11897_v27 = vcombine.low %v6822_v40, %v6825_v20  ;;  %v8522_v18 = vsel %vm13186_vm5, %v12041_v37, %v8521_v17  ;;  %v14796_v36 = vld [vmem:[%s12887_s19 + $0xd4] sm:$0x3]  ;;  %v11328_v20 = vld [vmem:[%s12887_s19 + $0xc4] sm:$0xf] }
 0x1ea   : > { %v8523_v2 = vrot.slane %v8521_v17, 4  ;;  %v12089_v29 = vcombine.low %v8203_v49, %v8213_v57  ;;  %v7063_v42 = vshll.u32 %v14734_v23, 16  ;;  %v7068_v59 = vrot.slane %v6504_v32, 5 }
 0x1eb   : > { %v7062_v4 = vrot.slane %v7060_v38, 5  ;;  %7536 = vrot.lane.b32.xlu0 %v11897_v27, %s12839_s20  ;;  %v7069_v60 = vrot.slane %v6500_v24, 6  ;;  %v7074_v56 = vshrl.u32 %v14767_v22, 16  ;;  %v7077_v50 = vshll.u32 %v14767_v22, 16  ;;  %v11345_v38 = vld [vmem:[%s12887_s19 + $0xc0] sm:$0xc] }
 0x1ec   : > { %v8525_v21 = vsel %vm13186_vm5, %v8523_v2, %v8524_v39  ;;  %9092 = vrot.lane.b32.xlu1 %v12089_v29, %s12839_s20  ;;  %v7065_v16 = vrot.slane %v7063_v42, 6  ;;  %v11102_v41 = vrot.slane %v1799_v28, 10  ;;  %v1948_v51 = vrot.slane %v1800_v12, 6  ;;  %v11329_v28 = vld [vmem:[%s12887_s19 + $0xc8] sm:$0x3]  ;;  %v2803_v12 = vpop.permute.xlu1 %2802 }
 0x1ed   : > { %v12105_v23 = vcombine.low %v8522_v18, %v8525_v21  ;;  %v7070_v33 = vor.u32 %v7069_v60, %v7068_v59  ;;  %v7076_v35 = vrot.slane %v7074_v56, 5  ;;  %v7079_v46 = vrot.slane %v7077_v50, 6 }
 0x1ee   : > { %v1951_v19 = vrot.slane %v1801_v43, 6  ;;  %v7066_v52 = vor.u32 %v7065_v16, %v7062_v4  ;;  %v1949_v26 = vsel %vm13666_vm12, %v11102_v41, %v1948_v51  ;;  %v1950_v10 = vrot.slane %v1948_v51, 4  ;;  %v1417_v43 = vpop.permute.xlu0 %1416 }
 0x1ef   : > { %v6109_v44 = vsel %vm1586_vm14, %v6077_v11, %v5997_v1  ;;  %v7072_v34 = vrot.slane %v7070_v33, 4  ;;  %v7080_v30 = vor.u32 %v7079_v46, %v7076_v35  ;;  %v5475_v37 = vshrl.u32 %v11551_v5, 16  ;;  %v12057_v46 = vld [vmem:[%s12887_s19 + $0x8c] sm:$0x3] }
 0x1f0   : > { %v11724_v48 = vcombine.low %v6109_v44, %v6109_v44  ;;  %v11725_v61 = vcombine.high %v6109_v44, %v6109_v44  ;;  %9172 = vrot.lane.b32.xlu1 %v12105_v23, %s12840_s21  ;;  %v7067_v40 = vrot.slane %v7066_v52, 4  ;;  %v1952_v62 = vsel %vm13666_vm12, %v1950_v10, %v1951_v19  ;;  %v11849_v44 = vld [vmem:[%s12887_s19 + $0x78] sm:$0xc] }
 0x1f1   : > { %v5478_v49 = vshll.u32 %v11551_v5, 16  ;;  %v7081_v11 = vsel %vm13345_vm8, %v7072_v34, %v7080_v30  ;;  %v11198_v47 = vcombine.low %v1949_v26, %v1952_v62  ;;  %v5484_v17 = vshrl.u32 %v14793_v45, 16 }
 0x1f2   : > { %6252 = vst [vmem:[#allocation2 + $0x124] sm:$0xf] %v11724_v48  ;;  %6253 = vst [vmem:[#allocation2 + $0x140] sm:$0xf] %v11725_v61  ;;  %v5487_v39 = vshll.u32 %v14793_v45, 16  ;;  %v7071_v57 = vsel %vm13345_vm8, %v7067_v40, %v7070_v33  ;;  %v5477_v27 = vrot.slane %v5475_v37, 5 }
 0x1f3   : > { %v5480_v18 = vrot.slane %v5478_v49, 6  ;;  %v5494_v2 = vshrl.u32 %v14796_v36, 16  ;;  %v11913_v29 = vcombine.low %v7071_v57, %v7081_v11  ;;  %v2928_v4 = vsel %vm1504_vm9, %v11198_v47, %v2723_v6  ;;  %v17662_v6 = vld [vmem:[#allocation9_spill] sm:$0xff]  ;;  %v2883_v47 = vpop.permute.xlu1 %2882 }
 0x1f4   : > { %v5486_v42 = vrot.slane %v5484_v17, 5  ;;  %v5489_v59 = vrot.slane %v5487_v39, 6  ;;  %v5497_v56 = vshll.u32 %v14796_v36, 16  ;;  %v11361_v50 = vrot.slane %v11345_v38, 10 }
 0x1f5   : > { %v5481_v21 = vor.u32 %v5480_v18, %v5477_v27  ;;  %v5496_v60 = vrot.slane %v5494_v2, 5  ;;  %7616 = vrot.lane.b32.xlu0 %v11913_v29, %s12840_s21  ;;  %v3813_v23 = vrot.slane %v11328_v20, 6  ;;  %v3816_v16 = vrot.slane %v11329_v28, 6  ;;  %v1497_v2 = vpop.permute.xlu0 %1496  ;;  %v11601_v29 = vld [vmem:[%s12887_s19 + $0xcc] sm:$0xc] }
 0x1f6   : > { %v5490_v1 = vor.u32 %v5489_v59, %v5486_v42  ;;  %v2963_v41 = vsel %vm1553_vm13, %v2928_v4, %v2803_v12  ;;  %v5499_v33 = vrot.slane %v5497_v56, 6  ;;  %v1579_v35 = vsel %vm1553_vm13, %v17662_v6, %v1417_v43 }
 0x1f7   : > { %v5482_v51 = vrot.slane %v5481_v21, 4  ;;  %v8760_v19 = vshrl.u32 %v14746_v15, 16  ;;  %v3814_v52 = vsel %vm13666_vm12, %v11361_v50, %v3813_v23  ;;  %v3815_v26 = vrot.slane %v3813_v23, 4 }
 0x1f8   : > { %v5492_v5 = vrot.slane %v5490_v1, 4  ;;  %v8763_v10 = vshll.u32 %v14746_v15, 16  ;;  %v5500_v30 = vor.u32 %v5499_v33, %v5496_v60  ;;  %v8768_v61 = vrot.slane %v8204_v14, 5  ;;  %v12507_v15 = vld [vmem:[#allocation2 + $0x120] ss:$28 sps:$4 sm:$0xff]  }
 0x1f9   : > { %v5491_v34 = vsel %vm13345_vm8, %v5482_v51, %v5490_v1  ;;  %v8762_v48 = vrot.slane %v8760_v19, 5  ;;  %v12505_v40 = vld [vmem:[#allocation2 + $0x124] ss:$28 sps:$4 sm:$0xff]   ;;  %v3817_v62 = vsel %vm13666_vm12, %v3815_v26, %v3816_v16  ;;  %v8769_v49 = vrot.slane %v8200_v58, 6  ;;  %v11392_v1 = vld [vmem:[%s12887_s19 + $0xcc] sm:$0xf] }
 0x1fa   : > { %v8765_v37 = vrot.slane %v8763_v10, 6  ;;  %v8774_v11 = vshrl.u32 %v12057_v46, 16  ;;  %v5501_v17 = vsel %vm13345_vm8, %v5492_v5, %v5500_v30  ;;  %v11441_v39 = vcombine.low %v3814_v52, %v3817_v62  ;;  %10708 = vmatprep.subr.bf16.mxu1 %v12505_v40  ;;  %v11393_v51 = vld [vmem:[%s12887_s19 + $0xd0] sm:$0xf]  ;;  %v11294_v10 = vld [vmem:[%s12887_s19 + $0x3c] sm:$0xe] }
 0x1fb   : > { %v8777_v20 = vshll.u32 %v12057_v46, 16  ;;  %v11865_v38 = vrot.slane %v11849_v44, 10  ;;  %v11681_v14 = vcombine.low %v5491_v34, %v5501_v17  ;;  %v8770_v27 = vor.u32 %v8769_v49, %v8768_v61  ;;  %10709 = vmatpush1.bf16.xpose.msra.mxu1 %v12507_v15  ;;  %v11520_v61 = vld [vmem:[%s12887_s19 + $0x50] sm:$0x1]  ;;  %v12717_v62 = vld [vmem:[%s12887_s19 + $0x48] sm:$0xe]  ;;  %v5803_v49 = vpop.permute.xlu1 %5802 }
 0x1fc   : > { %v8766_v57 = vor.u32 %v8765_v37, %v8762_v48  ;;  %v8776_v18 = vrot.slane %v8774_v11, 5  ;;  %4380 = vrot.lane.b32.xlu0 %v11441_v39, %s12839_s20  ;;  %v7365_v58 = vrot.slane %v14731_v13, 6  ;;  %v7368_v28 = vrot.slane %v14767_v22, 6  ;;  %v14859_v11 = vpop.permute.xlu0 %4358  ;;  %v12718_v39 = vld [vmem:[%s12887_s19 + $0x4c] sm:$0xf] }
 0x1fd   : > { %v8779_v9 = vrot.slane %v8777_v20, 6  ;;  %v2995_v12 = vsel %vm1586_vm14, %v2963_v41, %v2883_v47  ;;  %5824 = vrot.lane.b32.xlu1 %v11681_v14, %s12839_s20  ;;  %v8772_v42 = vrot.slane %v8770_v27, 4  ;;  %v1612_v50 = vsel %vm1586_vm14, %v1579_v35, %v1497_v2 }
 0x1fe   : > { %v8767_v4 = vrot.slane %v8766_v57, 4  ;;  %v11274_v59 = vcombine.low %v2995_v12, %v2995_v12  ;;  %v11275_v43 = vcombine.high %v2995_v12, %v2995_v12  ;;  %v7366_v60 = vsel %vm13666_vm12, %v11865_v38, %v7365_v58  ;;  %v11982_v12 = vld [vmem:[%s12887_s19 + $0x78] sm:$0xf] }
 0x1ff   : > { %v8780_v21 = vor.u32 %v8779_v9, %v8776_v18  ;;  %v7367_v56 = vrot.slane %v7365_v58, 4  ;;  %v11082_v23 = vcombine.low %v1612_v50, %v1612_v50  ;;  %v11083_v16 = vcombine.high %v1612_v50, %v1612_v50  ;;  %v11409_v18 = vld [vmem:[%s12887_s19 + $0xd4] sm:$0x1] }
 0x200   : > { %v8771_v22 = vsel %vm13345_vm8, %v8767_v4, %v8770_v27  ;;  %3138 = vst [vmem:[#allocation2 + $0x2a4] sm:$0xf] %v11274_v59  ;;  %3139 = vst [vmem:[#allocation2 + $0x2c0] sm:$0xf] %v11275_v43  ;;  %v11617_v41 = vrot.slane %v11601_v29, 10  ;;  %v5657_v35 = vrot.slane %v14793_v45, 6  ;;  %v11457_v40 = vcombine.low %v11392_v1, %v11393_v51 }
 0x201   : > { %v8781_v33 = vsel %vm13345_vm8, %v8772_v42, %v8780_v21  ;;  %v7369_v6 = vsel %vm13666_vm12, %v7367_v56, %v7368_v28  ;;  %v5660_v46 = vrot.slane %v14796_v36, 6  ;;  %1755 = vst [vmem:[#allocation2 + $0x2a0] sm:$0xf] %v11082_v23  ;;  %1756 = vst [vmem:[#allocation2 + $0x2bc] sm:$0xf] %v11083_v16  ;;  %v4231_v52 = vshrl.u32 %v11392_v1, 16  ;;  %v5883_v23 = vpop.permute.xlu1 %5882  ;;  %v4471_v16 = vpop.permute.xlu0 %4470 }
 0x202   : > { %v12121_v19 = vcombine.low %v8771_v22, %v8781_v33  ;;  %v11929_v5 = vcombine.low %v7366_v60, %v7369_v6  ;;  %v4234_v26 = vshll.u32 %v11392_v1, 16  ;;  %v5658_v44 = vsel %vm13666_vm12, %v11617_v41, %v5657_v35  ;;  %v12504_v43 = vld [vmem:[%s12887_s19 + $0xd8] sm:$0xff]  }
 0x203   : > { %v5659_v34 = vrot.slane %v5657_v35, 4  ;;  %v4240_v30 = vshll.u32 %v11393_v51, 16  ;;  %v4244_v48 = vshrl.u32 %v11393_v51, 16  ;;  %v4233_v45 = vrot.slane %v4231_v52, 4  ;;  %v14882_v51 = vld [vmem:[%s12887_s19 + $0x7c] sm:$0xf] }
 0x204   : > { %9252 = vrot.lane.b32.xlu1 %v12121_v19, %s12841_s22  ;;  %7696 = vrot.lane.b32.xlu0 %v11929_v5, %s12841_s22  ;;  %v4236_v36 = vrot.slane %v4234_v26, 5  ;;  %v11558_v37 = vrot.slane %v12717_v62, 9  ;;  %v4956_v20 = vrot.slane %v12718_v39, 5  ;;  %v4959_v14 = vrot.slane %v11520_v61, 5  ;;  %v14887_v19 = vld [vmem:[%s12887_s19 + $0x80] sm:$0x1] }
 0x205   : > { %v5661_v47 = vsel %vm13666_vm12, %v5659_v34, %v5660_v46  ;;  %v4242_v15 = vrot.slane %v4240_v30, 5  ;;  %v4246_v17 = vrot.slane %v4244_v48, 4  ;;  %v3307_v57 = vshrl.u32 %v11294_v10, 16  ;;  %v14895_v34 = vld [vmem:[%s12887_s19 + $0x70] sm:$0xf] }
 0x206   : > { %v11697_v38 = vcombine.low %v5658_v44, %v5661_v47  ;;  %v3310_v27 = vshll.u32 %v11294_v10, 16  ;;  %v4957_v2 = vsel %vm13186_vm5, %v11558_v37, %v4956_v20  ;;  %v4958_v9 = vrot.slane %v4956_v20, 4  ;;  %v11800_v47 = vld [vmem:[%s12887_s19 + $0x6c] sm:$0xe] }
 0x207   : > { %v3318_v58 = vrot.slane %v3316_v31, 5  ;;  %v3321_v28 = vrot.slane %v3319_v54, 6  ;;  %v3309_v29 = vrot.slane %v3307_v57, 5  ;;  %v3328_v42 = vrot.slane %v3326_v63, 5  ;;  %v12508_v60 = vld [vmem:[#allocation2 + $0x2a4] ss:$28 sps:$4 sm:$0xff]  }
 0x208   : > { %5904 = vrot.lane.b32.xlu1 %v11697_v38, %s12840_s21  ;;  %4492 = vrot.lane.b32.xlu0 %v11457_v40, %s12840_s21  ;;  %v3312_v4 = vrot.slane %v3310_v27, 6  ;;  %v3331_v59 = vrot.slane %v3329_v8, 6  ;;  %v4960_v31 = vsel %vm13186_vm5, %v4958_v9, %v4959_v14  ;;  %v4237_v54 = vor.u32 %v4236_v36, %v4233_v45  ;;  %v12510_v63 = vld [vmem:[#allocation2 + $0x2a0] ss:$28 sps:$4 sm:$0xff]   ;;  %v11766_v36 = vld [vmem:[%s12887_s19 + $0x74] sm:$0x1]  ;;  %v5995_v38 = vpop.permute.xlu1 %5994  ;;  %v4551_v14 = vpop.permute.xlu0 %4550 }
 0x209   : > { %v3322_v53 = vor.u32 %v3321_v28, %v3318_v58  ;;  %v4247_v21 = vor.u32 %v4246_v17, %v4242_v15  ;;  %v11654_v56 = vcombine.low %v4957_v2, %v4960_v31  ;;  %v4250_v22 = vshll.u32 %v11409_v18, 16  ;;  %10673 = vmatprep.subr.bf16.mxu0 %v12508_v60  ;;  %v14910_v57 = vld [vmem:[%s12887_s19 + $0x78] sm:$0xe] }
 0x20a   : > { %v3313_v50 = vor.u32 %v3312_v4, %v3309_v29  ;;  %v3332_v1 = vor.u32 %v3331_v59, %v3328_v42  ;;  %v4238_v7 = vrot.slane %v4237_v54, 4  ;;  %v8167_v33 = vshrl.u32 %v11982_v12, 16  ;;  %10674 = vmatpush2.bf16.xpose.msra.mxu0 %v12510_v63 }
 0x20b   : > { %v3324_v41 = vrot.slane %v3322_v53, 4  ;;  %v4248_v8 = vrot.slane %v4247_v21, 4  ;;  %v6032_v6 = vsel %vm1504_vm9, %v11654_v56, %v5803_v49  ;;  %v4252_v46 = vrot.slane %v4250_v22, 5  ;;  %v14928_v21 = vld [vmem:[%s12887_s19 + $0x74] sm:$0x3] }
 0x20c   : > { %v3314_v35 = vrot.slane %v3313_v50, 4  ;;  %6016 = vrot.lane.b32.xlu1 %v12504_v43, %s12841_s22  ;;  %v8170_v5 = vshll.u32 %v11982_v12, 16  ;;  %v4243_v26 = vsel %vm12915_vm2, %v4238_v7, %v4242_v15  ;;  %v6075_v10 = vsel %vm1553_vm13, %v6032_v6, %v5883_v23  ;;  %v1415_v6 = vpop.permute.xlu1 %1414 }
 0x20d   : > { %v3333_v52 = vsel %vm13345_vm8, %v3324_v41, %v3332_v1  ;;  %v8169_v44 = vrot.slane %v8167_v33, 4  ;;  %v4253_v48 = vsel %vm12915_vm2, %v4248_v8, %v4252_v46  ;;  %v8176_v45 = vshll.u32 %v14882_v51, 16 }
 0x20e   : > { %v3323_v30 = vsel %vm13345_vm8, %v3314_v35, %v3322_v53  ;;  %v8172_v61 = vrot.slane %v8170_v5, 5  ;;  %v11473_v62 = vcombine.low %v4243_v26, %v4253_v48  ;;  %v8180_v37 = vshrl.u32 %v14882_v51, 16  ;;  %v1796_v35 = vld [vmem:[%s12887_s19 + $0x84] sm:$0xc]  ;;  %v1797_v26 = vld [vmem:[%s12887_s19 + $0x88] sm:$0xf] }
 0x20f   : > { %v11414_v40 = vcombine.low %v3323_v30, %v3333_v52  ;;  %v8186_v49 = vshll.u32 %v14887_v19, 16  ;;  %v8178_v17 = vrot.slane %v8176_v45, 5  ;;  %v11816_v39 = vrot.slane %v11800_v47, 9 }
 0x210   : > { %v8173_v15 = vor.u32 %v8172_v61, %v8169_v44  ;;  %v6814_v20 = vrot.slane %v14895_v34, 5  ;;  %4572 = vrot.lane.b32.xlu0 %v11473_v62, %s12841_s22  ;;  %v8182_v18 = vrot.slane %v8180_v37, 4  ;;  %v6817_v9 = vrot.slane %v11766_v36, 5  ;;  %v1798_v36 = vld [vmem:[%s12887_s19 + $0x8c] sm:$0x3] }
 0x211   : > { %v4588_v27 = vsel %vm1504_vm9, %v11414_v40, %v14859_v11  ;;  %v8188_v2 = vrot.slane %v8186_v49, 5  ;;  %v6107_v42 = vsel %vm1586_vm14, %v6075_v10, %v5995_v38  ;;  %v12040_v59 = vrot.slane %v14910_v57, 9  ;;  %v11548_v10 = vld [vmem:[%s12887_s19 + $0xc0] sm:$0xe]  ;;  %v17663_v49 = vld [vmem:[#allocation6_spill] sm:$0xff] }
 0x212   : > { %v4631_v58 = vsel %vm1553_vm13, %v4588_v27, %v4471_v16  ;;  %v8174_v28 = vrot.slane %v8173_v15, 4  ;;  %v6815_v12 = vsel %vm13186_vm5, %v11816_v39, %v6814_v20  ;;  %v6816_v29 = vrot.slane %v6814_v20, 4 }
 0x213   : > { %v8183_v4 = vor.u32 %v8182_v18, %v8178_v17  ;;  %v4663_v11 = vsel %vm1586_vm14, %v4631_v58, %v4551_v14  ;;  %v11722_v53 = vcombine.low %v6107_v42, %v6107_v42  ;;  %v11723_v54 = vcombine.high %v6107_v42, %v6107_v42  ;;  %v14955_v14 = vld [vmem:[%s12887_s19 + $0xc4] sm:$0xf] }
 0x214   : > { %v8179_v43 = vsel %vm12915_vm2, %v8174_v28, %v8178_v17  ;;  %v6818_v31 = vsel %vm13186_vm5, %v6816_v29, %v6817_v9  ;;  %v11482_v50 = vcombine.low %v4663_v11, %v4663_v11  ;;  %v11483_v1 = vcombine.high %v4663_v11, %v4663_v11  ;;  %v14958_v9 = vld [vmem:[%s12887_s19 + $0xc8] sm:$0x3]  ;;  %v11325_v11 = vld [vmem:[%s12887_s19 + $0xb8] sm:$0xf] }
 0x215   : > { %v8184_v60 = vrot.slane %v8183_v4, 4  ;;  %v11896_v56 = vcombine.low %v6815_v12, %v6818_v31  ;;  %6250 = vst [vmem:[#allocation2 + $0xec] sm:$0xf] %v11722_v53  ;;  %6251 = vst [vmem:[#allocation2 + $0x108] sm:$0xf] %v11723_v54  ;;  %v8514_v22 = vrot.slane %v14882_v51, 5 }
 0x216   : > { %v8517_v23 = vrot.slane %v14887_v19, 5  ;;  %v6476_v16 = vshll.u32 %v14895_v34, 16  ;;  %v6480_v63 = vshrl.u32 %v14895_v34, 16  ;;  %4806 = vst [vmem:[#allocation2 + $0xe8] sm:$0xf] %v11482_v50  ;;  %v7037_v7 = vshrl.u32 %v11800_v47, 16 }
 0x217   : > { %v8189_v41 = vsel %vm12915_vm2, %v8184_v60, %v8188_v2  ;;  %7534 = vrot.lane.b32.xlu0 %v11896_v56, %s12839_s20  ;;  %4807 = vst [vmem:[#allocation2 + $0x104] sm:$0xf] %v11483_v1  ;;  %v7040_v8 = vshll.u32 %v11800_v47, 16  ;;  %v7051_v33 = vshrl.u32 %v14928_v21, 16  ;;  %v8515_v19 = vsel %vm13186_vm5, %v12040_v59, %v8514_v22  ;;  %v2721_v2 = vpop.permute.xlu0 %2720  ;;  %v11344_v59 = vld [vmem:[%s12887_s19 + $0xb4] sm:$0xc] }
 0x218   : > { %v12088_v46 = vcombine.low %v8179_v43, %v8189_v41  ;;  %v8516_v5 = vrot.slane %v8514_v22, 4  ;;  %v7045_v52 = vrot.slane %v6480_v63, 5  ;;  %v7039_v44 = vrot.slane %v7037_v7, 5 }
 0x219   : > { %v7042_v30 = vrot.slane %v7040_v8, 6  ;;  %v7046_v48 = vrot.slane %v6476_v16, 6  ;;  %v7053_v61 = vrot.slane %v7051_v33, 5  ;;  %v7054_v62 = vshll.u32 %v14928_v21, 16 }
 0x21a   : > { %9090 = vrot.lane.b32.xlu1 %v12088_v46, %s12839_s20  ;;  %v8518_v40 = vsel %vm13186_vm5, %v8516_v5, %v8517_v23  ;;  %v1577_v47 = vsel %vm1553_vm13, %v17663_v49, %v1415_v6  ;;  %v11101_v15 = vrot.slane %v1796_v35, 10  ;;  %v1941_v38 = vrot.slane %v1797_v26, 6  ;;  %v11326_v6 = vld [vmem:[%s12887_s19 + $0xbc] sm:$0x3]  ;;  %v1495_v35 = vpop.permute.xlu1 %1494 }
 0x21b   : > { %v12104_v17 = vcombine.low %v8515_v19, %v8518_v40  ;;  %v7043_v39 = vor.u32 %v7042_v30, %v7039_v44  ;;  %v7047_v20 = vor.u32 %v7046_v48, %v7045_v52  ;;  %v7056_v27 = vrot.slane %v7054_v62, 6  ;;  %v2801_v48 = vpop.permute.xlu0 %2800 }
 0x21c   : > { %v1944_v18 = vrot.slane %v1798_v36, 6  ;;  %v5447_v58 = vshrl.u32 %v11548_v10, 16  ;;  %v5450_v28 = vshll.u32 %v11548_v10, 16  ;;  %v1942_v4 = vsel %vm13666_vm12, %v11101_v15, %v1941_v38  ;;  %v12512_v22 = vld [vmem:[#allocation2 + $0xec] ss:$28 sps:$4 sm:$0xff]  }
 0x21d   : > { %v7044_v12 = vrot.slane %v7043_v39, 4  ;;  %v7049_v29 = vrot.slane %v7047_v20, 4  ;;  %v1943_v42 = vrot.slane %v1941_v38, 4  ;;  %v7057_v43 = vor.u32 %v7056_v27, %v7053_v61  ;;  %10710 = vmatprep.subr.bf16.mxu1 %v12512_v22 }
 0x21e   : > { %9170 = vrot.lane.b32.xlu1 %v12104_v17, %s12840_s21  ;;  %v5449_v31 = vrot.slane %v5447_v58, 5  ;;  %v5452_v53 = vrot.slane %v5450_v28, 6  ;;  %v5456_v54 = vshrl.u32 %v14955_v14, 16  ;;  %v5459_v50 = vshll.u32 %v14955_v14, 16  ;;  %v12514_v23 = vld [vmem:[#allocation2 + $0xe8] ss:$28 sps:$4 sm:$0xff]  }
 0x21f   : > { %v7048_v60 = vsel %vm13345_vm8, %v7044_v12, %v7047_v20  ;;  %v1945_v56 = vsel %vm13666_vm12, %v1943_v42, %v1944_v18  ;;  %v5466_v1 = vshrl.u32 %v14958_v9, 16  ;;  %v7058_v41 = vsel %vm13345_vm8, %v7049_v29, %v7057_v43  ;;  %10711 = vmatpush1.bf16.xpose.msra.mxu1 %v12514_v23  ;;  %v12056_v20 = vld [vmem:[%s12887_s19 + $0x80] sm:$0x3]  ;;  %v11848_v29 = vld [vmem:[%s12887_s19 + $0x6c] sm:$0xc] }
 0x220   : > { %v11197_v7 = vcombine.low %v1942_v4, %v1945_v56  ;;  %v5453_v8 = vor.u32 %v5452_v53, %v5449_v31  ;;  %v5458_v33 = vrot.slane %v5456_v54, 5  ;;  %v11912_v46 = vcombine.low %v7048_v60, %v7058_v41  ;;  %v11291_v43 = vld [vmem:[%s12887_s19 + $0x30] sm:$0xe] }
 0x221   : > { %v5461_v19 = vrot.slane %v5459_v50, 6  ;;  %v5468_v5 = vrot.slane %v5466_v1, 5  ;;  %v5469_v52 = vshll.u32 %v14958_v9, 16  ;;  %v11360_v44 = vrot.slane %v11344_v59, 10 }
 0x222   : > { %v2925_v26 = vsel %vm1504_vm9, %v11197_v7, %v2721_v2  ;;  %v5454_v10 = vrot.slane %v5453_v8, 4  ;;  %v3806_v30 = vrot.slane %v11325_v11, 6  ;;  %7614 = vrot.lane.b32.xlu0 %v11912_v46, %s12840_s21  ;;  %v3809_v40 = vrot.slane %v11326_v6, 6  ;;  %v12719_v46 = vld [vmem:[%s12887_s19 + $0x34] sm:$0xf] }
 0x223   : > { %v5462_v61 = vor.u32 %v5461_v19, %v5458_v33  ;;  %v5471_v36 = vrot.slane %v5469_v52, 6  ;;  %v1610_v62 = vsel %vm1586_vm14, %v1577_v47, %v1495_v35  ;;  %v2961_v2 = vsel %vm1553_vm13, %v2925_v26, %v2801_v48  ;;  %v11600_v48 = vld [vmem:[%s12887_s19 + $0xc0] sm:$0xc] }
 0x224   : > { %v3807_v49 = vsel %vm13666_vm12, %v11360_v44, %v3806_v30  ;;  %v3808_v15 = vrot.slane %v3806_v30, 4  ;;  %v11080_v17 = vcombine.low %v1610_v62, %v1610_v62  ;;  %v11081_v39 = vcombine.high %v1610_v62, %v1610_v62  ;;  %v2881_v30 = vpop.permute.xlu0 %2880 }
 0x225   : > { %v5463_v38 = vsel %vm13345_vm8, %v5454_v10, %v5462_v61  ;;  %v5464_v27 = vrot.slane %v5462_v61, 4  ;;  %v5472_v18 = vor.u32 %v5471_v36, %v5468_v5  ;;  %v8737_v47 = vshrl.u32 %v14910_v57, 16  ;;  %v15004_v5 = vpop.permute.xlu1 %4356  ;;  %v12720_v10 = vld [vmem:[%s12887_s19 + $0x38] sm:$0x3] }
 0x226   : > { %v3810_v58 = vsel %vm13666_vm12, %v3808_v15, %v3809_v40  ;;  %1753 = vst [vmem:[#allocation2 + $0x268] sm:$0xf] %v11080_v17  ;;  %1754 = vst [vmem:[#allocation2 + $0x284] sm:$0xf] %v11081_v39  ;;  %v8740_v28 = vshll.u32 %v14910_v57, 16  ;;  %v8745_v12 = vrot.slane %v8180_v37, 5 }
 0x227   : > { %v5473_v4 = vsel %vm13345_vm8, %v5464_v27, %v5472_v18  ;;  %v11440_v42 = vcombine.low %v3807_v49, %v3810_v58  ;;  %v8746_v11 = vrot.slane %v8176_v45, 6  ;;  %v8751_v59 = vshrl.u32 %v12056_v20, 16  ;;  %v11390_v58 = vld [vmem:[%s12887_s19 + $0xc0] sm:$0xf] }
 0x228   : > { %v11680_v31 = vcombine.low %v5463_v38, %v5473_v4  ;;  %v8739_v53 = vrot.slane %v8737_v47, 5  ;;  %v8742_v54 = vrot.slane %v8740_v28, 6  ;;  %v8754_v60 = vshll.u32 %v12056_v20, 16  ;;  %v11391_v4 = vld [vmem:[%s12887_s19 + $0xc4] sm:$0xf] }
 0x229   : > { %4378 = vrot.lane.b32.xlu0 %v11440_v42, %s12839_s20  ;;  %v8747_v57 = vor.u32 %v8746_v11, %v8745_v12  ;;  %v8753_v56 = vrot.slane %v8751_v59, 5  ;;  %v11864_v37 = vrot.slane %v11848_v29, 10  ;;  %v7358_v50 = vrot.slane %v14895_v34, 6 }
 0x22a   : > { %5822 = vrot.lane.b32.xlu1 %v11680_v31, %s12839_s20  ;;  %v8743_v1 = vor.u32 %v8742_v54, %v8739_v53  ;;  %v8756_v22 = vrot.slane %v8754_v60, 6  ;;  %v7361_v51 = vrot.slane %v14928_v21, 6  ;;  %v3279_v45 = vshrl.u32 %v11291_v43, 16  ;;  %v15025_v60 = vpop.permute.xlu0 %5800 }
 0x22b   : > { %v8749_v23 = vrot.slane %v8747_v57, 4  ;;  %v7359_v41 = vsel %vm13666_vm12, %v11864_v37, %v7358_v50  ;;  %v7360_v7 = vrot.slane %v7358_v50, 4  ;;  %v3282_v8 = vshll.u32 %v11291_v43, 16  ;;  %v11517_v50 = vld [vmem:[%s12887_s19 + $0x44] sm:$0x1] }
 0x22c   : > { %v8744_v33 = vrot.slane %v8743_v1, 4  ;;  %v8757_v6 = vor.u32 %v8756_v22, %v8753_v56  ;;  %v3281_v35 = vrot.slane %v3279_v45, 5  ;;  %v3288_v19 = vshrl.u32 %v12719_v46, 16 }
 0x22d   : > { %v7362_v52 = vsel %vm13666_vm12, %v7360_v7, %v7361_v51  ;;  %v3284_v26 = vrot.slane %v3282_v8, 6  ;;  %v3291_v21 = vshll.u32 %v12719_v46, 16  ;;  %v3298_v44 = vshrl.u32 %v12720_v10, 16 }
 0x22e   : > { %v8748_v61 = vsel %vm13345_vm8, %v8744_v33, %v8747_v57  ;;  %v8758_v36 = vsel %vm13345_vm8, %v8749_v23, %v8757_v6  ;;  %v11928_v40 = vcombine.low %v7359_v41, %v7362_v52  ;;  %v3290_v62 = vrot.slane %v3288_v19, 5  ;;  %v11408_v23 = vld [vmem:[%s12887_s19 + $0xc8] sm:$0x1]  ;;  %v11980_v41 = vld [vmem:[%s12887_s19 + $0x6c] sm:$0xf] }
 0x22f   : > { %v12120_v49 = vcombine.low %v8748_v61, %v8758_v36  ;;  %v3285_v15 = vor.u32 %v3284_v26, %v3281_v35  ;;  %v3293_v17 = vrot.slane %v3291_v21, 6  ;;  %v3300_v39 = vrot.slane %v3298_v44, 5  ;;  %v12721_v6 = vld [vmem:[%s12887_s19 + $0x3c] sm:$0xe]  ;;  %v12722_v19 = vld [vmem:[%s12887_s19 + $0x40] sm:$0xf] }
 0x230   : > { %7694 = vrot.lane.b32.xlu0 %v11928_v40, %s12841_s22  ;;  %v3301_v20 = vshll.u32 %v12720_v10, 16  ;;  %v2993_v38 = vsel %vm1586_vm14, %v2961_v2, %v2881_v30  ;;  %v11616_v27 = vrot.slane %v11600_v48, 10  ;;  %v5650_v18 = vrot.slane %v14955_v14, 6  ;;  %v4469_v2 = vpop.permute.xlu1 %4468  ;;  %v12515_v21 = vld [vmem:[%s12887_s19 + $0xcc] sm:$0xff]  }
 0x231   : > { %9250 = vrot.lane.b32.xlu1 %v12120_v49, %s12841_s22  ;;  %v3286_v47 = vrot.slane %v3285_v15, 4  ;;  %v3294_v28 = vor.u32 %v3293_v17, %v3290_v62  ;;  %v11272_v12 = vcombine.low %v2993_v38, %v2993_v38  ;;  %v11273_v29 = vcombine.high %v2993_v38, %v2993_v38  ;;  %v15040_v61 = vld [vmem:[%s12887_s19 + $0x70] sm:$0xf]  ;;  %v15050_v38 = vld [vmem:[%s12887_s19 + $0x64] sm:$0xf] }
 0x232   : > { %v3303_v42 = vrot.slane %v3301_v20, 6  ;;  %v5651_v11 = vsel %vm13666_vm12, %v11616_v27, %v5650_v18  ;;  %v5652_v59 = vrot.slane %v5650_v18, 4  ;;  %v5653_v43 = vrot.slane %v14958_v9, 6  ;;  %v15047_v20 = vld [vmem:[%s12887_s19 + $0x74] sm:$0x1] }
 0x233   : > { %v3295_v14 = vsel %vm13345_vm8, %v3286_v47, %v3294_v28  ;;  %v3296_v31 = vrot.slane %v3294_v28, 4  ;;  %3136 = vst [vmem:[#allocation2 + $0x26c] sm:$0xf] %v11272_v12  ;;  %3137 = vst [vmem:[#allocation2 + $0x288] sm:$0xf] %v11273_v29  ;;  %v4207_v53 = vshrl.u32 %v11390_v58, 16  ;;  %v11456_v45 = vcombine.low %v11390_v58, %v11391_v4 }
 0x234   : > { %v4210_v54 = vshll.u32 %v11390_v58, 16  ;;  %v3304_v57 = vor.u32 %v3303_v42, %v3300_v39  ;;  %v5654_v56 = vsel %vm13666_vm12, %v5652_v59, %v5653_v43  ;;  %v4216_v37 = vshll.u32 %v11391_v4, 16  ;;  %v4549_v48 = vpop.permute.xlu1 %4548  ;;  %v5881_v39 = vpop.permute.xlu0 %5880  ;;  %v12518_v42 = vld [vmem:[#allocation2 + $0x268] ss:$28 sps:$4 sm:$0xff]  }
 0x235   : > { %v4220_v9 = vshrl.u32 %v11391_v4, 16  ;;  %v11696_v1 = vcombine.low %v5651_v11, %v5654_v56  ;;  %v4209_v22 = vrot.slane %v4207_v53, 4  ;;  %v11557_v35 = vrot.slane %v12721_v6, 9  ;;  %4490 = vrot.lane.b32.xlu0 %v11456_v45, %s12840_s21  ;;  %v1795_v45 = vld [vmem:[%s12887_s19 + $0x80] sm:$0x3] }
 0x236   : > { %v4212_v51 = vrot.slane %v4210_v54, 5  ;;  %v3305_v7 = vsel %vm13345_vm8, %v3296_v31, %v3304_v57  ;;  %v4218_v8 = vrot.slane %v4216_v37, 5  ;;  %v4949_v52 = vrot.slane %v12722_v19, 5  ;;  %v15063_v31 = vld [vmem:[%s12887_s19 + $0x60] sm:$0xe] }
 0x237   : > { %v4222_v33 = vrot.slane %v4220_v9, 4  ;;  %v11413_v46 = vcombine.low %v3295_v14, %v3305_v7  ;;  %5902 = vrot.lane.b32.xlu1 %v11696_v1, %s12840_s21  ;;  %v4952_v26 = vrot.slane %v11517_v50, 5  ;;  %v4226_v30 = vshll.u32 %v11408_v23, 16  ;;  %v11763_v14 = vld [vmem:[%s12887_s19 + $0x68] sm:$0x1] }
 0x238   : > { %v4213_v10 = vor.u32 %v4212_v51, %v4209_v22  ;;  %v8143_v36 = vshrl.u32 %v11980_v41, 16  ;;  %v8146_v40 = vshll.u32 %v11980_v41, 16  ;;  %v4950_v49 = vsel %vm13186_vm5, %v11557_v35, %v4949_v52  ;;  %v1793_v37 = vld [vmem:[%s12887_s19 + $0x78] sm:$0xc]  ;;  %v1794_v9 = vld [vmem:[%s12887_s19 + $0x7c] sm:$0xf] }
 0x239   : > { %v4223_v44 = vor.u32 %v4222_v33, %v4218_v8  ;;  %v4585_v62 = vsel %vm1504_vm9, %v11413_v46, %v15004_v5  ;;  %v4951_v15 = vrot.slane %v4949_v52, 4  ;;  %v4228_v58 = vrot.slane %v4226_v30, 5  ;;  %v15082_v33 = vld [vmem:[%s12887_s19 + $0x6c] sm:$0xe] }
 0x23a   : > { %v4214_v17 = vrot.slane %v4213_v10, 4  ;;  %v4629_v27 = vsel %vm1553_vm13, %v4585_v62, %v4469_v2  ;;  %v8145_v47 = vrot.slane %v8143_v36, 4  ;;  %v8148_v29 = vrot.slane %v8146_v40, 5  ;;  %v12516_v4 = vld [vmem:[#allocation2 + $0x26c] ss:$28 sps:$4 sm:$0xff]  }
 0x23b   : > { %v4224_v18 = vrot.slane %v4223_v44, 4  ;;  %v4953_v5 = vsel %vm13186_vm5, %v4951_v15, %v4952_v26  ;;  %6014 = vrot.lane.b32.xlu1 %v12515_v21, %s12841_s22  ;;  %v4661_v12 = vsel %vm1586_vm14, %v4629_v27, %v4549_v48  ;;  %v8152_v57 = vshll.u32 %v15040_v61, 16  ;;  %10675 = vmatprep.subr.bf16.mxu0 %v12516_v4  ;;  %v2719_v44 = vpop.permute.xlu1 %2718 }
 0x23c   : > { %v4219_v28 = vsel %vm12915_vm2, %v4214_v17, %v4218_v8  ;;  %v11653_v11 = vcombine.low %v4950_v49, %v4953_v5  ;;  %v11480_v43 = vcombine.low %v4661_v12, %v4661_v12  ;;  %v11481_v2 = vcombine.high %v4661_v12, %v4661_v12  ;;  %10676 = vmatpush2.bf16.xpose.msra.mxu0 %v12518_v42  ;;  %v5993_v8 = vpop.permute.xlu0 %5992 }
 0x23d   : > { %v4229_v59 = vsel %vm12915_vm2, %v4224_v18, %v4228_v58  ;;  %v8149_v54 = vor.u32 %v8148_v29, %v8145_v47  ;;  %v8156_v56 = vshrl.u32 %v15040_v61, 16  ;;  %v8162_v1 = vshll.u32 %v15047_v20, 16  ;;  %v15104_v29 = vld [vmem:[%s12887_s19 + $0x68] sm:$0x3] }
 0x23e   : > { %v11472_v53 = vcombine.low %v4219_v28, %v4229_v59  ;;  %v6029_v50 = vsel %vm1504_vm9, %v11653_v11, %v15025_v60  ;;  %4804 = vst [vmem:[#allocation2 + $0xb0] sm:$0xf] %v11480_v43  ;;  %4805 = vst [vmem:[#allocation2 + $0xcc] sm:$0xf] %v11481_v2  ;;  %v11815_v22 = vrot.slane %v15063_v31, 9  ;;  %v6807_v51 = vrot.slane %v15050_v38, 5 }
 0x23f   : > { %v6073_v23 = vsel %vm1553_vm13, %v6029_v50, %v5881_v39  ;;  %v8150_v41 = vrot.slane %v8149_v54, 4  ;;  %v8154_v7 = vrot.slane %v8152_v57, 5  ;;  %v8158_v60 = vrot.slane %v8156_v56, 4 }
 0x240   : > { %4570 = vrot.lane.b32.xlu0 %v11472_v53, %s12841_s22  ;;  %v8164_v6 = vrot.slane %v8162_v1, 5  ;;  %v6808_v35 = vsel %vm13186_vm5, %v11815_v22, %v6807_v51  ;;  %v6809_v46 = vrot.slane %v6807_v51, 4  ;;  %v6810_v19 = vrot.slane %v11763_v14, 5  ;;  %v2799_v53 = vpop.permute.xlu1 %2798  ;;  %v1413_v54 = vpop.permute.xlu0 %1412  ;;  %v11545_v1 = vld [vmem:[%s12887_s19 + $0xb4] sm:$0xe] }
 0x241   : > { %v8155_v52 = vsel %vm12915_vm2, %v8150_v41, %v8154_v7  ;;  %v8159_v26 = vor.u32 %v8158_v60, %v8154_v7  ;;  %v11100_v21 = vrot.slane %v1793_v37, 10  ;;  %v1934_v10 = vrot.slane %v1794_v9, 6  ;;  %v15122_v41 = vld [vmem:[%s12887_s19 + $0xb8] sm:$0xf]  ;;  %v15125_v7 = vld [vmem:[%s12887_s19 + $0xbc] sm:$0x3] }
 0x242   : > { %v6811_v30 = vsel %vm13186_vm5, %v6809_v46, %v6810_v19  ;;  %v1937_v48 = vrot.slane %v1795_v45, 6  ;;  %v6105_v36 = vsel %vm1586_vm14, %v6073_v23, %v5993_v8  ;;  %v12039_v40 = vrot.slane %v15082_v33, 9 }
 0x243   : > { %v8160_v62 = vrot.slane %v8159_v26, 4  ;;  %v11895_v49 = vcombine.low %v6808_v35, %v6811_v30  ;;  %v1935_v15 = vsel %vm13666_vm12, %v11100_v21, %v1934_v10  ;;  %v1936_v17 = vrot.slane %v1934_v10, 4  ;;  %v17664_v35 = vld [vmem:[#allocation7_spill] sm:$0xff]  ;;  %v11322_v10 = vld [vmem:[%s12887_s19 + $0xac] sm:$0xf] }
 0x244   : > { %v11720_v39 = vcombine.low %v6105_v36, %v6105_v36  ;;  %v11721_v27 = vcombine.high %v6105_v36, %v6105_v36  ;;  %v8507_v18 = vrot.slane %v15040_v61, 5  ;;  %v8510_v58 = vrot.slane %v15047_v20, 5 }
 0x245   : > { %v8165_v47 = vsel %vm12915_vm2, %v8160_v62, %v8164_v6  ;;  %7532 = vrot.lane.b32.xlu0 %v11895_v49, %s12839_s20  ;;  %v1938_v5 = vsel %vm13666_vm12, %v1936_v17, %v1937_v48  ;;  %v6452_v28 = vshll.u32 %v15050_v38, 16  ;;  %v6456_v12 = vshrl.u32 %v15050_v38, 16  ;;  %v11343_v62 = vld [vmem:[%s12887_s19 + $0xa8] sm:$0xc] }
 0x246   : > { %v12087_v4 = vcombine.low %v8155_v52, %v8165_v47  ;;  %v11196_v42 = vcombine.low %v1935_v15, %v1938_v5  ;;  %6248 = vst [vmem:[#allocation2 + $0xb4] sm:$0xf] %v11720_v39  ;;  %6249 = vst [vmem:[#allocation2 + $0xd0] sm:$0xf] %v11721_v27  ;;  %v8508_v20 = vsel %vm13186_vm5, %v12039_v40, %v8507_v18  ;;  %v8509_v11 = vrot.slane %v8507_v18, 4  ;;  %v2879_v5 = vpop.permute.xlu1 %2878 }
 0x247   : > { %v7014_v59 = vshrl.u32 %v15063_v31, 16  ;;  %v7017_v43 = vshll.u32 %v15063_v31, 16  ;;  %v7022_v2 = vrot.slane %v6456_v12, 5  ;;  %v7023_v14 = vrot.slane %v6452_v28, 6 }
 0x248   : > { %9088 = vrot.lane.b32.xlu1 %v12087_v4, %s12839_s20  ;;  %v2922_v37 = vsel %vm1504_vm9, %v11196_v42, %v2719_v44  ;;  %v8511_v9 = vsel %vm13186_vm5, %v8509_v11, %v8510_v58  ;;  %v7028_v50 = vshrl.u32 %v15104_v29, 16  ;;  %v7031_v31 = vshll.u32 %v15104_v29, 16  ;;  %v11323_v44 = vld [vmem:[%s12887_s19 + $0xb0] sm:$0x3]  ;;  %v1493_v4 = vpop.permute.xlu0 %1492 }
 0x249   : > { %v12103_v22 = vcombine.low %v8508_v20, %v8511_v9  ;;  %v7016_v51 = vrot.slane %v7014_v59, 5  ;;  %v7019_v45 = vrot.slane %v7017_v43, 6  ;;  %v7024_v23 = vor.u32 %v7023_v14, %v7022_v2  ;;  %v12522_v2 = vld [vmem:[#allocation2 + $0xb0] ss:$28 sps:$4 sm:$0xff]  }
 0x24a   : > { %v7030_v60 = vrot.slane %v7028_v50, 5  ;;  %v7033_v8 = vrot.slane %v7031_v31, 6  ;;  %v2959_v6 = vsel %vm1553_vm13, %v2922_v37, %v2799_v53  ;;  %v1575_v46 = vsel %vm1553_vm13, %v17664_v35, %v1413_v54  ;;  %v5799_v61 = vpop.permute.xlu1 %5798 }
 0x24b   : > { %v7020_v19 = vor.u32 %v7019_v45, %v7016_v51  ;;  %v7026_v52 = vrot.slane %v7024_v23, 4  ;;  %v5419_v26 = vshrl.u32 %v11545_v1, 16  ;;  %v5422_v21 = vshll.u32 %v11545_v1, 16 }
 0x24c   : > { %9168 = vrot.lane.b32.xlu1 %v12103_v22, %s12840_s21  ;;  %v7034_v30 = vor.u32 %v7033_v8, %v7030_v60  ;;  %v5428_v48 = vshrl.u32 %v15122_v41, 16  ;;  %v5431_v36 = vshll.u32 %v15122_v41, 16  ;;  %v5438_v40 = vshrl.u32 %v15125_v7, 16 }
 0x24d   : > { %v7021_v49 = vrot.slane %v7020_v19, 4  ;;  %v5421_v15 = vrot.slane %v5419_v26, 5  ;;  %v5424_v17 = vrot.slane %v5422_v21, 6  ;;  %v5441_v39 = vshll.u32 %v15125_v7, 16  ;;  %v12520_v42 = vld [vmem:[#allocation2 + $0xb4] ss:$28 sps:$4 sm:$0xff]  }
 0x24e   : > { %v7035_v27 = vsel %vm13345_vm8, %v7026_v52, %v7034_v30  ;;  %v5430_v18 = vrot.slane %v5428_v48, 5  ;;  %v5433_v58 = vrot.slane %v5431_v36, 6  ;;  %v5440_v47 = vrot.slane %v5438_v40, 5  ;;  %10712 = vmatprep.subr.bf16.mxu1 %v12520_v42  ;;  %v12055_v52 = vld [vmem:[%s12887_s19 + $0x74] sm:$0x3] }
 0x24f   : > { %v7025_v20 = vsel %vm13345_vm8, %v7021_v49, %v7024_v23  ;;  %v5425_v11 = vor.u32 %v5424_v17, %v5421_v15  ;;  %v5443_v59 = vrot.slane %v5441_v39, 6  ;;  %v11359_v43 = vrot.slane %v11343_v62, 10  ;;  %10713 = vmatpush1.bf16.xpose.msra.mxu1 %v12522_v2  ;;  %v11288_v17 = vld [vmem:[%s12887_s19 + $0x24] sm:$0xe] }
 0x250   : > { %v11911_v14 = vcombine.low %v7025_v20, %v7035_v27  ;;  %v5434_v53 = vor.u32 %v5433_v58, %v5430_v18  ;;  %v3799_v54 = vrot.slane %v11322_v10, 6  ;;  %v3802_v37 = vrot.slane %v11323_v44, 6  ;;  %v11847_v10 = vld [vmem:[%s12887_s19 + $0x60] sm:$0xc]  ;;  %v11514_v18 = vld [vmem:[%s12887_s19 + $0x38] sm:$0x1] }
 0x251   : > { %v5426_v9 = vrot.slane %v5425_v11, 4  ;;  %v5444_v50 = vor.u32 %v5443_v59, %v5440_v47  ;;  %v2991_v31 = vsel %vm1586_vm14, %v2959_v6, %v2879_v5  ;;  %v1608_v1 = vsel %vm1586_vm14, %v1575_v46, %v1493_v4  ;;  %v12723_v5 = vld [vmem:[%s12887_s19 + $0x30] sm:$0xe]  ;;  %v12724_v59 = vld [vmem:[%s12887_s19 + $0x34] sm:$0xf] }
 0x252   : > { %7612 = vrot.lane.b32.xlu0 %v11911_v14, %s12840_s21  ;;  %v5436_v22 = vrot.slane %v5434_v53, 4  ;;  %v3800_v51 = vsel %vm13666_vm12, %v11359_v43, %v3799_v54  ;;  %v3801_v45 = vrot.slane %v3799_v54, 4  ;;  %v11270_v23 = vcombine.low %v2991_v31, %v2991_v31 }
 0x253   : > { %v5435_v60 = vsel %vm13345_vm8, %v5426_v9, %v5434_v53  ;;  %v11271_v8 = vcombine.high %v2991_v31, %v2991_v31  ;;  %v11078_v35 = vcombine.low %v1608_v1, %v1608_v1  ;;  %v11079_v19 = vcombine.high %v1608_v1, %v1608_v1  ;;  %v11599_v31 = vld [vmem:[%s12887_s19 + $0xb4] sm:$0xc] }
 0x254   : > { %v5445_v6 = vsel %vm13345_vm8, %v5436_v22, %v5444_v50  ;;  %v3803_v46 = vsel %vm13666_vm12, %v3801_v45, %v3802_v37  ;;  %3134 = vst [vmem:[#allocation2 + $0x234] sm:$0xf] %v11270_v23  ;;  %v8714_v26 = vshrl.u32 %v15082_v33, 16  ;;  %v8717_v21 = vshll.u32 %v15082_v33, 16  ;;  %v15180_v23 = vpop.permute.xlu0 %4354 }
 0x255   : > { %v11679_v44 = vcombine.low %v5435_v60, %v5445_v6  ;;  %v11439_v30 = vcombine.low %v3800_v51, %v3803_v46  ;;  %3135 = vst [vmem:[#allocation2 + $0x250] sm:$0xf] %v11271_v8  ;;  %1751 = vst [vmem:[#allocation2 + $0x230] sm:$0xf] %v11078_v35  ;;  %v8722_v48 = vrot.slane %v8156_v56, 5  ;;  %v8723_v36 = vrot.slane %v8152_v57, 6  ;;  %v5879_v46 = vpop.permute.xlu1 %5878 }
 0x256   : > { %1752 = vst [vmem:[#allocation2 + $0x24c] sm:$0xf] %v11079_v19  ;;  %v8716_v40 = vrot.slane %v8714_v26, 5  ;;  %v8719_v62 = vrot.slane %v8717_v21, 6  ;;  %v8728_v49 = vshrl.u32 %v12055_v52, 16  ;;  %v8731_v15 = vshll.u32 %v12055_v52, 16 }
 0x257   : > { %5820 = vrot.lane.b32.xlu1 %v11679_v44, %s12839_s20  ;;  %4376 = vrot.lane.b32.xlu0 %v11439_v30, %s12839_s20  ;;  %v8724_v33 = vor.u32 %v8723_v36, %v8722_v48  ;;  %v11863_v39 = vrot.slane %v11847_v10, 10  ;;  %v7351_v27 = vrot.slane %v15050_v38, 6  ;;  %v7354_v56 = vrot.slane %v15104_v29, 6  ;;  %v12725_v52 = vld [vmem:[%s12887_s19 + $0x28] sm:$0xf] }
 0x258   : > { %v8720_v57 = vor.u32 %v8719_v62, %v8716_v40  ;;  %v8730_v58 = vrot.slane %v8728_v49, 5  ;;  %v8733_v47 = vrot.slane %v8731_v15, 6  ;;  %v11556_v4 = vrot.slane %v12723_v5, 9  ;;  %v12726_v44 = vld [vmem:[%s12887_s19 + $0x2c] sm:$0x3] }
 0x259   : > { %v8726_v42 = vrot.slane %v8724_v33, 4  ;;  %v7352_v20 = vsel %vm13666_vm12, %v11863_v39, %v7351_v27  ;;  %v7353_v11 = vrot.slane %v7351_v27, 4  ;;  %v4942_v43 = vrot.slane %v12724_v59, 5  ;;  %v11388_v15 = vld [vmem:[%s12887_s19 + $0xb4] sm:$0xf] }
 0x25a   : > { %v8721_v2 = vrot.slane %v8720_v57, 4  ;;  %v8734_v14 = vor.u32 %v8733_v47, %v8730_v58  ;;  %v4945_v53 = vrot.slane %v11514_v18, 5  ;;  %v3251_v29 = vshrl.u32 %v11288_v17, 16 }
 0x25b   : > { %v7355_v54 = vsel %vm13666_vm12, %v7353_v11, %v7354_v56  ;;  %v4943_v37 = vsel %vm13186_vm5, %v11556_v4, %v4942_v43  ;;  %v4944_v9 = vrot.slane %v4942_v43, 4  ;;  %v3254_v50 = vshll.u32 %v11288_v17, 16  ;;  %v11389_v56 = vld [vmem:[%s12887_s19 + $0xb8] sm:$0xf] }
 0x25c   : > { %v8725_v1 = vsel %vm13345_vm8, %v8721_v2, %v8724_v33  ;;  %v8735_v22 = vsel %vm13345_vm8, %v8726_v42, %v8734_v14  ;;  %v11927_v51 = vcombine.low %v7352_v20, %v7355_v54  ;;  %v3253_v45 = vrot.slane %v3251_v29, 5  ;;  %v12524_v60 = vld [vmem:[#allocation2 + $0x234] ss:$28 sps:$4 sm:$0xff]   ;;  %v4467_v20 = vpop.permute.xlu0 %4466  ;;  %v11407_v2 = vld [vmem:[%s12887_s19 + $0xbc] sm:$0x1]  ;;  %v5991_v14 = vpop.permute.xlu1 %5990 }
 0x25d   : > { %v12119_v8 = vcombine.low %v8725_v1, %v8735_v22  ;;  %v4946_v35 = vsel %vm13186_vm5, %v4944_v9, %v4945_v53  ;;  %v3256_v19 = vrot.slane %v3254_v50, 6  ;;  %v3260_v6 = vshrl.u32 %v12725_v52, 16  ;;  %v12526_v26 = vld [vmem:[#allocation2 + $0x230] ss:$28 sps:$4 sm:$0xff]   ;;  %10677 = vmatprep.subr.bf16.mxu0 %v12524_v60  ;;  %v11978_v53 = vld [vmem:[%s12887_s19 + $0x60] sm:$0xf] }
 0x25e   : > { %7692 = vrot.lane.b32.xlu0 %v11927_v51, %s12841_s22  ;;  %v11652_v21 = vcombine.low %v4943_v37, %v4946_v35  ;;  %v3263_v10 = vshll.u32 %v12725_v52, 16  ;;  %v3270_v30 = vshrl.u32 %v12726_v44, 16  ;;  %v3273_v48 = vshll.u32 %v12726_v44, 16  ;;  %10678 = vmatpush2.bf16.xpose.msra.mxu0 %v12526_v26  ;;  %v12523_v51 = vld [vmem:[%s12887_s19 + $0xc0] sm:$0xff]  }
 0x25f   : > { %9248 = vrot.lane.b32.xlu1 %v12119_v8, %s12841_s22  ;;  %v3257_v36 = vor.u32 %v3256_v19, %v3253_v45  ;;  %v3262_v40 = vrot.slane %v3260_v6, 5  ;;  %v11615_v62 = vrot.slane %v11599_v31, 10  ;;  %v5643_v49 = vrot.slane %v15122_v41, 6  ;;  %v15209_v8 = vld [vmem:[%s12887_s19 + $0x64] sm:$0xf] }
 0x260   : > { %v6026_v17 = vsel %vm1504_vm9, %v11652_v21, %v5799_v61  ;;  %v3265_v33 = vrot.slane %v3263_v10, 6  ;;  %v3272_v39 = vrot.slane %v3270_v30, 5  ;;  %v3275_v27 = vrot.slane %v3273_v48, 6  ;;  %v15212_v21 = vld [vmem:[%s12887_s19 + $0x68] sm:$0x1]  ;;  %v4547_v44 = vpop.permute.xlu0 %4546 }
 0x261   : > { %v3258_v18 = vrot.slane %v3257_v36, 4  ;;  %v5644_v57 = vsel %vm13666_vm12, %v11615_v62, %v5643_v49  ;;  %v5645_v58 = vrot.slane %v5643_v49, 4  ;;  %v5646_v47 = vrot.slane %v15125_v7, 6 }
 0x262   : > { %v3266_v5 = vor.u32 %v3265_v33, %v3262_v40  ;;  %v3276_v4 = vor.u32 %v3275_v27, %v3272_v39  ;;  %v4183_v41 = vshrl.u32 %v11388_v15, 16  ;;  %v4186_v42 = vshll.u32 %v11388_v15, 16  ;;  %v11760_v27 = vld [vmem:[%s12887_s19 + $0x5c] sm:$0x1] }
 0x263   : > { %v5647_v61 = vsel %vm13666_vm12, %v5645_v58, %v5646_v47  ;;  %v4192_v11 = vshll.u32 %v11389_v56, 16  ;;  %v4196_v59 = vshrl.u32 %v11389_v56, 16  ;;  %v11455_v43 = vcombine.low %v11388_v15, %v11389_v56  ;;  %v15218_v15 = vld [vmem:[%s12887_s19 + $0x58] sm:$0xf]  ;;  %v1790_v47 = vld [vmem:[%s12887_s19 + $0x6c] sm:$0xc] }
 0x264   : > { %v3267_v29 = vsel %vm13345_vm8, %v3258_v18, %v3266_v5  ;;  %v3268_v7 = vrot.slane %v3266_v5, 4  ;;  %v11695_v54 = vcombine.low %v5644_v57, %v5647_v61  ;;  %v4185_v37 = vrot.slane %v4183_v41, 4  ;;  %v1791_v5 = vld [vmem:[%s12887_s19 + $0x70] sm:$0xf]  ;;  %v11798_v61 = vld [vmem:[%s12887_s19 + $0x54] sm:$0xe] }
 0x265   : > { %v4188_v9 = vrot.slane %v4186_v42, 5  ;;  %v4194_v50 = vrot.slane %v4192_v11, 5  ;;  %v4198_v31 = vrot.slane %v4196_v59, 4  ;;  %4488 = vrot.lane.b32.xlu0 %v11455_v43, %s12840_s21  ;;  %v6071_v1 = vsel %vm1553_vm13, %v6026_v17, %v5879_v46  ;;  %v1792_v11 = vld [vmem:[%s12887_s19 + $0x74] sm:$0x3] }
 0x266   : > { %v3277_v22 = vsel %vm13345_vm8, %v3268_v7, %v3276_v4  ;;  %5900 = vrot.lane.b32.xlu1 %v11695_v54, %s12840_s21  ;;  %v4202_v45 = vshll.u32 %v11407_v2, 16  ;;  %v6103_v60 = vsel %vm1586_vm14, %v6071_v1, %v5991_v14  ;;  %v8119_v35 = vshrl.u32 %v11978_v53, 16 }
 0x267   : > { %v11412_v19 = vcombine.low %v3267_v29, %v3277_v22  ;;  %v4189_v52 = vor.u32 %v4188_v9, %v4185_v37  ;;  %v4199_v6 = vor.u32 %v4198_v31, %v4194_v50  ;;  %v11718_v26 = vcombine.low %v6103_v60, %v6103_v60  ;;  %v2717_v9 = vpop.permute.xlu0 %2716  ;;  %v2797_v22 = vpop.permute.xlu1 %2796 }
 0x268   : > { %v4204_v46 = vrot.slane %v4202_v45, 5  ;;  %v11719_v10 = vcombine.high %v6103_v60, %v6103_v60  ;;  %v8121_v30 = vrot.slane %v8119_v35, 4  ;;  %v8122_v48 = vshll.u32 %v11978_v53, 16  ;;  %v15240_v53 = vld [vmem:[%s12887_s19 + $0x60] sm:$0xe] }
 0x269   : > { %v4582_v36 = vsel %vm1504_vm9, %v11412_v19, %v15180_v23  ;;  %v4190_v40 = vrot.slane %v4189_v52, 4  ;;  %v4200_v62 = vrot.slane %v4199_v6, 4  ;;  %6246 = vst [vmem:[#allocation2 + $0x7c] sm:$0xf] %v11718_v26  ;;  %v8128_v49 = vshll.u32 %v15209_v8, 16 }
 0x26a   : > { %v4627_v17 = vsel %vm1553_vm13, %v4582_v36, %v4467_v20  ;;  %6012 = vrot.lane.b32.xlu1 %v12523_v51, %s12841_s22  ;;  %6247 = vst [vmem:[#allocation2 + $0x98] sm:$0xf] %v11719_v10  ;;  %v8124_v33 = vrot.slane %v8122_v48, 5  ;;  %v8132_v39 = vshrl.u32 %v15209_v8, 16  ;;  %v8138_v23 = vshll.u32 %v15212_v21, 16 }
 0x26b   : > { %v4195_v56 = vsel %vm12915_vm2, %v4190_v40, %v4194_v50  ;;  %v4205_v18 = vsel %vm12915_vm2, %v4200_v62, %v4204_v46  ;;  %v4659_v57 = vsel %vm1586_vm14, %v4627_v17, %v4547_v44  ;;  %v8130_v58 = vrot.slane %v8128_v49, 5  ;;  %v15259_v36 = vld [vmem:[%s12887_s19 + $0x5c] sm:$0x3] }
 0x26c   : > { %v11471_v4 = vcombine.low %v4195_v56, %v4205_v18  ;;  %v11478_v41 = vcombine.low %v4659_v57, %v4659_v57  ;;  %v11479_v42 = vcombine.high %v4659_v57, %v4659_v57  ;;  %v8125_v20 = vor.u32 %v8124_v33, %v8121_v30  ;;  %v1491_v18 = vpop.permute.xlu0 %1490 }
 0x26d   : > { %v8134_v59 = vrot.slane %v8132_v39, 4  ;;  %v8140_v43 = vrot.slane %v8138_v23, 5  ;;  %v11814_v2 = vrot.slane %v11798_v61, 9  ;;  %v6800_v14 = vrot.slane %v15218_v15, 5 }
 0x26e   : > { %4568 = vrot.lane.b32.xlu0 %v11471_v4, %s12841_s22  ;;  %4802 = vst [vmem:[#allocation2 + $0x78] sm:$0xf] %v11478_v41  ;;  %4803 = vst [vmem:[#allocation2 + $0x94] sm:$0xf] %v11479_v42  ;;  %v8126_v29 = vrot.slane %v8125_v20, 4  ;;  %v6803_v7 = vrot.slane %v11760_v27, 5  ;;  %v2877_v4 = vpop.permute.xlu1 %2876 }
 0x26f   : > { %v11099_v54 = vrot.slane %v1790_v47, 10  ;;  %v1927_v37 = vrot.slane %v1791_v5, 6  ;;  %v8135_v50 = vor.u32 %v8134_v59, %v8130_v58  ;;  %v6801_v31 = vsel %vm13186_vm5, %v11814_v2, %v6800_v14 }
 0x270   : > { %v6802_v1 = vrot.slane %v6800_v14, 4  ;;  %v1930_v51 = vrot.slane %v1792_v11, 6  ;;  %v8131_v45 = vsel %vm12915_vm2, %v8126_v29, %v8130_v58  ;;  %v12038_v19 = vrot.slane %v15240_v53, 9  ;;  %v17665_v29 = vld [vmem:[#allocation10_spill] sm:$0xff] }
 0x271   : > { %v1928_v60 = vsel %vm13666_vm12, %v11099_v54, %v1927_v37  ;;  %v1929_v35 = vrot.slane %v1927_v37, 4  ;;  %v8136_v52 = vrot.slane %v8135_v50, 4  ;;  %v8500_v26 = vrot.slane %v15209_v8, 5  ;;  %v12527_v41 = vld [vmem:[#allocation2 + $0x7c] ss:$28 sps:$4 sm:$0xff]  }
 0x272   : > { %v6804_v6 = vsel %vm13186_vm5, %v6802_v1, %v6803_v7  ;;  %v8503_v46 = vrot.slane %v15212_v21, 5  ;;  %v6428_v30 = vshll.u32 %v15218_v15, 16  ;;  %v6432_v48 = vshrl.u32 %v15218_v15, 16  ;;  %v11542_v54 = vld [vmem:[%s12887_s19 + $0xa8] sm:$0xe]  ;;  %10714 = vmatprep.subr.bf16.mxu1 %v12527_v41 }
 0x273   : > { %v11894_v10 = vcombine.low %v6801_v31, %v6804_v6  ;;  %v1931_v44 = vsel %vm13666_vm12, %v1929_v35, %v1930_v51  ;;  %v8141_v40 = vsel %vm12915_vm2, %v8136_v52, %v8140_v43  ;;  %v8501_v17 = vsel %vm13186_vm5, %v12038_v19, %v8500_v26  ;;  %v15282_v1 = vld [vmem:[%s12887_s19 + $0xac] sm:$0xf]  ;;  %v15285_v51 = vld [vmem:[%s12887_s19 + $0xb0] sm:$0x3]  ;;  %v11319_v19 = vld [vmem:[%s12887_s19 + $0xa0] sm:$0xf] }
 0x274   : > { %v11195_v62 = vcombine.low %v1928_v60, %v1931_v44  ;;  %v8502_v33 = vrot.slane %v8500_v26, 4  ;;  %v12086_v23 = vcombine.low %v8131_v45, %v8141_v40  ;;  %v6991_v21 = vshrl.u32 %v11798_v61, 16 }
 0x275   : > { %7530 = vrot.lane.b32.xlu0 %v11894_v10, %s12839_s20  ;;  %v6994_v27 = vshll.u32 %v11798_v61, 16  ;;  %v6999_v56 = vrot.slane %v6432_v48, 5  ;;  %v7000_v47 = vrot.slane %v6428_v30, 6  ;;  %v7005_v5 = vshrl.u32 %v15259_v36, 16  ;;  %v12529_v59 = vld [vmem:[#allocation2 + $0x78] ss:$28 sps:$4 sm:$0xff]  }
 0x276   : > { %v2919_v57 = vsel %vm1504_vm9, %v11195_v62, %v2717_v9  ;;  %v8504_v58 = vsel %vm13186_vm5, %v8502_v33, %v8503_v46  ;;  %9086 = vrot.lane.b32.xlu1 %v12086_v23, %s12839_s20  ;;  %v6993_v20 = vrot.slane %v6991_v21, 5  ;;  %v7008_v11 = vshll.u32 %v15259_v36, 16  ;;  %10715 = vmatpush1.bf16.xpose.msra.mxu1 %v12529_v59  ;;  %v11342_v10 = vld [vmem:[%s12887_s19 + $0x9c] sm:$0xc]  ;;  %v12551_v33 = vld [vmem:[%s17549_s1 + $0x4] ss:$28 sps:$4 sm:$0xff]  }
 0x277   : > { %v12102_v42 = vcombine.low %v8501_v17, %v8504_v58  ;;  %v6996_v61 = vrot.slane %v6994_v27, 6  ;;  %v7001_v43 = vor.u32 %v7000_v47, %v6999_v56  ;;  %v7007_v2 = vrot.slane %v7005_v5, 5  ;;  %10683 = vmatprep.mubr.bf16.mxu0 %v12551_v33 }
 0x278   : > { %v2957_v14 = vsel %vm1553_vm13, %v2919_v57, %v2797_v22  ;;  %v1606_v7 = vsel %vm1586_vm14, %v17665_v29, %v1491_v18  ;;  %v7010_v9 = vrot.slane %v7008_v11, 6  ;;  %v5391_v26 = vshrl.u32 %v11542_v54, 16  ;;  %v11320_v18 = vld [vmem:[%s12887_s19 + $0xa4] sm:$0x3] }
 0x279   : > { %v6997_v37 = vor.u32 %v6996_v61, %v6993_v20  ;;  %v2989_v50 = vsel %vm1586_vm14, %v2957_v14, %v2877_v4  ;;  %v11076_v31 = vcombine.low %v1606_v7, %v1606_v7  ;;  %v7003_v45 = vrot.slane %v7001_v43, 4  ;;  %v11511_v61 = vld [vmem:[%s12887_s19 + $0x2c] sm:$0x1]  ;;  %v12728_v14 = vld [vmem:[%s12887_s19 + $0x28] sm:$0xf] }
 0x27a   : > { %v11268_v60 = vcombine.low %v2989_v50, %v2989_v50  ;;  %v11269_v35 = vcombine.high %v2989_v50, %v2989_v50  ;;  %v11077_v22 = vcombine.high %v1606_v7, %v1606_v7  ;;  %9166 = vrot.lane.b32.xlu1 %v12102_v42, %s12840_s21  ;;  %v7011_v6 = vor.u32 %v7010_v9, %v7007_v2  ;;  %v11285_v7 = vld [vmem:[%s12887_s19 + $0x18] sm:$0xe] }
 0x27b   : > { %v6998_v52 = vrot.slane %v6997_v37, 4  ;;  %1749 = vst [vmem:[#allocation2 + $0x1f8] sm:$0xf] %v11076_v31  ;;  %v5394_v46 = vshll.u32 %v11542_v54, 16  ;;  %v5400_v44 = vshrl.u32 %v15282_v1, 16  ;;  %v5403_v40 = vshll.u32 %v15282_v1, 16 }
 0x27c   : > { %3132 = vst [vmem:[#allocation2 + $0x1fc] sm:$0xf] %v11268_v60  ;;  %3133 = vst [vmem:[#allocation2 + $0x218] sm:$0xf] %v11269_v35  ;;  %v5410_v62 = vshrl.u32 %v15285_v51, 16  ;;  %v5413_v17 = vshll.u32 %v15285_v51, 16  ;;  %v7012_v21 = vsel %vm13345_vm8, %v7003_v45, %v7011_v6 }
 0x27d   : > { %1750 = vst [vmem:[#allocation2 + $0x214] sm:$0xf] %v11077_v22  ;;  %v7002_v23 = vsel %vm13345_vm8, %v6998_v52, %v7001_v43  ;;  %v5393_v27 = vrot.slane %v5391_v26, 5  ;;  %v5396_v56 = vrot.slane %v5394_v46, 6  ;;  %v5402_v58 = vrot.slane %v5400_v44, 5  ;;  %v15315_v26 = vpop.permute.xlu0 %4352 }
 0x27e   : > { %v11910_v57 = vcombine.low %v7002_v23, %v7012_v21  ;;  %v5405_v47 = vrot.slane %v5403_v40, 6  ;;  %v5412_v5 = vrot.slane %v5410_v62, 5  ;;  %v5415_v41 = vrot.slane %v5413_v17, 6  ;;  %v12727_v43 = vld [vmem:[%s12887_s19 + $0x24] sm:$0xe]  ;;  %v5797_v62 = vpop.permute.xlu1 %5796 }
 0x27f   : > { %v5397_v4 = vor.u32 %v5396_v56, %v5393_v27  ;;  %v11358_v42 = vrot.slane %v11342_v10, 10  ;;  %v3792_v20 = vrot.slane %v11319_v19, 6  ;;  %v3795_v59 = vrot.slane %v11320_v18, 6  ;;  %v12729_v17 = vld [vmem:[%s12887_s19 + $0x1c] sm:$0xf] }
 0x280   : > { %7610 = vrot.lane.b32.xlu0 %v11910_v57, %s12840_s21  ;;  %v5406_v11 = vor.u32 %v5405_v47, %v5402_v58  ;;  %v11555_v2 = vrot.slane %v12727_v43, 9  ;;  %v4935_v29 = vrot.slane %v12728_v14, 5  ;;  %v5416_v37 = vor.u32 %v5415_v41, %v5412_v5  ;;  %v12730_v47 = vld [vmem:[%s12887_s19 + $0x20] sm:$0x3] }
 0x281   : > { %v5398_v54 = vrot.slane %v5397_v4, 4  ;;  %v3793_v9 = vsel %vm13666_vm12, %v11358_v42, %v3792_v20  ;;  %v3794_v50 = vrot.slane %v3792_v20, 4  ;;  %v4938_v35 = vrot.slane %v11511_v61, 5  ;;  %v12054_v20 = vld [vmem:[%s12887_s19 + $0x68] sm:$0x3] }
 0x282   : > { %v5408_v31 = vrot.slane %v5406_v11, 4  ;;  %v4936_v45 = vsel %vm13186_vm5, %v11555_v2, %v4935_v29  ;;  %v4937_v60 = vrot.slane %v4935_v29, 4  ;;  %v3223_v52 = vshrl.u32 %v11285_v7, 16  ;;  %v11846_v29 = vld [vmem:[%s12887_s19 + $0x54] sm:$0xc] }
 0x283   : > { %v5407_v22 = vsel %vm13345_vm8, %v5398_v54, %v5406_v11  ;;  %v3796_v19 = vsel %vm13666_vm12, %v3794_v50, %v3795_v59  ;;  %v3226_v6 = vshll.u32 %v11285_v7, 16  ;;  %v12532_v46 = vld [vmem:[#allocation2 + $0x1fc] ss:$28 sps:$4 sm:$0xff]   ;;  %v3232_v33 = vshrl.u32 %v12729_v17, 16  ;;  %v4465_v50 = vpop.permute.xlu0 %4464 }
 0x284   : > { %v5417_v10 = vsel %vm13345_vm8, %v5408_v31, %v5416_v37  ;;  %v11438_v44 = vcombine.low %v3793_v9, %v3796_v19  ;;  %v4939_v40 = vsel %vm13186_vm5, %v4937_v60, %v4938_v35  ;;  %v12534_v23 = vld [vmem:[#allocation2 + $0x1f8] ss:$28 sps:$4 sm:$0xff]   ;;  %v3225_v56 = vrot.slane %v3223_v52, 5  ;;  %10679 = vmatprep.subr.bf16.mxu0 %v12532_v46  ;;  %v5877_v35 = vpop.permute.xlu1 %5876 }
 0x285   : > { %v11678_v21 = vcombine.low %v5407_v22, %v5417_v10  ;;  %v11651_v27 = vcombine.low %v4936_v45, %v4939_v40  ;;  %v3228_v18 = vrot.slane %v3226_v6, 6  ;;  %v3234_v57 = vrot.slane %v3232_v33, 5  ;;  %10680 = vmatpush2.bf16.xpose.msra.mxu0 %v12534_v23  ;;  %v11386_v33 = vld [vmem:[%s12887_s19 + $0xa8] sm:$0xf] }
 0x286   : > { %4374 = vrot.lane.b32.xlu0 %v11438_v44, %s12839_s20  ;;  %v3235_v58 = vshll.u32 %v12729_v17, 16  ;;  %v3242_v5 = vshrl.u32 %v12730_v47, 16  ;;  %v3245_v4 = vshll.u32 %v12730_v47, 16  ;;  %v8691_v61 = vshrl.u32 %v15240_v53, 16  ;;  %v11598_v44 = vld [vmem:[%s12887_s19 + $0xa8] sm:$0xc] }
 0x287   : > { %5818 = vrot.lane.b32.xlu1 %v11678_v21, %s12839_s20  ;;  %v6023_v41 = vsel %vm1504_vm9, %v11651_v27, %v5797_v62  ;;  %v3229_v42 = vor.u32 %v3228_v18, %v3225_v56  ;;  %v8694_v11 = vshll.u32 %v15240_v53, 16  ;;  %v8699_v14 = vrot.slane %v8132_v39, 5 }
 0x288   : > { %v3237_v59 = vrot.slane %v3235_v58, 6  ;;  %v3244_v43 = vrot.slane %v3242_v5, 5  ;;  %v3247_v2 = vrot.slane %v3245_v4, 6  ;;  %v8693_v54 = vrot.slane %v8691_v61, 5  ;;  %v4545_v5 = vpop.permute.xlu0 %4544  ;;  %v11387_v61 = vld [vmem:[%s12887_s19 + $0xac] sm:$0xf] }
 0x289   : > { %v3230_v7 = vrot.slane %v3229_v42, 4  ;;  %v8696_v37 = vrot.slane %v8694_v11, 6  ;;  %v8700_v9 = vrot.slane %v8128_v49, 6  ;;  %v8705_v60 = vshrl.u32 %v12054_v20, 16 }
 0x28a   : > { %v3238_v31 = vor.u32 %v3237_v59, %v3234_v57  ;;  %v3248_v45 = vor.u32 %v3247_v2, %v3244_v43  ;;  %v8708_v53 = vshll.u32 %v12054_v20, 16  ;;  %v11862_v52 = vrot.slane %v11846_v29, 10 }
 0x28b   : > { %v8697_v22 = vor.u32 %v8696_v37, %v8693_v54  ;;  %v8701_v19 = vor.u32 %v8700_v9, %v8699_v14  ;;  %v7344_v39 = vrot.slane %v15218_v15, 6  ;;  %v8707_v10 = vrot.slane %v8705_v60, 5  ;;  %v11406_v9 = vld [vmem:[%s12887_s19 + $0xb0] sm:$0x1]  ;;  %v16052_v15 = vld [vmem:[%s12887_s19 + $0xec] sm:$0x1] }
 0x28c   : > { %v3239_v6 = vsel %vm13345_vm8, %v3230_v7, %v3238_v31  ;;  %v3240_v46 = vrot.slane %v3238_v31, 4  ;;  %v8710_v8 = vrot.slane %v8708_v53, 6  ;;  %v7347_v27 = vrot.slane %v15259_v36, 6  ;;  %v1788_v31 = vld [vmem:[%s12887_s19 + $0x64] sm:$0xf] }
 0x28d   : > { %v8698_v49 = vrot.slane %v8697_v22, 4  ;;  %v8703_v40 = vrot.slane %v8701_v19, 4  ;;  %v7345_v62 = vsel %vm13666_vm12, %v11862_v52, %v7344_v39  ;;  %v7346_v17 = vrot.slane %v7344_v39, 4  ;;  %v1789_v22 = vld [vmem:[%s12887_s19 + $0x68] sm:$0x3] }
 0x28e   : > { %v3249_v23 = vsel %vm13345_vm8, %v3240_v46, %v3248_v45  ;;  %v8711_v21 = vor.u32 %v8710_v8, %v8707_v10  ;;  %v6069_v56 = vsel %vm1553_vm13, %v6023_v41, %v5877_v35  ;;  %v11614_v58 = vrot.slane %v11598_v44, 10  ;;  %v5989_v41 = vpop.permute.xlu1 %5988  ;;  %v1787_v35 = vld [vmem:[%s12887_s19 + $0x60] sm:$0xc]  ;;  %v2715_v46 = vpop.permute.xlu0 %2714  ;;  %v11976_v10 = vld [vmem:[%s12887_s19 + $0x54] sm:$0xf] }
 0x28f   : > { %v11411_v18 = vcombine.low %v3239_v6, %v3249_v23  ;;  %v8702_v57 = vsel %vm13345_vm8, %v8698_v49, %v8701_v19  ;;  %v5636_v47 = vrot.slane %v15282_v1, 6  ;;  %v7348_v42 = vsel %vm13666_vm12, %v7346_v17, %v7347_v27  ;;  %v12531_v17 = vld [vmem:[%s12887_s19 + $0xb4] sm:$0xff]  }
 0x290   : > { %v8712_v4 = vsel %vm13345_vm8, %v8703_v40, %v8711_v21  ;;  %v5639_v20 = vrot.slane %v15285_v51, 6  ;;  %v4159_v36 = vshrl.u32 %v11386_v33, 16  ;;  %v11926_v43 = vcombine.low %v7345_v62, %v7348_v42  ;;  %v15371_v62 = vld [vmem:[%s12887_s19 + $0x58] sm:$0xf] }
 0x291   : > { %v4579_v11 = vsel %vm1504_vm9, %v11411_v18, %v15315_v26  ;;  %v12118_v59 = vcombine.low %v8702_v57, %v8712_v4  ;;  %v5637_v1 = vsel %vm13666_vm12, %v11614_v58, %v5636_v47  ;;  %v5638_v14 = vrot.slane %v5636_v47, 4  ;;  %v15377_v58 = vld [vmem:[%s12887_s19 + $0x5c] sm:$0x1] }
 0x292   : > { %v4625_v2 = vsel %vm1553_vm13, %v4579_v11, %v4465_v50  ;;  %v4161_v29 = vrot.slane %v4159_v36, 4  ;;  %v4162_v51 = vshll.u32 %v11386_v33, 16  ;;  %7690 = vrot.lane.b32.xlu0 %v11926_v43, %s12841_s22  ;;  %v4168_v7 = vshll.u32 %v11387_v61, 16  ;;  %v2795_v23 = vpop.permute.xlu1 %2794  ;;  %v15383_v36 = vld [vmem:[%s12887_s19 + $0x4c] sm:$0xf] }
 0x293   : > { %9246 = vrot.lane.b32.xlu1 %v12118_v59, %s12841_s22  ;;  %v4172_v54 = vshrl.u32 %v11387_v61, 16  ;;  %v11454_v26 = vcombine.low %v11386_v33, %v11387_v61  ;;  %v6101_v37 = vsel %vm1586_vm14, %v6069_v56, %v5989_v41  ;;  %v5640_v50 = vsel %vm13666_vm12, %v5638_v14, %v5639_v20 }
 0x294   : > { %v4164_v45 = vrot.slane %v4162_v51, 5  ;;  %v11716_v60 = vcombine.low %v6101_v37, %v6101_v37  ;;  %v11717_v53 = vcombine.high %v6101_v37, %v6101_v37  ;;  %v11694_v19 = vcombine.low %v5637_v1, %v5640_v50  ;;  %v11757_v1 = vld [vmem:[%s12887_s19 + $0x50] sm:$0x1] }
 0x295   : > { %v4170_v52 = vrot.slane %v4168_v7, 5  ;;  %v4174_v39 = vrot.slane %v4172_v54, 4  ;;  %v4657_v6 = vsel %vm1586_vm14, %v4625_v2, %v4545_v5  ;;  %v4178_v40 = vshll.u32 %v11406_v9, 16  ;;  %v1489_v7 = vpop.permute.xlu0 %1488 }
 0x296   : > { %6244 = vst [vmem:[#allocation2 + $0x44] sm:$0xf] %v11716_v60  ;;  %6245 = vst [vmem:[#allocation2 + $0x60] sm:$0xf] %v11717_v53  ;;  %v11476_v8 = vcombine.low %v4657_v6, %v4657_v6  ;;  %v11477_v44 = vcombine.high %v4657_v6, %v4657_v6  ;;  %v4165_v49 = vor.u32 %v4164_v45, %v4161_v29  ;;  %4486 = vrot.lane.b32.xlu0 %v11454_v26, %s12840_s21 }
 0x297   : > { %5898 = vrot.lane.b32.xlu1 %v11694_v19, %s12840_s21  ;;  %v4175_v33 = vor.u32 %v4174_v39, %v4170_v52  ;;  %v11098_v21 = vrot.slane %v1787_v35, 10  ;;  %v1920_v27 = vrot.slane %v1788_v31, 6  ;;  %v1923_v56 = vrot.slane %v1789_v22, 6  ;;  %v11797_v31 = vld [vmem:[%s12887_s19 + $0x48] sm:$0xe]  ;;  %v2875_v35 = vpop.permute.xlu1 %2874  ;;  %v17666_v39 = vld [vmem:[#allocation11_spill] sm:$0xff] }
 0x298   : > { %4800 = vst [vmem:[#allocation2 + $0x40] sm:$0xf] %v11476_v8  ;;  %4801 = vst [vmem:[#allocation2 + $0x5c] sm:$0xf] %v11477_v44  ;;  %v4166_v18 = vrot.slane %v4165_v49, 4  ;;  %v4180_v57 = vrot.slane %v4178_v40, 5  ;;  %v1604_v6 = vsel %vm1586_vm14, %v17666_v39, %v1489_v7 }
 0x299   : > { %v8095_v47 = vshrl.u32 %v11976_v10, 16  ;;  %v8098_v5 = vshll.u32 %v11976_v10, 16  ;;  %v4176_v4 = vrot.slane %v4175_v33, 4  ;;  %v1921_v42 = vsel %vm13666_vm12, %v11098_v21, %v1920_v27  ;;  %v15406_v10 = vld [vmem:[%s12887_s19 + $0x54] sm:$0xe] }
 0x29a   : > { %v1922_v20 = vrot.slane %v1920_v27, 4  ;;  %v8104_v61 = vshll.u32 %v15371_v62, 16  ;;  %v4171_v41 = vsel %vm12915_vm2, %v4166_v18, %v4170_v52  ;;  %v8108_v43 = vshrl.u32 %v15371_v62, 16  ;;  %v11282_v7 = vld [vmem:[%s12887_s19 + $0xc] sm:$0xe] }
 0x29b   : > { %v8097_v11 = vrot.slane %v8095_v47, 4  ;;  %v8100_v59 = vrot.slane %v8098_v5, 5  ;;  %6010 = vrot.lane.b32.xlu1 %v12531_v17, %s12841_s22  ;;  %v4181_v2 = vsel %vm12915_vm2, %v4176_v4, %v4180_v57  ;;  %v8114_v51 = vshll.u32 %v15377_v58, 16  ;;  %v15418_v4 = vld [vmem:[%s12887_s19 + $0x50] sm:$0x3] }
 0x29c   : > { %v1924_v14 = vsel %vm13666_vm12, %v1922_v20, %v1923_v56  ;;  %v8106_v29 = vrot.slane %v8104_v61, 5  ;;  %v11470_v54 = vcombine.low %v4171_v41, %v4181_v2  ;;  %v8110_v9 = vrot.slane %v8108_v43, 4  ;;  %v12732_v39 = vld [vmem:[%s12887_s19 + $0x1c] sm:$0xf] }
 0x29d   : > { %v11194_v26 = vcombine.low %v1921_v42, %v1924_v14  ;;  %v8101_v37 = vor.u32 %v8100_v59, %v8097_v11  ;;  %v8116_v50 = vrot.slane %v8114_v51, 5  ;;  %v11813_v45 = vrot.slane %v11797_v31, 9  ;;  %v12535_v17 = vld [vmem:[#allocation2 + $0x44] ss:$28 sps:$4 sm:$0xff]  }
 0x29e   : > { %v6793_v60 = vrot.slane %v15383_v36, 5  ;;  %v6796_v53 = vrot.slane %v11757_v1, 5  ;;  %4566 = vrot.lane.b32.xlu0 %v11470_v54, %s12841_s22  ;;  %v8111_v52 = vor.u32 %v8110_v9, %v8106_v29  ;;  %v11074_v40 = vcombine.low %v1604_v6, %v1604_v6  ;;  %10716 = vmatprep.subr.bf16.mxu1 %v12535_v17 }
 0x29f   : > { %v2916_v22 = vsel %vm1504_vm9, %v11194_v26, %v2715_v46  ;;  %v8102_v19 = vrot.slane %v8101_v37, 4  ;;  %v11075_v27 = vcombine.high %v1604_v6, %v1604_v6  ;;  %v12537_v56 = vld [vmem:[#allocation2 + $0x40] ss:$28 sps:$4 sm:$0xff]   ;;  %v12037_v5 = vrot.slane %v15406_v10, 9 }
 0x2a0   : > { %v6794_v8 = vsel %vm13186_vm5, %v11813_v45, %v6793_v60  ;;  %v6795_v44 = vrot.slane %v6793_v60, 4  ;;  %v2955_v49 = vsel %vm1553_vm13, %v2916_v22, %v2795_v23  ;;  %v8112_v46 = vrot.slane %v8111_v52, 4  ;;  %1747 = vst [vmem:[#allocation2 + $0x1c0] sm:$0xf] %v11074_v40  ;;  %10717 = vmatpush1.bf16.xpose.msra.mxu1 %v12537_v56 }
 0x2a1   : > { %v8107_v33 = vsel %vm12915_vm2, %v8102_v19, %v8106_v29  ;;  %v2987_v21 = vsel %vm1586_vm14, %v2955_v49, %v2875_v35  ;;  %1748 = vst [vmem:[#allocation2 + $0x1dc] sm:$0xf] %v11075_v27  ;;  %v8493_v20 = vrot.slane %v15371_v62, 5  ;;  %v8496_v41 = vrot.slane %v15377_v58, 5  ;;  %v11539_v27 = vld [vmem:[%s12887_s19 + $0x9c] sm:$0xe] }
 0x2a2   : > { %v6797_v18 = vsel %vm13186_vm5, %v6795_v44, %v6796_v53  ;;  %v11266_v57 = vcombine.low %v2987_v21, %v2987_v21  ;;  %v11267_v47 = vcombine.high %v2987_v21, %v2987_v21  ;;  %v8117_v23 = vsel %vm12915_vm2, %v8112_v46, %v8116_v50  ;;  %v11508_v50 = vld [vmem:[%s12887_s19 + $0x20] sm:$0x1]  ;;  %v12731_v53 = vld [vmem:[%s12887_s19 + $0x18] sm:$0xe] }
 0x2a3   : > { %v11893_v42 = vcombine.low %v6794_v8, %v6797_v18  ;;  %v12085_v11 = vcombine.low %v8107_v33, %v8117_v23  ;;  %v6404_v59 = vshll.u32 %v15383_v36, 16  ;;  %v6408_v1 = vshrl.u32 %v15383_v36, 16 }
 0x2a4   : > { %3130 = vst [vmem:[#allocation2 + $0x1c4] sm:$0xf] %v11266_v57  ;;  %3131 = vst [vmem:[#allocation2 + $0x1e0] sm:$0xf] %v11267_v47  ;;  %v6968_v2 = vshrl.u32 %v11797_v31, 16  ;;  %v8494_v14 = vsel %vm13186_vm5, %v12037_v5, %v8493_v20  ;;  %v8495_v29 = vrot.slane %v8493_v20, 4  ;;  %v5795_v20 = vpop.permute.xlu1 %5794 }
 0x2a5   : > { %7528 = vrot.lane.b32.xlu0 %v11893_v42, %s12839_s20  ;;  %v6971_v51 = vshll.u32 %v11797_v31, 16  ;;  %v6982_v58 = vshrl.u32 %v15418_v4, 16  ;;  %9084 = vrot.lane.b32.xlu1 %v12085_v11, %s12839_s20  ;;  %v6976_v26 = vrot.slane %v6408_v1, 5  ;;  %v6977_v37 = vrot.slane %v6404_v59, 6  ;;  %v12733_v47 = vld [vmem:[%s12887_s19 + $0x10] sm:$0xf] }
 0x2a6   : > { %v6970_v54 = vrot.slane %v6968_v2, 5  ;;  %v6985_v9 = vshll.u32 %v15418_v4, 16  ;;  %v8497_v45 = vsel %vm13186_vm5, %v8495_v29, %v8496_v41  ;;  %v11554_v35 = vrot.slane %v12731_v53, 9  ;;  %v12734_v11 = vld [vmem:[%s12887_s19 + $0x14] sm:$0x3] }
 0x2a7   : > { %v6973_v31 = vrot.slane %v6971_v51, 6  ;;  %v6984_v60 = vrot.slane %v6982_v58, 5  ;;  %v12101_v22 = vcombine.low %v8494_v14, %v8497_v45  ;;  %v6978_v19 = vor.u32 %v6977_v37, %v6976_v26  ;;  %v4351_v26 = vpop.permute.xlu0 %4350  ;;  %v15455_v37 = vld [vmem:[%s12887_s19 + $0xa0] sm:$0xf] }
 0x2a8   : > { %v6987_v52 = vrot.slane %v6985_v9, 6  ;;  %v4928_v6 = vrot.slane %v12732_v39, 5  ;;  %v4931_v44 = vrot.slane %v11508_v50, 5  ;;  %v3195_v49 = vshrl.u32 %v11282_v7, 16  ;;  %v12541_v29 = vld [vmem:[#allocation2 + $0x1c0] ss:$28 sps:$4 sm:$0xff]  }
 0x2a9   : > { %v6974_v8 = vor.u32 %v6973_v31, %v6970_v54  ;;  %v3198_v40 = vshll.u32 %v11282_v7, 16  ;;  %9164 = vrot.lane.b32.xlu1 %v12101_v22, %s12840_s21  ;;  %v6980_v17 = vrot.slane %v6978_v19, 4  ;;  %v3204_v5 = vshrl.u32 %v12733_v47, 16 }
 0x2aa   : > { %v6988_v33 = vor.u32 %v6987_v52, %v6984_v60  ;;  %v4929_v46 = vsel %vm13186_vm5, %v11554_v35, %v4928_v6  ;;  %v4930_v21 = vrot.slane %v4928_v6, 4  ;;  %v3197_v18 = vrot.slane %v3195_v49, 5  ;;  %v15458_v60 = vld [vmem:[%s12887_s19 + $0xa4] sm:$0x3]  ;;  %v11316_v52 = vld [vmem:[%s12887_s19 + $0x94] sm:$0xf] }
 0x2ab   : > { %v6975_v56 = vrot.slane %v6974_v8, 4  ;;  %v3200_v57 = vrot.slane %v3198_v40, 6  ;;  %v3207_v41 = vshll.u32 %v12733_v47, 16  ;;  %v3214_v2 = vshrl.u32 %v12734_v11, 16  ;;  %v12539_v14 = vld [vmem:[#allocation2 + $0x1c4] ss:$28 sps:$4 sm:$0xff]   ;;  %v5875_v47 = vpop.permute.xlu1 %5874 }
 0x2ac   : > { %v6989_v23 = vsel %vm13345_vm8, %v6980_v17, %v6988_v33  ;;  %v4932_v42 = vsel %vm13186_vm5, %v4930_v21, %v4931_v44  ;;  %v3206_v54 = vrot.slane %v3204_v5, 5  ;;  %v3217_v31 = vshll.u32 %v12734_v11, 16  ;;  %10681 = vmatprep.subr.bf16.mxu0 %v12539_v14  ;;  %v11317_v49 = vld [vmem:[%s12887_s19 + $0x98] sm:$0x3]  ;;  %v11341_v21 = vld [vmem:[%s12887_s19 + $0x90] sm:$0xc]  ;;  %v4463_v11 = vpop.permute.xlu0 %4462 }
 0x2ad   : > { %v6979_v51 = vsel %vm13345_vm8, %v6975_v56, %v6978_v19  ;;  %v11650_v58 = vcombine.low %v4929_v46, %v4932_v42  ;;  %v3201_v7 = vor.u32 %v3200_v57, %v3197_v18  ;;  %v3209_v50 = vrot.slane %v3207_v41, 6  ;;  %10682 = vmatpush2.bf16.xpose.msra.mxu0 %v12541_v29  ;;  %v12549_v5 = vld [vmem:[%s17549_s1] ss:$28 sps:$4 sm:$0xff]  }
 0x2ae   : > { %v11909_v9 = vcombine.low %v6979_v51, %v6989_v23  ;;  %v3216_v45 = vrot.slane %v3214_v2, 5  ;;  %v5363_v22 = vshrl.u32 %v11539_v27, 16  ;;  %v5366_v19 = vshll.u32 %v11539_v27, 16 }
 0x2af   : > { %v6020_v53 = vsel %vm1504_vm9, %v11650_v58, %v5795_v20  ;;  %v3202_v35 = vrot.slane %v3201_v7, 4  ;;  %v3210_v39 = vor.u32 %v3209_v50, %v3206_v54  ;;  %v3219_v6 = vrot.slane %v3217_v31, 6 }
 0x2b0   : > { %7608 = vrot.lane.b32.xlu0 %v11909_v9, %s12840_s21  ;;  %v5372_v8 = vshrl.u32 %v15455_v37, 16  ;;  %v5375_v44 = vshll.u32 %v15455_v37, 16  ;;  %v5365_v40 = vrot.slane %v5363_v22, 5  ;;  %v5368_v17 = vrot.slane %v5366_v19, 6 }
 0x2b1   : > { %v5382_v33 = vshrl.u32 %v15458_v60, 16  ;;  %v5385_v46 = vshll.u32 %v15458_v60, 16  ;;  %v3211_v27 = vsel %vm13345_vm8, %v3202_v35, %v3210_v39  ;;  %v3212_v56 = vrot.slane %v3210_v39, 4  ;;  %v12053_v39 = vld [vmem:[%s12887_s19 + $0x5c] sm:$0x3] }
 0x2b2   : > { %v3220_v18 = vor.u32 %v3219_v6, %v3216_v45  ;;  %v5374_v57 = vrot.slane %v5372_v8, 5  ;;  %v5369_v23 = vor.u32 %v5368_v17, %v5365_v40  ;;  %v5377_v42 = vrot.slane %v5375_v44, 6  ;;  %v11845_v8 = vld [vmem:[%s12887_s19 + $0x48] sm:$0xc]  ;;  %v5987_v17 = vpop.permute.xlu1 %5986 }
 0x2b3   : > { %v5384_v20 = vrot.slane %v5382_v33, 5  ;;  %v5387_v41 = vrot.slane %v5385_v46, 6  ;;  %v11357_v14 = vrot.slane %v11341_v21, 10  ;;  %v3785_v29 = vrot.slane %v11316_v52, 6 }
 0x2b4   : > { %v3221_v2 = vsel %vm13345_vm8, %v3212_v56, %v3220_v18  ;;  %v3788_v51 = vrot.slane %v11317_v49, 6  ;;  %v5370_v7 = vrot.slane %v5369_v23, 4  ;;  %v5378_v54 = vor.u32 %v5377_v42, %v5374_v57  ;;  %10684 = vmatmul.mubr.bf16.vlgmr.msra.gmra.mxu0 %v12549_v5 }
 0x2b5   : > { %v11410_v58 = vcombine.low %v3211_v27, %v3221_v2  ;;  %v5388_v9 = vor.u32 %v5387_v41, %v5384_v20  ;;  %v3786_v50 = vsel %vm13666_vm12, %v11357_v14, %v3785_v29  ;;  %v3787_v45 = vrot.slane %v3785_v29, 4  ;;  %v11597_v41 = vld [vmem:[%s12887_s19 + $0x9c] sm:$0xc] }
 0x2b6   : > { %v6067_v31 = vsel %vm1553_vm13, %v6020_v53, %v5875_v47  ;;  %v8668_v35 = vshrl.u32 %v15406_v10, 16  ;;  %v5379_v19 = vsel %vm13345_vm8, %v5370_v7, %v5378_v54  ;;  %v5380_v52 = vrot.slane %v5378_v54, 4  ;;  %v11384_v54 = vld [vmem:[%s12887_s19 + $0x9c] sm:$0xf] }
 0x2b7   : > { %v4576_v22 = vsel %vm1504_vm9, %v11410_v58, %v4351_v26  ;;  %v8671_v6 = vshll.u32 %v15406_v10, 16  ;;  %v3789_v44 = vsel %vm13666_vm12, %v3787_v45, %v3788_v51  ;;  %v8676_v53 = vrot.slane %v8108_v43, 5  ;;  %v4543_v10 = vpop.permute.xlu0 %4542 }
 0x2b8   : > { %v4623_v49 = vsel %vm1553_vm13, %v4576_v22, %v4463_v11  ;;  %v8670_v40 = vrot.slane %v8668_v35, 5  ;;  %v5389_v26 = vsel %vm13345_vm8, %v5380_v52, %v5388_v9  ;;  %v11437_v33 = vcombine.low %v3786_v50, %v3789_v44  ;;  %v11385_v9 = vld [vmem:[%s12887_s19 + $0xa0] sm:$0xf]  ;;  %v9093_v50 = vpop.permute.xlu1 %9092 }
 0x2b9   : > { %v8673_v46 = vrot.slane %v8671_v6, 6  ;;  %v8677_v21 = vrot.slane %v8104_v61, 6  ;;  %v11677_v27 = vcombine.low %v5379_v19, %v5389_v26  ;;  %v8682_v56 = vshrl.u32 %v12053_v39, 16 }
 0x2ba   : > { %v8685_v18 = vshll.u32 %v12053_v39, 16  ;;  %v11861_v57 = vrot.slane %v11845_v8, 10  ;;  %4372 = vrot.lane.b32.xlu0 %v11437_v33, %s12839_s20  ;;  %v7337_v43 = vrot.slane %v15383_v36, 6  ;;  %v7340_v23 = vrot.slane %v15418_v4, 6 }
 0x2bb   : > { %v8674_v47 = vor.u32 %v8673_v46, %v8670_v40  ;;  %v8678_v5 = vor.u32 %v8677_v21, %v8676_v53  ;;  %5816 = vrot.lane.b32.xlu1 %v11677_v27, %s12839_s20  ;;  %v8684_v62 = vrot.slane %v8682_v56, 5  ;;  %v6099_v42 = vsel %vm1586_vm14, %v6067_v31, %v5987_v17  ;;  %v11767_v53 = vld [vmem:[%s12887_s19 + $0x78] sm:$0xf]  ;;  %v12736_v27 = vld [vmem:[%s12887_s19 + $0x88] sm:$0xf] }
 0x2bc   : > { %v8687_v61 = vrot.slane %v8685_v18, 6  ;;  %v4655_v20 = vsel %vm1586_vm14, %v4623_v49, %v4543_v10  ;;  %v7338_v14 = vsel %vm13666_vm12, %v11861_v57, %v7337_v43  ;;  %v7339_v29 = vrot.slane %v7337_v43, 4  ;;  %v12735_v10 = vld [vmem:[%s12887_s19 + $0x84] sm:$0xf] }
 0x2bd   : > { %v8675_v11 = vrot.slane %v8674_v47, 4  ;;  %v8680_v2 = vrot.slane %v8678_v5, 4  ;;  %v11714_v58 = vcombine.low %v6099_v42, %v6099_v42  ;;  %v11715_v7 = vcombine.high %v6099_v42, %v6099_v42  ;;  %v11405_v43 = vld [vmem:[%s12887_s19 + $0xa4] sm:$0x1] }
 0x2be   : > { %v8688_v51 = vor.u32 %v8687_v61, %v8684_v62  ;;  %v11474_v4 = vcombine.low %v4655_v20, %v4655_v20  ;;  %v7341_v31 = vsel %vm13666_vm12, %v7339_v29, %v7340_v23  ;;  %v11475_v35 = vcombine.high %v4655_v20, %v4655_v20  ;;  %v9173_v23 = vpop.permute.xlu1 %9172 }
 0x2bf   : > { %v8679_v45 = vsel %vm13345_vm8, %v8675_v11, %v8678_v5  ;;  %v11613_v22 = vrot.slane %v11597_v41, 10  ;;  %v11925_v52 = vcombine.low %v7338_v14, %v7341_v31  ;;  %6242 = vst [vmem:[#allocation2 + $0xc] sm:$0xf] %v11714_v58  ;;  %6243 = vst [vmem:[#allocation2 + $0x28] sm:$0xf] %v11715_v7  ;;  %v5629_v39 = vrot.slane %v15455_v37, 6 }
 0x2c0   : > { %v8689_v19 = vsel %vm13345_vm8, %v8680_v2, %v8688_v51  ;;  %4798 = vst [vmem:[#allocation2 + $0x8] sm:$0xf] %v11474_v4  ;;  %v5632_v6 = vrot.slane %v15458_v60, 6  ;;  %4799 = vst [vmem:[#allocation2 + $0x24] sm:$0xf] %v11475_v35  ;;  %v4135_v44 = vshrl.u32 %v11384_v54, 16  ;;  %v11453_v46 = vcombine.low %v11384_v54, %v11385_v9  ;;  %v7537_v4 = vpop.permute.xlu0 %7536 }
 0x2c1   : > { %v12117_v8 = vcombine.low %v8679_v45, %v8689_v19  ;;  %v4138_v49 = vshll.u32 %v11384_v54, 16  ;;  %v4144_v40 = vshll.u32 %v11385_v9, 16  ;;  %7688 = vrot.lane.b32.xlu0 %v11925_v52, %s12841_s22  ;;  %v5630_v17 = vsel %vm13666_vm12, %v11613_v22, %v5629_v39  ;;  %v11974_v41 = vld [vmem:[%s12887_s19 + $0x48] sm:$0xf]  ;;  %v12737_v14 = vld [vmem:[%s12887_s19 + $0x80] sm:$0x1] }
 0x2c2   : > { %v5631_v26 = vrot.slane %v5629_v39, 4  ;;  %v4148_v33 = vshrl.u32 %v11385_v9, 16  ;;  %v4137_v37 = vrot.slane %v4135_v44, 4  ;;  %v12073_v56 = vcombine.low %v12735_v10, %v12736_v27  ;;  %v15533_v58 = vld [vmem:[%s12887_s19 + $0x4c] sm:$0xf] }
 0x2c3   : > { %9244 = vrot.lane.b32.xlu1 %v12117_v8, %s12841_s22  ;;  %v4140_v60 = vrot.slane %v4138_v49, 5  ;;  %v4146_v21 = vrot.slane %v4144_v40, 5  ;;  %v6491_v47 = vshrl.u32 %v11767_v53, 16  ;;  %v6494_v5 = vshll.u32 %v11767_v53, 16  ;;  %v12543_v54 = vld [vmem:[%s12887_s19 + $0xa8] sm:$0xff]  }
 0x2c4   : > { %v5633_v18 = vsel %vm13666_vm12, %v5631_v26, %v5632_v6  ;;  %v4150_v57 = vrot.slane %v4148_v33, 4  ;;  %v9293_v61 = vsel %vm1504_vm9, %v12073_v56, %v9093_v50  ;;  %v6502_v42 = vrot.slane %v6500_v24, 5 }
 0x2c5   : > { %v11693_v62 = vcombine.low %v5630_v17, %v5633_v18  ;;  %v6506_v20 = vrot.slane %v6504_v32, 4  ;;  %4484 = vrot.lane.b32.xlu0 %v11453_v46, %s12840_s21  ;;  %v6493_v11 = vrot.slane %v6491_v47, 4  ;;  %v6496_v2 = vrot.slane %v6494_v5, 5  ;;  %v15541_v32 = vld [vmem:[%s12887_s19 + $0x50] sm:$0x1]  ;;  %v7617_v47 = vpop.permute.xlu0 %7616 }
 0x2c6   : > { %v6510_v29 = vshll.u32 %v12737_v14, 16  ;;  %v4141_v51 = vor.u32 %v4140_v60, %v4137_v37  ;;  %v4151_v24 = vor.u32 %v4150_v57, %v4146_v21  ;;  %v4154_v9 = vshll.u32 %v11405_v43, 16  ;;  %v12544_v22 = vld [vmem:[#allocation2 + $0xc] ss:$28 sps:$4 sm:$0xff]   ;;  %v15553_v37 = vld [vmem:[%s12887_s19 + $0x40] sm:$0xf] }
 0x2c7   : > { %5896 = vrot.lane.b32.xlu1 %v11693_v62, %s12840_s21  ;;  %v6507_v7 = vor.u32 %v6506_v20, %v6502_v42  ;;  %v15538_v13 = vsel %vm1553_vm13, %v9293_v61, %v9173_v23  ;;  %v6497_v50 = vor.u32 %v6496_v2, %v6493_v11  ;;  %v8071_v35 = vshrl.u32 %v11974_v41, 16  ;;  %v12546_v8 = vld [vmem:[#allocation2 + $0x8] ss:$28 sps:$4 sm:$0xff]   ;;  %10718 = vmatprep.subr.bf16.mxu1 %v12544_v22  ;;  %v15562_v18 = vld [vmem:[%s12887_s19 + $0x3c] sm:$0xe] }
 0x2c8   : > { %v6512_v45 = vrot.slane %v6510_v29, 5  ;;  %v4142_v31 = vrot.slane %v4141_v51, 4  ;;  %v4152_v52 = vrot.slane %v4151_v24, 4  ;;  %v4156_v39 = vrot.slane %v4154_v9, 5  ;;  %v11754_v60 = vld [vmem:[%s12887_s19 + $0x44] sm:$0x1]  ;;  %10719 = vmatpush1.bf16.xpose.msra.mxu1 %v12546_v8 }
 0x2c9   : > { %v6508_v19 = vrot.slane %v6507_v7, 4  ;;  %v8074_v6 = vshll.u32 %v11974_v41, 16  ;;  %v6498_v44 = vrot.slane %v6497_v50, 4  ;;  %v8073_v40 = vrot.slane %v8071_v35, 4  ;;  %v11553_v62 = vld [vmem:[%s12887_s19 + $0xd4] sm:$0x1] }
 0x2ca   : > { %v4147_v49 = vsel %vm12915_vm2, %v4142_v31, %v4146_v21  ;;  %v8080_v53 = vshll.u32 %v15533_v58, 16  ;;  %v4157_v26 = vsel %vm12915_vm2, %v4152_v52, %v4156_v39  ;;  %v8084_v46 = vshrl.u32 %v15533_v58, 16  ;;  %v12738_v41 = vld [vmem:[%s12887_s19 + $0xcc] sm:$0xe]  ;;  %v12739_v51 = vld [vmem:[%s12887_s19 + $0xd0] sm:$0xf] }
 0x2cb   : > { %v6513_v17 = vsel %vm12915_vm2, %v6508_v19, %v6512_v45  ;;  %6008 = vrot.lane.b32.xlu1 %v12543_v54, %s12841_s22  ;;  %v8076_v33 = vrot.slane %v8074_v6, 5  ;;  %v6503_v21 = vsel %vm12915_vm2, %v6498_v44, %v6502_v42  ;;  %v11469_v10 = vcombine.low %v4147_v49, %v4157_v26  ;;  %v11327_v54 = vld [vmem:[%s12887_s19 + $0xc0] sm:$0xe]  ;;  %v12740_v6 = vld [vmem:[%s12887_s19 + $0xc4] sm:$0xf] }
 0x2cc   : > { %v8082_v27 = vrot.slane %v8080_v53, 5  ;;  %v8090_v56 = vshll.u32 %v15541_v32, 16  ;;  %v11881_v57 = vcombine.low %v6503_v21, %v6513_v17  ;;  %v8086_v43 = vrot.slane %v8084_v46, 4  ;;  %v5825_v17 = vpop.permute.xlu1 %5824 }
 0x2cd   : > { %v8077_v5 = vor.u32 %v8076_v33, %v8073_v40  ;;  %v11812_v23 = vrot.slane %v15562_v18, 9  ;;  %4564 = vrot.lane.b32.xlu0 %v11469_v10, %s12841_s22  ;;  %v6786_v42 = vrot.slane %v15553_v37, 5  ;;  %v6789_v20 = vrot.slane %v11754_v60, 5  ;;  %v15591_v33 = vld [vmem:[%s12887_s19 + $0x48] sm:$0xe] }
 0x2ce   : > { %v8092_v61 = vrot.slane %v8090_v56, 5  ;;  %v11569_v11 = vrot.slane %v12738_v41, 9  ;;  %v7737_v2 = vsel %vm1504_vm9, %v11881_v57, %v7537_v4  ;;  %v8087_v29 = vor.u32 %v8086_v43, %v8082_v27  ;;  %v4381_v56 = vpop.permute.xlu0 %4380 }
 0x2cf   : > { %v8078_v14 = vrot.slane %v8077_v5, 4  ;;  %v5033_v7 = vrot.slane %v12739_v51, 5  ;;  %v15575_v24 = vsel %vm1553_vm13, %v7737_v2, %v7617_v47  ;;  %v6787_v9 = vsel %vm13186_vm5, %v11812_v23, %v6786_v42  ;;  %v12741_v5 = vld [vmem:[%s12887_s19 + $0xc8] sm:$0x3] }
 0x2d0   : > { %v6788_v50 = vrot.slane %v6786_v42, 4  ;;  %v5036_v45 = vrot.slane %v11553_v62, 5  ;;  %v8088_v35 = vrot.slane %v8087_v29, 4  ;;  %v3615_v52 = vshrl.u32 %v11327_v54, 16 }
 0x2d1   : > { %v8083_v31 = vsel %vm12915_vm2, %v8078_v14, %v8082_v27  ;;  %v5034_v4 = vsel %vm13186_vm5, %v11569_v11, %v5033_v7  ;;  %v5035_v22 = vrot.slane %v5033_v7, 4  ;;  %v3618_v39 = vshll.u32 %v11327_v54, 16 }
 0x2d2   : > { %v6790_v19 = vsel %vm13186_vm5, %v6788_v50, %v6789_v20  ;;  %v3624_v8 = vshrl.u32 %v12740_v6, 16  ;;  %v8093_v44 = vsel %vm12915_vm2, %v8088_v35, %v8092_v61  ;;  %v3627_v26 = vshll.u32 %v12740_v6, 16  ;;  %v11536_v6 = vld [vmem:[%s12887_s19 + $0x90] sm:$0xe] }
 0x2d3   : > { %v11892_v49 = vcombine.low %v6787_v9, %v6790_v19  ;;  %v5037_v40 = vsel %vm13186_vm5, %v5035_v22, %v5036_v45  ;;  %v12084_v60 = vcombine.low %v8083_v31, %v8093_v44  ;;  %v3617_v10 = vrot.slane %v3615_v52, 5  ;;  %v15607_v31 = vld [vmem:[%s12887_s19 + $0x44] sm:$0x3]  ;;  %v9253_v52 = vpop.permute.xlu1 %9252 }
 0x2d4   : > { %v11665_v21 = vcombine.low %v5034_v4, %v5037_v40  ;;  %v3620_v27 = vrot.slane %v3618_v39, 6  ;;  %v3626_v57 = vrot.slane %v3624_v8, 5  ;;  %v3629_v47 = vrot.slane %v3627_v26, 6  ;;  %v7697_v39 = vpop.permute.xlu0 %7696 }
 0x2d5   : > { %7526 = vrot.lane.b32.xlu0 %v11892_v49, %s12839_s20  ;;  %v3634_v43 = vshrl.u32 %v12741_v5, 16  ;;  %v3637_v23 = vshll.u32 %v12741_v5, 16  ;;  %9082 = vrot.lane.b32.xlu1 %v12084_v60, %s12839_s20  ;;  %v12036_v42 = vrot.slane %v15591_v33, 9  ;;  %v8486_v20 = vrot.slane %v15533_v58, 5 }
 0x2d6   : > { %v15597_v62 = vsel %vm1504_vm9, %v11665_v21, %v5825_v17  ;;  %v3621_v61 = vor.u32 %v3620_v27, %v3617_v10  ;;  %v3630_v41 = vor.u32 %v3629_v47, %v3626_v57  ;;  %v8489_v14 = vrot.slane %v15541_v32, 5 }
 0x2d7   : > { %v3636_v11 = vrot.slane %v3634_v43, 5  ;;  %v3639_v2 = vrot.slane %v3637_v23, 6  ;;  %v8487_v51 = vsel %vm13186_vm5, %v12036_v42, %v8486_v20  ;;  %v8488_v7 = vrot.slane %v8486_v20, 4  ;;  %v15634_v42 = vld [vmem:[%s12887_s19 + $0x98] sm:$0x3] }
 0x2d8   : > { %v3622_v29 = vrot.slane %v3621_v61, 4  ;;  %v6380_v54 = vshll.u32 %v15553_v37, 16  ;;  %v3632_v9 = vrot.slane %v3630_v41, 4  ;;  %v6384_v45 = vshrl.u32 %v15553_v37, 16  ;;  %v15631_v61 = vld [vmem:[%s12887_s19 + $0x94] sm:$0xf] }
 0x2d9   : > { %v3640_v50 = vor.u32 %v3639_v2, %v3636_v11  ;;  %v6945_v35 = vshrl.u32 %v15562_v18, 16  ;;  %v8490_v32 = vsel %vm13186_vm5, %v8488_v7, %v8489_v14  ;;  %v6948_v22 = vshll.u32 %v15562_v18, 16  ;;  %v11313_v7 = vld [vmem:[%s12887_s19 + $0x88] sm:$0xf] }
 0x2da   : > { %v3631_v4 = vsel %vm13345_vm8, %v3622_v29, %v3630_v41  ;;  %v6954_v19 = vrot.slane %v6380_v54, 6  ;;  %v12100_v44 = vcombine.low %v8487_v51, %v8490_v32  ;;  %v6953_v40 = vrot.slane %v6384_v45, 5 }
 0x2db   : > { %v3641_v8 = vsel %vm13345_vm8, %v3632_v9, %v3640_v50  ;;  %v6947_v49 = vrot.slane %v6945_v35, 5  ;;  %v6950_v26 = vrot.slane %v6948_v22, 6  ;;  %v6959_v18 = vshrl.u32 %v15607_v31, 16 }
 0x2dc   : > { %v11425_v17 = vcombine.low %v3631_v4, %v3641_v8  ;;  %v6962_v60 = vshll.u32 %v15607_v31, 16  ;;  %9162 = vrot.lane.b32.xlu1 %v12100_v44, %s12840_s21  ;;  %v6955_v21 = vor.u32 %v6954_v19, %v6953_v40  ;;  %v9365_v10 = vsel %vm1586_vm14, %v15538_v13, %v9253_v52  ;;  %v11340_v13 = vld [vmem:[%s12887_s19 + $0x84] sm:$0xc]  ;;  %v11314_v4 = vld [vmem:[%s12887_s19 + $0x8c] sm:$0x3] }
 0x2dd   : > { %v7809_v27 = vsel %vm1586_vm14, %v15575_v24, %v7697_v39  ;;  %v5335_v57 = vshrl.u32 %v11536_v6, 16  ;;  %v6951_v5 = vor.u32 %v6950_v26, %v6947_v49  ;;  %v6961_v43 = vrot.slane %v6959_v18, 5  ;;  %v5905_v39 = vpop.permute.xlu1 %5904 }
 0x2de   : > { %v4621_v47 = vsel %vm1504_vm9, %v11425_v17, %v4381_v56  ;;  %v6964_v23 = vrot.slane %v6962_v60, 6  ;;  %v6957_v20 = vrot.slane %v6955_v21, 4  ;;  %v12144_v41 = vcombine.low %v9365_v10, %v9365_v10 }
 0x2df   : > { %v12145_v11 = vcombine.high %v9365_v10, %v9365_v10  ;;  %v11952_v2 = vcombine.low %v7809_v27, %v7809_v27  ;;  %v6952_v14 = vrot.slane %v6951_v5, 4  ;;  %v11953_v24 = vcombine.high %v7809_v27, %v7809_v27  ;;  %v12052_v5 = vld [vmem:[%s12887_s19 + $0x50] sm:$0x3] }
 0x2e0   : > { %v6965_v29 = vor.u32 %v6964_v23, %v6961_v43  ;;  %v5337_v51 = vrot.slane %v5335_v57, 5  ;;  %9508 = vst [vmem:[#allocation2 + $0x19c] sm:$0xf] %v12144_v41  ;;  %v5338_v56 = vshll.u32 %v11536_v6, 16  ;;  %v5344_v9 = vshrl.u32 %v15631_v61, 16  ;;  %v4493_v6 = vpop.permute.xlu0 %4492 }
 0x2e1   : > { %9509 = vst [vmem:[#allocation2 + $0x1b8] sm:$0xf] %v12145_v11  ;;  %7952 = vst [vmem:[#allocation2 + $0x198] sm:$0xf] %v11952_v2  ;;  %v5347_v50 = vshll.u32 %v15631_v61, 16  ;;  %v5354_v35 = vshrl.u32 %v15634_v42, 16  ;;  %v6956_v32 = vsel %vm13345_vm8, %v6952_v14, %v6955_v21  ;;  %v6097_v27 = vsel %vm1553_vm13, %v15597_v62, %v5905_v39 }
 0x2e2   : > { %v6966_v22 = vsel %vm13345_vm8, %v6957_v20, %v6965_v29  ;;  %7953 = vst [vmem:[#allocation2 + $0x1b4] sm:$0xf] %v11953_v24  ;;  %v5357_v19 = vshll.u32 %v15634_v42, 16  ;;  %v11356_v52 = vrot.slane %v11340_v13, 10  ;;  %v5340_v44 = vrot.slane %v5338_v56, 6 }
 0x2e3   : > { %v11908_v8 = vcombine.low %v6956_v32, %v6966_v22  ;;  %v5346_v49 = vrot.slane %v5344_v9, 5  ;;  %v5349_v40 = vrot.slane %v5347_v50, 6  ;;  %v5356_v17 = vrot.slane %v5354_v35, 5 }
 0x2e4   : > { %v5359_v26 = vrot.slane %v5357_v19, 6  ;;  %v3778_v18 = vrot.slane %v11313_v7, 6  ;;  %v3781_v60 = vrot.slane %v11314_v4, 6  ;;  %v5341_v21 = vor.u32 %v5340_v44, %v5337_v51  ;;  %v11844_v51 = vld [vmem:[%s12887_s19 + $0x3c] sm:$0xc]  ;;  %v6017_v7 = vpop.permute.xlu1 %6016  ;;  %v4573_v35 = vpop.permute.xlu0 %4572 }
 0x2e5   : > { %7606 = vrot.lane.b32.xlu0 %v11908_v8, %s12840_s21  ;;  %v5350_v10 = vor.u32 %v5349_v40, %v5346_v49  ;;  %v4653_v57 = vsel %vm1553_vm13, %v4621_v47, %v4493_v6  ;;  %v8645_v41 = vshrl.u32 %v15591_v33, 16  ;;  %v8648_v13 = vshll.u32 %v15591_v33, 16 }
 0x2e6   : > { %v5360_v43 = vor.u32 %v5359_v26, %v5356_v17  ;;  %v3779_v23 = vsel %vm13666_vm12, %v11356_v52, %v3778_v18  ;;  %v3780_v20 = vrot.slane %v3778_v18, 4  ;;  %v5342_v11 = vrot.slane %v5341_v21, 4  ;;  %v11596_v17 = vld [vmem:[%s12887_s19 + $0x90] sm:$0xc] }
 0x2e7   : > { %v5352_v2 = vrot.slane %v5350_v10, 4  ;;  %v8653_v14 = vrot.slane %v8084_v46, 5  ;;  %v8647_v29 = vrot.slane %v8645_v41, 5  ;;  %v8654_v47 = vrot.slane %v8080_v53, 6 }
 0x2e8   : > { %v3782_v62 = vsel %vm13666_vm12, %v3780_v20, %v3781_v60  ;;  %v8659_v24 = vshrl.u32 %v12052_v5, 16  ;;  %v5351_v56 = vsel %vm13345_vm8, %v5342_v11, %v5350_v10  ;;  %v8650_v50 = vrot.slane %v8648_v13, 6  ;;  %v12555_v4 = vld [vmem:[#allocation2 + $0x19c] ss:$28 sps:$4 sm:$0xff]   ;;  %v11382_v10 = vld [vmem:[%s12887_s19 + $0x90] sm:$0xf]  ;;  %v9091_v20 = vpop.permute.xlu1 %9090 }
 0x2e9   : > { %v5361_v9 = vsel %vm13345_vm8, %v5352_v2, %v5360_v43  ;;  %v11436_v33 = vcombine.low %v3779_v23, %v3782_v62  ;;  %v12553_v46 = vld [vmem:[#allocation2 + $0x198] ss:$28 sps:$4 sm:$0xff]   ;;  %v8655_v22 = vor.u32 %v8654_v47, %v8653_v14  ;;  %v8662_v58 = vshll.u32 %v12052_v5, 16  ;;  %10757 = vmatprep.subr.bf16.mxu0 %v12555_v4  ;;  %v11764_v47 = vld [vmem:[%s12887_s19 + $0x6c] sm:$0xf] }
 0x2ea   : > { %v11676_v32 = vcombine.low %v5351_v56, %v5361_v9  ;;  %v8661_v19 = vrot.slane %v8659_v24, 5  ;;  %v8651_v53 = vor.u32 %v8650_v50, %v8647_v29  ;;  %v11860_v52 = vrot.slane %v11844_v51, 10  ;;  %10758 = vmatpush1.bf16.xpose.msra.mxu0 %v12553_v46  ;;  %v11383_v2 = vld [vmem:[%s12887_s19 + $0x94] sm:$0xf]  ;;  %v12742_v46 = vld [vmem:[%s12887_s19 + $0x78] sm:$0xf] }
 0x2eb   : > { %4370 = vrot.lane.b32.xlu0 %v11436_v33, %s12839_s20  ;;  %v7330_v39 = vrot.slane %v15553_v37, 6  ;;  %v7333_v6 = vrot.slane %v15607_v31, 6  ;;  %v8657_v8 = vrot.slane %v8655_v22, 4  ;;  %v8664_v44 = vrot.slane %v8662_v58, 6  ;;  %v12743_v4 = vld [vmem:[%s12887_s19 + $0x7c] sm:$0xf] }
 0x2ec   : > { %5814 = vrot.lane.b32.xlu1 %v11676_v32, %s12839_s20  ;;  %v6129_v49 = vsel %vm1586_vm14, %v6097_v27, %v6017_v7  ;;  %v4685_v40 = vsel %vm1586_vm14, %v4653_v57, %v4573_v35  ;;  %v8652_v26 = vrot.slane %v8651_v53, 4  ;;  %v11612_v41 = vrot.slane %v11596_v17, 10 }
 0x2ed   : > { %v7331_v18 = vsel %vm13666_vm12, %v11860_v52, %v7330_v39  ;;  %v7332_v60 = vrot.slane %v7330_v39, 4  ;;  %v11744_v21 = vcombine.low %v6129_v49, %v6129_v49  ;;  %v8665_v31 = vor.u32 %v8664_v44, %v8661_v19  ;;  %v11404_v19 = vld [vmem:[%s12887_s19 + $0x98] sm:$0x1] }
 0x2ee   : > { %v11745_v5 = vcombine.high %v6129_v49, %v6129_v49  ;;  %v11504_v43 = vcombine.low %v4685_v40, %v4685_v40  ;;  %v11505_v23 = vcombine.high %v4685_v40, %v4685_v40  ;;  %v8656_v27 = vsel %vm13345_vm8, %v8652_v26, %v8655_v22  ;;  %v15703_v26 = vld [vmem:[%s12887_s19 + $0x40] sm:$0xf] }
 0x2ef   : > { %v7334_v57 = vsel %vm13666_vm12, %v7332_v60, %v7333_v6  ;;  %6272 = vst [vmem:[#allocation2 + $0x354] sm:$0xf] %v11744_v21  ;;  %v5622_v11 = vrot.slane %v15631_v61, 6  ;;  %v8666_v13 = vsel %vm13345_vm8, %v8657_v8, %v8665_v31  ;;  %v5625_v62 = vrot.slane %v15634_v42, 6  ;;  %v9171_v6 = vpop.permute.xlu1 %9170  ;;  %v11972_v8 = vld [vmem:[%s12887_s19 + $0x3c] sm:$0xf] }
 0x2f0   : > { %v11924_v14 = vcombine.low %v7331_v18, %v7334_v57  ;;  %6273 = vst [vmem:[#allocation2 + $0x370] sm:$0xf] %v11745_v5  ;;  %4828 = vst [vmem:[#allocation2 + $0x350] sm:$0xf] %v11504_v43  ;;  %v4111_v29 = vshrl.u32 %v11382_v10, 16  ;;  %v12116_v24 = vcombine.low %v8656_v27, %v8666_v13  ;;  %v4114_v7 = vshll.u32 %v11382_v10, 16 }
 0x2f1   : > { %4829 = vst [vmem:[#allocation2 + $0x36c] sm:$0xf] %v11505_v23  ;;  %v5623_v51 = vsel %vm13666_vm12, %v11612_v41, %v5622_v11  ;;  %v5624_v61 = vrot.slane %v5622_v11, 4  ;;  %v4120_v9 = vshll.u32 %v11383_v2, 16  ;;  %v4124_v33 = vshrl.u32 %v11383_v2, 16 }
 0x2f2   : > { %7686 = vrot.lane.b32.xlu0 %v11924_v14, %s12841_s22  ;;  %v4113_v56 = vrot.slane %v4111_v29, 4  ;;  %v11452_v50 = vcombine.low %v11382_v10, %v11383_v2  ;;  %9242 = vrot.lane.b32.xlu1 %v12116_v24, %s12841_s22  ;;  %v4116_v35 = vrot.slane %v4114_v7, 5  ;;  %v12072_v32 = vcombine.low %v12742_v46, %v12743_v4  ;;  %v12744_v60 = vld [vmem:[%s12887_s19 + $0x74] sm:$0x1]  ;;  %v12552_v10 = vld [vmem:[%s12887_s19 + $0x9c] sm:$0xff]  }
 0x2f3   : > { %v5626_v42 = vsel %vm13666_vm12, %v5624_v61, %v5625_v62  ;;  %v6467_v22 = vshrl.u32 %v11764_v47, 16  ;;  %v4122_v53 = vrot.slane %v4120_v9, 5  ;;  %v4126_v52 = vrot.slane %v4124_v33, 4  ;;  %v15709_v43 = vld [vmem:[%s12887_s19 + $0x44] sm:$0x1] }
 0x2f4   : > { %v11692_v58 = vcombine.low %v5623_v51, %v5626_v42  ;;  %v6470_v39 = vshll.u32 %v11764_v47, 16  ;;  %v9290_v44 = vsel %vm1504_vm9, %v12072_v32, %v9091_v20  ;;  %v6478_v40 = vrot.slane %v6476_v16, 5  ;;  %v7535_v20 = vpop.permute.xlu0 %7534  ;;  %v15726_v42 = vld [vmem:[%s12887_s19 + $0x34] sm:$0xf] }
 0x2f5   : > { %v6469_v49 = vrot.slane %v6467_v22, 4  ;;  %v6482_v17 = vrot.slane %v6480_v63, 4  ;;  %v6486_v21 = vshll.u32 %v12744_v60, 16  ;;  %v4117_v31 = vor.u32 %v4116_v35, %v4113_v56  ;;  %v11751_v35 = vld [vmem:[%s12887_s19 + $0x38] sm:$0x1] }
 0x2f6   : > { %4482 = vrot.lane.b32.xlu0 %v11452_v50, %s12840_s21  ;;  %v6472_v18 = vrot.slane %v6470_v39, 5  ;;  %v4127_v5 = vor.u32 %v4126_v52, %v4122_v53  ;;  %5894 = vrot.lane.b32.xlu1 %v11692_v58, %s12840_s21  ;;  %v4130_v16 = vshll.u32 %v11404_v19, 16  ;;  %v15713_v34 = vsel %vm1553_vm13, %v9290_v44, %v9171_v6  ;;  %v15736_v19 = vld [vmem:[%s12887_s19 + $0x30] sm:$0xe]  ;;  %v11550_v58 = vld [vmem:[%s12887_s19 + $0xc8] sm:$0x1] }
 0x2f7   : > { %v6483_v23 = vor.u32 %v6482_v17, %v6478_v40  ;;  %v8047_v63 = vshrl.u32 %v11972_v8, 16  ;;  %v12556_v27 = vld [vmem:[#allocation2 + $0x354] ss:$28 sps:$4 sm:$0xff]   ;;  %v6488_v41 = vrot.slane %v6486_v21, 5  ;;  %v4118_v11 = vrot.slane %v4117_v31, 4 }
 0x2f8   : > { %v6473_v57 = vor.u32 %v6472_v18, %v6469_v49  ;;  %v4128_v2 = vrot.slane %v4127_v5, 4  ;;  %v12558_v13 = vld [vmem:[#allocation2 + $0x350] ss:$28 sps:$4 sm:$0xff]   ;;  %v4132_v62 = vrot.slane %v4130_v16, 5  ;;  %v8050_v47 = vshll.u32 %v11972_v8, 16  ;;  %10720 = vmatprep.subr.bf16.mxu1 %v12556_v27  ;;  %v7615_v52 = vpop.permute.xlu0 %7614 }
 0x2f9   : > { %v6484_v14 = vrot.slane %v6483_v23, 4  ;;  %v8049_v29 = vrot.slane %v8047_v63, 4  ;;  %v4123_v51 = vsel %vm12915_vm2, %v4118_v11, %v4122_v53  ;;  %v8056_v61 = vshll.u32 %v15703_v26, 16  ;;  %10721 = vmatpush2.bf16.xpose.msra.mxu1 %v12558_v13  ;;  %v12745_v17 = vld [vmem:[%s12887_s19 + $0xc0] sm:$0xe] }
 0x2fa   : > { %v6474_v24 = vrot.slane %v6473_v57, 4  ;;  %v8060_v7 = vshrl.u32 %v15703_v26, 16  ;;  %6006 = vrot.lane.b32.xlu1 %v12552_v10, %s12841_s22  ;;  %v4133_v9 = vsel %vm12915_vm2, %v4128_v2, %v4132_v62  ;;  %v8052_v33 = vrot.slane %v8050_v47, 5  ;;  %v11324_v60 = vld [vmem:[%s12887_s19 + $0xb4] sm:$0xe] }
 0x2fb   : > { %v6489_v56 = vsel %vm12915_vm2, %v6484_v14, %v6488_v41  ;;  %v8066_v50 = vshll.u32 %v15709_v43, 16  ;;  %v11468_v4 = vcombine.low %v4123_v51, %v4133_v9  ;;  %v8058_v32 = vrot.slane %v8056_v61, 5  ;;  %v12746_v31 = vld [vmem:[%s12887_s19 + $0xc4] sm:$0xf] }
 0x2fc   : > { %v6479_v46 = vsel %vm12915_vm2, %v6474_v24, %v6478_v40  ;;  %v8062_v22 = vrot.slane %v8060_v7, 4  ;;  %v8053_v39 = vor.u32 %v8052_v33, %v8049_v29  ;;  %v11811_v8 = vrot.slane %v15736_v19, 9  ;;  %v12747_v29 = vld [vmem:[%s12887_s19 + $0xb8] sm:$0xf]  ;;  %v15761_v24 = vld [vmem:[%s12887_s19 + $0x3c] sm:$0xe]  ;;  %v5823_v33 = vpop.permute.xlu1 %5822 }
 0x2fd   : > { %v11880_v53 = vcombine.low %v6479_v46, %v6489_v56  ;;  %v8068_v6 = vrot.slane %v8066_v50, 5  ;;  %4562 = vrot.lane.b32.xlu0 %v11468_v4, %s12841_s22  ;;  %v6779_v49 = vrot.slane %v15726_v42, 5  ;;  %v6782_v40 = vrot.slane %v11751_v35, 5  ;;  %v4379_v35 = vpop.permute.xlu0 %4378 }
 0x2fe   : > { %v8063_v44 = vor.u32 %v8062_v22, %v8058_v32  ;;  %v11568_v18 = vrot.slane %v12745_v17, 9  ;;  %v8054_v10 = vrot.slane %v8053_v39, 4  ;;  %v5026_v5 = vrot.slane %v12746_v31, 5 }
 0x2ff   : > { %v7734_v21 = vsel %vm1504_vm9, %v11880_v53, %v7535_v20  ;;  %v5029_v23 = vrot.slane %v11550_v58, 5  ;;  %v6780_v27 = vsel %vm13186_vm5, %v11811_v8, %v6779_v49  ;;  %v6781_v57 = vrot.slane %v6779_v49, 4  ;;  %v12748_v58 = vld [vmem:[%s12887_s19 + $0xbc] sm:$0x3] }
 0x300   : > { %v15747_v16 = vsel %vm1553_vm13, %v7734_v21, %v7615_v52  ;;  %v8064_v63 = vrot.slane %v8063_v44, 4  ;;  %v8059_v41 = vsel %vm12915_vm2, %v8054_v10, %v8058_v32  ;;  %v5027_v20 = vsel %vm13186_vm5, %v11568_v18, %v5026_v5 }
 0x301   : > { %v5028_v11 = vrot.slane %v5026_v5, 4  ;;  %v3587_v2 = vshrl.u32 %v11324_v60, 16  ;;  %v6783_v14 = vsel %vm13186_vm5, %v6781_v57, %v6782_v40  ;;  %v3590_v62 = vshll.u32 %v11324_v60, 16 }
 0x302   : > { %v8069_v13 = vsel %vm12915_vm2, %v8064_v63, %v8068_v6  ;;  %v3596_v47 = vshrl.u32 %v12747_v29, 16  ;;  %v11891_v56 = vcombine.low %v6780_v27, %v6783_v14  ;;  %v3599_v22 = vshll.u32 %v12747_v29, 16  ;;  %v15779_v63 = vld [vmem:[%s12887_s19 + $0x38] sm:$0x3] }
 0x303   : > { %v12083_v51 = vcombine.low %v8059_v41, %v8069_v13  ;;  %v5030_v9 = vsel %vm13186_vm5, %v5028_v11, %v5029_v23  ;;  %v3589_v50 = vrot.slane %v3587_v2, 5  ;;  %v3592_v4 = vrot.slane %v3590_v62, 6  ;;  %v7695_v11 = vpop.permute.xlu0 %7694 }
 0x304   : > { %v11664_v46 = vcombine.low %v5027_v20, %v5030_v9  ;;  %v3598_v32 = vrot.slane %v3596_v47, 5  ;;  %7524 = vrot.lane.b32.xlu0 %v11891_v56, %s12839_s20  ;;  %v3606_v53 = vshrl.u32 %v12748_v58, 16  ;;  %v3609_v52 = vshll.u32 %v12748_v58, 16  ;;  %v9251_v20 = vpop.permute.xlu1 %9250  ;;  %v11533_v58 = vld [vmem:[%s12887_s19 + $0x84] sm:$0xe] }
 0x305   : > { %9080 = vrot.lane.b32.xlu1 %v12083_v51, %s12839_s20  ;;  %v12035_v39 = vrot.slane %v15761_v24, 9  ;;  %v8479_v6 = vrot.slane %v15703_v26, 5  ;;  %v3593_v44 = vor.u32 %v3592_v4, %v3589_v50  ;;  %v3601_v49 = vrot.slane %v3599_v22, 6 }
 0x306   : > { %v15771_v8 = vsel %vm1504_vm9, %v11664_v46, %v5823_v33  ;;  %v8482_v40 = vrot.slane %v15709_v43, 5  ;;  %v3608_v17 = vrot.slane %v3606_v53, 5  ;;  %v3611_v18 = vrot.slane %v3609_v52, 6  ;;  %v15802_v53 = vld [vmem:[%s12887_s19 + $0x88] sm:$0xf] }
 0x307   : > { %v8480_v60 = vsel %vm13186_vm5, %v12035_v39, %v8479_v6  ;;  %v8481_v21 = vrot.slane %v8479_v6, 4  ;;  %v3594_v10 = vrot.slane %v3593_v44, 4  ;;  %v3602_v31 = vor.u32 %v3601_v49, %v3598_v32  ;;  %v15805_v49 = vld [vmem:[%s12887_s19 + $0x8c] sm:$0x3] }
 0x308   : > { %v6356_v5 = vshll.u32 %v15726_v42, 16  ;;  %v6360_v23 = vshrl.u32 %v15726_v42, 16  ;;  %v3612_v27 = vor.u32 %v3611_v18, %v3608_v17  ;;  %v6922_v43 = vshrl.u32 %v15736_v19, 16  ;;  %v11310_v18 = vld [vmem:[%s12887_s19 + $0x7c] sm:$0xf] }
 0x309   : > { %v8483_v57 = vsel %vm13186_vm5, %v8481_v21, %v8482_v40  ;;  %v6925_v41 = vshll.u32 %v15736_v19, 16  ;;  %v3603_v2 = vsel %vm13345_vm8, %v3594_v10, %v3602_v31  ;;  %v3604_v13 = vrot.slane %v3602_v31, 4 }
 0x30a   : > { %v12099_v14 = vcombine.low %v8480_v60, %v8483_v57  ;;  %v6930_v62 = vrot.slane %v6360_v23, 5  ;;  %v6924_v29 = vrot.slane %v6922_v43, 5  ;;  %v6931_v51 = vrot.slane %v6356_v5, 6 }
 0x30b   : > { %v6927_v47 = vrot.slane %v6925_v41, 6  ;;  %v6936_v56 = vshrl.u32 %v15779_v63, 16  ;;  %v3613_v19 = vsel %vm13345_vm8, %v3604_v13, %v3612_v27  ;;  %v6939_v9 = vshll.u32 %v15779_v63, 16  ;;  %v11311_v27 = vld [vmem:[%s12887_s19 + $0x80] sm:$0x3] }
 0x30c   : > { %9160 = vrot.lane.b32.xlu1 %v12099_v14, %s12840_s21  ;;  %v9363_v33 = vsel %vm1586_vm14, %v15713_v34, %v9251_v20  ;;  %v7807_v50 = vsel %vm1586_vm14, %v15747_v16, %v7695_v11  ;;  %v11424_v46 = vcombine.low %v3603_v2, %v3613_v19  ;;  %v6932_v32 = vor.u32 %v6931_v51, %v6930_v62  ;;  %v11339_v20 = vld [vmem:[%s12887_s19 + $0x78] sm:$0xc]  ;;  %v5903_v62 = vpop.permute.xlu1 %5902 }
 0x30d   : > { %v6928_v4 = vor.u32 %v6927_v47, %v6924_v29  ;;  %v6938_v22 = vrot.slane %v6936_v56, 5  ;;  %v6941_v52 = vrot.slane %v6939_v9, 6  ;;  %v12142_v39 = vcombine.low %v9363_v33, %v9363_v33  ;;  %v4491_v29 = vpop.permute.xlu0 %4490 }
 0x30e   : > { %v12143_v6 = vcombine.high %v9363_v33, %v9363_v33  ;;  %v11950_v44 = vcombine.low %v7807_v50, %v7807_v50  ;;  %v4618_v34 = vsel %vm1504_vm9, %v11424_v46, %v4379_v35  ;;  %v6934_v17 = vrot.slane %v6932_v32, 4 }
 0x30f   : > { %v6929_v40 = vrot.slane %v6928_v4, 4  ;;  %v11951_v16 = vcombine.high %v7807_v50, %v7807_v50  ;;  %v6942_v60 = vor.u32 %v6941_v52, %v6938_v22  ;;  %9506 = vst [vmem:[#allocation2 + $0x164] sm:$0xf] %v12142_v39  ;;  %v5307_v21 = vshrl.u32 %v11533_v58, 16  ;;  %v12051_v52 = vld [vmem:[%s12887_s19 + $0x44] sm:$0x3] }
 0x310   : > { %9507 = vst [vmem:[#allocation2 + $0x180] sm:$0xf] %v12143_v6  ;;  %7950 = vst [vmem:[#allocation2 + $0x160] sm:$0xf] %v11950_v44  ;;  %v5310_v10 = vshll.u32 %v11533_v58, 16  ;;  %v5316_v31 = vshrl.u32 %v15802_v53, 16  ;;  %v6095_v22 = vsel %vm1553_vm13, %v15771_v8, %v5903_v62  ;;  %v4651_v58 = vsel %vm1553_vm13, %v4618_v34, %v4491_v29 }
 0x311   : > { %v6933_v57 = vsel %vm13345_vm8, %v6929_v40, %v6932_v32  ;;  %7951 = vst [vmem:[#allocation2 + $0x17c] sm:$0xf] %v11951_v16  ;;  %v5319_v35 = vshll.u32 %v15802_v53, 16  ;;  %v5326_v43 = vshrl.u32 %v15805_v49, 16  ;;  %v5329_v41 = vshll.u32 %v15805_v49, 16 }
 0x312   : > { %v6943_v11 = vsel %vm13345_vm8, %v6934_v17, %v6942_v60  ;;  %v5309_v2 = vrot.slane %v5307_v21, 5  ;;  %v5312_v13 = vrot.slane %v5310_v10, 6  ;;  %v5318_v14 = vrot.slane %v5316_v31, 5  ;;  %v11843_v17 = vld [vmem:[%s12887_s19 + $0x30] sm:$0xc] }
 0x313   : > { %v11907_v47 = vcombine.low %v6933_v57, %v6943_v11  ;;  %v5321_v51 = vrot.slane %v5319_v35, 6  ;;  %v5328_v56 = vrot.slane %v5326_v43, 5  ;;  %v5331_v19 = vrot.slane %v5329_v41, 6 }
 0x314   : > { %v5313_v9 = vor.u32 %v5312_v13, %v5309_v2  ;;  %v11355_v33 = vrot.slane %v11339_v20, 10  ;;  %v3771_v50 = vrot.slane %v11310_v18, 6  ;;  %v3774_v46 = vrot.slane %v11311_v27, 6  ;;  %v6015_v27 = vpop.permute.xlu1 %6014  ;;  %v11595_v20 = vld [vmem:[%s12887_s19 + $0x84] sm:$0xc] }
 0x315   : > { %7604 = vrot.lane.b32.xlu0 %v11907_v47, %s12840_s21  ;;  %v5322_v4 = vor.u32 %v5321_v51, %v5318_v14  ;;  %v5332_v32 = vor.u32 %v5331_v19, %v5328_v56  ;;  %v8622_v40 = vshrl.u32 %v15761_v24, 16  ;;  %v8625_v18 = vshll.u32 %v15761_v24, 16 }
 0x316   : > { %v5314_v39 = vrot.slane %v5313_v9, 4  ;;  %v3772_v6 = vsel %vm13666_vm12, %v11355_v33, %v3771_v50  ;;  %v3773_v44 = vrot.slane %v3771_v50, 4  ;;  %v8630_v60 = vrot.slane %v8060_v7, 5  ;;  %v4571_v7 = vpop.permute.xlu0 %4570 }
 0x317   : > { %v5324_v16 = vrot.slane %v5322_v4, 4  ;;  %v8631_v8 = vrot.slane %v8056_v61, 6  ;;  %v8624_v10 = vrot.slane %v8622_v40, 5  ;;  %v8636_v31 = vshrl.u32 %v12051_v52, 16  ;;  %v12564_v26 = vld [vmem:[#allocation2 + $0x164] ss:$28 sps:$4 sm:$0xff]  }
 0x318   : > { %v5323_v34 = vsel %vm13345_vm8, %v5314_v39, %v5322_v4  ;;  %v3775_v21 = vsel %vm13666_vm12, %v3773_v44, %v3774_v46  ;;  %v12562_v57 = vld [vmem:[#allocation2 + $0x160] ss:$28 sps:$4 sm:$0xff]   ;;  %v8627_v43 = vrot.slane %v8625_v18, 6  ;;  %v8639_v2 = vshll.u32 %v12051_v52, 16  ;;  %10759 = vmatprep.subr.bf16.mxu0 %v12564_v26  ;;  %v11381_v44 = vld [vmem:[%s12887_s19 + $0x88] sm:$0xf]  ;;  %v9089_v40 = vpop.permute.xlu1 %9088 }
 0x319   : > { %v5333_v35 = vsel %vm13345_vm8, %v5324_v16, %v5332_v32  ;;  %v11435_v24 = vcombine.low %v3772_v6, %v3775_v21  ;;  %v8632_v41 = vor.u32 %v8631_v8, %v8630_v60  ;;  %v8638_v11 = vrot.slane %v8636_v31, 5  ;;  %10760 = vmatpush1.bf16.xpose.msra.mxu0 %v12562_v57  ;;  %v11380_v32 = vld [vmem:[%s12887_s19 + $0x84] sm:$0xf]  ;;  %v11761_v21 = vld [vmem:[%s12887_s19 + $0x60] sm:$0xf] }
 0x31a   : > { %v11675_v61 = vcombine.low %v5323_v34, %v5333_v35  ;;  %v11859_v13 = vrot.slane %v11843_v17, 10  ;;  %v8628_v14 = vor.u32 %v8627_v43, %v8624_v10  ;;  %v7323_v29 = vrot.slane %v15726_v42, 6 }
 0x31b   : > { %4368 = vrot.lane.b32.xlu0 %v11435_v24, %s12839_s20  ;;  %v8634_v62 = vrot.slane %v8632_v41, 4  ;;  %v7326_v47 = vrot.slane %v15779_v63, 6  ;;  %v8641_v51 = vrot.slane %v8639_v2, 6  ;;  %v6127_v56 = vsel %vm1586_vm14, %v6095_v22, %v6015_v27 }
 0x31c   : > { %5812 = vrot.lane.b32.xlu1 %v11675_v61, %s12839_s20  ;;  %v4683_v19 = vsel %vm1586_vm14, %v4651_v58, %v4571_v7  ;;  %v11611_v9 = vrot.slane %v11595_v20, 10  ;;  %v8629_v33 = vrot.slane %v8628_v14, 4  ;;  %v7324_v50 = vsel %vm13666_vm12, %v11859_v13, %v7323_v29  ;;  %v12749_v7 = vld [vmem:[%s12887_s19 + $0x6c] sm:$0xf]  ;;  %v12750_v20 = vld [vmem:[%s12887_s19 + $0x70] sm:$0xf] }
 0x31d   : > { %v7325_v46 = vrot.slane %v7323_v29, 4  ;;  %v11742_v4 = vcombine.low %v6127_v56, %v6127_v56  ;;  %v8642_v52 = vor.u32 %v8641_v51, %v8638_v11  ;;  %v11743_v63 = vcombine.high %v6127_v56, %v6127_v56  ;;  %v11403_v11 = vld [vmem:[%s12887_s19 + $0x8c] sm:$0x1]  ;;  %v9169_v29 = vpop.permute.xlu1 %9168 }
 0x31e   : > { %v11502_v39 = vcombine.low %v4683_v19, %v4683_v19  ;;  %v11503_v6 = vcombine.high %v4683_v19, %v4683_v19  ;;  %v8633_v22 = vsel %vm13345_vm8, %v8629_v33, %v8632_v41  ;;  %v5615_v17 = vrot.slane %v15802_v53, 6 }
 0x31f   : > { %v7327_v58 = vsel %vm13666_vm12, %v7325_v46, %v7326_v47  ;;  %6270 = vst [vmem:[#allocation2 + $0x31c] sm:$0xf] %v11742_v4  ;;  %v5618_v16 = vrot.slane %v15805_v49, 6  ;;  %v8643_v18 = vsel %vm13345_vm8, %v8634_v62, %v8642_v52  ;;  %6271 = vst [vmem:[#allocation2 + $0x338] sm:$0xf] %v11743_v63  ;;  %v4087_v8 = vshrl.u32 %v11380_v32, 16 }
 0x320   : > { %v11923_v60 = vcombine.low %v7324_v50, %v7327_v58  ;;  %4826 = vst [vmem:[#allocation2 + $0x318] sm:$0xf] %v11502_v39  ;;  %4827 = vst [vmem:[#allocation2 + $0x334] sm:$0xf] %v11503_v6  ;;  %v4090_v34 = vshll.u32 %v11380_v32, 16  ;;  %v12115_v10 = vcombine.low %v8633_v22, %v8643_v18  ;;  %v5616_v31 = vsel %vm13666_vm12, %v11611_v9, %v5615_v17  ;;  %v12561_v46 = vld [vmem:[%s12887_s19 + $0x90] sm:$0xff]   ;;  %v7533_v6 = vpop.permute.xlu0 %7532 }
 0x321   : > { %v5617_v53 = vrot.slane %v5615_v17, 4  ;;  %v4096_v27 = vshll.u32 %v11381_v44, 16  ;;  %v4089_v49 = vrot.slane %v4087_v8, 4  ;;  %v4100_v35 = vshrl.u32 %v11381_v44, 16  ;;  %v11970_v47 = vld [vmem:[%s12887_s19 + $0x30] sm:$0xf] }
 0x322   : > { %7684 = vrot.lane.b32.xlu0 %v11923_v60, %s12841_s22  ;;  %v4092_v57 = vrot.slane %v4090_v34, 5  ;;  %v11451_v24 = vcombine.low %v11380_v32, %v11381_v44  ;;  %9240 = vrot.lane.b32.xlu1 %v12115_v10, %s12841_s22  ;;  %v12071_v26 = vcombine.low %v12749_v7, %v12750_v20  ;;  %v6443_v61 = vshrl.u32 %v11761_v21, 16  ;;  %v12751_v9 = vld [vmem:[%s12887_s19 + $0x68] sm:$0x1]  ;;  %v15878_v63 = vld [vmem:[%s12887_s19 + $0x34] sm:$0xf] }
 0x323   : > { %v5619_v43 = vsel %vm13666_vm12, %v5617_v53, %v5618_v16  ;;  %v4098_v41 = vrot.slane %v4096_v27, 5  ;;  %v4102_v13 = vrot.slane %v4100_v35, 4  ;;  %v6446_v14 = vshll.u32 %v11761_v21, 16  ;;  %v15885_v60 = vld [vmem:[%s12887_s19 + $0x38] sm:$0x1] }
 0x324   : > { %v11691_v2 = vcombine.low %v5616_v31, %v5619_v43  ;;  %v6454_v62 = vrot.slane %v6452_v28, 5  ;;  %v9287_v51 = vsel %vm1504_vm9, %v12071_v26, %v9089_v40  ;;  %v6445_v56 = vrot.slane %v6443_v61, 4  ;;  %v15903_v7 = vld [vmem:[%s12887_s19 + $0x24] sm:$0xe] }
 0x325   : > { %v6458_v19 = vrot.slane %v6456_v12, 4  ;;  %v6462_v33 = vshll.u32 %v12751_v9, 16  ;;  %v6448_v50 = vrot.slane %v6446_v14, 5  ;;  %v4093_v4 = vor.u32 %v4092_v57, %v4089_v49  ;;  %v15894_v49 = vld [vmem:[%s12887_s19 + $0x28] sm:$0xf] }
 0x326   : > { %4480 = vrot.lane.b32.xlu0 %v11451_v24, %s12840_s21  ;;  %v4103_v32 = vor.u32 %v4102_v13, %v4098_v41  ;;  %v4106_v52 = vshll.u32 %v11403_v11, 16  ;;  %5892 = vrot.lane.b32.xlu1 %v11691_v2, %s12840_s21  ;;  %v15882_v38 = vsel %vm1553_vm13, %v9287_v51, %v9169_v29  ;;  %v8023_v12 = vshrl.u32 %v11970_v47, 16  ;;  %v12565_v44 = vld [vmem:[#allocation2 + $0x31c] ss:$28 sps:$4 sm:$0xff]   ;;  %v11748_v57 = vld [vmem:[%s12887_s19 + $0x2c] sm:$0x1]  ;;  %v7613_v13 = vpop.permute.xlu0 %7612 }
 0x327   : > { %v6459_v28 = vor.u32 %v6458_v19, %v6454_v62  ;;  %v6464_v39 = vrot.slane %v6462_v33, 5  ;;  %v6449_v40 = vor.u32 %v6448_v50, %v6445_v56  ;;  %v4094_v22 = vrot.slane %v4093_v4, 4  ;;  %v12567_v16 = vld [vmem:[#allocation2 + $0x318] ss:$28 sps:$4 sm:$0xff]   ;;  %10722 = vmatprep.subr.bf16.mxu1 %v12565_v44  ;;  %v11321_v51 = vld [vmem:[%s12887_s19 + $0xa8] sm:$0xe] }
 0x328   : > { %v4104_v58 = vrot.slane %v4103_v32, 4  ;;  %v4108_v17 = vrot.slane %v4106_v52, 5  ;;  %v8025_v8 = vrot.slane %v8023_v12, 4  ;;  %v8026_v34 = vshll.u32 %v11970_v47, 16  ;;  %10723 = vmatpush2.bf16.xpose.msra.mxu1 %v12567_v16  ;;  %v12752_v9 = vld [vmem:[%s12887_s19 + $0xb4] sm:$0xe] }
 0x329   : > { %v6460_v18 = vrot.slane %v6459_v28, 4  ;;  %v8032_v21 = vshll.u32 %v15878_v63, 16  ;;  %v6450_v10 = vrot.slane %v6449_v40, 4  ;;  %v4099_v31 = vsel %vm12915_vm2, %v4094_v22, %v4098_v41  ;;  %v12753_v50 = vld [vmem:[%s12887_s19 + $0xb8] sm:$0xf] }
 0x32a   : > { %v4109_v53 = vsel %vm12915_vm2, %v4104_v58, %v4108_v17  ;;  %v8036_v27 = vshrl.u32 %v15878_v63, 16  ;;  %6004 = vrot.lane.b32.xlu1 %v12561_v46, %s12841_s22  ;;  %v8028_v43 = vrot.slane %v8026_v34, 5  ;;  %v8042_v61 = vshll.u32 %v15885_v60, 16  ;;  %v12754_v34 = vld [vmem:[%s12887_s19 + $0xac] sm:$0xf] }
 0x32b   : > { %v6465_v35 = vsel %vm12915_vm2, %v6460_v18, %v6464_v39  ;;  %v11467_v24 = vcombine.low %v4099_v31, %v4109_v53  ;;  %v8034_v41 = vrot.slane %v8032_v21, 5  ;;  %v6455_v20 = vsel %vm12915_vm2, %v6450_v10, %v6454_v62  ;;  %v11547_v62 = vld [vmem:[%s12887_s19 + $0xbc] sm:$0x1]  ;;  %v15933_v31 = vld [vmem:[%s12887_s19 + $0x30] sm:$0xe] }
 0x32c   : > { %v8038_v26 = vrot.slane %v8036_v27, 4  ;;  %v11810_v11 = vrot.slane %v15903_v7, 9  ;;  %v11879_v2 = vcombine.low %v6455_v20, %v6465_v35  ;;  %v8029_v14 = vor.u32 %v8028_v43, %v8025_v8  ;;  %v5821_v35 = vpop.permute.xlu1 %5820 }
 0x32d   : > { %4560 = vrot.lane.b32.xlu0 %v11467_v24, %s12841_s22  ;;  %v6772_v29 = vrot.slane %v15894_v49, 5  ;;  %v6775_v47 = vrot.slane %v11748_v57, 5  ;;  %v8044_v19 = vrot.slane %v8042_v61, 5  ;;  %v11567_v33 = vrot.slane %v12752_v9, 9 }
 0x32e   : > { %v8039_v56 = vor.u32 %v8038_v26, %v8034_v41  ;;  %v5019_v46 = vrot.slane %v12753_v50, 5  ;;  %v7731_v4 = vsel %vm1504_vm9, %v11879_v2, %v7533_v6  ;;  %v8030_v32 = vrot.slane %v8029_v14, 4 }
 0x32f   : > { %v6773_v52 = vsel %vm13186_vm5, %v11810_v11, %v6772_v29  ;;  %v6774_v28 = vrot.slane %v6772_v29, 4  ;;  %v15921_v39 = vsel %vm1553_vm13, %v7731_v4, %v7613_v13  ;;  %v5022_v58 = vrot.slane %v11547_v62, 5  ;;  %v12755_v11 = vld [vmem:[%s12887_s19 + $0xb0] sm:$0x3] }
 0x330   : > { %v8040_v12 = vrot.slane %v8039_v56, 4  ;;  %v5020_v44 = vsel %vm13186_vm5, %v11567_v33, %v5019_v46  ;;  %v5021_v40 = vrot.slane %v5019_v46, 4  ;;  %v8035_v22 = vsel %vm12915_vm2, %v8030_v32, %v8034_v41  ;;  %v4377_v41 = vpop.permute.xlu0 %4376 }
 0x331   : > { %v6776_v6 = vsel %vm13186_vm5, %v6774_v28, %v6775_v47  ;;  %v3559_v17 = vshrl.u32 %v11321_v51, 16  ;;  %v3562_v8 = vshll.u32 %v11321_v51, 16  ;;  %v3568_v10 = vshrl.u32 %v12754_v34, 16  ;;  %v15951_v28 = vld [vmem:[%s12887_s19 + $0x2c] sm:$0x3] }
 0x332   : > { %v8045_v16 = vsel %vm12915_vm2, %v8040_v12, %v8044_v19  ;;  %v11890_v18 = vcombine.low %v6773_v52, %v6776_v6  ;;  %v5023_v57 = vsel %vm13186_vm5, %v5021_v40, %v5022_v58  ;;  %v3571_v43 = vshll.u32 %v12754_v34, 16  ;;  %v9249_v6 = vpop.permute.xlu1 %9248 }
 0x333   : > { %v12082_v53 = vcombine.low %v8035_v22, %v8045_v16  ;;  %v3561_v24 = vrot.slane %v3559_v17, 5  ;;  %v11663_v20 = vcombine.low %v5020_v44, %v5023_v57  ;;  %v3564_v26 = vrot.slane %v3562_v8, 6 }
 0x334   : > { %7522 = vrot.lane.b32.xlu0 %v11890_v18, %s12839_s20  ;;  %v3570_v61 = vrot.slane %v3568_v10, 5  ;;  %v3578_v2 = vshrl.u32 %v12755_v11, 16  ;;  %v3573_v13 = vrot.slane %v3571_v43, 6  ;;  %v3581_v14 = vshll.u32 %v12755_v11, 16  ;;  %v7693_v58 = vpop.permute.xlu0 %7692 }
 0x335   : > { %9078 = vrot.lane.b32.xlu1 %v12082_v53, %s12839_s20  ;;  %v12034_v29 = vrot.slane %v15933_v31, 9  ;;  %v8472_v47 = vrot.slane %v15878_v63, 5  ;;  %v15943_v51 = vsel %vm1504_vm9, %v11663_v20, %v5821_v35  ;;  %v3565_v56 = vor.u32 %v3564_v26, %v3561_v24  ;;  %v11530_v20 = vld [vmem:[%s12887_s19 + $0x78] sm:$0xe] }
 0x336   : > { %v3580_v19 = vrot.slane %v3578_v2, 5  ;;  %v8475_v62 = vrot.slane %v15885_v60, 5  ;;  %v3574_v9 = vor.u32 %v3573_v13, %v3570_v61  ;;  %v3583_v33 = vrot.slane %v3581_v14, 6  ;;  %v15974_v13 = vld [vmem:[%s12887_s19 + $0x7c] sm:$0xf] }
 0x337   : > { %v8473_v50 = vsel %vm13186_vm5, %v12034_v29, %v8472_v47  ;;  %v8474_v46 = vrot.slane %v8472_v47, 4  ;;  %v3566_v4 = vrot.slane %v3565_v56, 4  ;;  %v6332_v32 = vshll.u32 %v15894_v49, 16 }
 0x338   : > { %v17593_v52 = vshrl.u32 %v15894_v49, 16  ;;  %v6899_v12 = vshrl.u32 %v15903_v7, 16  ;;  %v3576_v44 = vrot.slane %v3574_v9, 4  ;;  %v3584_v40 = vor.u32 %v3583_v33, %v3580_v19  ;;  %v15978_v19 = vld [vmem:[%s12887_s19 + $0x80] sm:$0x3] }
 0x339   : > { %v8476_v60 = vsel %vm13186_vm5, %v8474_v46, %v8475_v62  ;;  %v6902_v22 = vshll.u32 %v15903_v7, 16  ;;  %v3575_v17 = vsel %vm13345_vm8, %v3566_v4, %v3574_v9  ;;  %v6908_v53 = vrot.slane %v6332_v32, 6  ;;  %v11307_v33 = vld [vmem:[%s12887_s19 + $0x70] sm:$0xf] }
 0x33a   : > { %v12098_v16 = vcombine.low %v8473_v50, %v8476_v60  ;;  %v6901_v18 = vrot.slane %v6899_v12, 5  ;;  %v6907_v8 = vrot.slane %v17593_v52, 5  ;;  %v3585_v34 = vsel %vm13345_vm8, %v3576_v44, %v3584_v40  ;;  %v11338_v12 = vld [vmem:[%s12887_s19 + $0x6c] sm:$0xc] }
 0x33b   : > { %v6904_v10 = vrot.slane %v6902_v22, 6  ;;  %v6913_v7 = vshrl.u32 %v15951_v28, 16  ;;  %v11423_v57 = vcombine.low %v3575_v17, %v3585_v34  ;;  %v6916_v35 = vshll.u32 %v15951_v28, 16  ;;  %v4489_v34 = vpop.permute.xlu0 %4488 }
 0x33c   : > { %9158 = vrot.lane.b32.xlu1 %v12098_v16, %s12840_s21  ;;  %v9361_v24 = vsel %vm1586_vm14, %v15882_v38, %v9249_v6  ;;  %v7805_v43 = vsel %vm1586_vm14, %v15921_v39, %v7693_v58  ;;  %v6909_v61 = vor.u32 %v6908_v53, %v6907_v8  ;;  %v5279_v9 = vshrl.u32 %v11530_v20, 16  ;;  %v11308_v6 = vld [vmem:[%s12887_s19 + $0x74] sm:$0x3]  ;;  %v5901_v8 = vpop.permute.xlu1 %5900 }
 0x33d   : > { %v6905_v26 = vor.u32 %v6904_v10, %v6901_v18  ;;  %v6915_v11 = vrot.slane %v6913_v7, 5  ;;  %v12140_v2 = vcombine.low %v9361_v24, %v9361_v24  ;;  %v4615_v14 = vsel %vm1504_vm9, %v11423_v57, %v4377_v41 }
 0x33e   : > { %v6918_v29 = vrot.slane %v6916_v35, 6  ;;  %v12141_v47 = vcombine.high %v9361_v24, %v9361_v24  ;;  %v11948_v56 = vcombine.low %v7805_v43, %v7805_v43  ;;  %v6911_v62 = vrot.slane %v6909_v61, 4 }
 0x33f   : > { %v6906_v38 = vrot.slane %v6905_v26, 4  ;;  %9504 = vst [vmem:[#allocation2 + $0x12c] sm:$0xf] %v12140_v2  ;;  %v11949_v39 = vcombine.high %v7805_v43, %v7805_v43  ;;  %v5282_v46 = vshll.u32 %v11530_v20, 16  ;;  %v5288_v4 = vshrl.u32 %v15974_v13, 16 }
 0x340   : > { %v6919_v50 = vor.u32 %v6918_v29, %v6915_v11  ;;  %9505 = vst [vmem:[#allocation2 + $0x148] sm:$0xf] %v12141_v47  ;;  %7948 = vst [vmem:[#allocation2 + $0x128] sm:$0xf] %v11948_v56  ;;  %v5291_v41 = vshll.u32 %v15974_v13, 16  ;;  %v5281_v40 = vrot.slane %v5279_v9, 5  ;;  %v4649_v11 = vsel %vm1553_vm13, %v4615_v14, %v4489_v34 }
 0x341   : > { %v6910_v44 = vsel %vm13345_vm8, %v6906_v38, %v6909_v61  ;;  %7949 = vst [vmem:[#allocation2 + $0x144] sm:$0xf] %v11949_v39  ;;  %v5298_v60 = vshrl.u32 %v15978_v19, 16  ;;  %v5301_v22 = vshll.u32 %v15978_v19, 16  ;;  %v5284_v17 = vrot.slane %v5282_v46, 6 }
 0x342   : > { %v6920_v58 = vsel %vm13345_vm8, %v6911_v62, %v6919_v50  ;;  %v5290_v16 = vrot.slane %v5288_v4, 5  ;;  %v5293_v18 = vrot.slane %v5291_v41, 6  ;;  %v11354_v57 = vrot.slane %v11338_v12, 10  ;;  %v12050_v2 = vld [vmem:[%s12887_s19 + $0x38] sm:$0x3]  ;;  %v6013_v12 = vpop.permute.xlu1 %6012 }
 0x343   : > { %v11906_v10 = vcombine.low %v6910_v44, %v6920_v58  ;;  %v5300_v53 = vrot.slane %v5298_v60, 5  ;;  %v5303_v7 = vrot.slane %v5301_v22, 6  ;;  %v5285_v35 = vor.u32 %v5284_v17, %v5281_v40  ;;  %v11842_v39 = vld [vmem:[%s12887_s19 + $0x24] sm:$0xc]  ;;  %v4569_v17 = vpop.permute.xlu0 %4568 }
 0x344   : > { %v5294_v24 = vor.u32 %v5293_v18, %v5290_v16  ;;  %v3764_v43 = vrot.slane %v11307_v33, 6  ;;  %v3767_v20 = vrot.slane %v11308_v6, 6  ;;  %v6093_v61 = vsel %vm1553_vm13, %v15943_v51, %v5901_v8  ;;  %v11594_v16 = vld [vmem:[%s12887_s19 + $0x78] sm:$0xc] }
 0x345   : > { %7602 = vrot.lane.b32.xlu0 %v11906_v10, %s12840_s21  ;;  %v5304_v26 = vor.u32 %v5303_v7, %v5300_v53  ;;  %v8599_v29 = vshrl.u32 %v15933_v31, 16  ;;  %v5286_v47 = vrot.slane %v5285_v35, 4  ;;  %v8602_v33 = vshll.u32 %v15933_v31, 16 }
 0x346   : > { %v5296_v56 = vrot.slane %v5294_v24, 4  ;;  %v3765_v38 = vsel %vm13666_vm12, %v11354_v57, %v3764_v43  ;;  %v3766_v62 = vrot.slane %v3764_v43, 4  ;;  %v8607_v50 = vrot.slane %v8036_v27, 5 }
 0x347   : > { %v8601_v9 = vrot.slane %v8599_v29, 5  ;;  %v8608_v51 = vrot.slane %v8032_v21, 6  ;;  %v5295_v14 = vsel %vm13345_vm8, %v5286_v47, %v5294_v24  ;;  %v8613_v41 = vshrl.u32 %v12050_v2, 16  ;;  %v12573_v31 = vld [vmem:[#allocation2 + $0x12c] ss:$28 sps:$4 sm:$0xff]  }
 0x348   : > { %v5305_v46 = vsel %vm13345_vm8, %v5296_v56, %v5304_v26  ;;  %v3768_v4 = vsel %vm13666_vm12, %v3766_v62, %v3767_v20  ;;  %v12571_v44 = vld [vmem:[#allocation2 + $0x128] ss:$28 sps:$4 sm:$0xff]   ;;  %v8604_v27 = vrot.slane %v8602_v33, 6  ;;  %v8616_v21 = vshll.u32 %v12050_v2, 16  ;;  %10761 = vmatprep.subr.bf16.mxu0 %v12573_v31  ;;  %v11378_v2 = vld [vmem:[%s12887_s19 + $0x78] sm:$0xf] }
 0x349   : > { %v11674_v40 = vcombine.low %v5295_v14, %v5305_v46  ;;  %v11434_v60 = vcombine.low %v3765_v38, %v3768_v4  ;;  %v8609_v22 = vor.u32 %v8608_v51, %v8607_v50  ;;  %v8615_v63 = vrot.slane %v8613_v41, 5  ;;  %10762 = vmatpush1.bf16.xpose.msra.mxu0 %v12571_v44  ;;  %v11379_v29 = vld [vmem:[%s12887_s19 + $0x7c] sm:$0xf]  ;;  %v9087_v38 = vpop.permute.xlu1 %9086  ;;  %v11758_v46 = vld [vmem:[%s12887_s19 + $0x54] sm:$0xf] }
 0x34a   : > { %v11858_v6 = vrot.slane %v11842_v39, 10  ;;  %v7316_v58 = vrot.slane %v15894_v49, 6  ;;  %v8605_v18 = vor.u32 %v8604_v27, %v8601_v9  ;;  %v7319_v34 = vrot.slane %v15951_v28, 6 }
 0x34b   : > { %5810 = vrot.lane.b32.xlu1 %v11674_v40, %s12839_s20  ;;  %4366 = vrot.lane.b32.xlu0 %v11434_v60, %s12839_s20  ;;  %v8611_v8 = vrot.slane %v8609_v22, 4  ;;  %v6125_v10 = vsel %vm1586_vm14, %v6093_v61, %v6013_v12  ;;  %v8618_v53 = vrot.slane %v8616_v21, 6  ;;  %v4681_v20 = vsel %vm1586_vm14, %v4649_v11, %v4569_v17 }
 0x34c   : > { %v7317_v7 = vsel %vm13666_vm12, %v11858_v6, %v7316_v58  ;;  %v7318_v57 = vrot.slane %v7316_v58, 4  ;;  %v11740_v35 = vcombine.low %v6125_v10, %v6125_v10  ;;  %v8606_v24 = vrot.slane %v8605_v18, 4  ;;  %v11402_v58 = vld [vmem:[%s12887_s19 + $0x80] sm:$0x1] }
 0x34d   : > { %v11741_v43 = vcombine.high %v6125_v10, %v6125_v10  ;;  %v11610_v26 = vrot.slane %v11594_v16, 10  ;;  %v8619_v47 = vor.u32 %v8618_v53, %v8615_v63  ;;  %v11500_v61 = vcombine.low %v4681_v20, %v4681_v20  ;;  %v12757_v63 = vld [vmem:[%s12887_s19 + $0x64] sm:$0xf] }
 0x34e   : > { %v7320_v28 = vsel %vm13666_vm12, %v7318_v57, %v7319_v34  ;;  %6268 = vst [vmem:[#allocation2 + $0x2e4] sm:$0xf] %v11740_v35  ;;  %v11501_v56 = vcombine.high %v4681_v20, %v4681_v20  ;;  %v8610_v62 = vsel %vm13345_vm8, %v8606_v24, %v8609_v22  ;;  %v5608_v9 = vrot.slane %v15974_v13, 6  ;;  %v12756_v22 = vld [vmem:[%s12887_s19 + $0x60] sm:$0xf]  ;;  %v9167_v34 = vpop.permute.xlu1 %9166 }
 0x34f   : > { %v11922_v39 = vcombine.low %v7317_v7, %v7320_v28  ;;  %6269 = vst [vmem:[#allocation2 + $0x300] sm:$0xf] %v11741_v43  ;;  %v5611_v11 = vrot.slane %v15978_v19, 6  ;;  %v8620_v33 = vsel %vm13345_vm8, %v8611_v8, %v8619_v47  ;;  %4824 = vst [vmem:[#allocation2 + $0x2e0] sm:$0xf] %v11500_v61  ;;  %v4063_v50 = vshrl.u32 %v11378_v2, 16 }
 0x350   : > { %4825 = vst [vmem:[#allocation2 + $0x2fc] sm:$0xf] %v11501_v56  ;;  %v4066_v51 = vshll.u32 %v11378_v2, 16  ;;  %v4072_v14 = vshll.u32 %v11379_v29, 16  ;;  %v12114_v4 = vcombine.low %v8610_v62, %v8620_v33  ;;  %v5609_v13 = vsel %vm13666_vm12, %v11610_v26, %v5608_v9  ;;  %v12000_v10 = vld [vmem:[%s12887_s19 + $0xe4] sm:$0xf] }
 0x351   : > { %7682 = vrot.lane.b32.xlu0 %v11922_v39, %s12841_s22  ;;  %v5610_v41 = vrot.slane %v5608_v9, 4  ;;  %v4076_v19 = vshrl.u32 %v11379_v29, 16  ;;  %v4065_v12 = vrot.slane %v4063_v50, 4  ;;  %v11450_v40 = vcombine.low %v11378_v2, %v11379_v29  ;;  %v12758_v57 = vld [vmem:[%s12887_s19 + $0x5c] sm:$0x1]  ;;  %v7531_v29 = vpop.permute.xlu0 %7530  ;;  %v12570_v47 = vld [vmem:[%s12887_s19 + $0x84] sm:$0xff]  }
 0x352   : > { %v4068_v44 = vrot.slane %v4066_v51, 5  ;;  %v4074_v31 = vrot.slane %v4072_v14, 5  ;;  %9238 = vrot.lane.b32.xlu1 %v12114_v4, %s12841_s22  ;;  %v12070_v21 = vcombine.low %v12756_v22, %v12757_v63  ;;  %v6419_v6 = vshrl.u32 %v11758_v46, 16  ;;  %v16076_v22 = vld [vmem:[%s12887_s19 + $0xd8] sm:$0xe] }
 0x353   : > { %v5612_v60 = vsel %vm13666_vm12, %v5610_v41, %v5611_v11  ;;  %v4078_v27 = vrot.slane %v4076_v19, 4  ;;  %v6422_v16 = vshll.u32 %v11758_v46, 16  ;;  %v6430_v18 = vrot.slane %v6428_v30, 5  ;;  %v16049_v30 = vld [vmem:[%s12887_s19 + $0xe8] sm:$0xf] }
 0x354   : > { %v11690_v17 = vcombine.low %v5609_v13, %v5612_v60  ;;  %v6434_v8 = vrot.slane %v6432_v48, 4  ;;  %v9284_v53 = vsel %vm1504_vm9, %v12070_v21, %v9087_v38  ;;  %v6421_v7 = vrot.slane %v6419_v6, 4  ;;  %v16060_v38 = vld [vmem:[%s12887_s19 + $0xdc] sm:$0xf] }
 0x355   : > { %4478 = vrot.lane.b32.xlu0 %v11450_v40, %s12840_s21  ;;  %v6438_v35 = vshll.u32 %v12758_v57, 16  ;;  %v4069_v24 = vor.u32 %v4068_v44, %v4065_v12  ;;  %v6424_v43 = vrot.slane %v6422_v16, 5  ;;  %v4079_v26 = vor.u32 %v4078_v27, %v4074_v31  ;;  %v11793_v44 = vld [vmem:[%s12887_s19 + $0xe0] sm:$0x1] }
 0x356   : > { %v6435_v20 = vor.u32 %v6434_v8, %v6430_v18  ;;  %v4082_v2 = vshll.u32 %v11402_v58, 16  ;;  %5890 = vrot.lane.b32.xlu1 %v11690_v17, %s12840_s21  ;;  %v16057_v61 = vsel %vm1553_vm13, %v9284_v53, %v9167_v34  ;;  %v8383_v56 = vshrl.u32 %v12000_v10, 16  ;;  %v12574_v33 = vld [vmem:[#allocation2 + $0x2e4] ss:$28 sps:$4 sm:$0xff]   ;;  %v11544_v17 = vld [vmem:[%s12887_s19 + $0xb0] sm:$0x1]  ;;  %v7611_v8 = vpop.permute.xlu0 %7610 }
 0x357   : > { %v6440_v48 = vrot.slane %v6438_v35, 5  ;;  %v4070_v28 = vrot.slane %v4069_v24, 4  ;;  %v6425_v62 = vor.u32 %v6424_v43, %v6421_v7  ;;  %v4080_v9 = vrot.slane %v4079_v26, 4  ;;  %v12576_v4 = vld [vmem:[#allocation2 + $0x2e0] ss:$28 sps:$4 sm:$0xff]   ;;  %10724 = vmatprep.subr.bf16.mxu1 %v12574_v33 }
 0x358   : > { %v6436_v39 = vrot.slane %v6435_v20, 4  ;;  %v4084_v11 = vrot.slane %v4082_v2, 5  ;;  %v8385_v51 = vrot.slane %v8383_v56, 4  ;;  %v8386_v14 = vshll.u32 %v12000_v10, 16  ;;  %10725 = vmatpush2.bf16.xpose.msra.mxu1 %v12576_v4  ;;  %v11318_v7 = vld [vmem:[%s12887_s19 + $0x9c] sm:$0xe] }
 0x359   : > { %v4075_v50 = vsel %vm12915_vm2, %v4070_v28, %v4074_v31  ;;  %v8392_v46 = vshll.u32 %v16049_v30, 16  ;;  %v6426_v13 = vrot.slane %v6425_v62, 4  ;;  %v8396_v12 = vshrl.u32 %v16049_v30, 16  ;;  %v12759_v24 = vld [vmem:[%s12887_s19 + $0xa8] sm:$0xe] }
 0x35a   : > { %v6441_v41 = vsel %vm12915_vm2, %v6436_v39, %v6440_v48  ;;  %v4085_v19 = vsel %vm12915_vm2, %v4080_v9, %v4084_v11  ;;  %6002 = vrot.lane.b32.xlu1 %v12570_v47, %s12841_s22  ;;  %v8388_v40 = vrot.slane %v8386_v14, 5  ;;  %v8402_v27 = vshll.u32 %v16052_v15, 16  ;;  %v12760_v2 = vld [vmem:[%s12887_s19 + $0xac] sm:$0xf]  ;;  %v5819_v39 = vpop.permute.xlu1 %5818 }
 0x35b   : > { %v11466_v31 = vcombine.low %v4075_v50, %v4085_v19  ;;  %v8394_v60 = vrot.slane %v8392_v46, 5  ;;  %v6431_v63 = vsel %vm12915_vm2, %v6426_v13, %v6430_v18  ;;  %v8398_v21 = vrot.slane %v8396_v12, 4  ;;  %v12761_v13 = vld [vmem:[%s12887_s19 + $0xa0] sm:$0xf] }
 0x35c   : > { %v11825_v6 = vrot.slane %v16076_v22, 9  ;;  %v6877_v58 = vrot.slane %v16060_v38, 5  ;;  %v11878_v16 = vcombine.low %v6431_v63, %v6441_v41  ;;  %v8389_v34 = vor.u32 %v8388_v40, %v8385_v51  ;;  %v12762_v40 = vld [vmem:[%s12887_s19 + $0xa4] sm:$0x3] }
 0x35d   : > { %4558 = vrot.lane.b32.xlu0 %v11466_v31, %s12841_s22  ;;  %v8404_v10 = vrot.slane %v8402_v27, 5  ;;  %v6880_v53 = vrot.slane %v11793_v44, 5  ;;  %v8399_v57 = vor.u32 %v8398_v21, %v8394_v60  ;;  %v11566_v43 = vrot.slane %v12759_v24, 9  ;;  %v4375_v27 = vpop.permute.xlu0 %4374 }
 0x35e   : > { %v6878_v18 = vsel %vm13186_vm5, %v11825_v6, %v6877_v58  ;;  %v6879_v35 = vrot.slane %v6877_v58, 4  ;;  %v7728_v20 = vsel %vm1504_vm9, %v11878_v16, %v7531_v29  ;;  %v8390_v26 = vrot.slane %v8389_v34, 4 }
 0x35f   : > { %v5012_v48 = vrot.slane %v12760_v2, 5  ;;  %v5015_v47 = vrot.slane %v11544_v17, 5  ;;  %v16093_v28 = vsel %vm1553_vm13, %v7728_v20, %v7611_v8  ;;  %v8400_v56 = vrot.slane %v8399_v57, 4  ;;  %v16109_v17 = vld [vmem:[%s12887_s19 + $0xe4] sm:$0xe] }
 0x360   : > { %v6881_v62 = vsel %vm13186_vm5, %v6879_v35, %v6880_v53  ;;  %v3531_v9 = vshrl.u32 %v11318_v7, 16  ;;  %v8395_v11 = vsel %vm12915_vm2, %v8390_v26, %v8394_v60  ;;  %v3534_v4 = vshll.u32 %v11318_v7, 16  ;;  %v9247_v35 = vpop.permute.xlu1 %9246 }
 0x361   : > { %v11905_v33 = vcombine.low %v6878_v18, %v6881_v62  ;;  %v5013_v29 = vsel %vm13186_vm5, %v11566_v43, %v5012_v48  ;;  %v5014_v50 = vrot.slane %v5012_v48, 4  ;;  %v8405_v51 = vsel %vm12915_vm2, %v8400_v56, %v8404_v10  ;;  %v16123_v56 = vld [vmem:[%s12887_s19 + $0xe0] sm:$0x3] }
 0x362   : > { %v3533_v14 = vrot.slane %v3531_v9, 5  ;;  %v3540_v41 = vshrl.u32 %v12761_v13, 16  ;;  %v12097_v19 = vcombine.low %v8395_v11, %v8405_v51  ;;  %v3543_v31 = vshll.u32 %v12761_v13, 16 }
 0x363   : > { %7552 = vrot.lane.b32.xlu0 %v11905_v33, %s12839_s20  ;;  %v5016_v44 = vsel %vm13186_vm5, %v5014_v50, %v5015_v47  ;;  %v3550_v60 = vshrl.u32 %v12762_v40, 16  ;;  %v3536_v21 = vrot.slane %v3534_v4, 6  ;;  %v3553_v58 = vshll.u32 %v12762_v40, 16  ;;  %v7691_v33 = vpop.permute.xlu0 %7690 }
 0x364   : > { %v11662_v63 = vcombine.low %v5013_v29, %v5016_v44  ;;  %v3542_v6 = vrot.slane %v3540_v41, 5  ;;  %9108 = vrot.lane.b32.xlu1 %v12097_v19, %s12839_s20  ;;  %v3545_v16 = vrot.slane %v3543_v31, 6  ;;  %v12049_v34 = vrot.slane %v16109_v17, 9 }
 0x365   : > { %v3552_v8 = vrot.slane %v3550_v60, 5  ;;  %v8577_v10 = vrot.slane %v16049_v30, 5  ;;  %v3537_v7 = vor.u32 %v3536_v21, %v3533_v14  ;;  %v3555_v57 = vrot.slane %v3553_v58, 6  ;;  %v5899_v60 = vpop.permute.xlu1 %5898 }
 0x366   : > { %v16115_v53 = vsel %vm1504_vm9, %v11662_v63, %v5819_v39  ;;  %v8580_v18 = vrot.slane %v16052_v15, 5  ;;  %v3546_v24 = vor.u32 %v3545_v16, %v3542_v6  ;;  %v17592_v26 = vshll.u32 %v16060_v38, 16  ;;  %v12065_v16 = vld [vmem:[%s12887_s19 + $0xec] sm:$0x3] }
 0x367   : > { %v8578_v43 = vsel %vm13186_vm5, %v12049_v34, %v8577_v10  ;;  %v8579_v20 = vrot.slane %v8577_v10, 4  ;;  %v3538_v2 = vrot.slane %v3537_v7, 4  ;;  %v3556_v48 = vor.u32 %v3555_v57, %v3552_v8 }
 0x368   : > { %v17591_v47 = vshrl.u32 %v16060_v38, 16  ;;  %v7244_v62 = vshrl.u32 %v16076_v22, 16  ;;  %v3548_v39 = vrot.slane %v3546_v24, 4  ;;  %v7247_v9 = vshll.u32 %v16076_v22, 16 }
 0x369   : > { %v8581_v15 = vsel %vm13186_vm5, %v8579_v20, %v8580_v18  ;;  %v7253_v11 = vrot.slane %v17592_v26, 6  ;;  %v3547_v29 = vsel %vm13345_vm8, %v3538_v2, %v3546_v24  ;;  %v7258_v41 = vshrl.u32 %v16123_v56, 16  ;;  %v11857_v2 = vld [vmem:[%s12887_s19 + $0xd8] sm:$0xc]  ;;  %v6011_v30 = vpop.permute.xlu1 %6010  ;;  %v12783_v26 = vld [vmem:[%s12887_s19 + $0x80] sm:$0x3] }
 0x36a   : > { %v12113_v50 = vcombine.low %v8578_v43, %v8581_v15  ;;  %v7246_v51 = vrot.slane %v7244_v62, 5  ;;  %v7252_v14 = vrot.slane %v17591_v47, 5  ;;  %v3557_v4 = vsel %vm13345_vm8, %v3548_v39, %v3556_v48 }
 0x36b   : > { %v7249_v13 = vrot.slane %v7247_v9, 6  ;;  %v7261_v22 = vshll.u32 %v16123_v56, 16  ;;  %v11422_v19 = vcombine.low %v3547_v29, %v3557_v4  ;;  %v9359_v31 = vsel %vm1586_vm14, %v16057_v61, %v9247_v35  ;;  %v4487_v35 = vpop.permute.xlu0 %4486 }
 0x36c   : > { %9188 = vrot.lane.b32.xlu1 %v12113_v50, %s12840_s21  ;;  %v7254_v44 = vor.u32 %v7253_v11, %v7252_v14  ;;  %v7803_v40 = vsel %vm1586_vm14, %v16093_v28, %v7691_v33  ;;  %v7260_v21 = vrot.slane %v7258_v41, 5  ;;  %v12138_v58 = vcombine.low %v9359_v31, %v9359_v31  ;;  %v11998_v33 = vld [vmem:[%s12887_s19 + $0xd8] sm:$0xf]  ;;  %v16161_v14 = vld [vmem:[%s12887_s19 + $0xdc] sm:$0xf] }
 0x36d   : > { %v7250_v63 = vor.u32 %v7249_v13, %v7246_v51  ;;  %v7263_v6 = vrot.slane %v7261_v22, 6  ;;  %v4612_v8 = vsel %vm1504_vm9, %v11422_v19, %v4375_v27  ;;  %v12139_v10 = vcombine.high %v9359_v31, %v9359_v31  ;;  %v16168_v19 = vld [vmem:[%s12887_s19 + $0xe0] sm:$0x1] }
 0x36e   : > { %v7256_v34 = vrot.slane %v7254_v44, 4  ;;  %v11946_v7 = vcombine.low %v7803_v40, %v7803_v40  ;;  %9502 = vst [vmem:[#allocation2 + $0xf4] sm:$0xf] %v12138_v58  ;;  %v11947_v24 = vcombine.high %v7803_v40, %v7803_v40  ;;  %v8944_v61 = vshrl.u32 %v16109_v17, 16 }
 0x36f   : > { %v7251_v57 = vrot.slane %v7250_v63, 4  ;;  %v7264_v18 = vor.u32 %v7263_v6, %v7260_v21  ;;  %9503 = vst [vmem:[#allocation2 + $0x110] sm:$0xf] %v12139_v10  ;;  %v8947_v28 = vshll.u32 %v16109_v17, 16  ;;  %v8952_v43 = vrot.slane %v8396_v12, 5  ;;  %v4567_v21 = vpop.permute.xlu0 %4566 }
 0x370   : > { %7946 = vst [vmem:[#allocation2 + $0xf0] sm:$0xf] %v11946_v7  ;;  %v8953_v27 = vrot.slane %v8392_v46, 6  ;;  %v8958_v20 = vshrl.u32 %v12065_v16, 16  ;;  %7947 = vst [vmem:[#allocation2 + $0x10c] sm:$0xf] %v11947_v24  ;;  %v6091_v41 = vsel %vm1553_vm13, %v16115_v53, %v5899_v60  ;;  %v4647_v22 = vsel %vm1553_vm13, %v4612_v8, %v4487_v35 }
 0x371   : > { %v7255_v48 = vsel %vm13345_vm8, %v7251_v57, %v7254_v44  ;;  %v7265_v62 = vsel %vm13345_vm8, %v7256_v34, %v7264_v18  ;;  %v8946_v39 = vrot.slane %v8944_v61, 5  ;;  %v8961_v15 = vshll.u32 %v12065_v16, 16  ;;  %v16173_v63 = vld [vmem:[%s12887_s19 + $0xd0] sm:$0xf]  ;;  %v16178_v60 = vld [vmem:[%s12887_s19 + $0xcc] sm:$0xe] }
 0x372   : > { %v11921_v9 = vcombine.low %v7255_v48, %v7265_v62  ;;  %v8949_v17 = vrot.slane %v8947_v28, 6  ;;  %v8954_v11 = vor.u32 %v8953_v27, %v8952_v43  ;;  %v8960_v12 = vrot.slane %v8958_v20, 5  ;;  %v11790_v57 = vld [vmem:[%s12887_s19 + $0xd4] sm:$0x1]  ;;  %v16190_v28 = vpop.permute.xlu1 %9084 }
 0x373   : > { %v8963_v46 = vrot.slane %v8961_v15, 6  ;;  %v11873_v29 = vrot.slane %v11857_v2, 10  ;;  %v7421_v50 = vrot.slane %v16060_v38, 6  ;;  %v7424_v51 = vrot.slane %v16123_v56, 6 }
 0x374   : > { %7632 = vrot.lane.b32.xlu0 %v11921_v9, %s12840_s21  ;;  %v8950_v4 = vor.u32 %v8949_v17, %v8946_v39  ;;  %v8956_v13 = vrot.slane %v8954_v11, 4  ;;  %v8359_v40 = vshrl.u32 %v11998_v33, 16  ;;  %v8362_v58 = vshll.u32 %v11998_v33, 16 }
 0x375   : > { %v8964_v44 = vor.u32 %v8963_v46, %v8960_v12  ;;  %v7422_v31 = vsel %vm13666_vm12, %v11873_v29, %v7421_v50  ;;  %v7423_v56 = vrot.slane %v7421_v50, 4  ;;  %v8368_v16 = vshll.u32 %v16161_v14, 16  ;;  %v16200_v29 = vpop.permute.xlu0 %7528 }
 0x376   : > { %v8951_v6 = vrot.slane %v8950_v4, 4  ;;  %v8372_v53 = vshrl.u32 %v16161_v14, 16  ;;  %v8361_v10 = vrot.slane %v8359_v40, 4  ;;  %v8378_v7 = vshll.u32 %v16168_v19, 16  ;;  %v12580_v62 = vld [vmem:[#allocation2 + $0xf4] ss:$28 sps:$4 sm:$0xff]  }
 0x377   : > { %v8965_v8 = vsel %vm13345_vm8, %v8956_v13, %v8964_v44  ;;  %v7425_v34 = vsel %vm13666_vm12, %v7423_v56, %v7424_v51  ;;  %v8364_v61 = vrot.slane %v8362_v58, 5  ;;  %v8370_v35 = vrot.slane %v8368_v16, 5  ;;  %v12578_v43 = vld [vmem:[#allocation2 + $0xf0] ss:$28 sps:$4 sm:$0xff]   ;;  %v16205_v44 = vld [vmem:[%s12887_s19 + $0xd8] sm:$0xe]  ;;  %10763 = vmatprep.subr.bf16.mxu0 %v12580_v62 }
 0x378   : > { %v8955_v18 = vsel %vm13345_vm8, %v8951_v6, %v8954_v11  ;;  %v11937_v24 = vcombine.low %v7422_v31, %v7425_v34  ;;  %v8374_v20 = vrot.slane %v8372_v53, 4  ;;  %v8380_v2 = vrot.slane %v8378_v7, 5  ;;  %10764 = vmatpush1.bf16.xpose.msra.mxu0 %v12578_v43  ;;  %v16216_v58 = vld [vmem:[%s12887_s19 + $0xd4] sm:$0x3] }
 0x379   : > { %v12129_v27 = vcombine.low %v8955_v18, %v8965_v8  ;;  %v11824_v48 = vrot.slane %v16178_v60, 9  ;;  %v8365_v39 = vor.u32 %v8364_v61, %v8361_v10  ;;  %v6870_v15 = vrot.slane %v16173_v63, 5  ;;  %v16218_v8 = vpop.permute.xlu1 %9164 }
 0x37a   : > { %7712 = vrot.lane.b32.xlu0 %v11937_v24, %s12841_s22  ;;  %v6873_v9 = vrot.slane %v11790_v57, 5  ;;  %v6123_v17 = vsel %vm1586_vm14, %v6091_v41, %v6011_v30  ;;  %v8375_v11 = vor.u32 %v8374_v20, %v8370_v35  ;;  %v4679_v46 = vsel %vm1586_vm14, %v4647_v22, %v4567_v21 }
 0x37b   : > { %9268 = vrot.lane.b32.xlu1 %v12129_v27, %s12841_s22  ;;  %v11738_v12 = vcombine.low %v6123_v17, %v6123_v17  ;;  %v11739_v33 = vcombine.high %v6123_v17, %v6123_v17  ;;  %v8366_v50 = vrot.slane %v8365_v39, 4  ;;  %v6871_v51 = vsel %vm13186_vm5, %v11824_v48, %v6870_v15  ;;  %v16235_v48 = vpop.permute.xlu0 %7608 }
 0x37c   : > { %v6872_v4 = vrot.slane %v6870_v15, 4  ;;  %v11498_v13 = vcombine.low %v4679_v46, %v4679_v46  ;;  %v8376_v30 = vrot.slane %v8375_v11, 4  ;;  %v11499_v41 = vcombine.high %v4679_v46, %v4679_v46  ;;  %v12763_v11 = vld [vmem:[%s12887_s19 + $0x54] sm:$0xf] }
 0x37d   : > { %6266 = vst [vmem:[#allocation2 + $0x2ac] sm:$0xf] %v11738_v12  ;;  %6267 = vst [vmem:[#allocation2 + $0x2c8] sm:$0xf] %v11739_v33  ;;  %v12048_v31 = vrot.slane %v16205_v44, 9  ;;  %v8570_v22 = vrot.slane %v16161_v14, 5  ;;  %v8371_v56 = vsel %vm12915_vm2, %v8366_v50, %v8370_v35 }
 0x37e   : > { %v6874_v40 = vsel %vm13186_vm5, %v6872_v4, %v6873_v9  ;;  %4822 = vst [vmem:[#allocation2 + $0x2a8] sm:$0xf] %v11498_v13  ;;  %v8573_v21 = vrot.slane %v16168_v19, 5  ;;  %v17590_v6 = vshll.u32 %v16173_v63, 16  ;;  %v8381_v34 = vsel %vm12915_vm2, %v8376_v30, %v8380_v2  ;;  %4823 = vst [vmem:[#allocation2 + $0x2c4] sm:$0xf] %v11499_v41  ;;  %v16244_v30 = vpop.permute.xlu1 %5816 }
 0x37f   : > { %v11904_v10 = vcombine.low %v6871_v51, %v6874_v40  ;;  %v8571_v7 = vsel %vm13186_vm5, %v12048_v31, %v8570_v22  ;;  %v8572_v57 = vrot.slane %v8570_v22, 4  ;;  %v12096_v18 = vcombine.low %v8371_v56, %v8381_v34  ;;  %v11755_v35 = vld [vmem:[%s12887_s19 + $0x48] sm:$0xf]  ;;  %v12764_v12 = vld [vmem:[%s12887_s19 + $0x58] sm:$0xf] }
 0x380   : > { %v17585_v24 = vshrl.u32 %v16173_v63, 16  ;;  %v7221_v19 = vshrl.u32 %v16178_v60, 16  ;;  %v7224_v61 = vshll.u32 %v16178_v60, 16  ;;  %v7230_v27 = vrot.slane %v17590_v6, 6  ;;  %v12064_v40 = vld [vmem:[%s12887_s19 + $0xe0] sm:$0x3] }
 0x381   : > { %7550 = vrot.lane.b32.xlu0 %v11904_v10, %s12839_s20  ;;  %v8574_v43 = vsel %vm13186_vm5, %v8572_v57, %v8573_v21  ;;  %v7235_v20 = vshrl.u32 %v16216_v58, 16  ;;  %v7238_v2 = vshll.u32 %v16216_v58, 16  ;;  %9106 = vrot.lane.b32.xlu1 %v12096_v18, %s12839_s20  ;;  %v12069_v33 = vcombine.low %v12763_v11, %v12764_v12 }
 0x382   : > { %v12112_v62 = vcombine.low %v8571_v7, %v8574_v43  ;;  %v7223_v60 = vrot.slane %v7221_v19, 5  ;;  %v7226_v39 = vrot.slane %v7224_v61, 6  ;;  %v7229_v15 = vrot.slane %v17585_v24, 5  ;;  %v12765_v7 = vld [vmem:[%s12887_s19 + $0x50] sm:$0x1]  ;;  %v16257_v61 = vpop.permute.xlu0 %4372  ;;  %v16266_v11 = vpop.permute.xlu1 %9244 }
 0x383   : > { %v7237_v9 = vrot.slane %v7235_v20, 5  ;;  %v7240_v17 = vrot.slane %v7238_v2, 6  ;;  %v6395_v46 = vshrl.u32 %v11755_v35, 16  ;;  %v6398_v4 = vshll.u32 %v11755_v35, 16  ;;  %v11856_v20 = vld [vmem:[%s12887_s19 + $0xcc] sm:$0xc] }
 0x384   : > { %v7227_v50 = vor.u32 %v7226_v39, %v7223_v60  ;;  %v7231_v51 = vor.u32 %v7230_v27, %v7229_v15  ;;  %v6406_v13 = vrot.slane %v6404_v59, 5  ;;  %v9281_v31 = vsel %vm1504_vm9, %v12069_v33, %v16190_v28  ;;  %v12581_v36 = vld [vmem:[#allocation2 + $0x2ac] ss:$28 sps:$4 sm:$0xff]   ;;  %v16598_v24 = vld [vmem:[%s12887_s19 + $0xb4] sm:$0xe] }
 0x385   : > { %v7241_v41 = vor.u32 %v7240_v17, %v7237_v9  ;;  %v6397_v22 = vrot.slane %v6395_v46, 4  ;;  %v6410_v56 = vrot.slane %v6408_v1, 4  ;;  %9186 = vrot.lane.b32.xlu1 %v12112_v62, %s12840_s21  ;;  %v6400_v10 = vrot.slane %v6398_v4, 5  ;;  %v12583_v2 = vld [vmem:[#allocation2 + $0x2a8] ss:$28 sps:$4 sm:$0xff]   ;;  %10726 = vmatprep.subr.bf16.mxu1 %v12581_v36 }
 0x386   : > { %v7228_v21 = vrot.slane %v7227_v50, 4  ;;  %v7233_v34 = vrot.slane %v7231_v51, 4  ;;  %v6414_v57 = vshll.u32 %v12765_v7, 16  ;;  %v8921_v18 = vshrl.u32 %v16205_v44, 16  ;;  %10727 = vmatpush2.bf16.xpose.msra.mxu1 %v12583_v2 }
 0x387   : > { %v6411_v59 = vor.u32 %v6410_v56, %v6406_v13  ;;  %v8924_v19 = vshll.u32 %v16205_v44, 16  ;;  %v8929_v28 = vrot.slane %v8372_v53, 5  ;;  %v6401_v43 = vor.u32 %v6400_v10, %v6397_v22  ;;  %v16280_v10 = vpop.permute.xlu0 %7688 }
 0x388   : > { %v7232_v1 = vsel %vm13345_vm8, %v7228_v21, %v7231_v51  ;;  %v7242_v35 = vsel %vm13345_vm8, %v7233_v34, %v7241_v41  ;;  %v6416_v27 = vrot.slane %v6414_v57, 5  ;;  %v8923_v39 = vrot.slane %v8921_v18, 5  ;;  %v11996_v41 = vld [vmem:[%s12887_s19 + $0xcc] sm:$0xf]  ;;  %v16278_v34 = vld [vmem:[%s12887_s19 + $0xd0] sm:$0xf] }
 0x389   : > { %v11920_v62 = vcombine.low %v7232_v1, %v7242_v35  ;;  %v6412_v60 = vrot.slane %v6411_v59, 4  ;;  %v8926_v44 = vrot.slane %v8924_v19, 6  ;;  %v6402_v53 = vrot.slane %v6401_v43, 4  ;;  %v11787_v43 = vld [vmem:[%s12887_s19 + $0xc8] sm:$0x1] }
 0x38a   : > { %v8930_v15 = vrot.slane %v8368_v16, 6  ;;  %v8935_v9 = vshrl.u32 %v12064_v40, 16  ;;  %v8938_v17 = vshll.u32 %v12064_v40, 16  ;;  %v11872_v46 = vrot.slane %v11856_v20, 10 }
 0x38b   : > { %7630 = vrot.lane.b32.xlu0 %v11920_v62, %s12840_s21  ;;  %v6417_v12 = vsel %vm12915_vm2, %v6412_v60, %v6416_v27  ;;  %v8927_v33 = vor.u32 %v8926_v44, %v8923_v39  ;;  %v7414_v50 = vrot.slane %v16173_v63, 6  ;;  %v6407_v51 = vsel %vm12915_vm2, %v6402_v53, %v6406_v13  ;;  %v16307_v27 = vpop.permute.xlu1 %5896  ;;  %v16310_v39 = vld [vmem:[%s12887_s19 + $0xc0] sm:$0xe]  ;;  %v11541_v44 = vld [vmem:[%s12887_s19 + $0xa4] sm:$0x1] }
 0x38c   : > { %v8931_v14 = vor.u32 %v8930_v15, %v8929_v28  ;;  %v8937_v16 = vrot.slane %v8935_v9, 5  ;;  %v8940_v4 = vrot.slane %v8938_v17, 6  ;;  %v11877_v22 = vcombine.low %v6407_v51, %v6417_v12  ;;  %v16292_v28 = vld [vmem:[%s12887_s19 + $0xd4] sm:$0x1]  ;;  %v11315_v17 = vld [vmem:[%s12887_s19 + $0x90] sm:$0xe] }
 0x38d   : > { %v8928_v56 = vrot.slane %v8927_v33, 4  ;;  %v7415_v40 = vsel %vm13666_vm12, %v11872_v46, %v7414_v50  ;;  %v7416_v21 = vrot.slane %v7414_v50, 4  ;;  %v7417_v13 = vrot.slane %v16216_v58, 6  ;;  %v12766_v50 = vld [vmem:[%s12887_s19 + $0x9c] sm:$0xe] }
 0x38e   : > { %v8933_v7 = vrot.slane %v8931_v14, 4  ;;  %v8941_v57 = vor.u32 %v8940_v4, %v8937_v16  ;;  %v16285_v59 = vsel %vm1553_vm13, %v9281_v31, %v16218_v8  ;;  %v7725_v18 = vsel %vm1504_vm9, %v11877_v22, %v16200_v29  ;;  %v16304_v31 = vld [vmem:[%s12887_s19 + $0xc4] sm:$0xf] }
 0x38f   : > { %v8932_v19 = vsel %vm13345_vm8, %v8928_v56, %v8931_v14  ;;  %v8335_v36 = vshrl.u32 %v11996_v41, 16  ;;  %v8338_v1 = vshll.u32 %v11996_v41, 16  ;;  %v7418_v58 = vsel %vm13666_vm12, %v7416_v21, %v7417_v13  ;;  %v16323_v14 = vpop.permute.xlu0 %4484  ;;  %v12767_v41 = vld [vmem:[%s12887_s19 + $0xa0] sm:$0xf] }
 0x390   : > { %v8942_v35 = vsel %vm13345_vm8, %v8933_v7, %v8941_v57  ;;  %v16300_v8 = vsel %vm1553_vm13, %v7725_v18, %v16235_v48  ;;  %v8344_v29 = vshll.u32 %v16278_v34, 16  ;;  %v11936_v2 = vcombine.low %v7415_v40, %v7418_v58 }
 0x391   : > { %v12128_v20 = vcombine.low %v8932_v19, %v8942_v35  ;;  %v8337_v62 = vrot.slane %v8335_v36, 4  ;;  %v8340_v60 = vrot.slane %v8338_v1, 5  ;;  %v8348_v53 = vshrl.u32 %v16278_v34, 16  ;;  %v16332_v1 = vpop.permute.xlu1 %6008 }
 0x392   : > { %v8346_v48 = vrot.slane %v8344_v29, 5  ;;  %v8354_v15 = vshll.u32 %v16292_v28, 16  ;;  %v11823_v9 = vrot.slane %v16310_v39, 9  ;;  %7710 = vrot.lane.b32.xlu0 %v11936_v2, %s12841_s22  ;;  %v6863_v33 = vrot.slane %v16304_v31, 5 }
 0x393   : > { %9266 = vrot.lane.b32.xlu1 %v12128_v20, %s12841_s22  ;;  %v8341_v12 = vor.u32 %v8340_v60, %v8337_v62  ;;  %v6866_v46 = vrot.slane %v11787_v43, 5  ;;  %v11565_v51 = vrot.slane %v12766_v50, 9  ;;  %v8350_v16 = vrot.slane %v8348_v53, 4  ;;  %v12768_v20 = vld [vmem:[%s12887_s19 + $0x94] sm:$0xf] }
 0x394   : > { %v8356_v4 = vrot.slane %v8354_v15, 5  ;;  %v5005_v22 = vrot.slane %v12767_v41, 5  ;;  %v5008_v56 = vrot.slane %v11541_v44, 5  ;;  %v6864_v21 = vsel %vm13186_vm5, %v11823_v9, %v6863_v33 }
 0x395   : > { %v8342_v40 = vrot.slane %v8341_v12, 4  ;;  %v6865_v7 = vrot.slane %v6863_v33, 4  ;;  %v3503_v57 = vshrl.u32 %v11315_v17, 16  ;;  %v8351_v13 = vor.u32 %v8350_v16, %v8346_v48  ;;  %v12769_v33 = vld [vmem:[%s12887_s19 + $0x98] sm:$0x3] }
 0x396   : > { %v5006_v18 = vsel %vm13186_vm5, %v11565_v51, %v5005_v22  ;;  %v5007_v19 = vrot.slane %v5005_v22, 4  ;;  %v3506_v36 = vshll.u32 %v11315_v17, 16  ;;  %v3512_v2 = vshrl.u32 %v12768_v20, 16  ;;  %v16343_v51 = vld [vmem:[%s12887_s19 + $0xcc] sm:$0xe] }
 0x397   : > { %v8347_v35 = vsel %vm12915_vm2, %v8342_v40, %v8346_v48  ;;  %v6867_v58 = vsel %vm13186_vm5, %v6865_v7, %v6866_v46  ;;  %v3505_v43 = vrot.slane %v3503_v57, 5  ;;  %v8352_v62 = vrot.slane %v8351_v13, 4  ;;  %v16345_v48 = vpop.permute.xlu0 %4564 }
 0x398   : > { %v11903_v60 = vcombine.low %v6864_v21, %v6867_v58  ;;  %v5009_v44 = vsel %vm13186_vm5, %v5007_v19, %v5008_v56  ;;  %v3508_v15 = vrot.slane %v3506_v36, 6  ;;  %v3514_v17 = vrot.slane %v3512_v2, 5  ;;  %v16357_v19 = vpop.permute.xlu1 %9082 }
 0x399   : > { %v11661_v9 = vcombine.low %v5006_v18, %v5009_v44  ;;  %v3515_v12 = vshll.u32 %v12768_v20, 16  ;;  %v3522_v50 = vshrl.u32 %v12769_v33, 16  ;;  %v8357_v46 = vsel %vm12915_vm2, %v8352_v62, %v8356_v4 }
 0x39a   : > { %7548 = vrot.lane.b32.xlu0 %v11903_v60, %s12839_s20  ;;  %v3509_v16 = vor.u32 %v3508_v15, %v3505_v43  ;;  %v3525_v41 = vshll.u32 %v12769_v33, 16  ;;  %v12047_v22 = vrot.slane %v16343_v51, 9  ;;  %v12095_v56 = vcombine.low %v8347_v35, %v8357_v46  ;;  %v16363_v43 = vld [vmem:[%s12887_s19 + $0xc8] sm:$0x3] }
 0x39b   : > { %v16353_v40 = vsel %vm1504_vm9, %v11661_v9, %v16244_v30  ;;  %v3517_v21 = vrot.slane %v3515_v12, 6  ;;  %v3524_v7 = vrot.slane %v3522_v50, 5  ;;  %v8563_v18 = vrot.slane %v16278_v34, 5 }
 0x39c   : > { %v3510_v57 = vrot.slane %v3509_v16, 4  ;;  %v3527_v13 = vrot.slane %v3525_v41, 6  ;;  %v8566_v4 = vrot.slane %v16292_v28, 5  ;;  %9104 = vrot.lane.b32.xlu1 %v12095_v56, %s12839_s20  ;;  %v17584_v58 = vshll.u32 %v16304_v31, 16 }
 0x39d   : > { %v3518_v36 = vor.u32 %v3517_v21, %v3514_v17  ;;  %v17583_v35 = vshrl.u32 %v16304_v31, 16  ;;  %v7198_v30 = vshrl.u32 %v16310_v39, 16  ;;  %v8564_v2 = vsel %vm13186_vm5, %v12047_v22, %v8563_v18  ;;  %v16373_v17 = vpop.permute.xlu0 %7526 }
 0x39e   : > { %v3528_v20 = vor.u32 %v3527_v13, %v3524_v7  ;;  %v8565_v62 = vrot.slane %v8563_v18, 4  ;;  %v7201_v28 = vshll.u32 %v16310_v39, 16  ;;  %v7207_v50 = vrot.slane %v17584_v58, 6  ;;  %v16386_v13 = vpop.permute.xlu1 %9162 }
 0x39f   : > { %v3519_v60 = vsel %vm13345_vm8, %v3510_v57, %v3518_v36  ;;  %v3520_v44 = vrot.slane %v3518_v36, 4  ;;  %v7200_v15 = vrot.slane %v7198_v30, 5  ;;  %v7206_v9 = vrot.slane %v17583_v35, 5 }
 0x3a0   : > { %v8567_v12 = vsel %vm13186_vm5, %v8565_v62, %v8566_v4  ;;  %v7203_v33 = vrot.slane %v7201_v28, 6  ;;  %v7212_v39 = vshrl.u32 %v16363_v43, 16  ;;  %v7215_v41 = vshll.u32 %v16363_v43, 16 }
 0x3a1   : > { %v3529_v46 = vsel %vm13345_vm8, %v3520_v44, %v3528_v20  ;;  %v12111_v16 = vcombine.low %v8564_v2, %v8567_v12  ;;  %v9357_v22 = vsel %vm1586_vm14, %v16285_v59, %v16266_v11  ;;  %v7208_v7 = vor.u32 %v7207_v50, %v7206_v9  ;;  %v12063_v20 = vld [vmem:[%s12887_s19 + $0xd4] sm:$0x3]  ;;  %v11855_v9 = vld [vmem:[%s12887_s19 + $0xc0] sm:$0xc]  ;;  %v16398_v12 = vpop.permute.xlu0 %7606 }
 0x3a2   : > { %v11421_v56 = vcombine.low %v3519_v60, %v3529_v46  ;;  %v7204_v21 = vor.u32 %v7203_v33, %v7200_v15  ;;  %v7214_v57 = vrot.slane %v7212_v39, 5  ;;  %v7217_v18 = vrot.slane %v7215_v41, 6 }
 0x3a3   : > { %9184 = vrot.lane.b32.xlu1 %v12111_v16, %s12840_s21  ;;  %v12136_v4 = vcombine.low %v9357_v22, %v9357_v22  ;;  %v12137_v36 = vcombine.high %v9357_v22, %v9357_v22  ;;  %v7801_v30 = vsel %vm1586_vm14, %v16300_v8, %v16280_v10  ;;  %v7210_v2 = vrot.slane %v7208_v7, 4  ;;  %v11994_v16 = vld [vmem:[%s12887_s19 + $0xc0] sm:$0xf] }
 0x3a4   : > { %v4609_v11 = vsel %vm1504_vm9, %v11421_v56, %v16257_v61  ;;  %v7205_v59 = vrot.slane %v7204_v21, 4  ;;  %v11944_v62 = vcombine.low %v7801_v30, %v7801_v30  ;;  %v7218_v28 = vor.u32 %v7217_v18, %v7214_v57  ;;  %v16414_v18 = vld [vmem:[%s12887_s19 + $0xc4] sm:$0xf] }
 0x3a5   : > { %9500 = vst [vmem:[#allocation2 + $0xbc] sm:$0xf] %v12136_v4  ;;  %9501 = vst [vmem:[#allocation2 + $0xd8] sm:$0xf] %v12137_v36  ;;  %v11945_v60 = vcombine.high %v7801_v30, %v7801_v30  ;;  %v8898_v44 = vshrl.u32 %v16343_v51, 16  ;;  %v8901_v15 = vshll.u32 %v16343_v51, 16  ;;  %v6089_v36 = vsel %vm1553_vm13, %v16353_v40, %v16307_v27 }
 0x3a6   : > { %v7209_v10 = vsel %vm13345_vm8, %v7205_v59, %v7208_v7  ;;  %7944 = vst [vmem:[#allocation2 + $0xb8] sm:$0xf] %v11944_v62  ;;  %v8906_v61 = vrot.slane %v8348_v53, 5  ;;  %v8907_v8 = vrot.slane %v8344_v29, 6  ;;  %v8912_v33 = vshrl.u32 %v12063_v20, 16  ;;  %v16409_v7 = vpop.permute.xlu1 %5814 }
 0x3a7   : > { %v7219_v50 = vsel %vm13345_vm8, %v7210_v2, %v7218_v28  ;;  %7945 = vst [vmem:[#allocation2 + $0xd4] sm:$0xf] %v11945_v60  ;;  %v8900_v51 = vrot.slane %v8898_v44, 5  ;;  %v8903_v39 = vrot.slane %v8901_v15, 6  ;;  %v8915_v46 = vshll.u32 %v12063_v20, 16  ;;  %v16427_v60 = vpop.permute.xlu0 %4370 }
 0x3a8   : > { %v11919_v41 = vcombine.low %v7209_v10, %v7219_v50  ;;  %v8908_v22 = vor.u32 %v8907_v8, %v8906_v61  ;;  %v8914_v56 = vrot.slane %v8912_v33, 5  ;;  %v11871_v21 = vrot.slane %v11855_v9, 10  ;;  %v16423_v20 = vld [vmem:[%s12887_s19 + $0xc8] sm:$0x1]  ;;  %v11784_v8 = vld [vmem:[%s12887_s19 + $0xbc] sm:$0x1] }
 0x3a9   : > { %v8904_v53 = vor.u32 %v8903_v39, %v8900_v51  ;;  %v8917_v34 = vrot.slane %v8915_v46, 6  ;;  %v7407_v29 = vrot.slane %v16304_v31, 6  ;;  %v7410_v57 = vrot.slane %v16363_v43, 6  ;;  %v11806_v33 = vld [vmem:[%s12887_s19 + $0xb4] sm:$0xe] }
 0x3aa   : > { %7628 = vrot.lane.b32.xlu0 %v11919_v41, %s12840_s21  ;;  %v8910_v4 = vrot.slane %v8908_v22, 4  ;;  %v4645_v30 = vsel %vm1553_vm13, %v4609_v11, %v16323_v14  ;;  %v8311_v59 = vshrl.u32 %v11994_v16, 16  ;;  %v8314_v15 = vshll.u32 %v11994_v16, 16  ;;  %v16432_v14 = vld [vmem:[%s12887_s19 + $0xb8] sm:$0xf]  ;;  %v16445_v41 = vpop.permute.xlu1 %9242 }
 0x3ab   : > { %v8905_v2 = vrot.slane %v8904_v53, 4  ;;  %v8918_v43 = vor.u32 %v8917_v34, %v8914_v56  ;;  %v7408_v62 = vsel %vm13666_vm12, %v11871_v21, %v7407_v29  ;;  %v7409_v28 = vrot.slane %v7407_v29, 4 }
 0x3ac   : > { %v8313_v44 = vrot.slane %v8311_v59, 4  ;;  %v8320_v27 = vshll.u32 %v16414_v18, 16  ;;  %v8324_v40 = vshrl.u32 %v16414_v18, 16  ;;  %v8330_v61 = vshll.u32 %v16423_v20, 16  ;;  %v12587_v34 = vld [vmem:[#allocation2 + $0xbc] ss:$28 sps:$4 sm:$0xff]  }
 0x3ad   : > { %v8909_v11 = vsel %vm13345_vm8, %v8905_v2, %v8908_v22  ;;  %v8919_v9 = vsel %vm13345_vm8, %v8910_v4, %v8918_v43  ;;  %v7411_v10 = vsel %vm13666_vm12, %v7409_v28, %v7410_v57  ;;  %v8316_v39 = vrot.slane %v8314_v15, 5  ;;  %10765 = vmatprep.subr.bf16.mxu0 %v12587_v34  ;;  %v16458_v15 = vpop.permute.xlu0 %7686 }
 0x3ae   : > { %v12127_v50 = vcombine.low %v8909_v11, %v8919_v9  ;;  %v11935_v51 = vcombine.low %v7408_v62, %v7411_v10  ;;  %v8322_v46 = vrot.slane %v8320_v27, 5  ;;  %v12585_v16 = vld [vmem:[#allocation2 + $0xb8] ss:$28 sps:$4 sm:$0xff]   ;;  %v8326_v22 = vrot.slane %v8324_v40, 4 }
 0x3af   : > { %v8332_v56 = vrot.slane %v8330_v61, 5  ;;  %v11822_v21 = vrot.slane %v11806_v33, 9  ;;  %v6856_v53 = vrot.slane %v16432_v14, 5  ;;  %v8317_v29 = vor.u32 %v8316_v39, %v8313_v44  ;;  %v16461_v61 = vld [vmem:[%s12887_s19 + $0xc0] sm:$0xe]  ;;  %10766 = vmatpush1.bf16.xpose.msra.mxu0 %v12585_v16 }
 0x3b0   : > { %9264 = vrot.lane.b32.xlu1 %v12127_v50, %s12841_s22  ;;  %7708 = vrot.lane.b32.xlu0 %v11935_v51, %s12841_s22  ;;  %v6859_v57 = vrot.slane %v11784_v8, 5  ;;  %v6121_v4 = vsel %vm1586_vm14, %v6089_v36, %v16332_v1  ;;  %v4677_v59 = vsel %vm1586_vm14, %v4645_v30, %v16345_v48  ;;  %v8327_v2 = vor.u32 %v8326_v22, %v8322_v46  ;;  %v16472_v16 = vld [vmem:[%s12887_s19 + $0xbc] sm:$0x3]  ;;  %v16474_v22 = vpop.permute.xlu1 %5894 }
 0x3b1   : > { %v6857_v43 = vsel %vm13186_vm5, %v11822_v21, %v6856_v53  ;;  %v6858_v62 = vrot.slane %v6856_v53, 4  ;;  %v11736_v28 = vcombine.low %v6121_v4, %v6121_v4  ;;  %v8318_v11 = vrot.slane %v8317_v29, 4 }
 0x3b2   : > { %v11737_v9 = vcombine.high %v6121_v4, %v6121_v4  ;;  %v11496_v10 = vcombine.low %v4677_v59, %v4677_v59  ;;  %v11497_v44 = vcombine.high %v4677_v59, %v4677_v59  ;;  %v8328_v1 = vrot.slane %v8327_v2, 4  ;;  %v11752_v59 = vld [vmem:[%s12887_s19 + $0x3c] sm:$0xf] }
 0x3b3   : > { %v6860_v48 = vsel %vm13186_vm5, %v6858_v62, %v6859_v57  ;;  %6264 = vst [vmem:[#allocation2 + $0x274] sm:$0xf] %v11736_v28  ;;  %v12046_v36 = vrot.slane %v16461_v61, 9  ;;  %v8556_v30 = vrot.slane %v16414_v18, 5  ;;  %v8323_v8 = vsel %vm12915_vm2, %v8318_v11, %v8322_v46  ;;  %v16491_v28 = vpop.permute.xlu0 %4482 }
 0x3b4   : > { %v11902_v50 = vcombine.low %v6857_v43, %v6860_v48  ;;  %6265 = vst [vmem:[#allocation2 + $0x290] sm:$0xf] %v11737_v9  ;;  %4820 = vst [vmem:[#allocation2 + $0x270] sm:$0xf] %v11496_v10  ;;  %v8559_v51 = vrot.slane %v16423_v20, 5  ;;  %v17582_v39 = vshll.u32 %v16432_v14, 16  ;;  %v8333_v21 = vsel %vm12915_vm2, %v8328_v1, %v8332_v56 }
 0x3b5   : > { %4821 = vst [vmem:[#allocation2 + $0x28c] sm:$0xf] %v11497_v44  ;;  %v8557_v53 = vsel %vm13186_vm5, %v12046_v36, %v8556_v30  ;;  %v8558_v46 = vrot.slane %v8556_v30, 4  ;;  %v17581_v34 = vshrl.u32 %v16432_v14, 16  ;;  %v12094_v29 = vcombine.low %v8323_v8, %v8333_v21  ;;  %v12770_v10 = vld [vmem:[%s12887_s19 + $0x48] sm:$0xf] }
 0x3b6   : > { %7546 = vrot.lane.b32.xlu0 %v11902_v50, %s12839_s20  ;;  %v7175_v20 = vshrl.u32 %v11806_v33, 16  ;;  %v7178_v57 = vshll.u32 %v11806_v33, 16  ;;  %v7184_v4 = vrot.slane %v17582_v39, 6  ;;  %v7189_v43 = vshrl.u32 %v16472_v16, 16  ;;  %v12771_v44 = vld [vmem:[%s12887_s19 + $0x4c] sm:$0xf] }
 0x3b7   : > { %v8560_v56 = vsel %vm13186_vm5, %v8558_v46, %v8559_v51  ;;  %v7183_v2 = vrot.slane %v17581_v34, 5  ;;  %v7192_v62 = vshll.u32 %v16472_v16, 16  ;;  %9102 = vrot.lane.b32.xlu1 %v12094_v29, %s12839_s20  ;;  %v12068_v1 = vcombine.low %v12770_v10, %v12771_v44 }
 0x3b8   : > { %v12110_v11 = vcombine.low %v8557_v53, %v8560_v56  ;;  %v7177_v33 = vrot.slane %v7175_v20, 5  ;;  %v7180_v9 = vrot.slane %v7178_v57, 6  ;;  %v7191_v36 = vrot.slane %v7189_v43, 5  ;;  %v16500_v53 = vpop.permute.xlu1 %6006  ;;  %v12062_v56 = vld [vmem:[%s12887_s19 + $0xc8] sm:$0x3] }
 0x3b9   : > { %v7185_v48 = vor.u32 %v7184_v4, %v7183_v2  ;;  %v7194_v30 = vrot.slane %v7192_v62, 6  ;;  %v6371_v8 = vshrl.u32 %v11752_v59, 16  ;;  %v9278_v51 = vsel %vm1504_vm9, %v12068_v1, %v16357_v19  ;;  %v12772_v62 = vld [vmem:[%s12887_s19 + $0x44] sm:$0x1]  ;;  %v16514_v1 = vpop.permute.xlu0 %4562 }
 0x3ba   : > { %v7181_v50 = vor.u32 %v7180_v9, %v7177_v33  ;;  %v6374_v21 = vshll.u32 %v11752_v59, 16  ;;  %v6382_v46 = vrot.slane %v6380_v54, 5  ;;  %v6386_v4 = vrot.slane %v6384_v45, 4  ;;  %v11854_v45 = vld [vmem:[%s12887_s19 + $0xb4] sm:$0xc] }
 0x3bb   : > { %v7187_v29 = vrot.slane %v7185_v48, 4  ;;  %v7195_v20 = vor.u32 %v7194_v30, %v7191_v36  ;;  %v6373_v57 = vrot.slane %v6371_v8, 4  ;;  %9182 = vrot.lane.b32.xlu1 %v12110_v11, %s12840_s21  ;;  %v6390_v19 = vshll.u32 %v12772_v62, 16  ;;  %v12588_v33 = vld [vmem:[#allocation2 + $0x274] ss:$28 sps:$4 sm:$0xff]  }
 0x3bc   : > { %v7182_v2 = vrot.slane %v7181_v50, 4  ;;  %v6376_v43 = vrot.slane %v6374_v21, 5  ;;  %v8875_v59 = vshrl.u32 %v16461_v61, 16  ;;  %v6387_v9 = vor.u32 %v6386_v4, %v6382_v46  ;;  %v12590_v44 = vld [vmem:[#allocation2 + $0x270] ss:$28 sps:$4 sm:$0xff]   ;;  %10728 = vmatprep.subr.bf16.mxu1 %v12588_v33  ;;  %v16520_v34 = vpop.permute.xlu1 %9080 }
 0x3bd   : > { %v7196_v54 = vsel %vm13345_vm8, %v7187_v29, %v7195_v20  ;;  %v8878_v10 = vshll.u32 %v16461_v61, 16  ;;  %v8883_v37 = vrot.slane %v8324_v40, 5  ;;  %v6392_v30 = vrot.slane %v6390_v19, 5  ;;  %10729 = vmatpush2.bf16.xpose.msra.mxu1 %v12590_v44  ;;  %v11992_v19 = vld [vmem:[%s12887_s19 + $0xb4] sm:$0xf] }
 0x3be   : > { %v7186_v11 = vsel %vm13345_vm8, %v7182_v2, %v7185_v48  ;;  %v6377_v36 = vor.u32 %v6376_v43, %v6373_v57  ;;  %v8877_v8 = vrot.slane %v8875_v59, 5  ;;  %v6388_v21 = vrot.slane %v6387_v9, 4  ;;  %v16531_v33 = vld [vmem:[%s12887_s19 + $0xb8] sm:$0xf] }
 0x3bf   : > { %v11918_v50 = vcombine.low %v7186_v11, %v7196_v54  ;;  %v8880_v29 = vrot.slane %v8878_v10, 6  ;;  %v8884_v61 = vrot.slane %v8320_v27, 6  ;;  %v8889_v20 = vshrl.u32 %v12062_v56, 16 }
 0x3c0   : > { %v6378_v40 = vrot.slane %v6377_v36, 4  ;;  %v8892_v4 = vshll.u32 %v12062_v56, 16  ;;  %v11870_v62 = vrot.slane %v11854_v45, 10  ;;  %v6393_v48 = vsel %vm12915_vm2, %v6388_v21, %v6392_v30  ;;  %v16535_v45 = vpop.permute.xlu0 %7524 }
 0x3c1   : > { %7626 = vrot.lane.b32.xlu0 %v11918_v50, %s12840_s21  ;;  %v8881_v57 = vor.u32 %v8880_v29, %v8877_v8  ;;  %v8885_v2 = vor.u32 %v8884_v61, %v8883_v37  ;;  %v7400_v43 = vrot.slane %v16432_v14, 6  ;;  %v8891_v27 = vrot.slane %v8889_v20, 5  ;;  %v16546_v8 = vld [vmem:[%s12887_s19 + $0xbc] sm:$0x1]  ;;  %v16550_v29 = vld [vmem:[%s12887_s19 + $0xac] sm:$0xf]  ;;  %v16561_v20 = vpop.permute.xlu1 %9160 }
 0x3c2   : > { %v6383_v18 = vsel %vm12915_vm2, %v6378_v40, %v6382_v46  ;;  %v8894_v59 = vrot.slane %v8892_v4, 6  ;;  %v7403_v56 = vrot.slane %v16472_v16, 6  ;;  %v16539_v46 = vsel %vm1553_vm13, %v9278_v51, %v16386_v13  ;;  %v11781_v40 = vld [vmem:[%s12887_s19 + $0xb0] sm:$0x1] }
 0x3c3   : > { %v11876_v54 = vcombine.low %v6383_v18, %v6393_v48  ;;  %v8882_v9 = vrot.slane %v8881_v57, 4  ;;  %v8887_v10 = vrot.slane %v8885_v2, 4  ;;  %v7401_v37 = vsel %vm13666_vm12, %v11870_v62, %v7400_v43 }
 0x3c4   : > { %v8895_v44 = vor.u32 %v8894_v59, %v8891_v27  ;;  %v7402_v11 = vrot.slane %v7400_v43, 4  ;;  %v8287_v36 = vshrl.u32 %v11992_v19, 16  ;;  %v8290_v50 = vshll.u32 %v11992_v19, 16  ;;  %v11538_v27 = vld [vmem:[%s12887_s19 + $0x98] sm:$0x1] }
 0x3c5   : > { %v7722_v16 = vsel %vm1504_vm9, %v11876_v54, %v16373_v17  ;;  %v8886_v30 = vsel %vm13345_vm8, %v8882_v9, %v8885_v2  ;;  %v8296_v21 = vshll.u32 %v16531_v33, 16  ;;  %v16566_v2 = vld [vmem:[%s12887_s19 + $0xa8] sm:$0xe]  ;;  %v8300_v43 = vshrl.u32 %v16531_v33, 16  ;;  %v12773_v54 = vld [vmem:[%s12887_s19 + $0x90] sm:$0xe] }
 0x3c6   : > { %v8896_v13 = vsel %vm13345_vm8, %v8887_v10, %v8895_v44  ;;  %v7404_v51 = vsel %vm13666_vm12, %v7402_v11, %v7403_v56  ;;  %v16558_v17 = vsel %vm1553_vm13, %v7722_v16, %v16398_v12  ;;  %v8289_v61 = vrot.slane %v8287_v36, 4  ;;  %v12774_v10 = vld [vmem:[%s12887_s19 + $0x94] sm:$0xf]  ;;  %v11312_v44 = vld [vmem:[%s12887_s19 + $0x84] sm:$0xe]  ;;  %v16578_v11 = vpop.permute.xlu0 %7604 }
 0x3c7   : > { %v12126_v4 = vcombine.low %v8886_v30, %v8896_v13  ;;  %v11934_v62 = vcombine.low %v7401_v37, %v7404_v51  ;;  %v8292_v48 = vrot.slane %v8290_v50, 5  ;;  %v8298_v57 = vrot.slane %v8296_v21, 5 }
 0x3c8   : > { %v8306_v12 = vshll.u32 %v16546_v8, 16  ;;  %v11821_v19 = vrot.slane %v16566_v2, 9  ;;  %v6849_v18 = vrot.slane %v16550_v29, 5  ;;  %v6852_v56 = vrot.slane %v11781_v40, 5 }
 0x3c9   : > { %9262 = vrot.lane.b32.xlu1 %v12126_v4, %s12841_s22  ;;  %7706 = vrot.lane.b32.xlu0 %v11934_v62, %s12841_s22  ;;  %v8293_v59 = vor.u32 %v8292_v48, %v8289_v61  ;;  %v11564_v9 = vrot.slane %v12773_v54, 9  ;;  %v4998_v37 = vrot.slane %v12774_v10, 5  ;;  %v8302_v36 = vrot.slane %v8300_v43, 4  ;;  %v16588_v10 = vpop.permute.xlu1 %5812 }
 0x3ca   : > { %v8308_v16 = vrot.slane %v8306_v12, 5  ;;  %v6850_v30 = vsel %vm13186_vm5, %v11821_v19, %v6849_v18  ;;  %v6851_v50 = vrot.slane %v6849_v18, 4  ;;  %v5001_v40 = vrot.slane %v11538_v27, 5 }
 0x3cb   : > { %v8294_v13 = vrot.slane %v8293_v59, 4  ;;  %v4999_v51 = vsel %vm13186_vm5, %v11564_v9, %v4998_v37  ;;  %v5000_v61 = vrot.slane %v4998_v37, 4  ;;  %v8303_v4 = vor.u32 %v8302_v36, %v8298_v57  ;;  %v12775_v59 = vld [vmem:[%s12887_s19 + $0x88] sm:$0xf] }
 0x3cc   : > { %v6853_v62 = vsel %vm13186_vm5, %v6851_v50, %v6852_v56  ;;  %v3475_v48 = vshrl.u32 %v11312_v44, 16  ;;  %v3478_v54 = vshll.u32 %v11312_v44, 16  ;;  %v3484_v9 = vshrl.u32 %v12775_v59, 16  ;;  %v12776_v50 = vld [vmem:[%s12887_s19 + $0x8c] sm:$0x3] }
 0x3cd   : > { %v8299_v12 = vsel %vm12915_vm2, %v8294_v13, %v8298_v57  ;;  %v11901_v19 = vcombine.low %v6850_v30, %v6853_v62  ;;  %v5002_v18 = vsel %vm13186_vm5, %v5000_v61, %v5001_v40  ;;  %v8304_v27 = vrot.slane %v8303_v4, 4  ;;  %v16600_v57 = vpop.permute.xlu0 %4368  ;;  %v12615_v40 = vld [vmem:[%s17549_s1 + $0xc] ss:$28 sps:$4 sm:$0xff]  }
 0x3ce   : > { %v11660_v37 = vcombine.low %v4999_v51, %v5002_v18  ;;  %v3477_v36 = vrot.slane %v3475_v48, 5  ;;  %v3480_v39 = vrot.slane %v3478_v54, 6  ;;  %v3486_v56 = vrot.slane %v3484_v9, 5  ;;  %10736 = vmatprep.mubr.bf16.mxu1 %v12615_v40 }
 0x3cf   : > { %7544 = vrot.lane.b32.xlu0 %v11901_v19, %s12839_s20  ;;  %v3487_v44 = vshll.u32 %v12775_v59, 16  ;;  %v3494_v35 = vshrl.u32 %v12776_v50, 16  ;;  %v3497_v58 = vshll.u32 %v12776_v50, 16  ;;  %v8309_v30 = vsel %vm12915_vm2, %v8304_v27, %v8308_v16  ;;  %v16615_v59 = vpop.permute.xlu1 %9240 }
 0x3d0   : > { %v16606_v13 = vsel %vm1504_vm9, %v11660_v37, %v16409_v7  ;;  %v3481_v51 = vor.u32 %v3480_v39, %v3477_v36  ;;  %v12045_v61 = vrot.slane %v16598_v24, 9  ;;  %v12093_v4 = vcombine.low %v8299_v12, %v8309_v30  ;;  %v16620_v12 = vld [vmem:[%s12887_s19 + $0xb0] sm:$0x3] }
 0x3d1   : > { %v3489_v62 = vrot.slane %v3487_v44, 6  ;;  %v3496_v48 = vrot.slane %v3494_v35, 5  ;;  %v3499_v54 = vrot.slane %v3497_v58, 6  ;;  %v8549_v18 = vrot.slane %v16531_v33, 5 }
 0x3d2   : > { %v3482_v19 = vrot.slane %v3481_v51, 4  ;;  %v8552_v16 = vrot.slane %v16546_v8, 5  ;;  %v17587_v7 = vshll.u32 %v16550_v29, 16  ;;  %9100 = vrot.lane.b32.xlu1 %v12093_v4, %s12839_s20  ;;  %v17586_v27 = vshrl.u32 %v16550_v29, 16  ;;  %v16632_v51 = vpop.permute.xlu0 %7684 }
 0x3d3   : > { %v3490_v39 = vor.u32 %v3489_v62, %v3486_v56  ;;  %v3500_v9 = vor.u32 %v3499_v54, %v3496_v48  ;;  %v7152_v58 = vshrl.u32 %v16566_v2, 16  ;;  %v8550_v35 = vsel %vm13186_vm5, %v12045_v61, %v8549_v18 }
 0x3d4   : > { %v8551_v37 = vrot.slane %v8549_v18, 4  ;;  %v7155_v8 = vshll.u32 %v16566_v2, 16  ;;  %v7161_v36 = vrot.slane %v17587_v7, 6  ;;  %v7160_v30 = vrot.slane %v17586_v27, 5 }
 0x3d5   : > { %v3491_v44 = vsel %vm13345_vm8, %v3482_v19, %v3490_v39  ;;  %v3492_v56 = vrot.slane %v3490_v39, 4  ;;  %v7154_v50 = vrot.slane %v7152_v58, 5  ;;  %v7166_v4 = vshrl.u32 %v16620_v12, 16 }
 0x3d6   : > { %v8553_v40 = vsel %vm13186_vm5, %v8551_v37, %v8552_v16  ;;  %v7157_v61 = vrot.slane %v7155_v8, 6  ;;  %v7169_v2 = vshll.u32 %v16620_v12, 16  ;;  %v7162_v54 = vor.u32 %v7161_v36, %v7160_v30  ;;  %v16643_v16 = vpop.permute.xlu1 %5892 }
 0x3d7   : > { %v3501_v62 = vsel %vm13345_vm8, %v3492_v56, %v3500_v9  ;;  %v12109_v48 = vcombine.low %v8550_v35, %v8553_v40  ;;  %v9355_v19 = vsel %vm1586_vm14, %v16539_v46, %v16445_v41  ;;  %v7168_v58 = vrot.slane %v7166_v4, 5  ;;  %v12061_v35 = vld [vmem:[%s12887_s19 + $0xbc] sm:$0x3] }
 0x3d8   : > { %v11420_v18 = vcombine.low %v3491_v44, %v3501_v62  ;;  %v7158_v39 = vor.u32 %v7157_v61, %v7154_v50  ;;  %v7171_v27 = vrot.slane %v7169_v2, 6  ;;  %v7164_v37 = vrot.slane %v7162_v54, 4  ;;  %v11853_v61 = vld [vmem:[%s12887_s19 + $0xa8] sm:$0xc] }
 0x3d9   : > { %9180 = vrot.lane.b32.xlu1 %v12109_v48, %s12840_s21  ;;  %v12134_v8 = vcombine.low %v9355_v19, %v9355_v19  ;;  %v12135_v7 = vcombine.high %v9355_v19, %v9355_v19  ;;  %v7799_v9 = vsel %vm1586_vm14, %v16558_v17, %v16458_v15  ;;  %v8852_v50 = vshrl.u32 %v16598_v24, 16  ;;  %v16657_v15 = vpop.permute.xlu0 %4480 }
 0x3da   : > { %v4606_v41 = vsel %vm1504_vm9, %v11420_v18, %v16427_v60  ;;  %v7159_v46 = vrot.slane %v7158_v39, 4  ;;  %v7172_v36 = vor.u32 %v7171_v27, %v7168_v58  ;;  %v11942_v44 = vcombine.low %v7799_v9, %v7799_v9  ;;  %v11990_v18 = vld [vmem:[%s12887_s19 + $0xa8] sm:$0xf]  ;;  %v16667_v39 = vpop.permute.xlu1 %6004 }
 0x3db   : > { %9498 = vst [vmem:[#allocation2 + $0x84] sm:$0xf] %v12134_v8  ;;  %9499 = vst [vmem:[#allocation2 + $0xa0] sm:$0xf] %v12135_v7  ;;  %v11943_v56 = vcombine.high %v7799_v9, %v7799_v9  ;;  %v8855_v30 = vshll.u32 %v16598_v24, 16  ;;  %v8860_v40 = vrot.slane %v8300_v43, 5 }
 0x3dc   : > { %v7163_v60 = vsel %vm13345_vm8, %v7159_v46, %v7162_v54  ;;  %v7173_v17 = vsel %vm13345_vm8, %v7164_v37, %v7172_v36  ;;  %7942 = vst [vmem:[#allocation2 + $0x80] sm:$0xf] %v11942_v44  ;;  %v8861_v7 = vrot.slane %v8296_v21, 6  ;;  %v8866_v27 = vshrl.u32 %v12061_v35, 16  ;;  %v16675_v8 = vld [vmem:[%s12887_s19 + $0xac] sm:$0xf] }
 0x3dd   : > { %v11917_v4 = vcombine.low %v7163_v60, %v7173_v17  ;;  %7943 = vst [vmem:[#allocation2 + $0x9c] sm:$0xf] %v11943_v56  ;;  %v8854_v24 = vrot.slane %v8852_v50, 5  ;;  %v8857_v43 = vrot.slane %v8855_v30, 6  ;;  %v8869_v2 = vshll.u32 %v12061_v35, 16 }
 0x3de   : > { %v8862_v62 = vor.u32 %v8861_v7, %v8860_v40  ;;  %v8868_v48 = vrot.slane %v8866_v27, 5  ;;  %v11869_v19 = vrot.slane %v11853_v61, 10  ;;  %v7393_v54 = vrot.slane %v16550_v29, 6  ;;  %v16678_v9 = vld [vmem:[%s12887_s19 + $0xb0] sm:$0x1] }
 0x3df   : > { %7624 = vrot.lane.b32.xlu0 %v11917_v4, %s12840_s21  ;;  %v8858_v33 = vor.u32 %v8857_v43, %v8854_v24  ;;  %v8871_v21 = vrot.slane %v8869_v2, 6  ;;  %v7396_v58 = vrot.slane %v16620_v12, 6  ;;  %v6087_v37 = vsel %vm1553_vm13, %v16606_v13, %v16474_v22  ;;  %v16685_v40 = vld [vmem:[%s12887_s19 + $0xa0] sm:$0xf]  ;;  %v16687_v22 = vpop.permute.xlu0 %4560  ;;  %v11778_v7 = vld [vmem:[%s12887_s19 + $0xa4] sm:$0x1] }
 0x3e0   : > { %v8864_v35 = vrot.slane %v8862_v62, 4  ;;  %v7394_v46 = vsel %vm13666_vm12, %v11869_v19, %v7393_v54  ;;  %v7395_v36 = vrot.slane %v7393_v54, 4  ;;  %v4643_v44 = vsel %vm1553_vm13, %v4606_v41, %v16491_v28  ;;  %v16700_v24 = vld [vmem:[%s12887_s19 + $0x9c] sm:$0xe] }
 0x3e1   : > { %v8859_v56 = vrot.slane %v8858_v33, 4  ;;  %v8872_v12 = vor.u32 %v8871_v21, %v8868_v48  ;;  %v8263_v50 = vshrl.u32 %v11990_v18, 16  ;;  %v8266_v30 = vshll.u32 %v11990_v18, 16  ;;  %v16706_v18 = vpop.permute.xlu1 %9078 }
 0x3e2   : > { %v7397_v13 = vsel %vm13666_vm12, %v7395_v36, %v7396_v58  ;;  %v8272_v61 = vshll.u32 %v16675_v8, 16  ;;  %v8276_v60 = vshrl.u32 %v16675_v8, 16  ;;  %v8282_v17 = vshll.u32 %v16678_v9, 16 }
 0x3e3   : > { %v8863_v28 = vsel %vm13345_vm8, %v8859_v56, %v8862_v62  ;;  %v8873_v41 = vsel %vm13345_vm8, %v8864_v35, %v8872_v12  ;;  %v11933_v27 = vcombine.low %v7394_v46, %v7397_v13  ;;  %v8265_v4 = vrot.slane %v8263_v50, 4  ;;  %v12594_v35 = vld [vmem:[#allocation2 + $0x84] ss:$28 sps:$4 sm:$0xff]  }
 0x3e4   : > { %v12125_v43 = vcombine.low %v8863_v28, %v8873_v41  ;;  %v8268_v2 = vrot.slane %v8266_v30, 5  ;;  %v8274_v48 = vrot.slane %v8272_v61, 5  ;;  %v8278_v19 = vrot.slane %v8276_v60, 4  ;;  %v12592_v54 = vld [vmem:[#allocation2 + $0x80] ss:$28 sps:$4 sm:$0xff]   ;;  %10767 = vmatprep.subr.bf16.mxu0 %v12594_v35 }
 0x3e5   : > { %7704 = vrot.lane.b32.xlu0 %v11933_v27, %s12841_s22  ;;  %v8284_v62 = vrot.slane %v8282_v17, 5  ;;  %v11820_v33 = vrot.slane %v16700_v24, 9  ;;  %v6842_v21 = vrot.slane %v16685_v40, 5  ;;  %v6845_v58 = vrot.slane %v11778_v7, 5  ;;  %v16718_v7 = vpop.permute.xlu0 %7522  ;;  %10768 = vmatpush1.bf16.xpose.msra.mxu0 %v12592_v54 }
 0x3e6   : > { %9260 = vrot.lane.b32.xlu1 %v12125_v43, %s12841_s22  ;;  %v8269_v46 = vor.u32 %v8268_v2, %v8265_v4  ;;  %v8279_v36 = vor.u32 %v8278_v19, %v8274_v48  ;;  %v6119_v56 = vsel %vm1586_vm14, %v6087_v37, %v16500_v53  ;;  %v4675_v12 = vsel %vm1586_vm14, %v4643_v44, %v16514_v1  ;;  %v16721_v43 = vld [vmem:[%s12887_s19 + $0xa8] sm:$0xe]  ;;  %v16729_v2 = vld [vmem:[%s12887_s19 + $0xa4] sm:$0x3] }
 0x3e7   : > { %v6843_v50 = vsel %vm13186_vm5, %v11820_v33, %v6842_v21  ;;  %v6844_v30 = vrot.slane %v6842_v21, 4  ;;  %v11734_v13 = vcombine.low %v6119_v56, %v6119_v56  ;;  %v11735_v17 = vcombine.high %v6119_v56, %v6119_v56 }
 0x3e8   : > { %v8270_v28 = vrot.slane %v8269_v46, 4  ;;  %v8280_v41 = vrot.slane %v8279_v36, 4  ;;  %v11494_v27 = vcombine.low %v4675_v12, %v4675_v12  ;;  %v11495_v4 = vcombine.high %v4675_v12, %v4675_v12 }
 0x3e9   : > { %v6846_v53 = vsel %vm13186_vm5, %v6844_v30, %v6845_v58  ;;  %6262 = vst [vmem:[#allocation2 + $0x23c] sm:$0xf] %v11734_v13  ;;  %6263 = vst [vmem:[#allocation2 + $0x258] sm:$0xf] %v11735_v17  ;;  %v12044_v1 = vrot.slane %v16721_v43, 9  ;;  %v8542_v37 = vrot.slane %v16675_v8, 5  ;;  %v16736_v58 = vpop.permute.xlu1 %9158 }
 0x3ea   : > { %v8545_v44 = vrot.slane %v16678_v9, 5  ;;  %v8275_v19 = vsel %vm12915_vm2, %v8270_v28, %v8274_v48  ;;  %v8285_v54 = vsel %vm12915_vm2, %v8280_v41, %v8284_v62  ;;  %v11900_v33 = vcombine.low %v6843_v50, %v6846_v53  ;;  %4818 = vst [vmem:[#allocation2 + $0x238] sm:$0xf] %v11494_v27  ;;  %4819 = vst [vmem:[#allocation2 + $0x254] sm:$0xf] %v11495_v4  ;;  %v16756_v27 = vpop.permute.xlu0 %7602 }
 0x3eb   : > { %v17589_v21 = vshll.u32 %v16685_v40, 16  ;;  %v12092_v35 = vcombine.low %v8275_v19, %v8285_v54  ;;  %v8543_v9 = vsel %vm13186_vm5, %v12044_v1, %v8542_v37  ;;  %v8544_v46 = vrot.slane %v8542_v37, 4  ;;  %v11749_v50 = vld [vmem:[%s12887_s19 + $0x30] sm:$0xf]  ;;  %v12777_v28 = vld [vmem:[%s12887_s19 + $0x3c] sm:$0xf] }
 0x3ec   : > { %v17588_v48 = vshrl.u32 %v16685_v40, 16  ;;  %7542 = vrot.lane.b32.xlu0 %v11900_v33, %s12839_s20  ;;  %v7129_v62 = vshrl.u32 %v16700_v24, 16  ;;  %v7132_v36 = vshll.u32 %v16700_v24, 16  ;;  %v7143_v12 = vshrl.u32 %v16729_v2, 16  ;;  %v12778_v41 = vld [vmem:[%s12887_s19 + $0x40] sm:$0xf] }
 0x3ed   : > { %v7138_v56 = vrot.slane %v17589_v21, 6  ;;  %9098 = vrot.lane.b32.xlu1 %v12092_v35, %s12839_s20  ;;  %v8546_v30 = vsel %vm13186_vm5, %v8544_v46, %v8545_v44  ;;  %v7146_v17 = vshll.u32 %v16729_v2, 16  ;;  %v12067_v24 = vcombine.low %v12777_v28, %v12778_v41  ;;  %v11988_v8 = vld [vmem:[%s12887_s19 + $0x9c] sm:$0xf] }
 0x3ee   : > { %v7137_v13 = vrot.slane %v17588_v48, 5  ;;  %v12108_v4 = vcombine.low %v8543_v9, %v8546_v30  ;;  %v7131_v53 = vrot.slane %v7129_v62, 5  ;;  %v7134_v1 = vrot.slane %v7132_v36, 6  ;;  %v12060_v9 = vld [vmem:[%s12887_s19 + $0xb0] sm:$0x3]  ;;  %v16765_v62 = vpop.permute.xlu1 %5810 }
 0x3ef   : > { %v7145_v37 = vrot.slane %v7143_v12, 5  ;;  %v7148_v54 = vrot.slane %v7146_v17, 6  ;;  %v9275_v44 = vsel %vm1504_vm9, %v12067_v24, %v16520_v34  ;;  %v6347_v33 = vshrl.u32 %v11749_v50, 16  ;;  %v12779_v30 = vld [vmem:[%s12887_s19 + $0x38] sm:$0x1] }
 0x3f0   : > { %v7139_v19 = vor.u32 %v7138_v56, %v7137_v13  ;;  %v7135_v35 = vor.u32 %v7134_v1, %v7131_v53  ;;  %v6350_v46 = vshll.u32 %v11749_v50, 16  ;;  %v6358_v48 = vrot.slane %v6356_v5, 5  ;;  %v11852_v34 = vld [vmem:[%s12887_s19 + $0x9c] sm:$0xc] }
 0x3f1   : > { %v6362_v28 = vrot.slane %v6360_v23, 4  ;;  %9178 = vrot.lane.b32.xlu1 %v12108_v4, %s12840_s21  ;;  %v7149_v56 = vor.u32 %v7148_v54, %v7145_v37  ;;  %v6349_v12 = vrot.slane %v6347_v33, 4  ;;  %v6366_v13 = vshll.u32 %v12779_v30, 16  ;;  %v12595_v5 = vld [vmem:[#allocation2 + $0x23c] ss:$28 sps:$4 sm:$0xff]   ;;  %v16776_v37 = vpop.permute.xlu0 %4366 }
 0x3f2   : > { %v7141_v36 = vrot.slane %v7139_v19, 4  ;;  %v7136_v17 = vrot.slane %v7135_v35, 4  ;;  %v6352_v41 = vrot.slane %v6350_v46, 5  ;;  %v8829_v24 = vshrl.u32 %v16721_v43, 16  ;;  %v12597_v1 = vld [vmem:[#allocation2 + $0x238] ss:$28 sps:$4 sm:$0xff]   ;;  %10730 = vmatprep.subr.bf16.mxu1 %v12595_v5 }
 0x3f3   : > { %v6363_v50 = vor.u32 %v6362_v28, %v6358_v48  ;;  %v6368_v23 = vrot.slane %v6366_v13, 5  ;;  %v8832_v53 = vshll.u32 %v16721_v43, 16  ;;  %v8837_v4 = vrot.slane %v8276_v60, 5  ;;  %10731 = vmatpush2.bf16.xpose.msra.mxu1 %v12597_v1 }
 0x3f4   : > { %v7150_v42 = vsel %vm13345_vm8, %v7141_v36, %v7149_v56  ;;  %v7140_v54 = vsel %vm13345_vm8, %v7136_v17, %v7139_v19  ;;  %v6353_v33 = vor.u32 %v6352_v41, %v6349_v12  ;;  %v8831_v46 = vrot.slane %v8829_v24, 5  ;;  %v16784_v19 = vpop.permute.xlu1 %9238 }
 0x3f5   : > { %v6364_v35 = vrot.slane %v6363_v50, 4  ;;  %v11916_v28 = vcombine.low %v7140_v54, %v7150_v42  ;;  %v8834_v30 = vrot.slane %v8832_v53, 6  ;;  %v8838_v36 = vrot.slane %v8272_v61, 6  ;;  %v16801_v1 = vpop.permute.xlu0 %7682 }
 0x3f6   : > { %v8843_v43 = vshrl.u32 %v12060_v9, 16  ;;  %v6354_v60 = vrot.slane %v6353_v33, 4  ;;  %v8846_v13 = vshll.u32 %v12060_v9, 16  ;;  %v11868_v21 = vrot.slane %v11852_v34, 10  ;;  %v16797_v34 = vld [vmem:[%s12887_s19 + $0xa0] sm:$0xf] }
 0x3f7   : > { %v6369_v56 = vsel %vm12915_vm2, %v6364_v35, %v6368_v23  ;;  %7622 = vrot.lane.b32.xlu0 %v11916_v28, %s12840_s21  ;;  %v8835_v12 = vor.u32 %v8834_v30, %v8831_v46  ;;  %v8839_v17 = vor.u32 %v8838_v36, %v8837_v4  ;;  %v7386_v50 = vrot.slane %v16685_v40, 6  ;;  %v16808_v35 = vld [vmem:[%s12887_s19 + $0xa4] sm:$0x1]  ;;  %v16813_v28 = vld [vmem:[%s12887_s19 + $0x94] sm:$0xf] }
 0x3f8   : > { %v8845_v41 = vrot.slane %v8843_v43, 5  ;;  %v6359_v61 = vsel %vm12915_vm2, %v6354_v60, %v6358_v48  ;;  %v8848_v24 = vrot.slane %v8846_v13, 6  ;;  %v7389_v5 = vrot.slane %v16729_v2, 6  ;;  %v11775_v60 = vld [vmem:[%s12887_s19 + $0x98] sm:$0x1] }
 0x3f9   : > { %v16794_v9 = vsel %vm1553_vm13, %v9275_v44, %v16561_v20  ;;  %v11875_v42 = vcombine.low %v6359_v61, %v6369_v56  ;;  %v8836_v23 = vrot.slane %v8835_v12, 4  ;;  %v8841_v53 = vrot.slane %v8839_v17, 4  ;;  %v16824_v56 = vpop.permute.xlu1 %5890 }
 0x3fa   : > { %v7387_v4 = vsel %vm13666_vm12, %v11868_v21, %v7386_v50  ;;  %v8849_v48 = vor.u32 %v8848_v24, %v8845_v41  ;;  %v7388_v54 = vrot.slane %v7386_v50, 4  ;;  %v8239_v33 = vshrl.u32 %v11988_v8, 16  ;;  %v16829_v50 = vld [vmem:[%s12887_s19 + $0x90] sm:$0xe] }
 0x3fb   : > { %v8242_v2 = vshll.u32 %v11988_v8, 16  ;;  %v7719_v20 = vsel %vm1504_vm9, %v11875_v42, %v16535_v45  ;;  %v8840_v44 = vsel %vm13345_vm8, %v8836_v23, %v8839_v17  ;;  %v8248_v46 = vshll.u32 %v16797_v34, 16 }
 0x3fc   : > { %v8252_v21 = vshrl.u32 %v16797_v34, 16  ;;  %v8850_v30 = vsel %vm13345_vm8, %v8841_v53, %v8849_v48  ;;  %v7390_v36 = vsel %vm13666_vm12, %v7388_v54, %v7389_v5  ;;  %v16821_v45 = vsel %vm1553_vm13, %v7719_v20, %v16578_v11  ;;  %v11535_v5 = vld [vmem:[%s12887_s19 + $0x8c] sm:$0x1]  ;;  %v12780_v53 = vld [vmem:[%s12887_s19 + $0x84] sm:$0xe] }
 0x3fd   : > { %v8241_v43 = vrot.slane %v8239_v33, 4  ;;  %v12124_v13 = vcombine.low %v8840_v44, %v8850_v30  ;;  %v11932_v12 = vcombine.low %v7387_v4, %v7390_v36  ;;  %v8244_v17 = vrot.slane %v8242_v2, 5  ;;  %v12781_v48 = vld [vmem:[%s12887_s19 + $0x88] sm:$0xf]  ;;  %v11309_v33 = vld [vmem:[%s12887_s19 + $0x78] sm:$0xe]  ;;  %v16842_v2 = vpop.permute.xlu0 %4478 }
 0x3fe   : > { %v8250_v41 = vrot.slane %v8248_v46, 5  ;;  %v8254_v8 = vrot.slane %v8252_v21, 4  ;;  %v8258_v11 = vshll.u32 %v16808_v35, 16  ;;  %v11819_v61 = vrot.slane %v16829_v50, 9 }
 0x3ff   : > { %v6835_v24 = vrot.slane %v16813_v28, 5  ;;  %9258 = vrot.lane.b32.xlu1 %v12124_v13, %s12841_s22  ;;  %7702 = vrot.lane.b32.xlu0 %v11932_v12, %s12841_s22  ;;  %v8245_v42 = vor.u32 %v8244_v17, %v8241_v43  ;;  %v6838_v23 = vrot.slane %v11775_v60, 5  ;;  %v11563_v4 = vrot.slane %v12780_v53, 9 }
 0x400   : > { %v4991_v54 = vrot.slane %v12781_v48, 5  ;;  %v8255_v20 = vor.u32 %v8254_v8, %v8250_v41  ;;  %v8260_v44 = vrot.slane %v8258_v11, 5  ;;  %v4994_v60 = vrot.slane %v11535_v5, 5  ;;  %v16850_v8 = vpop.permute.xlu1 %6002 }
 0x401   : > { %v6836_v30 = vsel %vm13186_vm5, %v11819_v61, %v6835_v24  ;;  %v6837_v36 = vrot.slane %v6835_v24, 4  ;;  %v8246_v6 = vrot.slane %v8245_v42, 4  ;;  %v3447_v53 = vshrl.u32 %v11309_v33, 16  ;;  %v12782_v42 = vld [vmem:[%s12887_s19 + $0x7c] sm:$0xf] }
 0x402   : > { %v4992_v13 = vsel %vm13186_vm5, %v11563_v4, %v4991_v54  ;;  %v4993_v43 = vrot.slane %v4991_v54, 4  ;;  %v8256_v12 = vrot.slane %v8255_v20, 4  ;;  %v3450_v48 = vshll.u32 %v11309_v33, 16 }
 0x403   : > { %v6839_v17 = vsel %vm13186_vm5, %v6837_v36, %v6838_v23  ;;  %v8251_v11 = vsel %vm12915_vm2, %v8246_v6, %v8250_v41  ;;  %v3456_v4 = vshrl.u32 %v12782_v42, 16  ;;  %v3449_v23 = vrot.slane %v3447_v53, 5  ;;  %v16862_v6 = vld [vmem:[%s12887_s19 + $0x9c] sm:$0xe]  ;;  %v16864_v41 = vpop.permute.xlu0 %4558 }
 0x404   : > { %v11899_v61 = vcombine.low %v6836_v30, %v6839_v17  ;;  %v4995_v24 = vsel %vm13186_vm5, %v4993_v43, %v4994_v60  ;;  %v8261_v5 = vsel %vm12915_vm2, %v8256_v12, %v8260_v44  ;;  %v3452_v20 = vrot.slane %v3450_v48, 6 }
 0x405   : > { %v11659_v54 = vcombine.low %v4992_v13, %v4995_v24  ;;  %v12091_v36 = vcombine.low %v8251_v11, %v8261_v5  ;;  %v3458_v33 = vrot.slane %v3456_v4, 5  ;;  %v3459_v47 = vshll.u32 %v12782_v42, 16  ;;  %v16876_v24 = vpop.permute.xlu1 %9108  ;;  %v16881_v5 = vld [vmem:[%s12887_s19 + $0x98] sm:$0x3] }
 0x406   : > { %7540 = vrot.lane.b32.xlu0 %v11899_v61, %s12839_s20  ;;  %v3466_v52 = vshrl.u32 %v12783_v26, 16  ;;  %v3453_v43 = vor.u32 %v3452_v20, %v3449_v23  ;;  %v3469_v44 = vshll.u32 %v12783_v26, 16  ;;  %v12043_v13 = vrot.slane %v16862_v6, 9 }
 0x407   : > { %v16868_v30 = vsel %vm1504_vm9, %v11659_v54, %v16588_v10  ;;  %9096 = vrot.lane.b32.xlu1 %v12091_v36, %s12839_s20  ;;  %v3461_v60 = vrot.slane %v3459_v47, 6  ;;  %v8535_v17 = vrot.slane %v16797_v34, 5  ;;  %v8538_v53 = vrot.slane %v16808_v35, 5 }
 0x408   : > { %v3468_v12 = vrot.slane %v3466_v52, 5  ;;  %v3454_v48 = vrot.slane %v3453_v43, 4  ;;  %v3471_v11 = vrot.slane %v3469_v44, 6  ;;  %v17597_v61 = vshll.u32 %v16813_v28, 16  ;;  %v16893_v44 = vpop.permute.xlu0 %7552 }
 0x409   : > { %v17594_v10 = vshrl.u32 %v16813_v28, 16  ;;  %v3462_v42 = vor.u32 %v3461_v60, %v3458_v33  ;;  %v8536_v26 = vsel %vm13186_vm5, %v12043_v13, %v8535_v17  ;;  %v8537_v4 = vrot.slane %v8535_v17, 4 }
 0x40a   : > { %v7106_v52 = vshrl.u32 %v16829_v50, 16  ;;  %v3472_v47 = vor.u32 %v3471_v11, %v3468_v12  ;;  %v7109_v35 = vshll.u32 %v16829_v50, 16  ;;  %v7115_v23 = vrot.slane %v17597_v61, 6 }
 0x40b   : > { %v7114_v54 = vrot.slane %v17594_v10, 5  ;;  %v3463_v20 = vsel %vm13345_vm8, %v3454_v48, %v3462_v42  ;;  %v3464_v36 = vrot.slane %v3462_v42, 4  ;;  %v8539_v33 = vsel %vm13186_vm5, %v8537_v4, %v8538_v53 }
 0x40c   : > { %v7108_v43 = vrot.slane %v7106_v52, 5  ;;  %v12107_v13 = vcombine.low %v8536_v26, %v8539_v33  ;;  %v7111_v60 = vrot.slane %v7109_v35, 6  ;;  %v7120_v50 = vshrl.u32 %v16881_v5, 16  ;;  %v16906_v35 = vpop.permute.xlu1 %9188  ;;  %v12059_v33 = vld [vmem:[%s12887_s19 + $0xa4] sm:$0x3] }
 0x40d   : > { %v7116_v12 = vor.u32 %v7115_v23, %v7114_v54  ;;  %v3473_v17 = vsel %vm13345_vm8, %v3464_v36, %v3472_v47  ;;  %v7123_v11 = vshll.u32 %v16881_v5, 16  ;;  %v9353_v48 = vsel %vm1586_vm14, %v16794_v9, %v16615_v59 }
 0x40e   : > { %v7797_v53 = vsel %vm1586_vm14, %v16821_v45, %v16632_v51  ;;  %v11419_v42 = vcombine.low %v3463_v20, %v3473_v17  ;;  %9176 = vrot.lane.b32.xlu1 %v12107_v13, %s12840_s21  ;;  %v7112_v26 = vor.u32 %v7111_v60, %v7108_v43  ;;  %v7122_v52 = vrot.slane %v7120_v50, 5  ;;  %v11851_v45 = vld [vmem:[%s12887_s19 + $0x90] sm:$0xc] }
 0x40f   : > { %v7118_v4 = vrot.slane %v7116_v12, 4  ;;  %v7125_v47 = vrot.slane %v7123_v11, 6  ;;  %v12132_v54 = vcombine.low %v9353_v48, %v9353_v48  ;;  %v12133_v23 = vcombine.high %v9353_v48, %v9353_v48 }
 0x410   : > { %v11940_v36 = vcombine.low %v7797_v53, %v7797_v53  ;;  %v4603_v59 = vsel %vm1504_vm9, %v11419_v42, %v16600_v57  ;;  %v7113_v9 = vrot.slane %v7112_v26, 4  ;;  %v11941_v10 = vcombine.high %v7797_v53, %v7797_v53  ;;  %v16918_v57 = vpop.permute.xlu0 %7632  ;;  %v11986_v26 = vld [vmem:[%s12887_s19 + $0x90] sm:$0xf] }
 0x411   : > { %v8806_v51 = vshrl.u32 %v16862_v6, 16  ;;  %v7126_v20 = vor.u32 %v7125_v47, %v7122_v52  ;;  %9496 = vst [vmem:[#allocation2 + $0x4c] sm:$0xf] %v12132_v54  ;;  %9497 = vst [vmem:[#allocation2 + $0x68] sm:$0xf] %v12133_v23  ;;  %v8809_v43 = vshll.u32 %v16862_v6, 16 }
 0x412   : > { %7940 = vst [vmem:[#allocation2 + $0x48] sm:$0xf] %v11940_v36  ;;  %v8814_v13 = vrot.slane %v8252_v21, 5  ;;  %v8815_v60 = vrot.slane %v8248_v46, 6  ;;  %v7117_v50 = vsel %vm13345_vm8, %v7113_v9, %v7116_v12  ;;  %7941 = vst [vmem:[#allocation2 + $0x64] sm:$0xf] %v11941_v10  ;;  %v16929_v10 = vpop.permute.xlu1 %9268 }
 0x413   : > { %v8808_v17 = vrot.slane %v8806_v51, 5  ;;  %v8820_v11 = vshrl.u32 %v12059_v33, 16  ;;  %v8823_v48 = vshll.u32 %v12059_v33, 16  ;;  %v7127_v6 = vsel %vm13345_vm8, %v7118_v4, %v7126_v20  ;;  %v16927_v54 = vld [vmem:[%s12887_s19 + $0x94] sm:$0xf] }
 0x414   : > { %v8811_v53 = vrot.slane %v8809_v43, 6  ;;  %v8816_v42 = vor.u32 %v8815_v60, %v8814_v13  ;;  %v11867_v21 = vrot.slane %v11851_v45, 10  ;;  %v11915_v34 = vcombine.low %v7117_v50, %v7127_v6  ;;  %v16936_v33 = vld [vmem:[%s12887_s19 + $0x98] sm:$0x1] }
 0x415   : > { %v8822_v46 = vrot.slane %v8820_v11, 5  ;;  %v8825_v52 = vrot.slane %v8823_v48, 6  ;;  %v7379_v47 = vrot.slane %v16813_v28, 6  ;;  %v7382_v36 = vrot.slane %v16881_v5, 6 }
 0x416   : > { %v8812_v12 = vor.u32 %v8811_v53, %v8808_v17  ;;  %v8818_v23 = vrot.slane %v8816_v42, 4  ;;  %v6085_v4 = vsel %vm1553_vm13, %v16868_v30, %v16643_v16  ;;  %7620 = vrot.lane.b32.xlu0 %v11915_v34, %s12840_s21  ;;  %v4641_v20 = vsel %vm1553_vm13, %v4603_v59, %v16657_v15  ;;  %v16945_v16 = vld [vmem:[%s12887_s19 + $0x88] sm:$0xf]  ;;  %v16947_v30 = vpop.permute.xlu0 %7712  ;;  %v11772_v15 = vld [vmem:[%s12887_s19 + $0x8c] sm:$0x1] }
 0x417   : > { %v8826_v9 = vor.u32 %v8825_v52, %v8822_v46  ;;  %v7380_v51 = vsel %vm13666_vm12, %v11867_v21, %v7379_v47  ;;  %v7381_v45 = vrot.slane %v7379_v47, 4  ;;  %v8215_v5 = vshrl.u32 %v11986_v26, 16  ;;  %v16957_v59 = vld [vmem:[%s12887_s19 + $0x84] sm:$0xe] }
 0x418   : > { %v8813_v43 = vrot.slane %v8812_v12, 4  ;;  %v8218_v13 = vshll.u32 %v11986_v26, 16  ;;  %v17598_v60 = vshll.u32 %v16927_v54, 16  ;;  %v8228_v11 = vshrl.u32 %v16927_v54, 16 }
 0x419   : > { %v8827_v50 = vsel %vm13345_vm8, %v8818_v23, %v8826_v9  ;;  %v7383_v17 = vsel %vm13666_vm12, %v7381_v45, %v7382_v36  ;;  %v8234_v48 = vshll.u32 %v16936_v33, 16  ;;  %v8217_v21 = vrot.slane %v8215_v5, 4  ;;  %v12599_v34 = vld [vmem:[#allocation2 + $0x48] ss:$28 sps:$4 sm:$0xff]   ;;  %v16965_v36 = vpop.permute.xlu1 %9106 }
 0x41a   : > { %v8817_v6 = vsel %vm13345_vm8, %v8813_v43, %v8816_v42  ;;  %v11931_v53 = vcombine.low %v7380_v51, %v7383_v17  ;;  %v8220_v26 = vrot.slane %v8218_v13, 5  ;;  %v8226_v52 = vrot.slane %v17598_v60, 5  ;;  %v12601_v23 = vld [vmem:[#allocation2 + $0x4c] ss:$28 sps:$4 sm:$0xff]   ;;  %v16971_v43 = vld [vmem:[%s12887_s19 + $0x90] sm:$0xe] }
 0x41b   : > { %v12123_v46 = vcombine.low %v8817_v6, %v8827_v50  ;;  %v8230_v47 = vrot.slane %v8228_v11, 4  ;;  %v8236_v12 = vrot.slane %v8234_v48, 5  ;;  %v11818_v42 = vrot.slane %v16957_v59, 9  ;;  %10769 = vmatprep.subr.bf16.mxu0 %v12601_v23  ;;  %v12058_v60 = vld [vmem:[%s12887_s19 + $0x98] sm:$0x3] }
 0x41c   : > { %7700 = vrot.lane.b32.xlu0 %v11931_v53, %s12841_s22  ;;  %v8221_v9 = vor.u32 %v8220_v26, %v8217_v21  ;;  %v6828_v51 = vrot.slane %v16945_v16, 5  ;;  %v6831_v45 = vrot.slane %v11772_v15, 5  ;;  %v6117_v13 = vsel %vm1586_vm14, %v6085_v4, %v16667_v39  ;;  %10770 = vmatpush1.bf16.xpose.msra.mxu0 %v12599_v34  ;;  %v16981_v21 = vpop.permute.xlu0 %7550 }
 0x41d   : > { %9256 = vrot.lane.b32.xlu1 %v12123_v46, %s12841_s22  ;;  %v8231_v5 = vor.u32 %v8230_v47, %v8226_v52  ;;  %v4673_v50 = vsel %vm1586_vm14, %v4641_v20, %v16687_v22  ;;  %v12042_v17 = vrot.slane %v16971_v43, 9  ;;  %v11732_v53 = vcombine.low %v6117_v13, %v6117_v13 }
 0x41e   : > { %v8222_v48 = vrot.slane %v8221_v9, 4  ;;  %v6829_v6 = vsel %vm13186_vm5, %v11818_v42, %v6828_v51  ;;  %v6830_v15 = vrot.slane %v6828_v51, 4  ;;  %v11733_v46 = vcombine.high %v6117_v13, %v6117_v13  ;;  %v16990_v9 = vld [vmem:[%s12887_s19 + $0x8c] sm:$0x3] }
 0x41f   : > { %v8232_v26 = vrot.slane %v8231_v5, 4  ;;  %v11492_v47 = vcombine.low %v4673_v50, %v4673_v50  ;;  %v11493_v39 = vcombine.high %v4673_v50, %v4673_v50  ;;  %6260 = vst [vmem:[#allocation2 + $0x204] sm:$0xf] %v11732_v53  ;;  %v8528_v20 = vrot.slane %v16927_v54, 5  ;;  %v11746_v53 = vld [vmem:[%s12887_s19 + $0x24] sm:$0xf] }
 0x420   : > { %v8227_v22 = vsel %vm12915_vm2, %v8222_v48, %v8226_v52  ;;  %v6832_v4 = vsel %vm13186_vm5, %v6830_v15, %v6831_v45  ;;  %v8531_v23 = vrot.slane %v16936_v33, 5  ;;  %6261 = vst [vmem:[#allocation2 + $0x220] sm:$0xf] %v11733_v46  ;;  %v17596_v52 = vshll.u32 %v16945_v16, 16  ;;  %v16996_v45 = vpop.permute.xlu1 %9186 }
 0x421   : > { %v8237_v34 = vsel %vm12915_vm2, %v8232_v26, %v8236_v12  ;;  %v11898_v42 = vcombine.low %v6829_v6, %v6832_v4  ;;  %4816 = vst [vmem:[#allocation2 + $0x200] sm:$0xf] %v11492_v47  ;;  %4817 = vst [vmem:[#allocation2 + $0x21c] sm:$0xf] %v11493_v39  ;;  %v17595_v51 = vshrl.u32 %v16945_v16, 16  ;;  %v8529_v33 = vsel %vm13186_vm5, %v12042_v17, %v8528_v20 }
 0x422   : > { %v12090_v5 = vcombine.low %v8227_v22, %v8237_v34  ;;  %v8530_v13 = vrot.slane %v8528_v20, 4  ;;  %v7083_v12 = vshrl.u32 %v16957_v59, 16  ;;  %v7086_v50 = vshll.u32 %v16957_v59, 16  ;;  %v12784_v47 = vld [vmem:[%s12887_s19 + $0x30] sm:$0xf]  ;;  %v17015_v22 = vpop.permute.xlu0 %7630 }
 0x423   : > { %7538 = vrot.lane.b32.xlu0 %v11898_v42, %s12839_s20  ;;  %v7091_v48 = vrot.slane %v17595_v51, 5  ;;  %v7092_v6 = vrot.slane %v17596_v52, 6  ;;  %v7097_v15 = vshrl.u32 %v16990_v9, 16  ;;  %v7100_v46 = vshll.u32 %v16990_v9, 16  ;;  %v12785_v59 = vld [vmem:[%s12887_s19 + $0x34] sm:$0xf] }
 0x424   : > { %9094 = vrot.lane.b32.xlu1 %v12090_v5, %s12839_s20  ;;  %v8532_v17 = vsel %vm13186_vm5, %v8530_v13, %v8531_v23  ;;  %v7085_v26 = vrot.slane %v7083_v12, 5  ;;  %v12066_v39 = vcombine.low %v12784_v47, %v12785_v59  ;;  %v7088_v20 = vrot.slane %v7086_v50, 6 }
 0x425   : > { %v12106_v4 = vcombine.low %v8529_v33, %v8532_v17  ;;  %v7093_v34 = vor.u32 %v7092_v6, %v7091_v48  ;;  %v7099_v42 = vrot.slane %v7097_v15, 5  ;;  %v7102_v51 = vrot.slane %v7100_v46, 6  ;;  %v17024_v33 = vpop.permute.xlu1 %9266 }
 0x426   : > { %v9272_v5 = vsel %vm1504_vm9, %v12066_v39, %v16706_v18  ;;  %v6323_v52 = vshrl.u32 %v11746_v53, 16  ;;  %v6326_v23 = vshll.u32 %v11746_v53, 16  ;;  %v7089_v13 = vor.u32 %v7088_v20, %v7085_v26  ;;  %v12786_v18 = vld [vmem:[%s12887_s19 + $0x2c] sm:$0x1] }
 0x427   : > { %v7095_v12 = vrot.slane %v7093_v34, 4  ;;  %v6334_v61 = vrot.slane %v6332_v32, 5  ;;  %v17667_v47 = vshrl.u32 %v15894_v49, 16  ;;  %v7103_v50 = vor.u32 %v7102_v51, %v7099_v42  ;;  %v12602_v46 = vld [vmem:[#allocation2 + $0x204] ss:$28 sps:$4 sm:$0xff]   ;;  %v17035_v42 = vpop.permute.xlu0 %7710 }
 0x428   : > { %9174 = vrot.lane.b32.xlu1 %v12106_v4, %s12840_s21  ;;  %v6325_v48 = vrot.slane %v6323_v52, 4  ;;  %v6328_v6 = vrot.slane %v6326_v23, 5  ;;  %v6342_v15 = vshll.u32 %v12786_v18, 16  ;;  %v7090_v53 = vrot.slane %v7089_v13, 4  ;;  %v11850_v51 = vld [vmem:[%s12887_s19 + $0x84] sm:$0xc]  ;;  %10732 = vmatprep.subr.bf16.mxu1 %v12602_v46 }
 0x429   : > { %v6338_v59 = vrot.slane %v17667_v47, 4  ;;  %v8783_v26 = vshrl.u32 %v16971_v43, 16  ;;  %v8786_v32 = vshll.u32 %v16971_v43, 16  ;;  %v7104_v49 = vsel %vm13345_vm8, %v7095_v12, %v7103_v50  ;;  %v12604_v52 = vld [vmem:[#allocation2 + $0x200] ss:$28 sps:$4 sm:$0xff]  }
 0x42a   : > { %v6329_v39 = vor.u32 %v6328_v6, %v6325_v48  ;;  %v6344_v20 = vrot.slane %v6342_v15, 5  ;;  %v8791_v4 = vrot.slane %v8228_v11, 5  ;;  %v7094_v23 = vsel %vm13345_vm8, %v7090_v53, %v7093_v34  ;;  %10733 = vmatpush2.bf16.xpose.msra.mxu1 %v12604_v52  ;;  %v12653_v11 = vld [vmem:[%s17549_s1 + $0x3c] ss:$28 sps:$4 sm:$0xff]   ;;  %v11532_v52 = vld [vmem:[%s12887_s19 + $0x80] sm:$0x1] }
 0x42b   : > { %v6339_v17 = vor.u32 %v6338_v59, %v6334_v61  ;;  %v8785_v47 = vrot.slane %v8783_v26, 5  ;;  %v8788_v59 = vrot.slane %v8786_v32, 6  ;;  %v11914_v43 = vcombine.low %v7094_v23, %v7104_v49  ;;  %10693 = vmatprep.mubr.bf16.mxu0 %v12653_v11 }
 0x42c   : > { %v6330_v18 = vrot.slane %v6329_v39, 4  ;;  %v17668_v12 = vshll.u32 %v16927_v54, 16  ;;  %v8797_v48 = vshrl.u32 %v12058_v60, 16  ;;  %v8800_v15 = vshll.u32 %v12058_v60, 16  ;;  %v12655_v54 = vld [vmem:[%s17549_s1 + $0x38] ss:$28 sps:$4 sm:$0xff]  }
 0x42d   : > { %v6340_v13 = vrot.slane %v6339_v17, 4  ;;  %v8789_v34 = vor.u32 %v8788_v59, %v8785_v47  ;;  %v11866_v53 = vrot.slane %v11850_v51, 10  ;;  %v17046_v17 = vpop.permute.xlu1 %9104  ;;  %7618 = vrot.lane.b32.xlu0 %v11914_v43, %s12840_s21  ;;  %v7372_v49 = vrot.slane %v16945_v16, 6  ;;  %10694 = vmatmul.mubr.bf16.gmra.mxu0 %v12655_v54  ;;  %v17062_v59 = vpop.permute.xlu0 %7548 }
 0x42e   : > { %v8792_v50 = vrot.slane %v17668_v12, 6  ;;  %v6335_v26 = vsel %vm12915_vm2, %v6330_v18, %v6334_v61  ;;  %v8799_v46 = vrot.slane %v8797_v48, 5  ;;  %v7375_v51 = vrot.slane %v16990_v9, 6  ;;  %v12787_v12 = vld [vmem:[%s12887_s19 + $0x78] sm:$0xe] }
 0x42f   : > { %v6345_v6 = vsel %vm12915_vm2, %v6340_v13, %v6344_v20  ;;  %v8790_v39 = vrot.slane %v8789_v34, 4  ;;  %v8802_v20 = vrot.slane %v8800_v15, 6  ;;  %v7373_v13 = vsel %vm13666_vm12, %v11866_v53, %v7372_v49 }
 0x430   : > { %v8793_v32 = vor.u32 %v8792_v50, %v8791_v4  ;;  %v11874_v60 = vcombine.low %v6335_v26, %v6345_v6  ;;  %v7374_v47 = vrot.slane %v7372_v49, 4  ;;  %v9319_v61 = vsel %vm1553_vm13, %v9272_v5, %v16736_v58  ;;  %v11306_v4 = vld [vmem:[%s12887_s19 + $0x6c] sm:$0xe]  ;;  %v12788_v58 = vld [vmem:[%s12887_s19 + $0x7c] sm:$0xf] }
 0x431   : > { %v8803_v18 = vor.u32 %v8802_v20, %v8799_v46  ;;  %v11562_v50 = vrot.slane %v12787_v12, 9  ;;  %v4984_v5 = vrot.slane %v12788_v58, 5  ;;  %v4987_v6 = vrot.slane %v11532_v52, 5  ;;  %v17076_v54 = vpop.permute.xlu1 %9184  ;;  %v12789_v49 = vld [vmem:[%s12887_s19 + $0x70] sm:$0xf] }
 0x432   : > { %v8795_v23 = vrot.slane %v8793_v32, 4  ;;  %v7716_v43 = vsel %vm1504_vm9, %v11874_v60, %v16718_v7  ;;  %v8794_v9 = vsel %vm13345_vm8, %v8790_v39, %v8793_v32  ;;  %v7376_v48 = vsel %vm13666_vm12, %v7374_v47, %v7375_v51  ;;  %v12790_v51 = vld [vmem:[%s12887_s19 + $0x74] sm:$0x3] }
 0x433   : > { %v7763_v11 = vsel %vm1553_vm13, %v7716_v43, %v16756_v27  ;;  %v11930_v34 = vcombine.low %v7373_v13, %v7376_v48  ;;  %v3419_v15 = vshrl.u32 %v11306_v4, 16  ;;  %v3422_v53 = vshll.u32 %v11306_v4, 16  ;;  %v17088_v43 = vpop.permute.xlu0 %7628 }
 0x434   : > { %v8804_v7 = vsel %vm13345_vm8, %v8795_v23, %v8803_v18  ;;  %v4985_v32 = vsel %vm13186_vm5, %v11562_v50, %v4984_v5  ;;  %v4986_v46 = vrot.slane %v4984_v5, 4  ;;  %v3428_v60 = vshrl.u32 %v12789_v49, 16 }
 0x435   : > { %v12122_v26 = vcombine.low %v8794_v9, %v8804_v7  ;;  %7698 = vrot.lane.b32.xlu0 %v11930_v34, %s12841_s22  ;;  %v3421_v27 = vrot.slane %v3419_v15, 5  ;;  %v3424_v39 = vrot.slane %v3422_v53, 6  ;;  %v3431_v20 = vshll.u32 %v12789_v49, 16  ;;  %v12667_v7 = vld [vmem:[%s17549_s1 + $0x14] ss:$28 sps:$4 sm:$0xff]   ;;  %v17098_v53 = vpop.permute.xlu1 %9264 }
 0x436   : > { %v3438_v52 = vshrl.u32 %v12790_v51, 16  ;;  %v4988_v23 = vsel %vm13186_vm5, %v4986_v46, %v4987_v6  ;;  %v3430_v13 = vrot.slane %v3428_v60, 5  ;;  %v3441_v47 = vshll.u32 %v12790_v51, 16  ;;  %v11791_v6 = vld [vmem:[%s12887_s19 + $0xd8] sm:$0xf]  ;;  %10789 = vmatprep.mubr.bf16.mxu0 %v12667_v7 }
 0x437   : > { %9254 = vrot.lane.b32.xlu1 %v12122_v26, %s12841_s22  ;;  %v9351_v4 = vsel %vm1586_vm14, %v9319_v61, %v16784_v19  ;;  %v11658_v9 = vcombine.low %v4985_v32, %v4988_v23  ;;  %v3425_v18 = vor.u32 %v3424_v39, %v3421_v27  ;;  %v3433_v12 = vrot.slane %v3431_v20, 6  ;;  %v12792_v46 = vld [vmem:[%s12887_s19 + $0xe8] sm:$0xf]  ;;  %v11788_v23 = vld [vmem:[%s12887_s19 + $0xcc] sm:$0xf] }
 0x438   : > { %v3440_v50 = vrot.slane %v3438_v52, 5  ;;  %v3443_v48 = vrot.slane %v3441_v47, 6  ;;  %v12130_v58 = vcombine.low %v9351_v4, %v9351_v4  ;;  %v12131_v5 = vcombine.high %v9351_v4, %v9351_v4  ;;  %v12795_v7 = vld [vmem:[%s12887_s19 + $0xdc] sm:$0xf] }
 0x439   : > { %v7795_v55 = vsel %vm1586_vm14, %v7763_v11, %v16801_v1  ;;  %v6044_v19 = vsel %vm1504_vm9, %v11658_v9, %v16765_v62  ;;  %v3426_v61 = vrot.slane %v3425_v18, 4  ;;  %v3434_v34 = vor.u32 %v3433_v12, %v3430_v13  ;;  %v12791_v11 = vld [vmem:[%s12887_s19 + $0xe4] sm:$0xf]  ;;  %v17111_v13 = vpop.permute.xlu0 %7708 }
 0x43a   : > { %v11938_v15 = vcombine.low %v7795_v55, %v7795_v55  ;;  %v3444_v26 = vor.u32 %v3443_v48, %v3440_v50  ;;  %9494 = vst [vmem:[#allocation2 + $0x14] sm:$0xf] %v12130_v58  ;;  %9495 = vst [vmem:[#allocation2 + $0x30] sm:$0xf] %v12131_v5  ;;  %v11939_v32 = vcombine.high %v7795_v55, %v7795_v55  ;;  %v6683_v39 = vshrl.u32 %v11791_v6, 16 }
 0x43b   : > { %v6083_v1 = vsel %vm1553_vm13, %v6044_v19, %v16824_v56  ;;  %v12081_v49 = vcombine.low %v12791_v11, %v12792_v46  ;;  %v3435_v62 = vsel %vm13345_vm8, %v3426_v61, %v3434_v34  ;;  %v3436_v60 = vrot.slane %v3434_v34, 4  ;;  %v12793_v48 = vld [vmem:[%s12887_s19 + $0xe0] sm:$0x1] }
 0x43c   : > { %7938 = vst [vmem:[#allocation2 + $0x10] sm:$0xf] %v11938_v15  ;;  %v6115_v27 = vsel %vm1586_vm14, %v6083_v1, %v16850_v8  ;;  %7939 = vst [vmem:[#allocation2 + $0x2c] sm:$0xf] %v11939_v32  ;;  %v6686_v52 = vshll.u32 %v11791_v6, 16  ;;  %v6685_v4 = vrot.slane %v6683_v39, 4 }
 0x43d   : > { %v11730_v20 = vcombine.low %v6115_v27, %v6115_v27  ;;  %v11731_v51 = vcombine.high %v6115_v27, %v6115_v27  ;;  %v9317_v56 = vsel %vm1504_vm9, %v12081_v49, %v16876_v24  ;;  %v3445_v47 = vsel %vm13345_vm8, %v3436_v60, %v3444_v26  ;;  %v12794_v6 = vld [vmem:[%s12887_s19 + $0xd8] sm:$0xf]  ;;  %v17137_v27 = vpop.permute.xlu0 %7546 }
 0x43e   : > { %v17669_v8 = vshll.u32 %v16060_v38, 16  ;;  %v17670_v18 = vshrl.u32 %v16060_v38, 16  ;;  %v11418_v50 = vcombine.low %v3435_v62, %v3445_v47  ;;  %v6688_v24 = vrot.slane %v6686_v52, 5  ;;  %v17126_v38 = vpop.permute.xlu1 %9102 }
 0x43f   : > { %6258 = vst [vmem:[#allocation2 + $0x1cc] sm:$0xf] %v11730_v20  ;;  %6259 = vst [vmem:[#allocation2 + $0x1e8] sm:$0xf] %v11731_v51  ;;  %v6702_v58 = vshll.u32 %v12793_v48, 16  ;;  %v9349_v5 = vsel %vm1553_vm13, %v9317_v56, %v16906_v35  ;;  %v12080_v19 = vcombine.low %v12794_v6, %v12795_v7  ;;  %v6659_v61 = vshrl.u32 %v11788_v23, 16 }
 0x440   : > { %v6694_v9 = vrot.slane %v17669_v8, 5  ;;  %v6698_v12 = vrot.slane %v17670_v18, 4  ;;  %v9381_v0 = vsel %vm1586_vm14, %v9349_v5, %v16929_v10  ;;  %v4600_v34 = vsel %vm1504_vm9, %v11418_v50, %v16776_v37  ;;  %v11785_v37 = vld [vmem:[%s12887_s19 + $0xc0] sm:$0xf]  ;;  %v12796_v8 = vld [vmem:[%s12887_s19 + $0xd4] sm:$0x1] }
 0x441   : > { %v6689_v15 = vor.u32 %v6688_v24, %v6685_v4  ;;  %v6704_v26 = vrot.slane %v6702_v58, 5  ;;  %v12160_v32 = vcombine.low %v9381_v0, %v9381_v0  ;;  %v4639_v35 = vsel %vm1553_vm13, %v4600_v34, %v16842_v2  ;;  %v12797_v24 = vld [vmem:[%s12887_s19 + $0xcc] sm:$0xf]  ;;  %v12798_v48 = vld [vmem:[%s12887_s19 + $0xd0] sm:$0xf] }
 0x442   : > { %v6699_v55 = vor.u32 %v6698_v12, %v6694_v9  ;;  %v12161_v11 = vcombine.high %v9381_v0, %v9381_v0  ;;  %v9314_v10 = vsel %vm1504_vm9, %v12080_v19, %v16965_v36  ;;  %v4671_v46 = vsel %vm1586_vm14, %v4639_v35, %v16864_v41  ;;  %v12608_v36 = vld [vmem:[#allocation2 + $0x14] ss:$28 sps:$4 sm:$0xff]   ;;  %v17162_v35 = vpop.permute.xlu0 %7626 }
 0x443   : > { %v6690_v49 = vrot.slane %v6689_v15, 4  ;;  %9524 = vst [vmem:[#allocation2 + $0x35c] sm:$0xf] %v12160_v32  ;;  %v6661_v62 = vrot.slane %v6659_v61, 4  ;;  %v6662_v60 = vshll.u32 %v11788_v23, 16  ;;  %v11490_v39 = vcombine.low %v4671_v46, %v4671_v46  ;;  %10771 = vmatprep.subr.bf16.mxu0 %v12608_v36 }
 0x444   : > { %v6700_v1 = vrot.slane %v6699_v55, 4  ;;  %v11491_v20 = vcombine.high %v4671_v46, %v4671_v46  ;;  %v12606_v51 = vld [vmem:[#allocation2 + $0x10] ss:$28 sps:$4 sm:$0xff]   ;;  %9525 = vst [vmem:[#allocation2 + $0x378] sm:$0xf] %v12161_v11  ;;  %v17671_v41 = vshll.u32 %v16173_v63, 16  ;;  %v9347_v50 = vsel %vm1553_vm13, %v9314_v10, %v16996_v45  ;;  %v17152_v55 = vpop.permute.xlu1 %9182 }
 0x445   : > { %v6695_v52 = vsel %vm12915_vm2, %v6690_v49, %v6694_v9  ;;  %v6664_v23 = vrot.slane %v6662_v60, 5  ;;  %v17672_v47 = vshrl.u32 %v16173_v63, 16  ;;  %v6678_v18 = vshll.u32 %v12796_v8, 16  ;;  %4814 = vst [vmem:[#allocation2 + $0x1c8] sm:$0xf] %v11490_v39  ;;  %10772 = vmatpush1.bf16.xpose.msra.mxu0 %v12606_v51 }
 0x446   : > { %v6705_v2 = vsel %vm12915_vm2, %v6700_v1, %v6704_v26  ;;  %v6670_v56 = vrot.slane %v17671_v41, 5  ;;  %4815 = vst [vmem:[#allocation2 + $0x1e4] sm:$0xf] %v11491_v20  ;;  %v12079_v58 = vcombine.low %v12797_v24, %v12798_v48  ;;  %v6635_v5 = vshrl.u32 %v11785_v37, 16  ;;  %v12799_v20 = vld [vmem:[%s12887_s19 + $0xc8] sm:$0x1] }
 0x447   : > { %v6674_v4 = vrot.slane %v17672_v47, 4  ;;  %v11889_v12 = vcombine.low %v6695_v52, %v6705_v2  ;;  %v6665_v9 = vor.u32 %v6664_v23, %v6661_v62  ;;  %v6680_v63 = vrot.slane %v6678_v18, 5  ;;  %v12800_v41 = vld [vmem:[%s12887_s19 + $0xc0] sm:$0xf]  ;;  %v12801_v52 = vld [vmem:[%s12887_s19 + $0xc4] sm:$0xf] }
 0x448   : > { %v9379_v6 = vsel %vm1586_vm14, %v9347_v50, %v17024_v33  ;;  %v9311_v45 = vsel %vm1504_vm9, %v12079_v58, %v17046_v17  ;;  %v6637_v32 = vrot.slane %v6635_v5, 4  ;;  %v17673_v1 = vshll.u32 %v16304_v31, 16  ;;  %v9263_v51 = vpop.permute.xlu1 %9262  ;;  %v17188_v5 = vpop.permute.xlu0 %7706 }
 0x449   : > { %v6675_v0 = vor.u32 %v6674_v4, %v6670_v56  ;;  %v7761_v7 = vsel %vm1504_vm9, %v11889_v12, %v16893_v44  ;;  %v12158_v19 = vcombine.low %v9379_v6, %v9379_v6  ;;  %v12159_v61 = vcombine.high %v9379_v6, %v9379_v6 }
 0x44a   : > { %v7793_v34 = vsel %vm1553_vm13, %v7761_v7, %v16918_v57  ;;  %v6666_v15 = vrot.slane %v6665_v9, 4  ;;  %v6638_v44 = vshll.u32 %v11785_v37, 16  ;;  %v6646_v11 = vrot.slane %v17673_v1, 5  ;;  %v11782_v57 = vld [vmem:[%s12887_s19 + $0xb4] sm:$0xf] }
 0x44b   : > { %v6676_v26 = vrot.slane %v6675_v0, 4  ;;  %v7825_v33 = vsel %vm1586_vm14, %v7793_v34, %v16947_v30  ;;  %9522 = vst [vmem:[#allocation2 + $0x324] sm:$0xf] %v12158_v19  ;;  %9523 = vst [vmem:[#allocation2 + $0x340] sm:$0xf] %v12159_v61  ;;  %v17674_v17 = vshrl.u32 %v16304_v31, 16  ;;  %v9345_v36 = vsel %vm1553_vm13, %v9311_v45, %v17076_v54 }
 0x44c   : > { %v11968_v46 = vcombine.low %v7825_v33, %v7825_v33  ;;  %v11969_v49 = vcombine.high %v7825_v33, %v7825_v33  ;;  %v6671_v62 = vsel %vm12915_vm2, %v6666_v15, %v6670_v56  ;;  %v6640_v39 = vrot.slane %v6638_v44, 5  ;;  %v12609_v31 = vld [vmem:[#allocation2 + $0x1cc] ss:$28 sps:$4 sm:$0xff]   ;;  %v17206_v44 = vpop.permute.xlu1 %9100 }
 0x44d   : > { %v6650_v10 = vrot.slane %v17674_v17, 4  ;;  %v6681_v30 = vsel %vm12915_vm2, %v6676_v26, %v6680_v63  ;;  %v6654_v2 = vshll.u32 %v12799_v20, 16  ;;  %v12078_v23 = vcombine.low %v12800_v41, %v12801_v52  ;;  %v12611_v4 = vld [vmem:[#allocation2 + $0x1c8] ss:$28 sps:$4 sm:$0xff]   ;;  %10734 = vmatprep.subr.bf16.mxu1 %v12609_v31 }
 0x44e   : > { %v11888_v60 = vcombine.low %v6671_v62, %v6681_v30  ;;  %7968 = vst [vmem:[#allocation2 + $0x358] sm:$0xf] %v11968_v46  ;;  %7969 = vst [vmem:[#allocation2 + $0x374] sm:$0xf] %v11969_v49  ;;  %v6611_v47 = vshrl.u32 %v11782_v57, 16  ;;  %v6614_v56 = vshll.u32 %v11782_v57, 16  ;;  %v6641_v18 = vor.u32 %v6640_v39, %v6637_v32  ;;  %10735 = vmatpush2.bf16.xpose.msra.mxu1 %v12611_v4 }
 0x44f   : > { %v6651_v37 = vor.u32 %v6650_v10, %v6646_v11  ;;  %v6656_v50 = vrot.slane %v6654_v2, 5  ;;  %v9377_v54 = vsel %vm1586_vm14, %v9345_v36, %v17098_v53  ;;  %v9308_v48 = vsel %vm1504_vm9, %v12078_v23, %v17126_v38  ;;  %v12208_v38 = vld [vmem:[%s12887_s19 + $0xe8] sm:$0xf]  ;;  %v12802_v32 = vld [vmem:[%s12887_s19 + $0xbc] sm:$0x1]  ;;  %v17218_v36 = vpop.permute.xlu0 %7544 }
 0x450   : > { %v7758_v8 = vsel %vm1504_vm9, %v11888_v60, %v16981_v21  ;;  %v6613_v58 = vrot.slane %v6611_v47, 4  ;;  %v6642_v9 = vrot.slane %v6641_v18, 4  ;;  %v12156_v63 = vcombine.low %v9377_v54, %v9377_v54  ;;  %v12613_v61 = vld [vmem:[%s17549_s1 + $0x8] ss:$28 sps:$4 sm:$0xff]   ;;  %v12209_v10 = vld [vmem:[%s12887_s19 + $0xec] sm:$0x3] }
 0x451   : > { %v6652_v12 = vrot.slane %v6651_v37, 4  ;;  %v7791_v24 = vsel %vm1553_vm13, %v7758_v8, %v17015_v22  ;;  %v12207_v22 = vld [vmem:[%s12887_s19 + $0xe4] sm:$0xc]  ;;  %v12157_v53 = vcombine.high %v9377_v54, %v9377_v54  ;;  %v6616_v19 = vrot.slane %v6614_v56, 5  ;;  %v12618_v39 = vld [vmem:[#allocation2 + $0x35c] ss:$28 sps:$4 sm:$0xff]  }
 0x452   : > { %v7823_v21 = vsel %vm1586_vm14, %v7791_v24, %v17035_v42  ;;  %v6647_v45 = vsel %vm12915_vm2, %v6642_v9, %v6646_v11  ;;  %9520 = vst [vmem:[#allocation2 + $0x2ec] sm:$0xf] %v12156_v63  ;;  %v17675_v42 = vshll.u32 %v16432_v14, 16  ;;  %v17676_v15 = vshrl.u32 %v16432_v14, 16  ;;  %v12656_v14 = vld [vmem:[%s17549_s1 + $0x44] ss:$28 sps:$4 sm:$0xff]   ;;  %10773 = vmatprep.subr.bf16.mxu0 %v12618_v39  ;;  %v9181_v24 = vpop.permute.xlu1 %9180 }
 0x453   : > { %v6657_v0 = vsel %vm12915_vm2, %v6652_v12, %v6656_v50  ;;  %v11966_v6 = vcombine.low %v7823_v21, %v7823_v21  ;;  %v11967_v7 = vcombine.high %v7823_v21, %v7823_v21  ;;  %v6630_v33 = vshll.u32 %v12802_v32, 16  ;;  %9521 = vst [vmem:[#allocation2 + $0x308] sm:$0xf] %v12157_v53  ;;  %v12183_v31 = vld [vmem:[%s12887_s19 + $0x84] sm:$0xc] }
 0x454   : > { %v6622_v34 = vrot.slane %v17675_v42, 5  ;;  %v6626_v26 = vrot.slane %v17676_v15, 4  ;;  %v11887_v1 = vcombine.low %v6647_v45, %v6657_v0  ;;  %v6617_v17 = vor.u32 %v6616_v19, %v6613_v58  ;;  %v12184_v47 = vld [vmem:[%s12887_s19 + $0x88] sm:$0xf]  ;;  %v12185_v56 = vld [vmem:[%s12887_s19 + $0x8c] sm:$0x3]  ;;  %v17249_v15 = vpop.permute.xlu0 %7624 }
 0x455   : > { %7966 = vst [vmem:[#allocation2 + $0x320] sm:$0xf] %v11966_v6  ;;  %7967 = vst [vmem:[#allocation2 + $0x33c] sm:$0xf] %v11967_v7  ;;  %v9343_v11 = vsel %vm1553_vm13, %v9308_v48, %v17152_v55  ;;  %v12225_v57 = vrot.slane %v12207_v22, 10  ;;  %v6632_v62 = vrot.slane %v6630_v33, 5  ;;  %10737 = vmatmul.mubr.bf16.vlgmr.msra.gmra.mxu1 %v12613_v61 }
 0x456   : > { %v12616_v46 = vld [vmem:[#allocation2 + $0x358] ss:$28 sps:$4 sm:$0xff]   ;;  %v6627_v49 = vor.u32 %v6626_v26, %v6622_v34  ;;  %v9375_v30 = vsel %vm1586_vm14, %v9343_v11, %v9263_v51  ;;  %v9729_v60 = vrot.slane %v12208_v38, 6  ;;  %v7755_v37 = vsel %vm1504_vm9, %v11887_v1, %v17062_v59  ;;  %10746 = vmatprep.mubr.bf16.mxu1 %v12656_v14  ;;  %v12205_v53 = vld [vmem:[%s12887_s19 + $0xdc] sm:$0xf] }
 0x457   : > { %v6618_v20 = vrot.slane %v6617_v17, 4  ;;  %v12154_v55 = vcombine.low %v9375_v30, %v9375_v30  ;;  %v12155_v2 = vcombine.high %v9375_v30, %v9375_v30  ;;  %v7789_v41 = vsel %vm1553_vm13, %v7755_v37, %v17088_v43  ;;  %v11779_v43 = vld [vmem:[%s12887_s19 + $0xa8] sm:$0xf]  ;;  %10774 = vmatpush2.bf16.xpose.msra.mxu0 %v12616_v46  ;;  %v12803_v9 = vld [vmem:[%s12887_s19 + $0xb4] sm:$0xf] }
 0x458   : > { %v6628_v52 = vrot.slane %v6627_v49, 4  ;;  %v9730_v23 = vsel %vm13666_vm12, %v12225_v57, %v9729_v60  ;;  %v9731_v51 = vrot.slane %v9729_v60, 4  ;;  %v7821_v59 = vsel %vm1586_vm14, %v7789_v41, %v17111_v13  ;;  %v12804_v0 = vld [vmem:[%s12887_s19 + $0xb8] sm:$0xf]  ;;  %v12622_v19 = vld [vmem:[#allocation2 + $0x324] ss:$28 sps:$4 sm:$0xff]  }
 0x459   : > { %v6623_v4 = vsel %vm12915_vm2, %v6618_v20, %v6622_v34  ;;  %9518 = vst [vmem:[#allocation2 + $0x2b4] sm:$0xf] %v12154_v55  ;;  %9519 = vst [vmem:[#allocation2 + $0x2d0] sm:$0xf] %v12155_v2  ;;  %v9732_v8 = vrot.slane %v12209_v10, 6  ;;  %v11964_v18 = vcombine.low %v7821_v59, %v7821_v59  ;;  %v11965_v12 = vcombine.high %v7821_v59, %v7821_v59  ;;  %v9261_v55 = vpop.permute.xlu1 %9260 }
 0x45a   : > { %v6633_v50 = vsel %vm12915_vm2, %v6628_v52, %v6632_v62  ;;  %9797 = vst.msk [vmem:[#allocation2 + $0x360] sm:$0xf] %vm9766_vm15, %v9730_v23  ;;  %v12217_v13 = vrot.slane %v12183_v31, 10  ;;  %v9673_v58 = vrot.slane %v12184_v47, 6  ;;  %v9676_v21 = vrot.slane %v12185_v56, 6  ;;  %10775 = vmatprep.subr.bf16.mxu0 %v12622_v19  ;;  %v9943_v52 = vld [vmem:[%s17550_s2] sm:$0xff] }
 0x45b   : > { %v11886_v54 = vcombine.low %v6623_v4, %v6633_v50  ;;  %v9733_v48 = vsel %vm13666_vm12, %v9731_v51, %v9732_v8  ;;  %7964 = vst [vmem:[#allocation2 + $0x2e8] sm:$0xf] %v11964_v18  ;;  %7965 = vst [vmem:[#allocation2 + $0x304] sm:$0xf] %v11965_v12  ;;  %v12077_v63 = vcombine.low %v12803_v9, %v12804_v0  ;;  %v6587_v22 = vshrl.u32 %v11779_v43, 16  ;;  %v7705_v12 = vpop.permute.xlu0 %7704 }
 0x45c   : > { %9798 = vst.msk [vmem:[#allocation2 + $0x37c] sm:$0xf] %vm9766_vm15, %v9733_v48  ;;  %v6590_v6 = vshll.u32 %v11779_v43, 16  ;;  %v12204_v7 = vld [vmem:[%s12887_s19 + $0xd8] sm:$0xc]  ;;  %v9674_v61 = vsel %vm13666_vm12, %v12217_v13, %v9673_v58  ;;  %v9675_v45 = vrot.slane %v9673_v58, 4 }
 0x45d   : > { %v7752_v38 = vsel %vm1504_vm9, %v11886_v54, %v17137_v27  ;;  %v17677_v42 = vshll.u32 %v16550_v29, 16  ;;  %v12658_v26 = vld [vmem:[%s17549_s1 + $0x40] ss:$28 sps:$4 sm:$0xff]   ;;  %9781 = vst.msk [vmem:[#allocation2 + $0x1a0] sm:$0xf] %vm9766_vm15, %v9674_v61  ;;  %v9305_v33 = vsel %vm1504_vm9, %v12077_v63, %v17206_v44  ;;  %v6589_v1 = vrot.slane %v6587_v22, 4 }
 0x45e   : > { %v12620_v32 = vld [vmem:[#allocation2 + $0x320] ss:$28 sps:$4 sm:$0xff]   ;;  %v7787_v27 = vsel %vm1553_vm13, %v7752_v38, %v17162_v35  ;;  %v6592_v17 = vrot.slane %v6590_v6, 5  ;;  %v17262_v11 = vld [vmem:[%s17549_s1 + $0x18] ss:$28 sps:$4 sm:$0xff]   ;;  %v9677_v35 = vsel %vm13666_vm12, %v9675_v45, %v9676_v21  ;;  %v17678_v57 = vshrl.u32 %v16550_v29, 16  ;;  %10747 = vmatmul.mubr.bf16.gmra.mxu1 %v12658_v26 }
 0x45f   : > { %v17247_v34 = vrot.slane %v17677_v42, 5  ;;  %v7819_v10 = vsel %vm1586_vm14, %v7787_v27, %v17188_v5  ;;  %v12805_v46 = vld [vmem:[%s12887_s19 + $0xb0] sm:$0x1]  ;;  %v12206_v49 = vld [vmem:[%s12887_s19 + $0xe0] sm:$0x3]  ;;  %v9341_v37 = vsel %vm1553_vm13, %v9305_v33, %v9181_v24  ;;  %v9944_v5 = vld [vmem:[%s17550_s2 + $0x8] sm:$0xff]  ;;  %10776 = vmatpush2.bf16.xpose.msra.mxu0 %v12620_v32  ;;  %12373 = vmatprep.mubr.msk.bf16.mxu1 %vm1504_vm9, %v17262_v11 }
 0x460   : > { %v6602_v14 = vrot.slane %v17678_v57, 4  ;;  %v6606_v44 = vshll.u32 %v12805_v46, 16  ;;  %v12180_v62 = vld [vmem:[%s12887_s19 + $0x78] sm:$0xc]  ;;  %v11962_v30 = vcombine.low %v7819_v10, %v7819_v10  ;;  %v11963_v60 = vcombine.high %v7819_v10, %v7819_v10  ;;  %9782 = vst.msk [vmem:[#allocation2 + $0x1bc] sm:$0xf] %vm9766_vm15, %v9677_v35 }
 0x461   : > { %v6593_v39 = vor.u32 %v6592_v17, %v6589_v1  ;;  %v12181_v20 = vld [vmem:[%s12887_s19 + $0x7c] sm:$0xf]  ;;  %v12224_v31 = vrot.slane %v12204_v7, 10  ;;  %v9722_v41 = vrot.slane %v12205_v53, 6  ;;  %v9725_v51 = vrot.slane %v12206_v49, 6  ;;  %v9945_v6 = vld [vmem:[%s17550_s2 + $0x10] sm:$0xff] }
 0x462   : > { %v6603_v29 = vor.u32 %v6602_v14, %v17247_v34  ;;  %v6608_v2 = vrot.slane %v6606_v44, 5  ;;  %7962 = vst [vmem:[#allocation2 + $0x2b0] sm:$0xf] %v11962_v30  ;;  %7963 = vst [vmem:[#allocation2 + $0x2cc] sm:$0xf] %v11963_v60  ;;  %v12216_v56 = vrot.slane %v12180_v62, 10  ;;  %v9373_v18 = vsel %vm1586_vm14, %v9341_v37, %v9261_v55 }
 0x463   : > { %v6594_v23 = vrot.slane %v6593_v39, 4  ;;  %v12182_v47 = vld [vmem:[%s12887_s19 + $0x80] sm:$0x3]  ;;  %v9723_v4 = vsel %vm13666_vm12, %v12224_v31, %v9722_v41  ;;  %v9724_v8 = vrot.slane %v9722_v41, 4  ;;  %v12842_v43 = vmov 0   ;;  %v9946_v7 = vld [vmem:[%s17550_s2 + $0x18] sm:$0xff]  ;;  %v17330_v39 = vpop.permute.xlu0 %7542 }
 0x464   : > { %v6604_v59 = vrot.slane %v6603_v29, 4  ;;  %12415 = vset.pattern.permute.xlu1 %v12842_v43  ;;  %12414 = vset.pattern.permute.xlu0 %v12842_v43  ;;  %v11776_v50 = vld [vmem:[%s12887_s19 + $0x9c] sm:$0xf]  ;;  %v12626_v13 = vld [vmem:[#allocation2 + $0x2ec] ss:$28 sps:$4 sm:$0xff]   ;;  %v12152_v48 = vcombine.low %v9373_v18, %v9373_v18  ;;  %v12153_v58 = vcombine.high %v9373_v18, %v9373_v18  ;;  %v9666_v0 = vrot.slane %v12181_v20, 6 }
 0x465   : > { %v12627_v24 = vld [vmem:[#allocation2 + $0x360] ss:$28 sps:$4 sm:$0xff]   ;;  %v6599_v54 = vsel %vm12915_vm2, %v6594_v23, %v17247_v34  ;;  %9795 = vst.msk [vmem:[#allocation2 + $0x328] sm:$0xf] %vm9766_vm15, %v9723_v4  ;;  %9954 = vperm.xlu1 %12415, %v9944_v5   ;;  %9949 = vperm.xlu0 %12414, %v9943_v52   ;;  %v9726_v9 = vsel %vm13666_vm12, %v9724_v8, %v9725_v51  ;;  %v9669_v63 = vrot.slane %v12182_v47, 6  ;;  %v6563_v38 = vshrl.u32 %v11776_v50, 16 }
 0x466   : > { %v6609_v21 = vsel %vm12915_vm2, %v6604_v59, %v6608_v2  ;;  %v17299_v22 = vld [vmem:[%s12887_s19 + $0xcc] sm:$0xc]  ;;  %v12624_v53 = vld [vmem:[#allocation2 + $0x2e8] ss:$28 sps:$4 sm:$0xff]   ;;  %10777 = vmatprep.subr.bf16.mxu0 %v12626_v13  ;;  %12377 = vmatprep.subr.msk.bf16.mxu1 %vm1504_vm9, %v12627_v24  ;;  %9796 = vst.msk [vmem:[#allocation2 + $0x344] sm:$0xf] %vm9766_vm15, %v9726_v9  ;;  %v9667_v34 = vsel %vm13666_vm12, %v12216_v56, %v9666_v0 }
 0x467   : > { %v11885_v19 = vcombine.low %v6599_v54, %v6609_v21  ;;  %9516 = vst [vmem:[#allocation2 + $0x27c] sm:$0xf] %v12152_v48  ;;  %9517 = vst [vmem:[#allocation2 + $0x298] sm:$0xf] %v12153_v58  ;;  %v6566_v61 = vshll.u32 %v11776_v50, 16  ;;  %v9668_v26 = vrot.slane %v9666_v0, 4  ;;  %10778 = vmatpush2.bf16.xpose.msra.mxu0 %v12624_v53 }
 0x468   : > { %v12202_v45 = vld [vmem:[%s12887_s19 + $0xd0] sm:$0xf]  ;;  %v12628_v42 = vld [vmem:[#allocation2 + $0x1a0] ss:$28 sps:$4 sm:$0xff]   ;;  %v17679_v32 = vshll.u32 %v16685_v40, 16  ;;  %v6565_v10 = vrot.slane %v6563_v38, 4 }
 0x469   : > { %v12203_v33 = vld [vmem:[%s12887_s19 + $0xd4] sm:$0x3]  ;;  %v12177_v1 = vld [vmem:[%s12887_s19 + $0x6c] sm:$0xc]  ;;  %v7749_v17 = vsel %vm1504_vm9, %v11885_v19, %v17218_v36  ;;  %9779 = vst.msk [vmem:[#allocation2 + $0x168] sm:$0xf] %vm9766_vm15, %v9667_v34  ;;  %9959 = vperm.xlu1 %12415, %v9945_v6   ;;  %9964 = vperm.xlu0 %12414, %v9946_v7   ;;  %v9670_v62 = vsel %vm13666_vm12, %v9668_v26, %v9669_v63  ;;  %v17327_v36 = vpop.permute.xlu1 %9098 }
 0x46a   : > { %v6574_v27 = vrot.slane %v17679_v32, 5  ;;  %v6568_v35 = vrot.slane %v6566_v61, 5  ;;  %v17680_v57 = vshrl.u32 %v16685_v40, 16  ;;  %v12178_v46 = vld [vmem:[%s12887_s19 + $0x70] sm:$0xf]  ;;  %v10625_v44 = vsel %vm1504_vm9, %v12628_v42, 0  ;;  %v7623_v61 = vpop.permute.xlu0 %7622 }
 0x46b   : > { %v7785_v49 = vsel %vm1553_vm13, %v7749_v17, %v17249_v15  ;;  %v12806_v30 = vld [vmem:[%s12887_s19 + $0xa4] sm:$0x1]  ;;  %v12179_v40 = vld [vmem:[%s12887_s19 + $0x74] sm:$0x3]  ;;  %12358 = vmatpush3.bf16.xpose.msra.mxu1 %v10625_v44  ;;  %9780 = vst.msk [vmem:[#allocation2 + $0x184] sm:$0xf] %vm9766_vm15, %v9670_v62 }
 0x46c   : > { %v6578_v14 = vrot.slane %v17680_v57, 4  ;;  %v6582_v60 = vshll.u32 %v12806_v30, 16  ;;  %v7817_v37 = vsel %vm1586_vm14, %v7785_v49, %v7705_v12  ;;  %v12633_v15 = vld [vmem:[#allocation2 + $0x2b4] ss:$28 sps:$4 sm:$0xff]   ;;  %v6569_v20 = vor.u32 %v6568_v35, %v6565_v10  ;;  %v12198_v29 = vld [vmem:[%s12887_s19 + $0xc0] sm:$0xc] }
 0x46d   : > { %v12223_v55 = vrot.slane %v17299_v22, 10  ;;  %v11960_v2 = vcombine.low %v7817_v37, %v7817_v37  ;;  %v11961_v31 = vcombine.high %v7817_v37, %v7817_v37  ;;  %v9715_v52 = vrot.slane %v12202_v45, 6  ;;  %v12199_v23 = vld [vmem:[%s12887_s19 + $0xc4] sm:$0xf]  ;;  %v12200_v51 = vld [vmem:[%s12887_s19 + $0xc8] sm:$0x3]  ;;  %10779 = vmatprep.subr.bf16.mxu0 %v12633_v15  ;;  %v9179_v38 = vpop.permute.xlu1 %9178 }
 0x46e   : > { %v6579_v5 = vor.u32 %v6578_v14, %v6574_v27  ;;  %v6584_v41 = vrot.slane %v6582_v60, 5  ;;  %v12174_v47 = vld [vmem:[%s12887_s19 + $0x60] sm:$0xc]  ;;  %v6570_v56 = vrot.slane %v6569_v20, 4  ;;  %v9718_v4 = vrot.slane %v12203_v33, 6 }
 0x46f   : > { %v12215_v8 = vrot.slane %v12177_v1, 10  ;;  %v12175_v43 = vld [vmem:[%s12887_s19 + $0x64] sm:$0xf]  ;;  %7960 = vst [vmem:[#allocation2 + $0x278] sm:$0xf] %v11960_v2  ;;  %v9716_v24 = vsel %vm13666_vm12, %v12223_v55, %v9715_v52  ;;  %v9717_v54 = vrot.slane %v9715_v52, 4 }
 0x470   : > { %v6580_v59 = vrot.slane %v6579_v5, 4  ;;  %v12629_v18 = vld [vmem:[#allocation2 + $0x328] ss:$28 sps:$4 sm:$0xff]   ;;  %7961 = vst [vmem:[#allocation2 + $0x294] sm:$0xf] %v11961_v31  ;;  %v9659_v48 = vrot.slane %v12178_v46, 6  ;;  %v6575_v21 = vsel %vm12915_vm2, %v6570_v56, %v6574_v27 }
 0x471   : > { %v12807_v12 = vld [vmem:[%s12887_s19 + $0xa8] sm:$0xf]  ;;  %v12808_v50 = vld [vmem:[%s12887_s19 + $0xac] sm:$0xf]  ;;  %9793 = vst.msk [vmem:[#allocation2 + $0x2f0] sm:$0xf] %vm9766_vm15, %v9716_v24  ;;  %12378 = vmatprep.subr.msk.bf16.mxu1 %vm1504_vm9, %v12629_v18  ;;  %v9719_v7 = vsel %vm13666_vm12, %v9717_v54, %v9718_v4  ;;  %v9259_v15 = vpop.permute.xlu1 %9258  ;;  %v7703_v20 = vpop.permute.xlu0 %7702 }
 0x472   : > { %v12076_v13 = vcombine.low %v12807_v12, %v12808_v50  ;;  %v12631_v58 = vld [vmem:[#allocation2 + $0x2b0] ss:$28 sps:$4 sm:$0xff]   ;;  %v6585_v9 = vsel %vm12915_vm2, %v6580_v59, %v6584_v41  ;;  %v9662_v0 = vrot.slane %v12179_v40, 6  ;;  %v12222_v63 = vrot.slane %v12198_v29, 10  ;;  %v12176_v22 = vld [vmem:[%s12887_s19 + $0x68] sm:$0x3] }
 0x473   : > { %v11884_v6 = vcombine.low %v6575_v21, %v6585_v9  ;;  %v9660_v53 = vsel %vm13666_vm12, %v12215_v8, %v9659_v48  ;;  %v9661_v19 = vrot.slane %v9659_v48, 4  ;;  %9794 = vst.msk [vmem:[#allocation2 + $0x30c] sm:$0xf] %vm9766_vm15, %v9719_v7  ;;  %v9708_v45 = vrot.slane %v12199_v23, 6  ;;  %v11773_v32 = vld [vmem:[%s12887_s19 + $0x90] sm:$0xf]  ;;  %10780 = vmatpush2.bf16.xpose.msra.mxu0 %v12631_v58 }
 0x474   : > { %9777 = vst.msk [vmem:[#allocation2 + $0x130] sm:$0xf] %vm9766_vm15, %v9660_v53  ;;  %v9711_v42 = vrot.slane %v12200_v51, 6  ;;  %v12214_v34 = vrot.slane %v12174_v47, 10  ;;  %v9652_v26 = vrot.slane %v12175_v43, 6  ;;  %v9655_v1 = vrot.slane %v12176_v22, 6 }
 0x475   : > { %v12630_v27 = vld [vmem:[#allocation2 + $0x168] ss:$28 sps:$4 sm:$0xff]   ;;  %v9663_v33 = vsel %vm13666_vm12, %v9661_v19, %v9662_v0  ;;  %v9709_v17 = vsel %vm13666_vm12, %v12222_v63, %v9708_v45  ;;  %v9710_v10 = vrot.slane %v9708_v45, 4  ;;  %v9302_v14 = vsel %vm1504_vm9, %v12076_v13, %v17327_v36  ;;  %v12195_v44 = vld [vmem:[%s12887_s19 + $0xb4] sm:$0xc] }
 0x476   : > { %9778 = vst.msk [vmem:[#allocation2 + $0x14c] sm:$0xf] %vm9766_vm15, %v9663_v33  ;;  %v9653_v35 = vsel %vm13666_vm12, %v12214_v34, %v9652_v26  ;;  %v10622_v57 = vsel %vm1504_vm9, %v12630_v27, 0  ;;  %9791 = vst.msk [vmem:[#allocation2 + $0x2b8] sm:$0xf] %vm9766_vm15, %v9709_v17  ;;  %v9654_v46 = vrot.slane %v9652_v26, 4  ;;  %v7746_v62 = vsel %vm1504_vm9, %v11884_v6, %v17330_v39 }
 0x477   : > { %9775 = vst.msk [vmem:[#allocation2 + $0xf8] sm:$0xf] %vm9766_vm15, %v9653_v35  ;;  %v12196_v49 = vld [vmem:[%s12887_s19 + $0xb8] sm:$0xf]  ;;  %12360 = vmatpush3.bf16.xpose.msra.mxu1 %v10622_v57  ;;  %v9339_v30 = vsel %vm1553_vm13, %v9302_v14, %v9179_v38  ;;  %v9712_v60 = vsel %vm13666_vm12, %v9710_v10, %v9711_v42  ;;  %v6539_v40 = vshrl.u32 %v11773_v32, 16  ;;  %v7783_v36 = vsel %vm1553_vm13, %v7746_v62, %v7623_v61 }
 0x478   : > { %v12197_v37 = vld [vmem:[%s12887_s19 + $0xbc] sm:$0x3]  ;;  %9792 = vst.msk [vmem:[#allocation2 + $0x2d4] sm:$0xf] %vm9766_vm15, %v9712_v60  ;;  %v9656_v55 = vsel %vm13666_vm12, %v9654_v46, %v9655_v1  ;;  %v6542_v29 = vshll.u32 %v11773_v32, 16  ;;  %v17681_v39 = vshll.u32 %v16813_v28, 16  ;;  %v9371_v31 = vsel %vm1586_vm14, %v9339_v30, %v9259_v15 }
 0x479   : > { %v12638_v5 = vld [vmem:[#allocation2 + $0x27c] ss:$28 sps:$4 sm:$0xff]   ;;  %v7815_v41 = vsel %vm1586_vm14, %v7783_v36, %v7703_v20  ;;  %9776 = vst.msk [vmem:[#allocation2 + $0x114] sm:$0xf] %vm9766_vm15, %v9656_v55  ;;  %v17682_v23 = vshrl.u32 %v16813_v28, 16  ;;  %v12221_v47 = vrot.slane %v12195_v44, 10  ;;  %v12150_v4 = vcombine.low %v9371_v31, %v9371_v31 }
 0x47a   : > { %v17385_v2 = vrot.slane %v17681_v39, 5  ;;  %v12636_v52 = vld [vmem:[#allocation2 + $0x278] ss:$28 sps:$4 sm:$0xff]   ;;  %v12634_v59 = vld [vmem:[#allocation2 + $0x2f0] ss:$28 sps:$4 sm:$0xff]   ;;  %v12151_v8 = vcombine.high %v9371_v31, %v9371_v31  ;;  %v11958_v43 = vcombine.low %v7815_v41, %v7815_v41  ;;  %v11959_v18 = vcombine.high %v7815_v41, %v7815_v41  ;;  %10781 = vmatprep.subr.bf16.mxu0 %v12638_v5 }
 0x47b   : > { %v6554_v51 = vrot.slane %v17682_v23, 4  ;;  %v12171_v56 = vld [vmem:[%s12887_s19 + $0x54] sm:$0xc]  ;;  %v6541_v12 = vrot.slane %v6539_v40, 4  ;;  %v9701_v50 = vrot.slane %v12196_v49, 6  ;;  %12379 = vmatprep.subr.msk.bf16.mxu1 %vm1504_vm9, %v12634_v59  ;;  %v9704_v28 = vrot.slane %v12197_v37, 6  ;;  %10782 = vmatpush2.bf16.xpose.msra.mxu0 %v12636_v52 }
 0x47c   : > { %v12172_v13 = vld [vmem:[%s12887_s19 + $0x58] sm:$0xf]  ;;  %v12173_v24 = vld [vmem:[%s12887_s19 + $0x5c] sm:$0x3]  ;;  %9514 = vst [vmem:[#allocation2 + $0x244] sm:$0xf] %v12150_v4 }
 0x47d   : > { %v12635_v54 = vld [vmem:[#allocation2 + $0x130] ss:$28 sps:$4 sm:$0xff]   ;;  %9515 = vst [vmem:[#allocation2 + $0x260] sm:$0xf] %v12151_v8  ;;  %7958 = vst [vmem:[#allocation2 + $0x240] sm:$0xf] %v11958_v43  ;;  %v9702_v21 = vsel %vm13666_vm12, %v12221_v47, %v9701_v50  ;;  %v6555_v63 = vor.u32 %v6554_v51, %v17385_v2 }
 0x47e   : > { %7959 = vst [vmem:[#allocation2 + $0x25c] sm:$0xf] %v11959_v18  ;;  %v12213_v48 = vrot.slane %v12171_v56, 10  ;;  %v6544_v58 = vrot.slane %v6542_v29, 5  ;;  %v9703_v9 = vrot.slane %v9701_v50, 4  ;;  %v10619_v0 = vsel %vm1504_vm9, %v12635_v54, 0  ;;  %v9097_v54 = vpop.permute.xlu1 %9096 }
 0x47f   : > { %9789 = vst.msk [vmem:[#allocation2 + $0x280] sm:$0xf] %vm9766_vm15, %v9702_v21  ;;  %v9645_v22 = vrot.slane %v12172_v13, 6  ;;  %v9648_v6 = vrot.slane %v12173_v24, 6  ;;  %v12192_v7 = vld [vmem:[%s12887_s19 + $0xa8] sm:$0xc]  ;;  %12362 = vmatpush3.bf16.xpose.msra.mxu1 %v10619_v0 }
 0x480   : > { %v12193_v53 = vld [vmem:[%s12887_s19 + $0xac] sm:$0xf]  ;;  %v12639_v19 = vld [vmem:[#allocation2 + $0x2b8] ss:$28 sps:$4 sm:$0xff]   ;;  %v9705_v38 = vsel %vm13666_vm12, %v9703_v9, %v9704_v28  ;;  %v12194_v61 = vld [vmem:[%s12887_s19 + $0xb0] sm:$0x3]  ;;  %v6545_v27 = vor.u32 %v6544_v58, %v6541_v12  ;;  %v7541_v28 = vpop.permute.xlu0 %7540 }
 0x481   : > { %v12168_v45 = vld [vmem:[%s12887_s19 + $0x48] sm:$0xc]  ;;  %v12169_v42 = vld [vmem:[%s12887_s19 + $0x4c] sm:$0xf]  ;;  %v12640_v34 = vld [vmem:[#allocation2 + $0xf8] ss:$28 sps:$4 sm:$0xff]   ;;  %v9646_v26 = vsel %vm13666_vm12, %v12213_v48, %v9645_v22  ;;  %12380 = vmatprep.subr.msk.bf16.mxu1 %vm1504_vm9, %v12639_v19 }
 0x482   : > { %9790 = vst.msk [vmem:[#allocation2 + $0x29c] sm:$0xf] %vm9766_vm15, %v9705_v38  ;;  %v9647_v32 = vrot.slane %v9645_v22, 4  ;;  %v12809_v33 = vld [vmem:[%s12887_s19 + $0x98] sm:$0x1]  ;;  %v17416_v35 = vrot.slane %v6555_v63, 4 }
 0x483   : > { %v6558_v1 = vshll.u32 %v12809_v33, 16  ;;  %9773 = vst.msk [vmem:[#allocation2 + $0xc0] sm:$0xf] %vm9766_vm15, %v9646_v26  ;;  %v12170_v17 = vld [vmem:[%s12887_s19 + $0x50] sm:$0x3]  ;;  %v12220_v14 = vrot.slane %v12192_v7, 10 }
 0x484   : > { %v12190_v10 = vld [vmem:[%s12887_s19 + $0xa0] sm:$0xf]  ;;  %v9649_v57 = vsel %vm13666_vm12, %v9647_v32, %v9648_v6  ;;  %v12189_v46 = vld [vmem:[%s12887_s19 + $0x9c] sm:$0xc]  ;;  %v12191_v44 = vld [vmem:[%s12887_s19 + $0xa4] sm:$0x3] }
 0x485   : > { %v10616_v49 = vsel %vm1504_vm9, %v12640_v34, 0  ;;  %9774 = vst.msk [vmem:[#allocation2 + $0xdc] sm:$0xf] %vm9766_vm15, %v9649_v57  ;;  %v12643_v62 = vld [vmem:[#allocation2 + $0x240] ss:$28 sps:$4 sm:$0xff]   ;;  %v9694_v30 = vrot.slane %v12193_v53, 6 }
 0x486   : > { %v12645_v60 = vld [vmem:[#allocation2 + $0x244] ss:$28 sps:$4 sm:$0xff]   ;;  %v9697_v40 = vrot.slane %v12194_v61, 6  ;;  %v12212_v37 = vrot.slane %v12168_v45, 10  ;;  %v9638_v36 = vrot.slane %v12169_v42, 6  ;;  %v9641_v15 = vrot.slane %v12170_v17, 6 }
 0x487   : > { %v12165_v20 = vld [vmem:[%s12887_s19 + $0x3c] sm:$0xc]  ;;  %v12166_v5 = vld [vmem:[%s12887_s19 + $0x40] sm:$0xf]  ;;  %v12167_v55 = vld [vmem:[%s12887_s19 + $0x44] sm:$0x3]  ;;  %v9695_v31 = vsel %vm13666_vm12, %v12220_v14, %v9694_v30  ;;  %10783 = vmatprep.subr.bf16.mxu0 %v12645_v60  ;;  %12364 = vmatpush3.bf16.xpose.msra.mxu1 %v10616_v49 }
 0x488   : > { %v6546_v29 = vrot.slane %v6545_v27, 4  ;;  %v6560_v39 = vrot.slane %v6558_v1, 5  ;;  %v9696_v41 = vrot.slane %v9694_v30, 4  ;;  %v12187_v52 = vld [vmem:[%s12887_s19 + $0x94] sm:$0xf]  ;;  %v9639_v23 = vsel %vm13666_vm12, %v12212_v37, %v9638_v36  ;;  %10784 = vmatpush2.bf16.xpose.msra.mxu0 %v12643_v62 }
 0x489   : > { %9787 = vst.msk [vmem:[#allocation2 + $0x248] sm:$0xf] %vm9766_vm15, %v9695_v31  ;;  %v9640_v51 = vrot.slane %v9638_v36, 4  ;;  %v12219_v47 = vrot.slane %v12189_v46, 10  ;;  %v9687_v56 = vrot.slane %v12190_v10, 6  ;;  %v9690_v43 = vrot.slane %v12191_v44, 6  ;;  %v9177_v10 = vpop.permute.xlu1 %9176 }
 0x48a   : > { %v12186_v59 = vld [vmem:[%s12887_s19 + $0x90] sm:$0xc]  ;;  %v12641_v4 = vld [vmem:[#allocation2 + $0x280] ss:$28 sps:$4 sm:$0xff]   ;;  %v9698_v8 = vsel %vm13666_vm12, %v9696_v41, %v9697_v40  ;;  %9771 = vst.msk [vmem:[#allocation2 + $0x88] sm:$0xf] %vm9766_vm15, %v9639_v23  ;;  %v6551_v63 = vsel %vm12915_vm2, %v6546_v29, %v17385_v2  ;;  %v6561_v22 = vsel %vm12915_vm2, %v17416_v35, %v6560_v39  ;;  %v7621_v35 = vpop.permute.xlu0 %7620 }
 0x48b   : > { %9788 = vst.msk [vmem:[#allocation2 + $0x264] sm:$0xf] %vm9766_vm15, %v9698_v8  ;;  %v9642_v18 = vsel %vm13666_vm12, %v9640_v51, %v9641_v15  ;;  %v9688_v12 = vsel %vm13666_vm12, %v12219_v47, %v9687_v56  ;;  %v12188_v50 = vld [vmem:[%s12887_s19 + $0x98] sm:$0x3]  ;;  %v12162_v13 = vld [vmem:[%s12887_s19 + $0x30] sm:$0xc]  ;;  %12381 = vmatprep.subr.msk.bf16.mxu1 %vm1504_vm9, %v12641_v4  ;;  %v11883_v17 = vcombine.low %v6551_v63, %v6561_v22 }
 0x48c   : > { %v12163_v24 = vld [vmem:[%s12887_s19 + $0x34] sm:$0xf]  ;;  %9772 = vst.msk [vmem:[#allocation2 + $0xa4] sm:$0xf] %vm9766_vm15, %v9642_v18  ;;  %v9689_v48 = vrot.slane %v9687_v56, 4  ;;  %v12211_v58 = vrot.slane %v12165_v20, 10 }
 0x48d   : > { %9785 = vst.msk [vmem:[#allocation2 + $0x210] sm:$0xf] %vm9766_vm15, %v9688_v12  ;;  %v9631_v21 = vrot.slane %v12166_v5, 6  ;;  %v9634_v9 = vrot.slane %v12167_v55, 6  ;;  %v12164_v0 = vld [vmem:[%s12887_s19 + $0x38] sm:$0x3]  ;;  %v7743_v37 = vsel %vm1504_vm9, %v11883_v17, %v7541_v28 }
 0x48e   : > { %v12642_v6 = vld [vmem:[#allocation2 + $0xc0] ss:$28 sps:$4 sm:$0xff]   ;;  %v12218_v7 = vrot.slane %v12186_v59, 10  ;;  %v9680_v53 = vrot.slane %v12187_v52, 6  ;;  %v9691_v19 = vsel %vm13666_vm12, %v9689_v48, %v9690_v43  ;;  %v9683_v45 = vrot.slane %v12188_v50, 6  ;;  %v7701_v20 = vpop.permute.xlu0 %7700 }
 0x48f   : > { %v9632_v38 = vsel %vm13666_vm12, %v12211_v58, %v9631_v21  ;;  %v9633_v61 = vrot.slane %v9631_v21, 4  ;;  %v10613_v42 = vsel %vm1504_vm9, %v12642_v6, 0  ;;  %9786 = vst.msk [vmem:[#allocation2 + $0x22c] sm:$0xf] %vm9766_vm15, %v9691_v19  ;;  %v12210_v26 = vrot.slane %v12162_v13, 10  ;;  %v9257_v39 = vpop.permute.xlu1 %9256 }
 0x490   : > { %9769 = vst.msk [vmem:[#allocation2 + $0x50] sm:$0xf] %vm9766_vm15, %v9632_v38  ;;  %v9681_v2 = vsel %vm13666_vm12, %v12218_v7, %v9680_v53  ;;  %v9682_v34 = vrot.slane %v9680_v53, 4  ;;  %v9624_v27 = vrot.slane %v12163_v24, 6  ;;  %v9627_v33 = vrot.slane %v12164_v0, 6  ;;  %12366 = vmatpush3.bf16.xpose.msra.mxu1 %v10613_v42 }
 0x491   : > { %v9635_v32 = vsel %vm13666_vm12, %v9633_v61, %v9634_v9  ;;  %9783 = vst.msk [vmem:[#allocation2 + $0x1d8] sm:$0xf] %vm9766_vm15, %v9681_v2  ;;  %v12810_v44 = vld [vmem:[%s12887_s19 + $0x9c] sm:$0xf]  ;;  %v12811_v49 = vld [vmem:[%s12887_s19 + $0xa0] sm:$0xf]  ;;  %v7781_v15 = vsel %vm1553_vm13, %v7743_v37, %v7621_v35 }
 0x492   : > { %9770 = vst.msk [vmem:[#allocation2 + $0x6c] sm:$0xf] %vm9766_vm15, %v9635_v32  ;;  %v9684_v1 = vsel %vm13666_vm12, %v9682_v34, %v9683_v45  ;;  %v12646_v57 = vld [vmem:[#allocation2 + $0x248] ss:$28 sps:$4 sm:$0xff]   ;;  %v9625_v14 = vsel %vm13666_vm12, %v12210_v26, %v9624_v27  ;;  %v9626_v46 = vrot.slane %v9624_v27, 4  ;;  %v12075_v62 = vcombine.low %v12810_v44, %v12811_v49 }
 0x493   : > { %9784 = vst.msk [vmem:[#allocation2 + $0x1f4] sm:$0xf] %vm9766_vm15, %v9684_v1  ;;  %v12647_v30 = vld [vmem:[#allocation2 + $0x88] ss:$28 sps:$4 sm:$0xff]   ;;  %9767 = vst.msk [vmem:[#allocation2 + $0x18] sm:$0xf] %vm9766_vm15, %v9625_v14  ;;  %12382 = vmatprep.subr.msk.bf16.mxu1 %vm1504_vm9, %v12646_v57  ;;  %v7813_v31 = vsel %vm1586_vm14, %v7781_v15, %v7701_v20 }
 0x494   : > { %v9628_v60 = vsel %vm13666_vm12, %v9626_v46, %v9627_v33  ;;  %v11770_v40 = vld [vmem:[%s12887_s19 + $0x84] sm:$0xf]  ;;  %v9299_v36 = vsel %vm1504_vm9, %v12075_v62, %v9097_v54  ;;  %v10610_v5 = vsel %vm1504_vm9, %v12647_v30, 0  ;;  %v11956_v23 = vcombine.low %v7813_v31, %v7813_v31  ;;  %v12812_v48 = vld [vmem:[%s12887_s19 + $0x8c] sm:$0x1] }
 0x495   : > { %9768 = vst.msk [vmem:[#allocation2 + $0x34] sm:$0xf] %vm9766_vm15, %v9628_v60  ;;  %v9337_v29 = vsel %vm1553_vm13, %v9299_v36, %v9177_v10  ;;  %v6515_v3 = vshrl.u32 %v11770_v40, 16  ;;  %v6518_v41 = vshll.u32 %v11770_v40, 16  ;;  %v11957_v51 = vcombine.high %v7813_v31, %v7813_v31  ;;  %v7539_v6 = vpop.permute.xlu0 %7538  ;;  %v12813_v2 = vld [vmem:[%s12887_s19 + $0x90] sm:$0xf] }
 0x496   : > { %v12651_v55 = vld [vmem:[#allocation2 + $0x210] ss:$28 sps:$4 sm:$0xff]   ;;  %v9369_v52 = vsel %vm1586_vm14, %v9337_v29, %v9257_v39  ;;  %7956 = vst [vmem:[#allocation2 + $0x208] sm:$0xf] %v11956_v23  ;;  %v17683_v43 = vshll.u32 %v16945_v16, 16  ;;  %v17684_v12 = vshrl.u32 %v16945_v16, 16  ;;  %v9095_v7 = vpop.permute.xlu1 %9094 }
 0x497   : > { %v12148_v47 = vcombine.low %v9369_v52, %v9369_v52  ;;  %v12149_v56 = vcombine.high %v9369_v52, %v9369_v52  ;;  %7957 = vst [vmem:[#allocation2 + $0x224] sm:$0xf] %v11957_v51  ;;  %v6517_v4 = vrot.slane %v6515_v3, 4  ;;  %v6520_v8 = vrot.slane %v6518_v41, 5  ;;  %v12814_v34 = vld [vmem:[%s12887_s19 + $0x94] sm:$0xf] }
 0x498   : > { %12368 = vmatpush3.bf16.xpose.msra.mxu1 %v10610_v5  ;;  %v6526_v18 = vrot.slane %v17683_v43, 5  ;;  %v6530_v50 = vrot.slane %v17684_v12, 4  ;;  %v6534_v58 = vshll.u32 %v12812_v48, 16  ;;  %v12074_v26 = vcombine.low %v12813_v2, %v12814_v34  ;;  %v12668_v32 = vld [vmem:[%s17549_s1 + $0x50] ss:$28 sps:$4 sm:$0xff]   ;;  %v10685_v5 = vpop.f32.mrf.mxu0 }
 0x499   : > { %12383 = vmatprep.subr.msk.bf16.mxu1 %vm1504_vm9, %v12651_v55  ;;  %v12652_v59 = vld [vmem:[#allocation2 + $0x50] ss:$28 sps:$4 sm:$0xff]   ;;  %9512 = vst [vmem:[#allocation2 + $0x20c] sm:$0xf] %v12148_v47  ;;  %9513 = vst [vmem:[#allocation2 + $0x228] sm:$0xf] %v12149_v56  ;;  %v6521_v54 = vor.u32 %v6520_v8, %v6517_v4 }
 0x49a   : > { %v10607_v13 = vsel %vm1504_vm9, %v12652_v59, 0  ;;  %v12659_v24 = vld [vmem:[#allocation2 + $0x1d8] ss:$28 sps:$4 sm:$0xff]   ;;  %v6531_v28 = vor.u32 %v6530_v50, %v6526_v18  ;;  %v6536_v22 = vrot.slane %v6534_v58, 5  ;;  %v9175_v42 = vpop.permute.xlu1 %9174  ;;  %v9296_v33 = vsel %vm1504_vm9, %v12074_v26, %v9095_v7  ;;  %v12669_v60 = vld [vmem:[%s17549_s1 + $0x4c] ss:$28 sps:$4 sm:$0xff]   ;;  %v10687_v29 = vpop.f32.mrf.mxu0 }
 0x49b   : > { %v6522_v0 = vrot.slane %v6521_v54, 4  ;;  %v9335_v25 = vsel %vm1553_vm13, %v9296_v33, %v9175_v42  ;;  %v12671_v40 = vld [vmem:[%s17549_s1 + $0x48] ss:$28 sps:$4 sm:$0xff]  }
 0x49c   : > { %v12660_v21 = vld [vmem:[#allocation2 + $0x18] ss:$28 sps:$4 sm:$0xff]   ;;  %v6532_v63 = vrot.slane %v6531_v28, 4  ;;  %v10689_v31 = vpop.f32.mrf.mxu0 }
 0x49d   : > { %v10604_v53 = vsel %vm1504_vm9, %v12660_v21, 0  ;;  %v6527_v19 = vsel %vm12915_vm2, %v6522_v0, %v6526_v18 }
 0x49e   : > { %v12648_v9 = vld [vmem:[#allocation2 + $0x208] ss:$28 sps:$4 sm:$0xff]   ;;  %v6537_v38 = vsel %vm12915_vm2, %v6532_v63, %v6536_v22  ;;  %v10691_v41 = vpop.f32.mrf.mxu0 }
 0x49f   : > { %v7619_v61 = vpop.permute.xlu0 %7618  ;;  %v11882_v45 = vcombine.low %v6527_v19, %v6537_v38 }
 0x4a0   : > { %12370 = vmatpush3.bf16.xpose.msra.mxu1 %v10607_v13  ;;  %v12650_v16 = vld [vmem:[#allocation2 + $0x20c] ss:$28 sps:$4 sm:$0xff]  }
 0x4a1   : > { %12384 = vmatprep.subr.msk.bf16.mxu1 %vm1504_vm9, %v12659_v24  ;;  %10785 = vmatprep.subr.bf16.mxu0 %v12650_v16  ;;  %v7740_v27 = vsel %vm1504_vm9, %v11882_v45, %v7539_v6 }
 0x4a2   : > { %10786 = vmatpush2.bf16.xpose.msra.mxu0 %v12648_v9  ;;  %v7779_v1 = vsel %vm1553_vm13, %v7740_v27, %v7619_v61 }
 0x4a7   : > { %v7699_v17 = vpop.permute.xlu0 %7698 }
 0x4a8   : > { %12372 = vmatpush3.bf16.xpose.msra.mxu1 %v10604_v53  ;;  %v7811_v35 = vsel %vm1586_vm14, %v7779_v1, %v7699_v17 }
 0x4a9   : > { %v9255_v10 = vpop.permute.xlu1 %9254  ;;  %v11954_v14 = vcombine.low %v7811_v35, %v7811_v35  ;;  %v11955_v46 = vcombine.high %v7811_v35, %v7811_v35 }
 0x4aa   : > { %v9367_v57 = vsel %vm1586_vm14, %v9335_v25, %v9255_v10 }
 0x4ab   : > { %v12146_v44 = vcombine.low %v9367_v57, %v9367_v57  ;;  %v12147_v49 = vcombine.high %v9367_v57, %v9367_v57  ;;  %7954 = vst [vmem:[#allocation2 + $0x1d0] sm:$0xf] %v11954_v14  ;;  %7955 = vst [vmem:[#allocation2 + $0x1ec] sm:$0xf] %v11955_v46 }
 0x4ad   : > { %9510 = vst [vmem:[#allocation2 + $0x1d4] sm:$0xf] %v12146_v44  ;;  %9511 = vst [vmem:[#allocation2 + $0x1f0] sm:$0xf] %v12147_v49 }
 0x4af   : > { %12374 = vmatmul.mubr.msk.bf16.vlgmr.msra.gmra.mxu1 %vm1504_vm9, %v17262_v11  ;;  %v12665_v11 = vld [vmem:[%s17549_s1 + $0x10] ss:$28 sps:$4 sm:$0xff]  }
 0x4b0   : > { %12375 = vmatprep.mubr.msk.bf16.mxu1 %vm1504_vm9, %v12668_v32 }
 0x4b2   : > { %v12661_v62 = vld [vmem:[#allocation2 + $0x1d0] ss:$28 sps:$4 sm:$0xff]  }
 0x4b4   : > { %v12663_v30 = vld [vmem:[#allocation2 + $0x1d4] ss:$28 sps:$4 sm:$0xff]  }
 0x4b5   : > { %10787 = vmatprep.subr.bf16.mxu0 %v12663_v30 }
 0x4b6   : > { %10788 = vmatpush2.bf16.xpose.msra.mxu0 %v12661_v62 }
 0x4b7   : > { %12376 = vmatmul.mubr.msk.bf16.gmra.mxu1 %vm1504_vm9, %v12668_v32 }
 0x4bd   : > { %10790 = vmatmul.mubr.bf16.vlgmr.msra.gmra.mxu0 %v12665_v11 }
 0x4be   : > { %10799 = vmatprep.mubr.bf16.mxu0 %v12669_v60 }
 0x4c5   : > { %10800 = vmatmul.mubr.bf16.gmra.mxu0 %v12671_v40 }
 0x4e0   : > { %v9950_v59 = vpop.permute.xlu0 %9949  ;;  %v9955_v8 = vpop.permute.xlu1 %9954 }
 0x4e1   : > { %v10686_v18 = vadd.f32 %v10685_v5, %v9950_v59  ;;  %v10688_v50 = vadd.f32 %v10687_v29, %v9950_v59  ;;  %v10690_v48 = vadd.f32 %v10689_v31, %v9955_v8  ;;  %v10692_v9 = vadd.f32 %v10691_v41, %v9955_v8 }
 0x4e4   : > { %v9960_v24 = vpop.permute.xlu1 %9959  ;;  %v9965_v6 = vpop.permute.xlu0 %9964 }
 0x4ed   : > { %v10695_v23 = vpop.f32.mrf.mxu0 }
 0x4ee   : > { %v10696_v22 = vadd.f32 %v10695_v23, %v9960_v24 }
 0x4ef   : > { %v10697_v47 = vpop.f32.mrf.mxu0 }
 0x4f0   : > { %v10698_v61 = vadd.f32 %v10697_v47, %v9960_v24 }
 0x4f1   : > { %v10699_v4 = vpop.f32.mrf.mxu0 }
 0x4f2   : > { %v10700_v34 = vadd.f32 %v10699_v4, %v9965_v6 }
 0x4f3   : > { %v10701_v12 = vpop.f32.mrf.mxu0 }
 0x4f4   : > { %v10702_v17 = vadd.f32 %v10701_v12, %v9965_v6 }
 0x515   : > { %v10738_v37 = vpop.f32.mrf.mxu1 }
 0x516   : > { %v10739_v13 = vadd.f32 %v10738_v37, %v10686_v18 }
 0x517   : > { %v10740_v36 = vpop.f32.mrf.mxu1 }
 0x518   : > { %v10741_v58 = vadd.f32 %v10740_v36, %v10688_v50 }
 0x519   : > { %v10742_v15 = vpop.f32.mrf.mxu1 }
 0x51a   : > { %v10743_v63 = vadd.f32 %v10742_v15, %v10690_v48 }
 0x51b   : > { %v10744_v20 = vpop.f32.mrf.mxu1 }
 0x51c   : > { %v10745_v38 = vadd.f32 %v10744_v20, %v10692_v9 }
 0x51e   : > { %v10748_v55 = vpop.f32.mrf.mxu1 }
 0x51f   : > { %v10749_v27 = vadd.f32 %v10748_v55, %v10696_v22 }
 0x520   : > { %v10750_v39 = vpop.f32.mrf.mxu1 }
 0x521   : > { %v10751_v35 = vadd.f32 %v10750_v39, %v10698_v61 }
 0x522   : > { %v10752_v3 = vpop.f32.mrf.mxu1 }
 0x523   : > { %v10753_v44 = vadd.f32 %v10752_v3, %v10700_v34 }
 0x524   : > { %v10754_v52 = vpop.f32.mrf.mxu1 }
 0x525   : > { %v10755_v30 = vadd.f32 %v10754_v52, %v10702_v17 }
 0x56f   : > { %v10844_v51 = vpop.f32.mrf.mxu1 }
 0x571   : > { %v10846_v56 = vpop.f32.mrf.mxu1 }
 0x573   : > { %v10848_v43 = vpop.f32.mrf.mxu1 }
 0x575   : > { %v10850_v28 = vpop.f32.mrf.mxu1 }
 0x577   : > { %v10854_v19 = vpop.f32.mrf.mxu1 }
 0x579   : > { %v10856_v33 = vpop.f32.mrf.mxu1 }
 0x57b   : > { %v10858_v49 = vpop.f32.mrf.mxu1 }
 0x57d   : > { %v10791_v54 = vpop.f32.mrf.mxu0  ;;  %v10860_v15 = vpop.f32.mrf.mxu1 }
 0x57e   : > { %v10792_v21 = vadd.f32 %v10791_v54, %v10739_v13 }
 0x57f   : > { %v10793_v0 = vpop.f32.mrf.mxu0 }
 0x580   : > { %v10845_v16 = vadd.f32 %v10844_v51, %v10792_v21  ;;  %v10794_v7 = vadd.f32 %v10793_v0, %v10741_v58 }
 0x581   : > { %v10795_v53 = vpop.f32.mrf.mxu0 }
 0x582   : > { %10863 = vst [vmem:[%s17529_s16] sm:$0xff] %v10845_v16  ;;  %v10847_v45 = vadd.f32 %v10846_v56, %v10794_v7  ;;  %v10796_v42 = vadd.f32 %v10795_v53, %v10743_v63 }
 0x583   : > { %v10797_v2 = vpop.f32.mrf.mxu0 }
 0x584   : > { %10864 = vst [vmem:[%s17529_s16 + $0x8] sm:$0xff] %v10847_v45  ;;  %v10849_v26 = vadd.f32 %v10848_v43, %v10796_v42  ;;  %v10798_v32 = vadd.f32 %v10797_v2, %v10745_v38 }
 0x585   : > { %v10801_v1 = vpop.f32.mrf.mxu0 }
 0x586   : > { %10865 = vst [vmem:[%s17529_s16 + $0x10] sm:$0xff] %v10849_v26  ;;  %v10851_v25 = vadd.f32 %v10850_v28, %v10798_v32  ;;  %v10802_v10 = vadd.f32 %v10801_v1, %v10749_v27 }
 0x587   : > { %v10803_v57 = vpop.f32.mrf.mxu0 }
 0x588   : > { %10866 = vst [vmem:[%s17529_s16 + $0x18] sm:$0xff] %v10851_v25  ;;  %v10855_v14 = vadd.f32 %v10854_v19, %v10802_v10  ;;  %v10804_v46 = vadd.f32 %v10803_v57, %v10751_v35 }
 0x589   : > { %v10805_v62 = vpop.f32.mrf.mxu0 }
 0x58a   : > { %10867 = vst [vmem:[%s17529_s16 + $0x20] sm:$0xff] %v10855_v14  ;;  %v10857_v11 = vadd.f32 %v10856_v33, %v10804_v46  ;;  %v10806_v60 = vadd.f32 %v10805_v62, %v10753_v44 }
 0x58b   : > { %v10807_v40 = vpop.f32.mrf.mxu0 }
 0x58c   : > { %10868 = vst [vmem:[%s17529_s16 + $0x28] sm:$0xff] %v10857_v11  ;;  %v10859_v37 = vadd.f32 %v10858_v49, %v10806_v60  ;;  %v10808_v36 = vadd.f32 %v10807_v40, %v10755_v30 }
 0x58e   : > { %10869 = vst [vmem:[%s17529_s16 + $0x30] sm:$0xff] %v10859_v37  ;;  %v10861_v20 = vadd.f32 %v10860_v15, %v10808_v36 }
 0x590   : > { %10870 = vst [vmem:[%s17529_s16 + $0x38] sm:$0xff] %v10861_v20 }
 0x591 PF: > { %s13_s14 = sadd.s32 1, %s12837_s14   ;;  %s17685_s12 = smov %s12833_s13 }
 0x592   : > { %p10_p5 = scmp.ge.s32.totalorder %s13_s14, 4   ;;  %s17686_s13 = smov %s17688_s15 }
 0x594   :  { %12 = sbr.rel (!%p10_p5) target bundleno = 2 (0x2), region = 67 }

</bundles_post_ra>
